<compile_context>
chip_gen: v5e
topology: v5e:2x2
jax: 0.10.0
libtpu: 0.0.40
codegen_flags: <defaults>
</compile_context>

<pallas_src>
import functools

import numpy as np
import jax
import jax.numpy as jnp
from jax.experimental import pallas as pl
from jax.experimental.pallas import tpu as pltpu


_NEG_INF = -1e30


def _round_up(x, m):
    return ((x + m - 1) // m) * m


def _seg_reduce(x, stride, count, op):
    """Reduce `op` over the lane coset {t + k*stride mod width}, k=0..count-1, of a 2-D value.

    Requires stride*count == x.shape[-1] (guaranteed by construction: width = H*n*n,
    stride = H*n, count = n).  The result is broadcast back to every lane of its coset,
    so no gather / broadcast-back step is needed.  Uses XLU lane rotations only.
    """
    total = stride * count
    if count & (count - 1) == 0:                      # power-of-two group: log tree
        shift = stride
        while shift < total:
            x = op(x, pltpu.roll(x, shift, 1))
            shift *= 2
        return x
    acc = x                                           # general fallback: linear accumulation
    for k in range(1, count):
        acc = op(acc, pltpu.roll(x, k * stride, 1))
    return acc


# ----------------------------------------------------------------------------
# Fused CAP (num_layers of multi-head self-attention + pairwise inner products
# + feature-map update) + MLP + sigmoid.  One batch tile per grid step.
#
# Lane orderings (host-built matrices follow these conventions):
#   feature  f  = i*E + e                 (field i, embed channel e),        width F  = n*E
#   score    t  = j*(H*n) + h*n + i       (key j outermost -> stride-H*n
#                                          cosets for the softmax over j),   width SW = H*n*n
#   expansion u = j*F + (h*n + i)*hd + d  (score expansion, contract over d), width XW = n*F
#   expansion v = (i*E + h*hd + d)*n + j  (output expansion, contract over j),width XW = n*F
# ----------------------------------------------------------------------------
def _dcap_fused_kernel(*refs, num_layers, num_fields, num_heads, embed_dim, num_hidden):
    L, n, H, E = num_layers, num_fields, num_heads, embed_dim
    (x_ref,
     wq_ref, bq_ref, wk_ref, bk_ref, wv_ref, bv_ref, wo_ref, bo_ref, w1c_ref,
     r_ref, c_ref, tp_ref, ta_ref, tx_ref, mgt_ref, mlt_ref, mask_ref,
     w1e_ref, b1_ref, sc1_ref, sh1_ref) = refs[:22]
    rest = refs[22:]
    n_extra = 4 * (num_hidden - 1)
    hidden_refs = rest[:n_extra]
    wf_ref, bf_ref, out_ref = rest[n_extra], rest[n_extra + 1], rest[n_extra + 2]

    f32 = jnp.float32
    x0 = x_ref[...].astype(f32)                                     # (TB, F), bf16 -> f32
    mask = mask_ref[...]                                            # (1, SW) additive mask
    stride = H * n

    # layer-independent pieces
    x0_gt = jnp.dot(x0, mgt_ref[...], preferred_element_type=f32)   # (TB, F)  sum_{j>f} x0_j
    x0_tx = jnp.dot(x0, tx_ref[...], preferred_element_type=f32)    # (TB, P*E) x0[col_p] per (pair,e)

    # MLP layer-1 pre-activation: embedding part + bias (cross terms accumulated per layer)
    h = jnp.dot(x0, w1e_ref[...], preferred_element_type=f32) + b1_ref[...]   # (TB, d1)

    x = x0
    inv_nm1 = f32(1.0 / (n - 1))
    for l in range(L):
        # ---- multi-head self-attention as lane-dense matmuls -------------------------
        q = jnp.dot(x, wq_ref[l], preferred_element_type=f32) + bq_ref[l]     # (TB, XW) q_{i,h,d}*scale, bcast over j
        k = jnp.dot(x, wk_ref[l], preferred_element_type=f32) + bk_ref[l]     # (TB, XW) k_{j,h,d},       bcast over i
        s = jnp.dot(q * k, r_ref[...], preferred_element_type=f32) + mask     # (TB, SW) scores (j,h,i) + attn_mask
        m = _seg_reduce(s, stride, n, jnp.maximum)                            # exact per-(h,i) max over keys j
        p = jnp.exp(s - m)
        denom = _seg_reduce(p, stride, n, jnp.add)                            # per-(h,i) sum over keys j
        p = p * pl.reciprocal(denom, approx=True)                             # softmax over keys (EUP recip)
        pe = jnp.dot(p, tp_ref[...], preferred_element_type=f32)              # (TB, XW) p, bcast over d, order (i,h,d,j)
        v = jnp.dot(x, wv_ref[l], preferred_element_type=f32) + bv_ref[l]     # (TB, XW) v_{j,h,d}, bcast over i
        o = jnp.dot(pe * v, c_ref[...], preferred_element_type=f32)           # (TB, F) heads concatenated per field
        attn = jnp.dot(o, wo_ref[l], preferred_element_type=f32) + bo_ref[l]  # out_proj (block-diag) per field

        # ---- pairwise inner products <attn_i, x0_j>, i<j, folded into MLP layer 1 ----
        a_ta = jnp.dot(attn, ta_ref[...], preferred_element_type=f32)         # (TB, P*E) attn[row_p] per (pair,e)
        h = h + jnp.dot(a_ta * x0_tx, w1c_ref[l], preferred_element_type=f32)

        # ---- next layer's feature map: mean of Hadamard products each field joins ----
        if l + 1 < L:
            a_lt = jnp.dot(attn, mlt_ref[...], preferred_element_type=f32)    # sum_{i<f} attn_i
            x = (attn * x0_gt + x0 * a_lt) * inv_nm1

    # ---- MLP: (Linear done above) -> BN(eval, folded) -> ReLU, remaining hidden layers,
    #      final Linear(., 1) -> sigmoid.  Dropout is identity at inference. ------------
    h = jnp.maximum(h * sc1_ref[...] + sh1_ref[...], 0.0)
    for i in range(num_hidden - 1):
        w_ref, b_ref, sc_ref, sh_ref = hidden_refs[4 * i: 4 * i + 4]
        h = jnp.dot(h, w_ref[...], preferred_element_type=f32) + b_ref[...]
        h = jnp.maximum(h * sc_ref[...] + sh_ref[...], 0.0)
    z = jnp.dot(h, wf_ref[...], preferred_element_type=f32) + bf_ref[...]     # (TB, 1)
    out_ref[...] = 1.0 / (1.0 + jnp.exp(-z))                                  # exact sigmoid


# ----------------------------------------------------------------------------
# Host-side parameter folding: builds every matrix the fused kernel consumes.
# ----------------------------------------------------------------------------
def prepare_params(params, *, field_dims, embed_dim, num_heads, num_layers, mlp_dims):
    n = len(field_dims)
    E = embed_dim
    H = num_heads
    L = num_layers
    assert E % H == 0, "embed_dim must be divisible by num_heads"
    hd = E // H
    F = n * E                      # flattened feature width (n*E)
    SW = H * n * n                 # score width, lanes ordered (j, h, i)
    XW = n * F                     # expansion width (= H*n*n*hd)
    P = n * (n - 1) // 2
    scale = float(hd) ** -0.5
    d1 = int(mlp_dims[0])

    wqkv = np.asarray(params["wqkv_t"], np.float32)     # (L, E, 3E) pre-transposed in_proj
    bqkv = np.asarray(params["bqkv"], np.float32)       # (L, 1, 3E)
    wout = np.asarray(params["wout_t"], np.float32)     # (L, E, E)  pre-transposed out_proj
    bout = np.asarray(params["bout"], np.float32)       # (L, 1, E)

    wq_exp = np.zeros((L, F, XW), np.float32)
    bq_exp = np.zeros((L, 1, XW), np.float32)
    wk_exp = np.zeros((L, F, XW), np.float32)
    bk_exp = np.zeros((L, 1, XW), np.float32)
    wv_exp = np.zeros((L, F, XW), np.float32)
    bv_exp = np.zeros((L, 1, XW), np.float32)
    for l in range(L):
        wq, wk, wv = wqkv[l][:, :E], wqkv[l][:, E:2 * E], wqkv[l][:, 2 * E:]
        bq, bk, bv = bqkv[l][0, :E], bqkv[l][0, E:2 * E], bqkv[l][0, 2 * E:]
        for hh in range(H):
            for d in range(hd):
                e = hh * hd + d
                for i in range(n):          # query field
                    for j in range(n):      # key / value field
                        u = j * F + (hh * n + i) * hd + d            # score expansion lane
                        v = ((i * H + hh) * hd + d) * n + j          # output expansion lane
                        wq_exp[l, i * E:(i + 1) * E, u] = wq[:, e] * scale
                        bq_exp[l, 0, u] = bq[e] * scale
                        wk_exp[l, j * E:(j + 1) * E, u] = wk[:, e]
                        bk_exp[l, 0, u] = bk[e]
                        wv_exp[l, j * E:(j + 1) * E, v] = wv[:, e]
                        bv_exp[l, 0, v] = bv[e]

    eye_E = np.eye(E, dtype=np.float32)
    # contraction over d (score) and over j (attention output)
    r_mat = np.kron(np.eye(SW, dtype=np.float32), np.ones((hd, 1), np.float32))   # (XW, SW)
    c_mat = np.kron(np.eye(F, dtype=np.float32), np.ones((n, 1), np.float32))     # (XW, F)
    # broadcast of attention probs P[(j,h,i)] -> (i,h,d,j)
    t_p = np.zeros((SW, XW), np.float32)
    for hh in range(H):
        for i in range(n):
            for j in range(n):
                t = j * (H * n) + hh * n + i
                for d in range(hd):
                    t_p[t, ((i * H + hh) * hd + d) * n + j] = 1.0
    # additive attention mask: -inf iff key j < query i  (exactly generate_square_subsequent_mask)
    mask = np.zeros((1, SW), np.float32)
    for j in range(n):
        for hh in range(H):
            for i in range(n):
                if j < i:
                    mask[0, j * (H * n) + hh * n + i] = _NEG_INF
    # block-diagonal out_proj
    wout_bd = np.stack([np.kron(np.eye(n, dtype=np.float32), wout[l]) for l in range(L)])
    bout_bd = np.stack([np.tile(bout[l], (1, n)) for l in range(L)])
    # triu pair selection (same order as np.triu_indices / the i<j double loop)
    rows, cols = np.triu_indices(n, k=1)
    t_a = np.zeros((F, P * E), np.float32)
    t_x = np.zeros((F, P * E), np.float32)
    for p, (i, j) in enumerate(zip(rows, cols)):
        t_a[i * E:(i + 1) * E, p * E:(p + 1) * E] = eye_E
        t_x[j * E:(j + 1) * E, p * E:(p + 1) * E] = eye_E
    # feature-map update matrices: sum_{j>f} x0_j  and  sum_{i<f} attn_i
    m_gt = np.kron(np.tril(np.ones((n, n), np.float32), k=-1), eye_E)
    m_lt = np.kron(np.triu(np.ones((n, n), np.float32), k=1), eye_E)

    # MLP layer 1: split the (F + L*P, d1) weight into the embedding part and the
    # (triu-selection folded) per-layer cross-term parts.
    w1, b1, sc1, sh1 = [np.asarray(a, np.float32) for a in params["mlp_hidden"][0]]
    w1_emb = w1[:F]
    w1c = np.stack([np.repeat(w1[F + l * P: F + (l + 1) * P, :], E, axis=0) for l in range(L)])

    extra = []
    for (w, b, sc, sh) in params["mlp_hidden"][1:]:
        extra += [np.asarray(w, np.float32), np.asarray(b, np.float32),
                  np.asarray(sc, np.float32), np.asarray(sh, np.float32)]
    wf = np.asarray(params["wf"], np.float32)
    bf = np.asarray(params["bf"], np.float32)

    weights = [wq_exp, bq_exp, wk_exp, bk_exp, wv_exp, bv_exp, wout_bd, bout_bd, w1c,
               r_mat, c_mat, t_p, t_a, t_x, m_gt, m_lt, mask,
               w1_emb, b1, sc1, sh1] + extra + [wf, bf]

    offsets = np.concatenate(([0], np.cumsum(field_dims)[:-1])).astype(np.int32)
    return {
        "embedding": jnp.asarray(params["embedding"], jnp.float32),
        "offsets": jnp.asarray(offsets),
        "weights": [jnp.asarray(w) for w in weights],
        "num_fields": n, "embed_dim": E, "num_heads": H, "num_layers": L,
        "num_hidden": len(mlp_dims),
    }


# ----------------------------------------------------------------------------
# Forward pass.
# ----------------------------------------------------------------------------
def dcap_forward(x_idx, prep, *, tb_max=512):
    n, E = prep["num_fields"], prep["embed_dim"]
    H, L = prep["num_heads"], prep["num_layers"]
    num_hidden = prep["num_hidden"]
    F = n * E
    B = x_idx.shape[0]

    # FeaturesEmbedding: offsets + table lookup (gather stays in plain JAX).
    embed_x = jnp.take(prep["embedding"], x_idx + prep["offsets"][None, :], axis=0)   # (B, n, E)
    x0f = embed_x.reshape(B, F).astype(jnp.bfloat16)    # lane-dense (B, 128), bf16 streaming

    # Batch tiling: TB multiple of 16 (bf16 sublane packing), batch padded to a tile multiple.
    TB = _round_up(min(int(tb_max), _round_up(B, 16)), 16)
    B_pad = _round_up(B, TB)
    if B_pad != B:
        x0f = jnp.pad(x0f, ((0, B_pad - B), (0, 0)))

    weights = prep["weights"]
    in_specs = [pl.BlockSpec((TB, F), lambda b: (b, 0))]
    for w in weights:                                   # constants: full-array blocks
        in_specs.append(pl.BlockSpec(w.shape, lambda b, _nd=w.ndim: (0,) * _nd))

    kernel = functools.partial(
        _dcap_fused_kernel,
        num_layers=L, num_fields=n, num_heads=H, embed_dim=E, num_hidden=num_hidden)

    out = pl.pallas_call(
        kernel,
        out_shape=jax.ShapeDtypeStruct((B_pad, 1), jnp.float32),
        grid=(B_pad // TB,),
        in_specs=in_specs,
        out_specs=pl.BlockSpec((TB, 1), lambda b: (b, 0)),
        compiler_params=pltpu.CompilerParams(
            dimension_semantics=("parallel",),          # megacore sharding on v7x
            vmem_limit_bytes=40 * 1024 * 1024),         # safe on v5e/v6e/v7x for TB<=512
    )(x0f, *weights)

    return out[:B, 0]                                   # matches torch.sigmoid(x.squeeze(1))


# ----------------------------------------------------------------------------
# Deterministic parameter construction (synthetic; no checkpoint loading)
# ----------------------------------------------------------------------------
def init_params(key, field_dims, embed_dim, num_heads, num_layers, mlp_dims):
    n = len(field_dims)
    E = embed_dim
    L = num_layers
    in_dim = n * E + L * n * (n - 1) // 2

    keys = jax.random.split(key, 8)
    params = {}
    params["embedding"] = 0.1 * jax.random.normal(keys[0], (int(sum(field_dims)), E), jnp.float32)

    # nn.MultiheadAttention params per layer (in_proj: (3E,E) -> stored transposed (E,3E))
    params["wqkv_t"] = 0.1 * jax.random.normal(keys[1], (L, E, 3 * E), jnp.float32)
    params["bqkv"] = 0.02 * jax.random.normal(keys[2], (L, 1, 3 * E), jnp.float32)
    params["wout_t"] = 0.1 * jax.random.normal(keys[3], (L, E, E), jnp.float32)
    params["bout"] = 0.02 * jax.random.normal(keys[4], (L, 1, E), jnp.float32)

    # MultiLayerPerceptron: Linear -> BatchNorm1d -> ReLU -> Dropout per hidden dim, + Linear(.,1)
    dims = [in_dim] + list(mlp_dims)
    kk = jax.random.split(keys[5], 2 * len(mlp_dims) + 2)
    hidden = []
    for i, (di, do) in enumerate(zip(dims[:-1], dims[1:])):
        w = (1.0 / np.sqrt(di)) * jax.random.normal(kk[2 * i], (di, do), jnp.float32)
        b = 0.01 * jax.random.normal(kk[2 * i + 1], (1, do), jnp.float32)
        gamma = jnp.ones((1, do), jnp.float32)
        beta = jnp.zeros((1, do), jnp.float32)
        run_mean = jnp.zeros((1, do), jnp.float32)
        run_var = jnp.ones((1, do), jnp.float32)
        scale = gamma / jnp.sqrt(run_var + 1e-5)   # eval-mode BN folded
        shift = beta - run_mean * scale
        hidden.append((w, b, scale, shift))
    params["mlp_hidden"] = hidden
    params["wf"] = (1.0 / np.sqrt(dims[-1])) * jax.random.normal(kk[-2], (dims[-1], 1), jnp.float32)
    params["bf"] = 0.01 * jax.random.normal(kk[-1], (1, 1), jnp.float32)
    return params


if __name__ == "__main__":
    field_dims = (10, 20, 30, 40, 50, 60, 70, 80)   # num_fields = 8
    embed_dim = 16
    num_heads = 2
    num_layers = 2
    mlp_dims = (32, 16)
    batch = 2

    key = jax.random.PRNGKey(0)
    k_in, k_par = jax.random.split(key)

    fd = jnp.asarray(field_dims, jnp.int32)
    x = jax.random.randint(k_in, (batch, len(field_dims)), 0, 10_000, dtype=jnp.int32) % fd[None, :]

    params = init_params(k_par, field_dims, embed_dim, num_heads, num_layers, mlp_dims)
    prep = prepare_params(params, field_dims=field_dims, embed_dim=embed_dim,
                          num_heads=num_heads, num_layers=num_layers, mlp_dims=mlp_dims)

    out = dcap_forward(x, prep)
    out = jax.block_until_ready(out)

    assert out.shape == (batch,)
    assert bool(jnp.all(jnp.isfinite(out)))
    assert bool(jnp.all((out >= 0.0) & (out <= 1.0)))
    print("KERNEL_OK")
</pallas_src>

<mosaic_0001>
module attributes {stable_mosaic.version = 11 : i64} {
  func.func @_dcap_fused_kernel(%arg0: i32, %arg1: memref<16x128xbf16, #tpu.memory_space<vmem>>, %arg2: memref<2x128x1024xf32, #tpu.memory_space<vmem>>, %arg3: memref<2x1x1024xf32, #tpu.memory_space<vmem>>, %arg4: memref<2x128x1024xf32, #tpu.memory_space<vmem>>, %arg5: memref<2x1x1024xf32, #tpu.memory_space<vmem>>, %arg6: memref<2x128x1024xf32, #tpu.memory_space<vmem>>, %arg7: memref<2x1x1024xf32, #tpu.memory_space<vmem>>, %arg8: memref<2x128x128xf32, #tpu.memory_space<vmem>>, %arg9: memref<2x1x128xf32, #tpu.memory_space<vmem>>, %arg10: memref<2x448x32xf32, #tpu.memory_space<vmem>>, %arg11: memref<1024x128xf32, #tpu.memory_space<vmem>>, %arg12: memref<1024x128xf32, #tpu.memory_space<vmem>>, %arg13: memref<128x1024xf32, #tpu.memory_space<vmem>>, %arg14: memref<128x448xf32, #tpu.memory_space<vmem>>, %arg15: memref<128x448xf32, #tpu.memory_space<vmem>>, %arg16: memref<128x128xf32, #tpu.memory_space<vmem>>, %arg17: memref<128x128xf32, #tpu.memory_space<vmem>>, %arg18: memref<1x128xf32, #tpu.memory_space<vmem>>, %arg19: memref<128x32xf32, #tpu.memory_space<vmem>>, %arg20: memref<1x32xf32, #tpu.memory_space<vmem>>, %arg21: memref<1x32xf32, #tpu.memory_space<vmem>>, %arg22: memref<1x32xf32, #tpu.memory_space<vmem>>, %arg23: memref<32x16xf32, #tpu.memory_space<vmem>>, %arg24: memref<1x16xf32, #tpu.memory_space<vmem>>, %arg25: memref<1x16xf32, #tpu.memory_space<vmem>>, %arg26: memref<1x16xf32, #tpu.memory_space<vmem>>, %arg27: memref<16x1xf32, #tpu.memory_space<vmem>>, %arg28: memref<1x1xf32, #tpu.memory_space<vmem>>, %arg29: memref<16x1xf32, #tpu.memory_space<vmem>>) attributes {dimension_semantics = [#tpu.dimension_semantics<parallel>], iteration_bounds = array<i64: 1>, scalar_prefetch = 0 : i64, scratch_operands = 0 : i64, tpu.core_type = #tpu.core_type<tc>, window_params = [{transform_indices = @transform_0, window_bounds = array<i64: 16, 128>}, {pipeline_mode = #tpu.pipeline_mode<synchronous>, transform_indices = @transform_1, window_bounds = array<i64: 2, 128, 1024>}, {pipeline_mode = #tpu.pipeline_mode<synchronous>, transform_indices = @transform_2, window_bounds = array<i64: 2, 1, 1024>}, {pipeline_mode = #tpu.pipeline_mode<synchronous>, transform_indices = @transform_3, window_bounds = array<i64: 2, 128, 1024>}, {pipeline_mode = #tpu.pipeline_mode<synchronous>, transform_indices = @transform_4, window_bounds = array<i64: 2, 1, 1024>}, {pipeline_mode = #tpu.pipeline_mode<synchronous>, transform_indices = @transform_5, window_bounds = array<i64: 2, 128, 1024>}, {pipeline_mode = #tpu.pipeline_mode<synchronous>, transform_indices = @transform_6, window_bounds = array<i64: 2, 1, 1024>}, {pipeline_mode = #tpu.pipeline_mode<synchronous>, transform_indices = @transform_7, window_bounds = array<i64: 2, 128, 128>}, {pipeline_mode = #tpu.pipeline_mode<synchronous>, transform_indices = @transform_8, window_bounds = array<i64: 2, 1, 128>}, {pipeline_mode = #tpu.pipeline_mode<synchronous>, transform_indices = @transform_9, window_bounds = array<i64: 2, 448, 32>}, {pipeline_mode = #tpu.pipeline_mode<synchronous>, transform_indices = @transform_10, window_bounds = array<i64: 1024, 128>}, {pipeline_mode = #tpu.pipeline_mode<synchronous>, transform_indices = @transform_11, window_bounds = array<i64: 1024, 128>}, {pipeline_mode = #tpu.pipeline_mode<synchronous>, transform_indices = @transform_12, window_bounds = array<i64: 128, 1024>}, {pipeline_mode = #tpu.pipeline_mode<synchronous>, transform_indices = @transform_13, window_bounds = array<i64: 128, 448>}, {pipeline_mode = #tpu.pipeline_mode<synchronous>, transform_indices = @transform_14, window_bounds = array<i64: 128, 448>}, {pipeline_mode = #tpu.pipeline_mode<synchronous>, transform_indices = @transform_15, window_bounds = array<i64: 128, 128>}, {pipeline_mode = #tpu.pipeline_mode<synchronous>, transform_indices = @transform_16, window_bounds = array<i64: 128, 128>}, {pipeline_mode = #tpu.pipeline_mode<synchronous>, transform_indices = @transform_17, window_bounds = array<i64: 1, 128>}, {pipeline_mode = #tpu.pipeline_mode<synchronous>, transform_indices = @transform_18, window_bounds = array<i64: 128, 32>}, {pipeline_mode = #tpu.pipeline_mode<synchronous>, transform_indices = @transform_19, window_bounds = array<i64: 1, 32>}, {pipeline_mode = #tpu.pipeline_mode<synchronous>, transform_indices = @transform_20, window_bounds = array<i64: 1, 32>}, {pipeline_mode = #tpu.pipeline_mode<synchronous>, transform_indices = @transform_21, window_bounds = array<i64: 1, 32>}, {pipeline_mode = #tpu.pipeline_mode<synchronous>, transform_indices = @transform_22, window_bounds = array<i64: 32, 16>}, {pipeline_mode = #tpu.pipeline_mode<synchronous>, transform_indices = @transform_23, window_bounds = array<i64: 1, 16>}, {pipeline_mode = #tpu.pipeline_mode<synchronous>, transform_indices = @transform_24, window_bounds = array<i64: 1, 16>}, {pipeline_mode = #tpu.pipeline_mode<synchronous>, transform_indices = @transform_25, window_bounds = array<i64: 1, 16>}, {pipeline_mode = #tpu.pipeline_mode<synchronous>, transform_indices = @transform_26, window_bounds = array<i64: 16, 1>}, {pipeline_mode = #tpu.pipeline_mode<synchronous>, transform_indices = @transform_27, window_bounds = array<i64: 1, 1>}, {transform_indices = @transform_28, window_bounds = array<i64: 16, 1>}]} {
    %c0 = arith.constant 0 : index
    %c0_0 = arith.constant 0 : index
    %0 = vector.load %arg1[%c0, %c0_0] : memref<16x128xbf16, #tpu.memory_space<vmem>>, vector<16x128xbf16>
    %1 = arith.extf %0 : vector<16x128xbf16> to vector<16x128xf32>
    %c0_1 = arith.constant 0 : index
    %c0_2 = arith.constant 0 : index
    %2 = vector.load %arg18[%c0_1, %c0_2] : memref<1x128xf32, #tpu.memory_space<vmem>>, vector<1x128xf32>
    %c0_3 = arith.constant 0 : index
    %c0_4 = arith.constant 0 : index
    %3 = vector.load %arg16[%c0_3, %c0_4] : memref<128x128xf32, #tpu.memory_space<vmem>>, vector<128x128xf32>
    %cst = arith.constant dense<0.000000e+00> : vector<16x128xf32>
    %4 = tpu.matmul %1, %3, %cst {dimension_numbers = #tpu.dot_dimension_numbers<[1], [0], [0], [1], [0, 0, 1, 1], [], []>} : vector<16x128xf32>, vector<128x128xf32>, vector<16x128xf32> -> vector<16x128xf32>
    %c0_5 = arith.constant 0 : index
    %c0_6 = arith.constant 0 : index
    %5 = vector.load %arg15[%c0_5, %c0_6] : memref<128x448xf32, #tpu.memory_space<vmem>>, vector<128x448xf32>
    %cst_7 = arith.constant dense<0.000000e+00> : vector<16x448xf32>
    %6 = tpu.matmul %1, %5, %cst_7 {dimension_numbers = #tpu.dot_dimension_numbers<[1], [0], [0], [1], [0, 0, 1, 1], [], []>} : vector<16x128xf32>, vector<128x448xf32>, vector<16x448xf32> -> vector<16x448xf32>
    %c0_8 = arith.constant 0 : index
    %c0_9 = arith.constant 0 : index
    %7 = vector.load %arg19[%c0_8, %c0_9] : memref<128x32xf32, #tpu.memory_space<vmem>>, vector<128x32xf32>
    %cst_10 = arith.constant dense<0.000000e+00> : vector<16x32xf32>
    %8 = tpu.matmul %1, %7, %cst_10 {dimension_numbers = #tpu.dot_dimension_numbers<[1], [0], [0], [1], [0, 0, 1, 1], [], []>} : vector<16x128xf32>, vector<128x32xf32>, vector<16x32xf32> -> vector<16x32xf32>
    %c0_11 = arith.constant 0 : index
    %c0_12 = arith.constant 0 : index
    %9 = vector.load %arg20[%c0_11, %c0_12] : memref<1x32xf32, #tpu.memory_space<vmem>>, vector<1x32xf32>
    %10 = vector.broadcast %9 : vector<1x32xf32> to vector<16x32xf32>
    %11 = arith.addf %8, %10 : vector<16x32xf32>
    %c0_13 = arith.constant 0 : index
    %c0_14 = arith.constant 0 : index
    %c0_15 = arith.constant 0 : index
    %12 = vector.load %arg2[%c0_13, %c0_14, %c0_15] : memref<2x128x1024xf32, #tpu.memory_space<vmem>>, vector<1x128x1024xf32>
    %13 = vector.shape_cast %12 : vector<1x128x1024xf32> to vector<128x1024xf32>
    %cst_16 = arith.constant dense<0.000000e+00> : vector<16x1024xf32>
    %14 = tpu.matmul %1, %13, %cst_16 {dimension_numbers = #tpu.dot_dimension_numbers<[1], [0], [0], [1], [0, 0, 1, 1], [], []>} : vector<16x128xf32>, vector<128x1024xf32>, vector<16x1024xf32> -> vector<16x1024xf32>
    %c0_17 = arith.constant 0 : index
    %c0_18 = arith.constant 0 : index
    %c0_19 = arith.constant 0 : index
    %15 = vector.load %arg3[%c0_17, %c0_18, %c0_19] : memref<2x1x1024xf32, #tpu.memory_space<vmem>>, vector<1x1x1024xf32>
    %16 = vector.shape_cast %15 : vector<1x1x1024xf32> to vector<1x1024xf32>
    %17 = vector.broadcast %16 : vector<1x1024xf32> to vector<16x1024xf32>
    %18 = arith.addf %14, %17 : vector<16x1024xf32>
    %c0_20 = arith.constant 0 : index
    %c0_21 = arith.constant 0 : index
    %c0_22 = arith.constant 0 : index
    %19 = vector.load %arg4[%c0_20, %c0_21, %c0_22] : memref<2x128x1024xf32, #tpu.memory_space<vmem>>, vector<1x128x1024xf32>
    %20 = vector.shape_cast %19 : vector<1x128x1024xf32> to vector<128x1024xf32>
    %cst_23 = arith.constant dense<0.000000e+00> : vector<16x1024xf32>
    %21 = tpu.matmul %1, %20, %cst_23 {dimension_numbers = #tpu.dot_dimension_numbers<[1], [0], [0], [1], [0, 0, 1, 1], [], []>} : vector<16x128xf32>, vector<128x1024xf32>, vector<16x1024xf32> -> vector<16x1024xf32>
    %c0_24 = arith.constant 0 : index
    %c0_25 = arith.constant 0 : index
    %c0_26 = arith.constant 0 : index
    %22 = vector.load %arg5[%c0_24, %c0_25, %c0_26] : memref<2x1x1024xf32, #tpu.memory_space<vmem>>, vector<1x1x1024xf32>
    %23 = vector.shape_cast %22 : vector<1x1x1024xf32> to vector<1x1024xf32>
    %24 = vector.broadcast %23 : vector<1x1024xf32> to vector<16x1024xf32>
    %25 = arith.addf %21, %24 : vector<16x1024xf32>
    %26 = arith.mulf %18, %25 : vector<16x1024xf32>
    %c0_27 = arith.constant 0 : index
    %c0_28 = arith.constant 0 : index
    %27 = vector.load %arg11[%c0_27, %c0_28] : memref<1024x128xf32, #tpu.memory_space<vmem>>, vector<1024x128xf32>
    %cst_29 = arith.constant dense<0.000000e+00> : vector<16x128xf32>
    %28 = tpu.matmul %26, %27, %cst_29 {dimension_numbers = #tpu.dot_dimension_numbers<[1], [0], [0], [1], [0, 0, 1, 1], [], []>} : vector<16x1024xf32>, vector<1024x128xf32>, vector<16x128xf32> -> vector<16x128xf32>
    %29 = vector.broadcast %2 : vector<1x128xf32> to vector<16x128xf32>
    %30 = arith.addf %28, %29 : vector<16x128xf32>
    %c16_i32 = arith.constant 16 : i32
    %31 = tpu.dynamic_rotate %30 by %c16_i32 dim 1 : vector<16x128xf32>, i32 -> vector<16x128xf32>
    %32 = arith.maximumf %30, %31 : vector<16x128xf32>
    %c32_i32 = arith.constant 32 : i32
    %33 = tpu.dynamic_rotate %32 by %c32_i32 dim 1 : vector<16x128xf32>, i32 -> vector<16x128xf32>
    %34 = arith.maximumf %32, %33 : vector<16x128xf32>
    %c64_i32 = arith.constant 64 : i32
    %35 = tpu.dynamic_rotate %34 by %c64_i32 dim 1 : vector<16x128xf32>, i32 -> vector<16x128xf32>
    %36 = arith.maximumf %34, %35 : vector<16x128xf32>
    %37 = arith.subf %30, %36 : vector<16x128xf32>
    %38 = math.exp %37 : vector<16x128xf32>
    %c16_i32_30 = arith.constant 16 : i32
    %39 = tpu.dynamic_rotate %38 by %c16_i32_30 dim 1 : vector<16x128xf32>, i32 -> vector<16x128xf32>
    %40 = arith.addf %38, %39 : vector<16x128xf32>
    %c32_i32_31 = arith.constant 32 : i32
    %41 = tpu.dynamic_rotate %40 by %c32_i32_31 dim 1 : vector<16x128xf32>, i32 -> vector<16x128xf32>
    %42 = arith.addf %40, %41 : vector<16x128xf32>
    %c64_i32_32 = arith.constant 64 : i32
    %43 = tpu.dynamic_rotate %42 by %c64_i32_32 dim 1 : vector<16x128xf32>, i32 -> vector<16x128xf32>
    %44 = arith.addf %42, %43 : vector<16x128xf32>
    %45 = tpu.reciprocal %44 {approx = true} : vector<16x128xf32> -> vector<16x128xf32>
    %46 = arith.mulf %38, %45 : vector<16x128xf32>
    %c0_33 = arith.constant 0 : index
    %c0_34 = arith.constant 0 : index
    %47 = vector.load %arg13[%c0_33, %c0_34] : memref<128x1024xf32, #tpu.memory_space<vmem>>, vector<128x1024xf32>
    %cst_35 = arith.constant dense<0.000000e+00> : vector<16x1024xf32>
    %48 = tpu.matmul %46, %47, %cst_35 {dimension_numbers = #tpu.dot_dimension_numbers<[1], [0], [0], [1], [0, 0, 1, 1], [], []>} : vector<16x128xf32>, vector<128x1024xf32>, vector<16x1024xf32> -> vector<16x1024xf32>
    %c0_36 = arith.constant 0 : index
    %c0_37 = arith.constant 0 : index
    %c0_38 = arith.constant 0 : index
    %49 = vector.load %arg6[%c0_36, %c0_37, %c0_38] : memref<2x128x1024xf32, #tpu.memory_space<vmem>>, vector<1x128x1024xf32>
    %50 = vector.shape_cast %49 : vector<1x128x1024xf32> to vector<128x1024xf32>
    %cst_39 = arith.constant dense<0.000000e+00> : vector<16x1024xf32>
    %51 = tpu.matmul %1, %50, %cst_39 {dimension_numbers = #tpu.dot_dimension_numbers<[1], [0], [0], [1], [0, 0, 1, 1], [], []>} : vector<16x128xf32>, vector<128x1024xf32>, vector<16x1024xf32> -> vector<16x1024xf32>
    %c0_40 = arith.constant 0 : index
    %c0_41 = arith.constant 0 : index
    %c0_42 = arith.constant 0 : index
    %52 = vector.load %arg7[%c0_40, %c0_41, %c0_42] : memref<2x1x1024xf32, #tpu.memory_space<vmem>>, vector<1x1x1024xf32>
    %53 = vector.shape_cast %52 : vector<1x1x1024xf32> to vector<1x1024xf32>
    %54 = vector.broadcast %53 : vector<1x1024xf32> to vector<16x1024xf32>
    %55 = arith.addf %51, %54 : vector<16x1024xf32>
    %56 = arith.mulf %48, %55 : vector<16x1024xf32>
    %c0_43 = arith.constant 0 : index
    %c0_44 = arith.constant 0 : index
    %57 = vector.load %arg12[%c0_43, %c0_44] : memref<1024x128xf32, #tpu.memory_space<vmem>>, vector<1024x128xf32>
    %cst_45 = arith.constant dense<0.000000e+00> : vector<16x128xf32>
    %58 = tpu.matmul %56, %57, %cst_45 {dimension_numbers = #tpu.dot_dimension_numbers<[1], [0], [0], [1], [0, 0, 1, 1], [], []>} : vector<16x1024xf32>, vector<1024x128xf32>, vector<16x128xf32> -> vector<16x128xf32>
    %c0_46 = arith.constant 0 : index
    %c0_47 = arith.constant 0 : index
    %c0_48 = arith.constant 0 : index
    %59 = vector.load %arg8[%c0_46, %c0_47, %c0_48] : memref<2x128x128xf32, #tpu.memory_space<vmem>>, vector<1x128x128xf32>
    %60 = vector.shape_cast %59 : vector<1x128x128xf32> to vector<128x128xf32>
    %cst_49 = arith.constant dense<0.000000e+00> : vector<16x128xf32>
    %61 = tpu.matmul %58, %60, %cst_49 {dimension_numbers = #tpu.dot_dimension_numbers<[1], [0], [0], [1], [0, 0, 1, 1], [], []>} : vector<16x128xf32>, vector<128x128xf32>, vector<16x128xf32> -> vector<16x128xf32>
    %c0_50 = arith.constant 0 : index
    %c0_51 = arith.constant 0 : index
    %c0_52 = arith.constant 0 : index
    %62 = vector.load %arg9[%c0_50, %c0_51, %c0_52] : memref<2x1x128xf32, #tpu.memory_space<vmem>>, vector<1x1x128xf32>
    %63 = vector.shape_cast %62 : vector<1x1x128xf32> to vector<1x128xf32>
    %64 = vector.broadcast %63 : vector<1x128xf32> to vector<16x128xf32>
    %65 = arith.addf %61, %64 : vector<16x128xf32>
    %c0_53 = arith.constant 0 : index
    %c0_54 = arith.constant 0 : index
    %66 = vector.load %arg14[%c0_53, %c0_54] : memref<128x448xf32, #tpu.memory_space<vmem>>, vector<128x448xf32>
    %cst_55 = arith.constant dense<0.000000e+00> : vector<16x448xf32>
    %67 = tpu.matmul %65, %66, %cst_55 {dimension_numbers = #tpu.dot_dimension_numbers<[1], [0], [0], [1], [0, 0, 1, 1], [], []>} : vector<16x128xf32>, vector<128x448xf32>, vector<16x448xf32> -> vector<16x448xf32>
    %68 = arith.mulf %67, %6 : vector<16x448xf32>
    %c0_56 = arith.constant 0 : index
    %c0_57 = arith.constant 0 : index
    %c0_58 = arith.constant 0 : index
    %69 = vector.load %arg10[%c0_56, %c0_57, %c0_58] : memref<2x448x32xf32, #tpu.memory_space<vmem>>, vector<1x448x32xf32>
    %70 = vector.shape_cast %69 : vector<1x448x32xf32> to vector<448x32xf32>
    %cst_59 = arith.constant dense<0.000000e+00> : vector<16x32xf32>
    %71 = tpu.matmul %68, %70, %cst_59 {dimension_numbers = #tpu.dot_dimension_numbers<[1], [0], [0], [1], [0, 0, 1, 1], [], []>} : vector<16x448xf32>, vector<448x32xf32>, vector<16x32xf32> -> vector<16x32xf32>
    %72 = arith.addf %11, %71 : vector<16x32xf32>
    %c0_60 = arith.constant 0 : index
    %c0_61 = arith.constant 0 : index
    %73 = vector.load %arg17[%c0_60, %c0_61] : memref<128x128xf32, #tpu.memory_space<vmem>>, vector<128x128xf32>
    %cst_62 = arith.constant dense<0.000000e+00> : vector<16x128xf32>
    %74 = tpu.matmul %65, %73, %cst_62 {dimension_numbers = #tpu.dot_dimension_numbers<[1], [0], [0], [1], [0, 0, 1, 1], [], []>} : vector<16x128xf32>, vector<128x128xf32>, vector<16x128xf32> -> vector<16x128xf32>
    %75 = arith.mulf %65, %4 : vector<16x128xf32>
    %76 = arith.mulf %1, %74 : vector<16x128xf32>
    %77 = arith.addf %75, %76 : vector<16x128xf32>
    %cst_63 = arith.constant 0.142857149 : f32
    %78 = vector.broadcast %cst_63 : f32 to vector<16x128xf32>
    %79 = arith.mulf %77, %78 : vector<16x128xf32>
    %c1 = arith.constant 1 : index
    %c0_64 = arith.constant 0 : index
    %c0_65 = arith.constant 0 : index
    %80 = vector.load %arg2[%c1, %c0_64, %c0_65] : memref<2x128x1024xf32, #tpu.memory_space<vmem>>, vector<1x128x1024xf32>
    %81 = vector.shape_cast %80 : vector<1x128x1024xf32> to vector<128x1024xf32>
    %cst_66 = arith.constant dense<0.000000e+00> : vector<16x1024xf32>
    %82 = tpu.matmul %79, %81, %cst_66 {dimension_numbers = #tpu.dot_dimension_numbers<[1], [0], [0], [1], [0, 0, 1, 1], [], []>} : vector<16x128xf32>, vector<128x1024xf32>, vector<16x1024xf32> -> vector<16x1024xf32>
    %c1_67 = arith.constant 1 : index
    %c0_68 = arith.constant 0 : index
    %c0_69 = arith.constant 0 : index
    %83 = vector.load %arg3[%c1_67, %c0_68, %c0_69] : memref<2x1x1024xf32, #tpu.memory_space<vmem>>, vector<1x1x1024xf32>
    %84 = vector.shape_cast %83 : vector<1x1x1024xf32> to vector<1x1024xf32>
    %85 = vector.broadcast %84 : vector<1x1024xf32> to vector<16x1024xf32>
    %86 = arith.addf %82, %85 : vector<16x1024xf32>
    %c1_70 = arith.constant 1 : index
    %c0_71 = arith.constant 0 : index
    %c0_72 = arith.constant 0 : index
    %87 = vector.load %arg4[%c1_70, %c0_71, %c0_72] : memref<2x128x1024xf32, #tpu.memory_space<vmem>>, vector<1x128x1024xf32>
    %88 = vector.shape_cast %87 : vector<1x128x1024xf32> to vector<128x1024xf32>
    %cst_73 = arith.constant dense<0.000000e+00> : vector<16x1024xf32>
    %89 = tpu.matmul %79, %88, %cst_73 {dimension_numbers = #tpu.dot_dimension_numbers<[1], [0], [0], [1], [0, 0, 1, 1], [], []>} : vector<16x128xf32>, vector<128x1024xf32>, vector<16x1024xf32> -> vector<16x1024xf32>
    %c1_74 = arith.constant 1 : index
    %c0_75 = arith.constant 0 : index
    %c0_76 = arith.constant 0 : index
    %90 = vector.load %arg5[%c1_74, %c0_75, %c0_76] : memref<2x1x1024xf32, #tpu.memory_space<vmem>>, vector<1x1x1024xf32>
    %91 = vector.shape_cast %90 : vector<1x1x1024xf32> to vector<1x1024xf32>
    %92 = vector.broadcast %91 : vector<1x1024xf32> to vector<16x1024xf32>
    %93 = arith.addf %89, %92 : vector<16x1024xf32>
    %94 = arith.mulf %86, %93 : vector<16x1024xf32>
    %c0_77 = arith.constant 0 : index
    %c0_78 = arith.constant 0 : index
    %95 = vector.load %arg11[%c0_77, %c0_78] : memref<1024x128xf32, #tpu.memory_space<vmem>>, vector<1024x128xf32>
    %cst_79 = arith.constant dense<0.000000e+00> : vector<16x128xf32>
    %96 = tpu.matmul %94, %95, %cst_79 {dimension_numbers = #tpu.dot_dimension_numbers<[1], [0], [0], [1], [0, 0, 1, 1], [], []>} : vector<16x1024xf32>, vector<1024x128xf32>, vector<16x128xf32> -> vector<16x128xf32>
    %97 = vector.broadcast %2 : vector<1x128xf32> to vector<16x128xf32>
    %98 = arith.addf %96, %97 : vector<16x128xf32>
    %c16_i32_80 = arith.constant 16 : i32
    %99 = tpu.dynamic_rotate %98 by %c16_i32_80 dim 1 : vector<16x128xf32>, i32 -> vector<16x128xf32>
    %100 = arith.maximumf %98, %99 : vector<16x128xf32>
    %c32_i32_81 = arith.constant 32 : i32
    %101 = tpu.dynamic_rotate %100 by %c32_i32_81 dim 1 : vector<16x128xf32>, i32 -> vector<16x128xf32>
    %102 = arith.maximumf %100, %101 : vector<16x128xf32>
    %c64_i32_82 = arith.constant 64 : i32
    %103 = tpu.dynamic_rotate %102 by %c64_i32_82 dim 1 : vector<16x128xf32>, i32 -> vector<16x128xf32>
    %104 = arith.maximumf %102, %103 : vector<16x128xf32>
    %105 = arith.subf %98, %104 : vector<16x128xf32>
    %106 = math.exp %105 : vector<16x128xf32>
    %c16_i32_83 = arith.constant 16 : i32
    %107 = tpu.dynamic_rotate %106 by %c16_i32_83 dim 1 : vector<16x128xf32>, i32 -> vector<16x128xf32>
    %108 = arith.addf %106, %107 : vector<16x128xf32>
    %c32_i32_84 = arith.constant 32 : i32
    %109 = tpu.dynamic_rotate %108 by %c32_i32_84 dim 1 : vector<16x128xf32>, i32 -> vector<16x128xf32>
    %110 = arith.addf %108, %109 : vector<16x128xf32>
    %c64_i32_85 = arith.constant 64 : i32
    %111 = tpu.dynamic_rotate %110 by %c64_i32_85 dim 1 : vector<16x128xf32>, i32 -> vector<16x128xf32>
    %112 = arith.addf %110, %111 : vector<16x128xf32>
    %113 = tpu.reciprocal %112 {approx = true} : vector<16x128xf32> -> vector<16x128xf32>
    %114 = arith.mulf %106, %113 : vector<16x128xf32>
    %c0_86 = arith.constant 0 : index
    %c0_87 = arith.constant 0 : index
    %115 = vector.load %arg13[%c0_86, %c0_87] : memref<128x1024xf32, #tpu.memory_space<vmem>>, vector<128x1024xf32>
    %cst_88 = arith.constant dense<0.000000e+00> : vector<16x1024xf32>
    %116 = tpu.matmul %114, %115, %cst_88 {dimension_numbers = #tpu.dot_dimension_numbers<[1], [0], [0], [1], [0, 0, 1, 1], [], []>} : vector<16x128xf32>, vector<128x1024xf32>, vector<16x1024xf32> -> vector<16x1024xf32>
    %c1_89 = arith.constant 1 : index
    %c0_90 = arith.constant 0 : index
    %c0_91 = arith.constant 0 : index
    %117 = vector.load %arg6[%c1_89, %c0_90, %c0_91] : memref<2x128x1024xf32, #tpu.memory_space<vmem>>, vector<1x128x1024xf32>
    %118 = vector.shape_cast %117 : vector<1x128x1024xf32> to vector<128x1024xf32>
    %cst_92 = arith.constant dense<0.000000e+00> : vector<16x1024xf32>
    %119 = tpu.matmul %79, %118, %cst_92 {dimension_numbers = #tpu.dot_dimension_numbers<[1], [0], [0], [1], [0, 0, 1, 1], [], []>} : vector<16x128xf32>, vector<128x1024xf32>, vector<16x1024xf32> -> vector<16x1024xf32>
    %c1_93 = arith.constant 1 : index
    %c0_94 = arith.constant 0 : index
    %c0_95 = arith.constant 0 : index
    %120 = vector.load %arg7[%c1_93, %c0_94, %c0_95] : memref<2x1x1024xf32, #tpu.memory_space<vmem>>, vector<1x1x1024xf32>
    %121 = vector.shape_cast %120 : vector<1x1x1024xf32> to vector<1x1024xf32>
    %122 = vector.broadcast %121 : vector<1x1024xf32> to vector<16x1024xf32>
    %123 = arith.addf %119, %122 : vector<16x1024xf32>
    %124 = arith.mulf %116, %123 : vector<16x1024xf32>
    %c0_96 = arith.constant 0 : index
    %c0_97 = arith.constant 0 : index
    %125 = vector.load %arg12[%c0_96, %c0_97] : memref<1024x128xf32, #tpu.memory_space<vmem>>, vector<1024x128xf32>
    %cst_98 = arith.constant dense<0.000000e+00> : vector<16x128xf32>
    %126 = tpu.matmul %124, %125, %cst_98 {dimension_numbers = #tpu.dot_dimension_numbers<[1], [0], [0], [1], [0, 0, 1, 1], [], []>} : vector<16x1024xf32>, vector<1024x128xf32>, vector<16x128xf32> -> vector<16x128xf32>
    %c1_99 = arith.constant 1 : index
    %c0_100 = arith.constant 0 : index
    %c0_101 = arith.constant 0 : index
    %127 = vector.load %arg8[%c1_99, %c0_100, %c0_101] : memref<2x128x128xf32, #tpu.memory_space<vmem>>, vector<1x128x128xf32>
    %128 = vector.shape_cast %127 : vector<1x128x128xf32> to vector<128x128xf32>
    %cst_102 = arith.constant dense<0.000000e+00> : vector<16x128xf32>
    %129 = tpu.matmul %126, %128, %cst_102 {dimension_numbers = #tpu.dot_dimension_numbers<[1], [0], [0], [1], [0, 0, 1, 1], [], []>} : vector<16x128xf32>, vector<128x128xf32>, vector<16x128xf32> -> vector<16x128xf32>
    %c1_103 = arith.constant 1 : index
    %c0_104 = arith.constant 0 : index
    %c0_105 = arith.constant 0 : index
    %130 = vector.load %arg9[%c1_103, %c0_104, %c0_105] : memref<2x1x128xf32, #tpu.memory_space<vmem>>, vector<1x1x128xf32>
    %131 = vector.shape_cast %130 : vector<1x1x128xf32> to vector<1x128xf32>
    %132 = vector.broadcast %131 : vector<1x128xf32> to vector<16x128xf32>
    %133 = arith.addf %129, %132 : vector<16x128xf32>
    %c0_106 = arith.constant 0 : index
    %c0_107 = arith.constant 0 : index
    %134 = vector.load %arg14[%c0_106, %c0_107] : memref<128x448xf32, #tpu.memory_space<vmem>>, vector<128x448xf32>
    %cst_108 = arith.constant dense<0.000000e+00> : vector<16x448xf32>
    %135 = tpu.matmul %133, %134, %cst_108 {dimension_numbers = #tpu.dot_dimension_numbers<[1], [0], [0], [1], [0, 0, 1, 1], [], []>} : vector<16x128xf32>, vector<128x448xf32>, vector<16x448xf32> -> vector<16x448xf32>
    %136 = arith.mulf %135, %6 : vector<16x448xf32>
    %c1_109 = arith.constant 1 : index
    %c0_110 = arith.constant 0 : index
    %c0_111 = arith.constant 0 : index
    %137 = vector.load %arg10[%c1_109, %c0_110, %c0_111] : memref<2x448x32xf32, #tpu.memory_space<vmem>>, vector<1x448x32xf32>
    %138 = vector.shape_cast %137 : vector<1x448x32xf32> to vector<448x32xf32>
    %cst_112 = arith.constant dense<0.000000e+00> : vector<16x32xf32>
    %139 = tpu.matmul %136, %138, %cst_112 {dimension_numbers = #tpu.dot_dimension_numbers<[1], [0], [0], [1], [0, 0, 1, 1], [], []>} : vector<16x448xf32>, vector<448x32xf32>, vector<16x32xf32> -> vector<16x32xf32>
    %140 = arith.addf %72, %139 : vector<16x32xf32>
    %c0_113 = arith.constant 0 : index
    %c0_114 = arith.constant 0 : index
    %141 = vector.load %arg21[%c0_113, %c0_114] : memref<1x32xf32, #tpu.memory_space<vmem>>, vector<1x32xf32>
    %142 = vector.broadcast %141 : vector<1x32xf32> to vector<16x32xf32>
    %143 = arith.mulf %140, %142 : vector<16x32xf32>
    %c0_115 = arith.constant 0 : index
    %c0_116 = arith.constant 0 : index
    %144 = vector.load %arg22[%c0_115, %c0_116] : memref<1x32xf32, #tpu.memory_space<vmem>>, vector<1x32xf32>
    %145 = vector.broadcast %144 : vector<1x32xf32> to vector<16x32xf32>
    %146 = arith.addf %143, %145 : vector<16x32xf32>
    %cst_117 = arith.constant 0.000000e+00 : f32
    %147 = vector.broadcast %cst_117 : f32 to vector<16x32xf32>
    %148 = arith.maximumf %146, %147 : vector<16x32xf32>
    %c0_118 = arith.constant 0 : index
    %c0_119 = arith.constant 0 : index
    %149 = vector.load %arg23[%c0_118, %c0_119] : memref<32x16xf32, #tpu.memory_space<vmem>>, vector<32x16xf32>
    %cst_120 = arith.constant dense<0.000000e+00> : vector<16x16xf32>
    %150 = tpu.matmul %148, %149, %cst_120 {dimension_numbers = #tpu.dot_dimension_numbers<[1], [0], [0], [1], [0, 0, 1, 1], [], []>} : vector<16x32xf32>, vector<32x16xf32>, vector<16x16xf32> -> vector<16x16xf32>
    %c0_121 = arith.constant 0 : index
    %c0_122 = arith.constant 0 : index
    %151 = vector.load %arg24[%c0_121, %c0_122] : memref<1x16xf32, #tpu.memory_space<vmem>>, vector<1x16xf32>
    %152 = vector.broadcast %151 : vector<1x16xf32> to vector<16x16xf32>
    %153 = arith.addf %150, %152 : vector<16x16xf32>
    %c0_123 = arith.constant 0 : index
    %c0_124 = arith.constant 0 : index
    %154 = vector.load %arg25[%c0_123, %c0_124] : memref<1x16xf32, #tpu.memory_space<vmem>>, vector<1x16xf32>
    %155 = vector.broadcast %154 : vector<1x16xf32> to vector<16x16xf32>
    %156 = arith.mulf %153, %155 : vector<16x16xf32>
    %c0_125 = arith.constant 0 : index
    %c0_126 = arith.constant 0 : index
    %157 = vector.load %arg26[%c0_125, %c0_126] : memref<1x16xf32, #tpu.memory_space<vmem>>, vector<1x16xf32>
    %158 = vector.broadcast %157 : vector<1x16xf32> to vector<16x16xf32>
    %159 = arith.addf %156, %158 : vector<16x16xf32>
    %cst_127 = arith.constant 0.000000e+00 : f32
    %160 = vector.broadcast %cst_127 : f32 to vector<16x16xf32>
    %161 = arith.maximumf %159, %160 : vector<16x16xf32>
    %c0_128 = arith.constant 0 : index
    %c0_129 = arith.constant 0 : index
    %162 = vector.load %arg27[%c0_128, %c0_129] : memref<16x1xf32, #tpu.memory_space<vmem>>, vector<16x1xf32>
    %cst_130 = arith.constant dense<0.000000e+00> : vector<16x1xf32>
    %163 = tpu.matmul %161, %162, %cst_130 {dimension_numbers = #tpu.dot_dimension_numbers<[1], [0], [0], [1], [0, 0, 1, 1], [], []>} : vector<16x16xf32>, vector<16x1xf32>, vector<16x1xf32> -> vector<16x1xf32>
    %c0_131 = arith.constant 0 : index
    %c0_132 = arith.constant 0 : index
    %164 = vector.load %arg28[%c0_131, %c0_132] : memref<1x1xf32, #tpu.memory_space<vmem>>, vector<1x1xf32>
    %165 = vector.broadcast %164 : vector<1x1xf32> to vector<16x1xf32>
    %166 = arith.addf %163, %165 : vector<16x1xf32>
    %cst_133 = arith.constant 0.000000e+00 : f32
    %167 = vector.broadcast %cst_133 : f32 to vector<16x1xf32>
    %168 = arith.subf %167, %166 : vector<16x1xf32>
    %169 = math.exp %168 : vector<16x1xf32>
    %cst_134 = arith.constant 1.000000e+00 : f32
    %170 = vector.broadcast %cst_134 : f32 to vector<16x1xf32>
    %171 = arith.addf %170, %169 : vector<16x1xf32>
    %cst_135 = arith.constant 1.000000e+00 : f32
    %172 = vector.broadcast %cst_135 : f32 to vector<16x1xf32>
    %173 = arith.divf %172, %171 : vector<16x1xf32>
    %c0_136 = arith.constant 0 : index
    %c0_137 = arith.constant 0 : index
    %174 = vector.load %arg29[%c0_136, %c0_137] : memref<16x1xf32, #tpu.memory_space<vmem>>, vector<16x1xf32>
    tpu.vector_store %arg29[%c0_136, %c0_137], %173 {strides = array<i32>} : memref<16x1xf32, #tpu.memory_space<vmem>>, vector<16x1xf32>,
    return
  }
  func.func @transform_0(%arg0: i32) -> (i32, i32) {
    %c0_i32 = arith.constant 0 : i32
    %c0_i32_0 = arith.constant 0 : i32
    return %arg0, %c0_i32 : i32, i32
  }
  func.func @transform_1(%arg0: i32) -> (i32, i32, i32) {
    %c0_i32 = arith.constant 0 : i32
    %c0_i32_0 = arith.constant 0 : i32
    %c0_i32_1 = arith.constant 0 : i32
    %c0_i32_2 = arith.constant 0 : i32
    return %c0_i32, %c0_i32_0, %c0_i32_1 : i32, i32, i32
  }
  func.func @transform_2(%arg0: i32) -> (i32, i32, i32) {
    %c0_i32 = arith.constant 0 : i32
    %c0_i32_0 = arith.constant 0 : i32
    %c0_i32_1 = arith.constant 0 : i32
    %c0_i32_2 = arith.constant 0 : i32
    return %c0_i32, %c0_i32_0, %c0_i32_1 : i32, i32, i32
  }
  func.func @transform_3(%arg0: i32) -> (i32, i32, i32) {
    %c0_i32 = arith.constant 0 : i32
    %c0_i32_0 = arith.constant 0 : i32
    %c0_i32_1 = arith.constant 0 : i32
    %c0_i32_2 = arith.constant 0 : i32
    return %c0_i32, %c0_i32_0, %c0_i32_1 : i32, i32, i32
  }
  func.func @transform_4(%arg0: i32) -> (i32, i32, i32) {
    %c0_i32 = arith.constant 0 : i32
    %c0_i32_0 = arith.constant 0 : i32
    %c0_i32_1 = arith.constant 0 : i32
    %c0_i32_2 = arith.constant 0 : i32
    return %c0_i32, %c0_i32_0, %c0_i32_1 : i32, i32, i32
  }
  func.func @transform_5(%arg0: i32) -> (i32, i32, i32) {
    %c0_i32 = arith.constant 0 : i32
    %c0_i32_0 = arith.constant 0 : i32
    %c0_i32_1 = arith.constant 0 : i32
    %c0_i32_2 = arith.constant 0 : i32
    return %c0_i32, %c0_i32_0, %c0_i32_1 : i32, i32, i32
  }
  func.func @transform_6(%arg0: i32) -> (i32, i32, i32) {
    %c0_i32 = arith.constant 0 : i32
    %c0_i32_0 = arith.constant 0 : i32
    %c0_i32_1 = arith.constant 0 : i32
    %c0_i32_2 = arith.constant 0 : i32
    return %c0_i32, %c0_i32_0, %c0_i32_1 : i32, i32, i32
  }
  func.func @transform_7(%arg0: i32) -> (i32, i32, i32) {
    %c0_i32 = arith.constant 0 : i32
    %c0_i32_0 = arith.constant 0 : i32
    %c0_i32_1 = arith.constant 0 : i32
    %c0_i32_2 = arith.constant 0 : i32
    return %c0_i32, %c0_i32_0, %c0_i32_1 : i32, i32, i32
  }
  func.func @transform_8(%arg0: i32) -> (i32, i32, i32) {
    %c0_i32 = arith.constant 0 : i32
    %c0_i32_0 = arith.constant 0 : i32
    %c0_i32_1 = arith.constant 0 : i32
    %c0_i32_2 = arith.constant 0 : i32
    return %c0_i32, %c0_i32_0, %c0_i32_1 : i32, i32, i32
  }
  func.func @transform_9(%arg0: i32) -> (i32, i32, i32) {
    %c0_i32 = arith.constant 0 : i32
    %c0_i32_0 = arith.constant 0 : i32
    %c0_i32_1 = arith.constant 0 : i32
    %c0_i32_2 = arith.constant 0 : i32
    return %c0_i32, %c0_i32_0, %c0_i32_1 : i32, i32, i32
  }
  func.func @transform_10(%arg0: i32) -> (i32, i32) {
    %c0_i32 = arith.constant 0 : i32
    %c0_i32_0 = arith.constant 0 : i32
    %c0_i32_1 = arith.constant 0 : i32
    return %c0_i32, %c0_i32_0 : i32, i32
  }
  func.func @transform_11(%arg0: i32) -> (i32, i32) {
    %c0_i32 = arith.constant 0 : i32
    %c0_i32_0 = arith.constant 0 : i32
    %c0_i32_1 = arith.constant 0 : i32
    return %c0_i32, %c0_i32_0 : i32, i32
  }
  func.func @transform_12(%arg0: i32) -> (i32, i32) {
    %c0_i32 = arith.constant 0 : i32
    %c0_i32_0 = arith.constant 0 : i32
    %c0_i32_1 = arith.constant 0 : i32
    return %c0_i32, %c0_i32_0 : i32, i32
  }
  func.func @transform_13(%arg0: i32) -> (i32, i32) {
    %c0_i32 = arith.constant 0 : i32
    %c0_i32_0 = arith.constant 0 : i32
    %c0_i32_1 = arith.constant 0 : i32
    return %c0_i32, %c0_i32_0 : i32, i32
  }
  func.func @transform_14(%arg0: i32) -> (i32, i32) {
    %c0_i32 = arith.constant 0 : i32
    %c0_i32_0 = arith.constant 0 : i32
    %c0_i32_1 = arith.constant 0 : i32
    return %c0_i32, %c0_i32_0 : i32, i32
  }
  func.func @transform_15(%arg0: i32) -> (i32, i32) {
    %c0_i32 = arith.constant 0 : i32
    %c0_i32_0 = arith.constant 0 : i32
    %c0_i32_1 = arith.constant 0 : i32
    return %c0_i32, %c0_i32_0 : i32, i32
  }
  func.func @transform_16(%arg0: i32) -> (i32, i32) {
    %c0_i32 = arith.constant 0 : i32
    %c0_i32_0 = arith.constant 0 : i32
    %c0_i32_1 = arith.constant 0 : i32
    return %c0_i32, %c0_i32_0 : i32, i32
  }
  func.func @transform_17(%arg0: i32) -> (i32, i32) {
    %c0_i32 = arith.constant 0 : i32
    %c0_i32_0 = arith.constant 0 : i32
    %c0_i32_1 = arith.constant 0 : i32
    return %c0_i32, %c0_i32_0 : i32, i32
  }
  func.func @transform_18(%arg0: i32) -> (i32, i32) {
    %c0_i32 = arith.constant 0 : i32
    %c0_i32_0 = arith.constant 0 : i32
    %c0_i32_1 = arith.constant 0 : i32
    return %c0_i32, %c0_i32_0 : i32, i32
  }
  func.func @transform_19(%arg0: i32) -> (i32, i32) {
    %c0_i32 = arith.constant 0 : i32
    %c0_i32_0 = arith.constant 0 : i32
    %c0_i32_1 = arith.constant 0 : i32
    return %c0_i32, %c0_i32_0 : i32, i32
  }
  func.func @transform_20(%arg0: i32) -> (i32, i32) {
    %c0_i32 = arith.constant 0 : i32
    %c0_i32_0 = arith.constant 0 : i32
    %c0_i32_1 = arith.constant 0 : i32
    return %c0_i32, %c0_i32_0 : i32, i32
  }
  func.func @transform_21(%arg0: i32) -> (i32, i32) {
    %c0_i32 = arith.constant 0 : i32
    %c0_i32_0 = arith.constant 0 : i32
    %c0_i32_1 = arith.constant 0 : i32
    return %c0_i32, %c0_i32_0 : i32, i32
  }
  func.func @transform_22(%arg0: i32) -> (i32, i32) {
    %c0_i32 = arith.constant 0 : i32
    %c0_i32_0 = arith.constant 0 : i32
    %c0_i32_1 = arith.constant 0 : i32
    return %c0_i32, %c0_i32_0 : i32, i32
  }
  func.func @transform_23(%arg0: i32) -> (i32, i32) {
    %c0_i32 = arith.constant 0 : i32
    %c0_i32_0 = arith.constant 0 : i32
    %c0_i32_1 = arith.constant 0 : i32
    return %c0_i32, %c0_i32_0 : i32, i32
  }
  func.func @transform_24(%arg0: i32) -> (i32, i32) {
    %c0_i32 = arith.constant 0 : i32
    %c0_i32_0 = arith.constant 0 : i32
    %c0_i32_1 = arith.constant 0 : i32
    return %c0_i32, %c0_i32_0 : i32, i32
  }
  func.func @transform_25(%arg0: i32) -> (i32, i32) {
    %c0_i32 = arith.constant 0 : i32
    %c0_i32_0 = arith.constant 0 : i32
    %c0_i32_1 = arith.constant 0 : i32
    return %c0_i32, %c0_i32_0 : i32, i32
  }
  func.func @transform_26(%arg0: i32) -> (i32, i32) {
    %c0_i32 = arith.constant 0 : i32
    %c0_i32_0 = arith.constant 0 : i32
    %c0_i32_1 = arith.constant 0 : i32
    return %c0_i32, %c0_i32_0 : i32, i32
  }
  func.func @transform_27(%arg0: i32) -> (i32, i32) {
    %c0_i32 = arith.constant 0 : i32
    %c0_i32_0 = arith.constant 0 : i32
    %c0_i32_1 = arith.constant 0 : i32
    return %c0_i32, %c0_i32_0 : i32, i32
  }
  func.func @transform_28(%arg0: i32) -> (i32, i32) {
    %c0_i32 = arith.constant 0 : i32
    %c0_i32_0 = arith.constant 0 : i32
    return %arg0, %c0_i32 : i32, i32
  }
}

</mosaic_0001>

<bundles_post_ra>
// kernel: tpu_custom_call.1
= control target key start
LH: loop header
LB: loop body
LE: loop exit
PB: predicated region body
PF: predicated region fallthrough
CT: control target
= control target key end

     0   :  { %s9615_s0 = inlined_call_operand.hbm [shape: bf16[16,128], index: 0, kind: input, shape index: {}]   ;;  %s9616_s1 = inlined_call_operand.hbm [shape: f32[2,128,1024], index: 1, kind: input, shape index: {}]   ;;  %s9617_s2 = inlined_call_operand.hbm [shape: f32[2,1,1024], index: 2, kind: input, shape index: {}]   ;;  %s9618_s3 = inlined_call_operand.hbm [shape: f32[2,128,1024], index: 3, kind: input, shape index: {}]   ;;  %s9619_s4 = inlined_call_operand.hbm [shape: f32[2,1,1024], index: 4, kind: input, shape index: {}]   ;;  %s9620_s5 = inlined_call_operand.hbm [shape: f32[2,128,1024], index: 5, kind: input, shape index: {}]   ;;  %s9621_s6 = inlined_call_operand.hbm [shape: f32[2,1,1024], index: 6, kind: input, shape index: {}]   ;;  %s9622_s7 = inlined_call_operand.vmem [shape: f32[2,128,128], index: 7, kind: input, shape index: {}]   ;;  %s9623_s8 = inlined_call_operand.hbm [shape: f32[2,1,128], index: 8, kind: input, shape index: {}]   ;;  %s9624_s9 = inlined_call_operand.vmem [shape: f32[2,448,32], index: 9, kind: input, shape index: {}]   ;;  %s9625_s10 = inlined_call_operand.vmem [shape: f32[1024,128], index: 10, kind: input, shape index: {}]   ;;  %s9626_s11 = inlined_call_operand.vmem [shape: f32[1024,128], index: 11, kind: input, shape index: {}]   ;;  %s9627_s12 = inlined_call_operand.hbm [shape: f32[128,1024], index: 12, kind: input, shape index: {}]   ;;  %s9628_s13 = inlined_call_operand.vmem [shape: f32[128,448], index: 13, kind: input, shape index: {}]   ;;  %s9629_s14 = inlined_call_operand.vmem [shape: f32[128,448], index: 14, kind: input, shape index: {}]   ;;  %s9630_s15 = inlined_call_operand.vmem [shape: f32[128,128], index: 15, kind: input, shape index: {}]   ;;  %s9631_s16 = inlined_call_operand.vmem [shape: f32[128,128], index: 16, kind: input, shape index: {}]   ;;  %s9632_s17 = inlined_call_operand.hbm [shape: f32[1,128], index: 17, kind: input, shape index: {}]   ;;  %s9633_s18 = inlined_call_operand.vmem [shape: f32[128,32], index: 18, kind: input, shape index: {}]   ;;  %s9634_s19 = inlined_call_operand.hbm [shape: f32[1,32], index: 19, kind: input, shape index: {}]   ;;  %s9635_s20 = inlined_call_operand.hbm [shape: f32[1,32], index: 20, kind: input, shape index: {}]   ;;  %s9636_s21 = inlined_call_operand.hbm [shape: f32[1,32], index: 21, kind: input, shape index: {}]   ;;  %s9637_s22 = inlined_call_operand.vmem [shape: f32[32,16], index: 22, kind: input, shape index: {}]   ;;  %s9638_s23 = inlined_call_operand.hbm [shape: f32[1,16], index: 23, kind: input, shape index: {}]   ;;  %s9639_s24 = inlined_call_operand.hbm [shape: f32[1,16], index: 24, kind: input, shape index: {}]   ;;  %s9640_s25 = inlined_call_operand.hbm [shape: f32[1,16], index: 25, kind: input, shape index: {}]   ;;  %s9641_s26 = inlined_call_operand.vmem [shape: f32[16,1], index: 26, kind: input, shape index: {}]   ;;  %s9642_s27 = inlined_call_operand.<no memory space> [shape: f32[1,1], index: 27, kind: input, shape index: {}]   ;;  %s9643_s28 = inlined_call_operand.vmem [shape: f32[16,1], index: 28, kind: output, shape index: {}]  }
   0x1   :  { %9652 = sst [smem:[#allocation37_spill]] %s9615_s0  ;;  %v33_v0 = vstv %s9642_s27 }
   0x2   :  { %9653 = sst [smem:[#allocation38_spill]] %s9616_s1  ;;  %34 = vst [vmem:[#allocation2] sm:$0x1] %v33_v0 }
   0x3   :  { %9654 = sst [smem:[#allocation39_spill]] %s9617_s2 }
   0x4   :  { %9655 = sst [smem:[#allocation40_spill]] %s9618_s3 }
   0x5   :  { %9656 = sst [smem:[#allocation41_spill]] %s9619_s4 }
   0x6   :  { %9657 = sst [smem:[#allocation42_spill]] %s9620_s5 }
   0x7   :  { %9658 = sst [smem:[#allocation43_spill]] %s9621_s6 }
   0x8   :  { %9659 = sst [smem:[#allocation44_spill]] %s9622_s7 }
   0x9   :  { %9660 = sst [smem:[#allocation45_spill]] %s9623_s8 }
   0xa   :  { %9661 = sst [smem:[#allocation46_spill]] %s9624_s9 }
   0xb   :  { %9662 = sst [smem:[#allocation47_spill]] %s9625_s10 }
   0xc   :  { %9663 = sst [smem:[#allocation48_spill]] %s9626_s11 }
   0xd   :  { %9664 = sst [smem:[#allocation49_spill]] %s9627_s12 }
   0xe   :  { %9665 = sst [smem:[#allocation50_spill]] %s9643_s28 }
   0xf   :  { %35 = vsyncpa [#allocation4], 0 }
  0x10   :  { %36 = vsyncpa [#allocation6], 0 }
  0x11   :  { %37 = vsyncpa [#allocation9], 0 }
  0x12   :  { %38 = vsyncpa [#allocation12], 0 }
  0x13   :  { %39 = vsyncpa [#allocation15], 0 }
  0x14   :  { %40 = vsyncpa [#allocation18], 0 }
  0x15   :  { %41 = vsyncpa [#allocation21], 0 }
  0x16   :  { %42 = vsyncpa [#allocation24], 0  ;;  %s9666_s3 = sld [smem:[#allocation38_spill]] }
  0x1c   :  { %s61_s6 = sshll.u32 %s9666_s3, 4  ;;  %s62_s6 = int_to_ptr.hbm [resolvable:$true] %s61_s6 }
  0x1d   :  { %43 = vsyncpa [#allocation27], 0  ;;  %s6070_s10 = smov [#allocation5]   ;;  %s9667_s29 = sld [smem:[#allocation40_spill]] }
  0x1e   :  { %s63_s0 = sshll.u32 %s6070_s10, 4  ;;  %s9649_s7 = smov 1024   ;;  %s64_s0 = int_to_ptr.vmem [resolvable:$true] %s63_s0 }
  0x1f   :  { %s6072_s12 = smov 64   ;;  %s6073_s1 = smov [#allocation8]  }
  0x20   :  { %69 = dma.hbm_to_vmem [thread:$0]  %s62_s6, 32768, %s64_s0, [#allocation6], %s9649_s7, %s9649_s7, %s6072_s12  }
  0x21   :  { %s89_s4 = sshll.u32 %s6073_s1, 4  ;;  %s9668_s9 = sld [smem:[#allocation42_spill]]  ;;  %s90_s4 = int_to_ptr.vmem [resolvable:$true] %s89_s4 }
  0x22   :  { %s9669_s11 = sld [smem:[#allocation45_spill]]  ;;  %s6075_s6 = smov [#allocation14]  }
  0x23   :  { %s87_s2 = sshll.u32 %s9667_s29, 4  ;;  %s6074_s29 = smov [#allocation11]   ;;  %s88_s2 = int_to_ptr.hbm [resolvable:$true] %s87_s2 }
  0x24   :  { %95 = dma.hbm_to_vmem [thread:$0]  %s88_s2, 32768, %s90_s4, [#allocation9], %s9649_s7, %s9649_s7, %s6072_s12  }
  0x25   :  { %s115_s28 = sshll.u32 %s6074_s29, 4  ;;  %s143_s0 = sshll.u32 %s6075_s6, 4  ;;  %s116_s28 = int_to_ptr.vmem [resolvable:$true] %s115_s28  ;;  %s144_s0 = int_to_ptr.vmem [resolvable:$true] %s143_s0 }
  0x26   :  { %s9650_s1 = smov 16   ;;  %s6077_s8 = smov 1  }
  0x27   :  { %s113_s30 = sshll.u32 %s9668_s9, 4  ;;  %s182_s5 = sshll.u32 %s9632_s17, 4  ;;  %s114_s30 = int_to_ptr.hbm [resolvable:$true] %s113_s30  ;;  %s183_s5 = int_to_ptr.hbm [resolvable:$true] %s182_s5 }
  0x28   :  { %s141_s27 = sshll.u32 %s9669_s11, 4  ;;  %s6078_s9 = smov [#allocation17]   ;;  %s142_s27 = int_to_ptr.hbm [resolvable:$true] %s141_s27 }
  0x29   :  { %121 = dma.hbm_to_vmem [thread:$0]  %s114_s30, 32768, %s116_s28, [#allocation12], %s9649_s7, %s9649_s7, %s6072_s12  }
  0x2a   :  { %149 = dma.hbm_to_vmem [thread:$0]  %s142_s27, 32, %s144_s0, [#allocation15], %s9650_s1, %s9650_s1, %s6077_s8  }
  0x2b   :  { %s184_s3 = sshll.u32 %s6078_s9, 4  ;;  %s206_s28 = sshll.u32 %s9635_s20, 4  ;;  %s185_s3 = int_to_ptr.vmem [resolvable:$true] %s184_s3  ;;  %s207_s28 = int_to_ptr.hbm [resolvable:$true] %s206_s28 }
  0x2c   :  { %187 = dma.hbm_to_vmem [thread:$0]  %s183_s5, 16, %s185_s3, [#allocation18]  }
  0x2d   :  { %s6079_s30 = smov [#allocation20]   ;;  %s230_s27 = sshll.u32 %s9638_s23, 4  ;;  %s231_s27 = int_to_ptr.hbm [resolvable:$true] %s230_s27 }
  0x2e   :  { %s208_s29 = sshll.u32 %s6079_s30, 4  ;;  %s9670_s8 = sld [smem:[#allocation37_spill]]  ;;  %s209_s29 = int_to_ptr.vmem [resolvable:$true] %s208_s29 }
  0x2f   :  { %211 = dma.hbm_to_vmem [thread:$0]  %s207_s28, 16, %s209_s29, [#allocation21]  }
  0x30   :  { %s6080_s4 = smov [#allocation23]   ;;  %s6081_s20 = smov [#allocation3]  }
  0x31   :  { %s232_s9 = sshll.u32 %s6080_s4, 4  ;;  %s50_s5 = sshll.u32 %s6081_s20, 4  ;;  %s233_s9 = int_to_ptr.vmem [resolvable:$true] %s232_s9  ;;  %s51_s5 = int_to_ptr.vmem [resolvable:$true] %s50_s5 }
  0x32   :  { %235 = dma.hbm_to_vmem [thread:$0]  %s231_s27, 16, %s233_s9, [#allocation24]  }
  0x33   :  { %s9671_s11 = sld [smem:[#allocation39_spill]]  ;;  %s6082_s23 = smov 4  }
  0x34   :  { %s48_s2 = sshll.u32 %s9670_s8, 4  ;;  %s6083_s28 = smov [#allocation7]   ;;  %s49_s2 = int_to_ptr.hbm [resolvable:$true] %s48_s2 }
  0x35   :  { %56 = dma.hbm_to_vmem [thread:$0]  %s49_s2, 128, %s51_s5, [#allocation4], %s6072_s12, %s6072_s12, %s6082_s23  }
  0x36   :  { %s76_s30 = sshll.u32 %s6083_s28, 4  ;;  %s6084_s29 = smov 128   ;;  %s77_s30 = int_to_ptr.vmem [resolvable:$true] %s76_s30 }
  0x37   :  { %s6085_s6 = smov 8   ;;  %s9672_s0 = sld [smem:[#allocation41_spill]] }
  0x38   :  { %s6086_s4 = smov [#allocation10]   ;;  %s9673_s10 = sld [smem:[#allocation43_spill]] }
  0x39   :  { %s74_s7 = sshll.u32 %s9671_s11, 4  ;;  %s102_s9 = sshll.u32 %s6086_s4, 4  ;;  %s75_s7 = int_to_ptr.hbm [resolvable:$true] %s74_s7  ;;  %s103_s9 = int_to_ptr.vmem [resolvable:$true] %s102_s9 }
  0x3a   :  { %82 = dma.hbm_to_vmem [thread:$0]  %s75_s7, 256, %s77_s30, [#allocation6], %s6084_s29, %s6084_s29, %s6085_s6  }
  0x3b   :  { %s6087_s2 = smov [#allocation13]   ;;  %s9674_s1 = sld [smem:[#allocation49_spill]] }
  0x3c   :  { %s128_s5 = sshll.u32 %s6087_s2, 4  ;;  %s195_s27 = sshll.u32 %s9634_s19, 4  ;;  %s129_s5 = int_to_ptr.vmem [resolvable:$true] %s128_s5  ;;  %s196_s27 = int_to_ptr.hbm [resolvable:$true] %s195_s27 }
  0x3d   :  { %s100_s8 = sshll.u32 %s9672_s0, 4  ;;  %s6088_s0 = smov [#allocation16]   ;;  %s101_s8 = int_to_ptr.hbm [resolvable:$true] %s100_s8 }
  0x3e   :  { %s126_s11 = sshll.u32 %s9673_s10, 4  ;;  %s162_s4 = sshll.u32 %s6088_s0, 4  ;;  %s127_s11 = int_to_ptr.hbm [resolvable:$true] %s126_s11  ;;  %s163_s4 = int_to_ptr.vmem [resolvable:$true] %s162_s4 }
  0x3f   :  { %108 = dma.hbm_to_vmem [thread:$0]  %s101_s8, 256, %s103_s9, [#allocation9], %s6084_s29, %s6084_s29, %s6085_s6  }
  0x40   :  { %134 = dma.hbm_to_vmem [thread:$0]  %s127_s11, 256, %s129_s5, [#allocation12], %s6084_s29, %s6084_s29, %s6085_s6  }
  0x41   :  { %s160_s7 = sshll.u32 %s9674_s1, 4  ;;  %s9675_s8 = smov 1024   ;;  %s161_s7 = int_to_ptr.hbm [resolvable:$true] %s160_s7 }
  0x42   :  { %168 = dma.hbm_to_vmem [thread:$0]  %s161_s7, 16384, %s163_s4, [#allocation15], %s9675_s8, %s9675_s8, %s6072_s12  }
  0x43   :  { %s6089_s9 = smov [#allocation19]   ;;  %s217_s1 = sshll.u32 %s9636_s21, 4  ;;  %s218_s1 = int_to_ptr.hbm [resolvable:$true] %s217_s1 }
  0x44   :  { %s197_s20 = sshll.u32 %s6089_s9, 4  ;;  %s241_s19 = sshll.u32 %s9639_s24, 4  ;;  %s198_s20 = int_to_ptr.vmem [resolvable:$true] %s197_s20  ;;  %s242_s19 = int_to_ptr.hbm [resolvable:$true] %s241_s19 }
  0x45   :  { %200 = dma.hbm_to_vmem [thread:$0]  %s196_s27, 16, %s198_s20, [#allocation18]  }
  0x46   :  { %s6090_s11 = smov [#allocation22]   ;;  %s6091_s5 = smov [#allocation25]  }
  0x47   :  { %s219_s2 = sshll.u32 %s6090_s11, 4  ;;  %s243_s23 = sshll.u32 %s6091_s5, 4  ;;  %s220_s2 = int_to_ptr.vmem [resolvable:$true] %s219_s2  ;;  %s244_s23 = int_to_ptr.vmem [resolvable:$true] %s243_s23 }
  0x48   :  { %222 = dma.hbm_to_vmem [thread:$0]  %s218_s1, 16, %s220_s2, [#allocation21]  }
  0x49   :  { %s252_s30 = sshll.u32 %s9640_s25, 4  ;;  %s6092_s21 = smov [#allocation26]   ;;  %s253_s30 = int_to_ptr.hbm [resolvable:$true] %s252_s30 }
  0x4a   :  { %246 = dma.hbm_to_vmem [thread:$0]  %s242_s19, 16, %s244_s23, [#allocation24]  }
  0x4b   :  { %s254_s17 = sshll.u32 %s6092_s21, 4  ;;  %s255_s17 = int_to_ptr.vmem [resolvable:$true] %s254_s17 }
  0x4c   :  { %257 = dma.hbm_to_vmem [thread:$0]  %s253_s30, 16, %s255_s17, [#allocation27]  }
  0x4d   :  { %6052 = dma.done.wait [#allocation4], 128  }
  0x4e   :  { %6053 = vsyncadd [#allocation4], 4294967168 }
  0x4f   :  { %6054 = dma.done.wait [#allocation6], 33024  }
  0x50   :  { %6055 = vsyncadd [#allocation6], 4294934272 }
  0x51   :  { %6056 = dma.done.wait [#allocation9], 33024  }
  0x52   :  { %6057 = vsyncadd [#allocation9], 4294934272 }
  0x53   :  { %6058 = dma.done.wait [#allocation12], 33024  }
  0x54   :  { %6059 = vsyncadd [#allocation12], 4294934272 }
  0x55   :  { %6060 = dma.done.wait [#allocation15], 16416  }
  0x56   :  { %6061 = vsyncadd [#allocation15], 4294950880 }
  0x57   :  { %6062 = dma.done.wait [#allocation18], 32  }
  0x58   :  { %6063 = vsyncadd [#allocation18], 4294967264 }
  0x59   :  { %6064 = dma.done.wait [#allocation21], 32  }
  0x5a   :  { %6065 = vsyncadd [#allocation21], 4294967264 }
  0x5b   :  { %6066 = dma.done.wait [#allocation24], 32  }
  0x5c   :  { %6067 = vsyncadd [#allocation24], 4294967264 }
  0x5d   :  { %6068 = dma.done.wait [#allocation27], 16  }
  0x5e   :  { %6069 = vsyncadd [#allocation27], 4294967280  ;;  %v346_v1 = vld [vmem:[%s9630_s15 + $0x78] sm:$0xff]  ;;  %v430_v2 = vld [vmem:[%s9629_s14 + $0x1e0] sm:$0xff]  ;;  %s9676_s8 = sld [smem:[#allocation47_spill]]  ;;  %s9677_s1 = smov 16  }
  0x5f   :  { %v431_v3 = vld [vmem:[%s9629_s14 + $0x1e8] sm:$0xff]  ;;  %347 = vmatpush.msra.mxu0 %v346_v1  ;;  %434 = vmatpush.msra.mxu1 %v430_v2  ;;  %v432_v4 = vld [vmem:[%s9629_s14 + $0x1f0] sm:$0xff]  ;;  %v426_v6 = vld [vmem:[%s9629_s14 + $0x1c0] sm:$0xff]  ;;  %s6093_s29 = smov 32   ;;  %s9678_s11 = sld [smem:[#allocation48_spill]]  ;;  %vm2839_vm0 = vcmask 523264  }
  0x60   :  { %v345_v5 = vld [vmem:[%s9630_s15 + $0x70] sm:$0xff]  ;;  %457 = vmatpush.msra.mxu2 %v431_v3  ;;  %480 = vmatpush.msra.mxu3 %v432_v4  ;;  %v427_v7 = vld [vmem:[%s9629_s14 + $0x1c8] sm:$0xff]  ;;  %v422_v10 = vld [vmem:[%s9629_s14 + $0x1a0] sm:$0xff]  ;;  %s9680_s30 = sld [smem:[#allocation46_spill]]  ;;  %vm4937_vm1 = vcmask 261120   ;;  %vm4987_vm2 = vcmask 130048  }
  0x61   :  { %v428_v8 = vld [vmem:[%s9629_s14 + $0x1d0] sm:$0xff]  ;;  %v344_v9 = vld [vmem:[%s9630_s15 + $0x68] sm:$0xff]  ;;  %348 = vmatpush.msra.mxu0 %v345_v5  ;;  %435 = vmatpush.msra.mxu1 %v426_v6  ;;  %v343_v13 = vld [vmem:[%s9630_s15 + $0x60] sm:$0xff]  ;;  %vm5055_vm6 = vcmask 7168   ;;  %s9681_s28 = sld [smem:[#allocation50_spill]] }
  0x62   :  { %v423_v11 = vld [vmem:[%s9629_s14 + $0x1a8] sm:$0xff]  ;;  %v424_v12 = vld [vmem:[%s9629_s14 + $0x1b0] sm:$0xff]  ;;  %458 = vmatpush.msra.mxu2 %v427_v7  ;;  %481 = vmatpush.msra.mxu3 %v428_v8  ;;  %v418_v14 = vld [vmem:[%s9629_s14 + $0x180] sm:$0xff] }
  0x63   :  { %349 = vmatpush.msra.mxu0 %v344_v9  ;;  %436 = vmatpush.msra.mxu1 %v422_v10  ;;  %v419_v15 = vld [vmem:[%s9629_s14 + $0x188] sm:$0xff]  ;;  %v420_v16 = vld [vmem:[%s9629_s14 + $0x190] sm:$0xff]  ;;  %v342_v17 = vld [vmem:[%s9630_s15 + $0x58] sm:$0xff] }
  0x64   :  { %459 = vmatpush.msra.mxu2 %v423_v11  ;;  %482 = vmatpush.msra.mxu3 %v424_v12  ;;  %v414_v18 = vld [vmem:[%s9629_s14 + $0x160] sm:$0xff]  ;;  %v415_v19 = vld [vmem:[%s9629_s14 + $0x168] sm:$0xff]  ;;  %v416_v20 = vld [vmem:[%s9629_s14 + $0x170] sm:$0xff] }
  0x65   :  { %350 = vmatpush.msra.mxu0 %v343_v13  ;;  %437 = vmatpush.msra.mxu1 %v418_v14  ;;  %v341_v21 = vld [vmem:[%s9630_s15 + $0x50] sm:$0xff]  ;;  %v410_v22 = vld [vmem:[%s9629_s14 + $0x140] sm:$0xff]  ;;  %v411_v23 = vld [vmem:[%s9629_s14 + $0x148] sm:$0xff] }
  0x66   :  { %460 = vmatpush.msra.mxu2 %v419_v15  ;;  %483 = vmatpush.msra.mxu3 %v420_v16  ;;  %v412_v24 = vld [vmem:[%s9629_s14 + $0x150] sm:$0xff]  ;;  %v340_v25 = vld [vmem:[%s9630_s15 + $0x48] sm:$0xff]  ;;  %v406_v26 = vld [vmem:[%s9629_s14 + $0x120] sm:$0xff] }
  0x67   :  { %351 = vmatpush.msra.mxu0 %v342_v17  ;;  %438 = vmatpush.msra.mxu1 %v414_v18  ;;  %v407_v27 = vld [vmem:[%s9629_s14 + $0x128] sm:$0xff]  ;;  %v408_v28 = vld [vmem:[%s9629_s14 + $0x130] sm:$0xff]  ;;  %v339_v29 = vld [vmem:[%s9630_s15 + $0x40] sm:$0xff] }
  0x68   :  { %461 = vmatpush.msra.mxu2 %v415_v19  ;;  %484 = vmatpush.msra.mxu3 %v416_v20  ;;  %v402_v30 = vld [vmem:[%s9629_s14 + $0x100] sm:$0xff]  ;;  %v403_v31 = vld [vmem:[%s9629_s14 + $0x108] sm:$0xff]  ;;  %v404_v32 = vld [vmem:[%s9629_s14 + $0x110] sm:$0xff] }
  0x69   :  { %352 = vmatpush.msra.mxu0 %v341_v21  ;;  %439 = vmatpush.msra.mxu1 %v410_v22  ;;  %v338_v33 = vld [vmem:[%s9630_s15 + $0x38] sm:$0xff]  ;;  %v398_v34 = vld [vmem:[%s9629_s14 + $0xe0] sm:$0xff]  ;;  %v399_v35 = vld [vmem:[%s9629_s14 + $0xe8] sm:$0xff] }
  0x6a   :  { %462 = vmatpush.msra.mxu2 %v411_v23  ;;  %485 = vmatpush.msra.mxu3 %v412_v24  ;;  %v400_v36 = vld [vmem:[%s9629_s14 + $0xf0] sm:$0xff]  ;;  %v394_v38 = vld [vmem:[%s9629_s14 + $0xc0] sm:$0xff]  ;;  %v395_v39 = vld [vmem:[%s9629_s14 + $0xc8] sm:$0xff] }
  0x6b   :  { %353 = vmatpush.msra.mxu0 %v340_v25  ;;  %440 = vmatpush.msra.mxu1 %v406_v26  ;;  %v337_v37 = vld [vmem:[%s9630_s15 + $0x30] sm:$0xff]  ;;  %v336_v41 = vld [vmem:[%s9630_s15 + $0x28] sm:$0xff]  ;;  %v390_v42 = vld [vmem:[%s9629_s14 + $0xa0] sm:$0xff] }
  0x6c   :  { %463 = vmatpush.msra.mxu2 %v407_v27  ;;  %486 = vmatpush.msra.mxu3 %v408_v28  ;;  %v396_v40 = vld [vmem:[%s9629_s14 + $0xd0] sm:$0xff]  ;;  %v391_v43 = vld [vmem:[%s9629_s14 + $0xa8] sm:$0xff]  ;;  %v335_v45 = vld [vmem:[%s9630_s15 + $0x20] sm:$0xff] }
  0x6d   :  { %354 = vmatpush.msra.mxu0 %v339_v29  ;;  %441 = vmatpush.msra.mxu1 %v402_v30  ;;  %v392_v44 = vld [vmem:[%s9629_s14 + $0xb0] sm:$0xff]  ;;  %v386_v46 = vld [vmem:[%s9629_s14 + $0x80] sm:$0xff]  ;;  %v387_v47 = vld [vmem:[%s9629_s14 + $0x88] sm:$0xff] }
  0x6e   :  { %464 = vmatpush.msra.mxu2 %v403_v31  ;;  %487 = vmatpush.msra.mxu3 %v404_v32  ;;  %v388_v48 = vld [vmem:[%s9629_s14 + $0x90] sm:$0xff]  ;;  %v334_v49 = vld [vmem:[%s9630_s15 + $0x18] sm:$0xff]  ;;  %v382_v50 = vld [vmem:[%s9629_s14 + $0x60] sm:$0xff] }
  0x6f   :  { %355 = vmatpush.msra.mxu0 %v338_v33  ;;  %442 = vmatpush.msra.mxu1 %v398_v34  ;;  %v383_v51 = vld [vmem:[%s9629_s14 + $0x68] sm:$0xff]  ;;  %v384_v52 = vld [vmem:[%s9629_s14 + $0x70] sm:$0xff]  ;;  %v378_v54 = vld [vmem:[%s9629_s14 + $0x40] sm:$0xff] }
  0x70   :  { %465 = vmatpush.msra.mxu2 %v399_v35  ;;  %488 = vmatpush.msra.mxu3 %v400_v36  ;;  %v333_v53 = vld [vmem:[%s9630_s15 + $0x10] sm:$0xff]  ;;  %v379_v55 = vld [vmem:[%s9629_s14 + $0x48] sm:$0xff]  ;;  %v374_v58 = vld [vmem:[%s9629_s14 + $0x20] sm:$0xff] }
  0x71   :  { %356 = vmatpush.msra.mxu0 %v337_v37  ;;  %443 = vmatpush.msra.mxu1 %v394_v38  ;;  %v380_v56 = vld [vmem:[%s9629_s14 + $0x50] sm:$0xff]  ;;  %v332_v57 = vld [vmem:[%s9630_s15 + $0x8] sm:$0xff]  ;;  %v331_v61 = vld [vmem:[%s9630_s15] sm:$0xff] }
  0x72   :  { %466 = vmatpush.msra.mxu2 %v395_v39  ;;  %489 = vmatpush.msra.mxu3 %v396_v40  ;;  %v375_v59 = vld [vmem:[%s9629_s14 + $0x28] sm:$0xff]  ;;  %v376_v60 = vld [vmem:[%s9629_s14 + $0x30] sm:$0xff]  ;;  %v370_v62 = vld [vmem:[%s9629_s14] sm:$0xff] }
  0x73   :  { %357 = vmatpush.msra.mxu0 %v336_v41  ;;  %444 = vmatpush.msra.mxu1 %v390_v42  ;;  %v371_v63 = vld [vmem:[%s9629_s14 + $0x8] sm:$0xff]  ;;  %v372_v0 = vld [vmem:[%s9629_s14 + $0x10] sm:$0xff]  ;;  %v433_v1 = vld [vmem:[%s9629_s14 + $0x1f8] sm:$0xff] }
  0x74   :  { %467 = vmatpush.msra.mxu2 %v391_v43  ;;  %490 = vmatpush.msra.mxu3 %v392_v44  ;;  %v541_v2 = vld [vmem:[%s9633_s18 + $0x78] sm:$0xff]  ;;  %v689_v3 = vld [vmem:[#allocation5 + $0x3c0] sm:$0xff]  ;;  %v538_v14 = vld [vmem:[%s9633_s18 + $0x60] sm:$0xff] }
  0x75   :  { %358 = vmatpush.msra.mxu0 %v335_v45  ;;  %445 = vmatpush.msra.mxu1 %v386_v46  ;;  %v690_v4 = vld [vmem:[#allocation5 + $0x3c8] sm:$0xff]  ;;  %v681_v7 = vld [vmem:[#allocation5 + $0x380] sm:$0xff]  ;;  %v534_v30 = vld [vmem:[%s9633_s18 + $0x40] sm:$0xff] }
  0x76   :  { %468 = vmatpush.msra.mxu2 %v387_v47  ;;  %491 = vmatpush.msra.mxu3 %v388_v48  ;;  %v429_v5 = vld [vmem:[%s9629_s14 + $0x1d8] sm:$0xff]  ;;  %v540_v6 = vld [vmem:[%s9633_s18 + $0x70] sm:$0xff]  ;;  %v539_v10 = vld [vmem:[%s9633_s18 + $0x68] sm:$0xff] }
  0x77   :  { %359 = vmatpush.msra.mxu0 %v334_v49  ;;  %446 = vmatpush.msra.mxu1 %v382_v50  ;;  %v682_v8 = vld [vmem:[#allocation5 + $0x388] sm:$0xff]  ;;  %v673_v11 = vld [vmem:[#allocation5 + $0x340] sm:$0xff]  ;;  %v530_v46 = vld [vmem:[%s9633_s18 + $0x20] sm:$0xff] }
  0x78   :  { %469 = vmatpush.msra.mxu2 %v383_v51  ;;  %492 = vmatpush.msra.mxu3 %v384_v52  ;;  %v425_v9 = vld [vmem:[%s9629_s14 + $0x1b8] sm:$0xff]  ;;  %v665_v15 = vld [vmem:[#allocation5 + $0x300] sm:$0xff] }
  0x79   :  { %360 = vmatpush.msra.mxu0 %v333_v53  ;;  %447 = vmatpush.msra.mxu1 %v378_v54  ;;  %v674_v12 = vld [vmem:[#allocation5 + $0x348] sm:$0xff]  ;;  %v657_v19 = vld [vmem:[#allocation5 + $0x2c0] sm:$0xff] }
  0x7a   :  { %470 = vmatpush.msra.mxu2 %v379_v55  ;;  %493 = vmatpush.msra.mxu3 %v380_v56  ;;  %v421_v13 = vld [vmem:[%s9629_s14 + $0x198] sm:$0xff]  ;;  %v536_v22 = vld [vmem:[%s9633_s18 + $0x50] sm:$0xff]  ;;  %v535_v26 = vld [vmem:[%s9633_s18 + $0x48] sm:$0xff] }
  0x7b   :  { %361 = vmatpush.msra.mxu0 %v332_v57  ;;  %448 = vmatpush.msra.mxu1 %v374_v58  ;;  %v666_v16 = vld [vmem:[#allocation5 + $0x308] sm:$0xff]  ;;  %v649_v23 = vld [vmem:[#allocation5 + $0x280] sm:$0xff] }
  0x7c   :  { %471 = vmatpush.msra.mxu2 %v375_v59  ;;  %494 = vmatpush.msra.mxu3 %v376_v60  ;;  %v417_v17 = vld [vmem:[%s9629_s14 + $0x178] sm:$0xff]  ;;  %v641_v27 = vld [vmem:[#allocation5 + $0x240] sm:$0xff] }
  0x7d   :  { %362 = vmatpush.msra.mxu0 %v331_v61  ;;  %449 = vmatpush.msra.mxu1 %v370_v62  ;;  %v537_v18 = vld [vmem:[%s9633_s18 + $0x58] sm:$0xff]  ;;  %v633_v31 = vld [vmem:[#allocation5 + $0x200] sm:$0xff]  ;;  %v6588_v61 = vld [vmem:[#allocation3] sm:$0xff]  }
  0x7e   :  { %472 = vmatpush.msra.mxu2 %v371_v63  ;;  %495 = vmatpush.msra.mxu3 %v372_v0  ;;  %v658_v20 = vld [vmem:[#allocation5 + $0x2c8] sm:$0xff]  ;;  %v625_v35 = vld [vmem:[#allocation5 + $0x1c0] sm:$0xff]  ;;  %v526_v63 = vld [vmem:[%s9633_s18] sm:$0xff] }
  0x7f   :  { %503 = vmatpush.msrb.mxu0 %v433_v1  ;;  %546 = vmatpush.msrb.mxu1 %v541_v2  ;;  %v413_v21 = vld [vmem:[%s9629_s14 + $0x158] sm:$0xff]  ;;  %v532_v38 = vld [vmem:[%s9633_s18 + $0x30] sm:$0xff]  ;;  %v531_v42 = vld [vmem:[%s9633_s18 + $0x28] sm:$0xff]  ;;  %v6597_v2 = vunpack.c.l.bf16 %v6588_v61 }
  0x80   :  { %715 = vmatpush.msrb.mxu2 %v689_v3  ;;  %738 = vmatpush.msrb.mxu3 %v690_v4  ;;  %v650_v24 = vld [vmem:[#allocation5 + $0x288] sm:$0xff]  ;;  %v617_v39 = vld [vmem:[#allocation5 + $0x180] sm:$0xff]  ;;  %v691_v3 = vld [vmem:[#allocation5 + $0x3d0] sm:$0xff] }
  0x81   :  { %504 = vmatpush.msrb.mxu0 %v429_v5  ;;  %547 = vmatpush.msrb.mxu1 %v540_v6  ;;  %v409_v25 = vld [vmem:[%s9629_s14 + $0x138] sm:$0xff]  ;;  %v609_v43 = vld [vmem:[#allocation5 + $0x140] sm:$0xff]  ;;  %v692_v4 = vld [vmem:[#allocation5 + $0x3d8] sm:$0xff] }
  0x82   :  { %716 = vmatpush.msrb.mxu2 %v681_v7  ;;  %739 = vmatpush.msrb.mxu3 %v682_v8  ;;  %v642_v28 = vld [vmem:[#allocation5 + $0x248] sm:$0xff]  ;;  %v601_v47 = vld [vmem:[#allocation5 + $0x100] sm:$0xff]  ;;  %v683_v7 = vld [vmem:[#allocation5 + $0x390] sm:$0xff] }
  0x83   :  { %505 = vmatpush.msrb.mxu0 %v425_v9  ;;  %548 = vmatpush.msrb.mxu1 %v539_v10  ;;  %v405_v29 = vld [vmem:[%s9629_s14 + $0x118] sm:$0xff]  ;;  %v593_v51 = vld [vmem:[#allocation5 + $0xc0] sm:$0xff]  ;;  %v684_v8 = vld [vmem:[#allocation5 + $0x398] sm:$0xff] }
  0x84   :  { %717 = vmatpush.msrb.mxu2 %v673_v11  ;;  %740 = vmatpush.msrb.mxu3 %v674_v12  ;;  %v634_v32 = vld [vmem:[#allocation5 + $0x208] sm:$0xff]  ;;  %v585_v55 = vld [vmem:[#allocation5 + $0x80] sm:$0xff]  ;;  %v675_v11 = vld [vmem:[#allocation5 + $0x350] sm:$0xff] }
  0x85   :  { %506 = vmatpush.msrb.mxu0 %v421_v13  ;;  %549 = vmatpush.msrb.mxu1 %v538_v14  ;;  %v401_v33 = vld [vmem:[%s9629_s14 + $0xf8] sm:$0xff]  ;;  %v528_v54 = vld [vmem:[%s9633_s18 + $0x10] sm:$0xff]  ;;  %v527_v58 = vld [vmem:[%s9633_s18 + $0x8] sm:$0xff] }
  0x86   :  { %718 = vmatpush.msrb.mxu2 %v665_v15  ;;  %741 = vmatpush.msrb.mxu3 %v666_v16  ;;  %v533_v34 = vld [vmem:[%s9633_s18 + $0x38] sm:$0xff]  ;;  %v577_v59 = vld [vmem:[#allocation5 + $0x40] sm:$0xff]  ;;  %v676_v12 = vld [vmem:[#allocation5 + $0x358] sm:$0xff] }
  0x87   :  { %507 = vmatpush.msrb.mxu0 %v417_v17  ;;  %550 = vmatpush.msrb.mxu1 %v537_v18  ;;  %v626_v36 = vld [vmem:[#allocation5 + $0x1c8] sm:$0xff]  ;;  %v569_v0 = vld [vmem:[#allocation5] sm:$0xff]  ;;  %v667_v15 = vld [vmem:[#allocation5 + $0x310] sm:$0xff] }
  0x88   :  { %719 = vmatpush.msrb.mxu2 %v657_v19  ;;  %742 = vmatpush.msrb.mxu3 %v658_v20  ;;  %v397_v37 = vld [vmem:[%s9629_s14 + $0xd8] sm:$0xff]  ;;  %v693_v5 = vld [vmem:[#allocation5 + $0x3e0] sm:$0xff]  ;;  %v668_v16 = vld [vmem:[#allocation5 + $0x318] sm:$0xff] }
  0x89   :  { %508 = vmatpush.msrb.mxu0 %v413_v21  ;;  %551 = vmatpush.msrb.mxu1 %v536_v22  ;;  %v618_v40 = vld [vmem:[#allocation5 + $0x188] sm:$0xff]  ;;  %v685_v9 = vld [vmem:[#allocation5 + $0x3a0] sm:$0xff]  ;;  %v659_v19 = vld [vmem:[#allocation5 + $0x2d0] sm:$0xff] }
  0x8a   :  { %720 = vmatpush.msrb.mxu2 %v649_v23  ;;  %743 = vmatpush.msrb.mxu3 %v650_v24  ;;  %v393_v41 = vld [vmem:[%s9629_s14 + $0xb8] sm:$0xff]  ;;  %v677_v13 = vld [vmem:[#allocation5 + $0x360] sm:$0xff]  ;;  %v660_v20 = vld [vmem:[#allocation5 + $0x2d8] sm:$0xff] }
  0x8b   :  { %509 = vmatpush.msrb.mxu0 %v409_v25  ;;  %552 = vmatpush.msrb.mxu1 %v535_v26  ;;  %v610_v44 = vld [vmem:[#allocation5 + $0x148] sm:$0xff]  ;;  %v669_v17 = vld [vmem:[#allocation5 + $0x320] sm:$0xff]  ;;  %v651_v23 = vld [vmem:[#allocation5 + $0x290] sm:$0xff] }
  0x8c   :  { %721 = vmatpush.msrb.mxu2 %v641_v27  ;;  %744 = vmatpush.msrb.mxu3 %v642_v28  ;;  %v389_v45 = vld [vmem:[%s9629_s14 + $0x98] sm:$0xff]  ;;  %v661_v21 = vld [vmem:[#allocation5 + $0x2e0] sm:$0xff]  ;;  %v652_v24 = vld [vmem:[#allocation5 + $0x298] sm:$0xff] }
  0x8d   :  { %510 = vmatpush.msrb.mxu0 %v405_v29  ;;  %553 = vmatpush.msrb.mxu1 %v534_v30  ;;  %v602_v48 = vld [vmem:[#allocation5 + $0x108] sm:$0xff]  ;;  %v653_v25 = vld [vmem:[#allocation5 + $0x2a0] sm:$0xff]  ;;  %v643_v27 = vld [vmem:[#allocation5 + $0x250] sm:$0xff] }
  0x8e   :  { %722 = vmatpush.msrb.mxu2 %v633_v31  ;;  %745 = vmatpush.msrb.mxu3 %v634_v32  ;;  %v385_v49 = vld [vmem:[%s9629_s14 + $0x78] sm:$0xff]  ;;  %v644_v28 = vld [vmem:[#allocation5 + $0x258] sm:$0xff]  ;;  %v645_v29 = vld [vmem:[#allocation5 + $0x260] sm:$0xff] }
  0x8f   :  { %511 = vmatpush.msrb.mxu0 %v401_v33  ;;  %554 = vmatpush.msrb.mxu1 %v533_v34  ;;  %v529_v50 = vld [vmem:[%s9633_s18 + $0x18] sm:$0xff]  ;;  %v636_v32 = vld [vmem:[#allocation5 + $0x218] sm:$0xff]  ;;  %v637_v33 = vld [vmem:[#allocation5 + $0x220] sm:$0xff] }
  0x90   :  { %723 = vmatpush.msrb.mxu2 %v625_v35  ;;  %746 = vmatpush.msrb.mxu3 %v626_v36  ;;  %v594_v52 = vld [vmem:[#allocation5 + $0xc8] sm:$0xff]  ;;  %v635_v31 = vld [vmem:[#allocation5 + $0x210] sm:$0xff]  ;;  %v628_v36 = vld [vmem:[#allocation5 + $0x1d8] sm:$0xff] }
  0x91   :  { %512 = vmatpush.msrb.mxu0 %v397_v37  ;;  %555 = vmatpush.msrb.mxu1 %v532_v38  ;;  %v381_v53 = vld [vmem:[%s9629_s14 + $0x58] sm:$0xff]  ;;  %v629_v37 = vld [vmem:[#allocation5 + $0x1e0] sm:$0xff] }
  0x92   :  { %724 = vmatpush.msrb.mxu2 %v617_v39  ;;  %747 = vmatpush.msrb.mxu3 %v618_v40  ;;  %v586_v56 = vld [vmem:[#allocation5 + $0x88] sm:$0xff]  ;;  %v627_v35 = vld [vmem:[#allocation5 + $0x1d0] sm:$0xff]  ;;  %v620_v40 = vld [vmem:[#allocation5 + $0x198] sm:$0xff] }
  0x93   :  { %513 = vmatpush.msrb.mxu0 %v393_v41  ;;  %556 = vmatpush.msrb.mxu1 %v531_v42  ;;  %v377_v57 = vld [vmem:[%s9629_s14 + $0x38] sm:$0xff]  ;;  %v621_v41 = vld [vmem:[#allocation5 + $0x1a0] sm:$0xff] }
  0x94   :  { %725 = vmatpush.msrb.mxu2 %v609_v43  ;;  %748 = vmatpush.msrb.mxu3 %v610_v44  ;;  %v578_v60 = vld [vmem:[#allocation5 + $0x48] sm:$0xff]  ;;  %v619_v39 = vld [vmem:[#allocation5 + $0x190] sm:$0xff]  ;;  %v612_v44 = vld [vmem:[#allocation5 + $0x158] sm:$0xff] }
  0x95   :  { %514 = vmatpush.msrb.mxu0 %v389_v45  ;;  %557 = vmatpush.msrb.mxu1 %v530_v46  ;;  %v373_v62 = vld [vmem:[%s9629_s14 + $0x18] sm:$0xff]  ;;  %v613_v45 = vld [vmem:[#allocation5 + $0x160] sm:$0xff]  ;;  %s9679_s14 = sld [smem:[#allocation44_spill]] }
  0x96   :  { %726 = vmatpush.msrb.mxu2 %v601_v47  ;;  %749 = vmatpush.msrb.mxu3 %v602_v48  ;;  %v570_v1 = vld [vmem:[#allocation5 + $0x8] sm:$0xff]  ;;  %v611_v43 = vld [vmem:[#allocation5 + $0x150] sm:$0xff]  ;;  %v6604_v47 = vunpack.c.h.bf16 %v6588_v61  ;;  %v580_v61 = vld [vmem:[#allocation5 + $0x58] sm:$0xff] }
  0x97   :  { %515 = vmatpush.msrb.mxu0 %v385_v49  ;;  %558 = vmatpush.msrb.mxu1 %v529_v50  ;;  %v694_v6 = vld [vmem:[#allocation5 + $0x3e8] sm:$0xff]  ;;  %v603_v48 = vld [vmem:[#allocation5 + $0x110] sm:$0xff]  ;;  %v604_v49 = vld [vmem:[#allocation5 + $0x118] sm:$0xff] }
  0x98   :  { %727 = vmatpush.msrb.mxu2 %v593_v51  ;;  %750 = vmatpush.msrb.mxu3 %v594_v52  ;;  %v686_v10 = vld [vmem:[#allocation5 + $0x3a8] sm:$0xff]  ;;  %v605_v50 = vld [vmem:[#allocation5 + $0x120] sm:$0xff]  ;;  %v595_v52 = vld [vmem:[#allocation5 + $0xd0] sm:$0xff] }
  0x99   :  { %516 = vmatpush.msrb.mxu0 %v381_v53  ;;  %559 = vmatpush.msrb.mxu1 %v528_v54  ;;  %v678_v14 = vld [vmem:[#allocation5 + $0x368] sm:$0xff]  ;;  %v596_v53 = vld [vmem:[#allocation5 + $0xd8] sm:$0xff]  ;;  %v597_v54 = vld [vmem:[#allocation5 + $0xe0] sm:$0xff] }
  0x9a   :  { %728 = vmatpush.msrb.mxu2 %v585_v55  ;;  %751 = vmatpush.msrb.mxu3 %v586_v56  ;;  %v670_v18 = vld [vmem:[#allocation5 + $0x328] sm:$0xff]  ;;  %v587_v56 = vld [vmem:[#allocation5 + $0x90] sm:$0xff] }
  0x9b   :  { %517 = vmatpush.msrb.mxu0 %v377_v57  ;;  %560 = vmatpush.msrb.mxu1 %v527_v58  ;;  %v662_v22 = vld [vmem:[#allocation5 + $0x2e8] sm:$0xff]  ;;  %v588_v57 = vld [vmem:[#allocation5 + $0x98] sm:$0xff]  ;;  %v589_v58 = vld [vmem:[#allocation5 + $0xa0] sm:$0xff] }
  0x9c   :  { %729 = vmatpush.msrb.mxu2 %v577_v59  ;;  %752 = vmatpush.msrb.mxu3 %v578_v60  ;;  %v654_v26 = vld [vmem:[#allocation5 + $0x2a8] sm:$0xff]  ;;  %v579_v60 = vld [vmem:[#allocation5 + $0x50] sm:$0xff] }
  0x9d   :  { %518 = vmatpush.msrb.mxu0 %v373_v62  ;;  %561 = vmatpush.msrb.mxu1 %v526_v63  ;;  %v646_v30 = vld [vmem:[#allocation5 + $0x268] sm:$0xff]  ;;  %v581_v62 = vld [vmem:[#allocation5 + $0x60] sm:$0xff] }
  0x9e   :  { %730 = vmatpush.msrb.mxu2 %v569_v0  ;;  %753 = vmatpush.msrb.mxu3 %v570_v1  ;;  %v638_v34 = vld [vmem:[#allocation5 + $0x228] sm:$0xff]  ;;  %v571_v0 = vld [vmem:[#allocation5 + $0x10] sm:$0xff]  ;;  %v572_v1 = vld [vmem:[#allocation5 + $0x18] sm:$0xff] }
  0x9f   :  { %363 = vmatmul.f32.vlgmr.msra.gmra.mxu0 %v6597_v2  ;;  %450 = vmatmul.f32.vlgmr.msra.gmra.mxu1 %v6597_v2  ;;  %v630_v38 = vld [vmem:[#allocation5 + $0x1e8] sm:$0xff] }
  0xa0   :  { %473 = vmatmul.f32.vlgmr.msra.gmra.mxu2 %v6597_v2  ;;  %496 = vmatmul.f32.vlgmr.msra.gmra.mxu3 %v6597_v2  ;;  %v622_v42 = vld [vmem:[#allocation5 + $0x1a8] sm:$0xff] }
  0xa1   :  { %761 = vmatpush.msra.mxu0 %v691_v3  ;;  %784 = vmatpush.msra.mxu1 %v692_v4  ;;  %v614_v46 = vld [vmem:[#allocation5 + $0x168] sm:$0xff]  ;;  %v573_v3 = vld [vmem:[#allocation5 + $0x20] sm:$0xff] }
  0xa2   :  { %807 = vmatpush.msra.mxu2 %v693_v5  ;;  %830 = vmatpush.msra.mxu3 %v694_v6  ;;  %v606_v51 = vld [vmem:[#allocation5 + $0x128] sm:$0xff]  ;;  %v695_v5 = vld [vmem:[#allocation5 + $0x3f0] sm:$0xff]  ;;  %v696_v6 = vld [vmem:[#allocation5 + $0x3f8] sm:$0xff] }
  0xa3   :  { %762 = vmatpush.msra.mxu0 %v683_v7  ;;  %785 = vmatpush.msra.mxu1 %v684_v8  ;;  %v598_v55 = vld [vmem:[#allocation5 + $0xe8] sm:$0xff]  ;;  %v1019_v7 = vld [vmem:[#allocation8 + $0x3c0] sm:$0xff]  ;;  %v1020_v8 = vld [vmem:[#allocation8 + $0x3c8] sm:$0xff] }
  0xa4   :  { %808 = vmatpush.msra.mxu2 %v685_v9  ;;  %831 = vmatpush.msra.mxu3 %v686_v10  ;;  %v590_v59 = vld [vmem:[#allocation5 + $0xa8] sm:$0xff]  ;;  %v687_v9 = vld [vmem:[#allocation5 + $0x3b0] sm:$0xff]  ;;  %v688_v10 = vld [vmem:[#allocation5 + $0x3b8] sm:$0xff] }
  0xa5   :  { %763 = vmatpush.msra.mxu0 %v675_v11  ;;  %786 = vmatpush.msra.mxu1 %v676_v12  ;;  %v582_v63 = vld [vmem:[#allocation5 + $0x68] sm:$0xff]  ;;  %v1011_v11 = vld [vmem:[#allocation8 + $0x380] sm:$0xff]  ;;  %v1012_v12 = vld [vmem:[#allocation8 + $0x388] sm:$0xff] }
  0xa6   :  { %809 = vmatpush.msra.mxu2 %v677_v13  ;;  %832 = vmatpush.msra.mxu3 %v678_v14  ;;  %v574_v4 = vld [vmem:[#allocation5 + $0x28] sm:$0xff]  ;;  %v679_v13 = vld [vmem:[#allocation5 + $0x370] sm:$0xff]  ;;  %v680_v14 = vld [vmem:[#allocation5 + $0x378] sm:$0xff] }
  0xa7   :  { %764 = vmatpush.msra.mxu0 %v667_v15  ;;  %787 = vmatpush.msra.mxu1 %v668_v16  ;;  %v1003_v15 = vld [vmem:[#allocation8 + $0x340] sm:$0xff]  ;;  %v1004_v16 = vld [vmem:[#allocation8 + $0x348] sm:$0xff] }
  0xa8   :  { %810 = vmatpush.msra.mxu2 %v669_v17  ;;  %833 = vmatpush.msra.mxu3 %v670_v18  ;;  %v671_v17 = vld [vmem:[#allocation5 + $0x330] sm:$0xff]  ;;  %v672_v18 = vld [vmem:[#allocation5 + $0x338] sm:$0xff] }
  0xa9   :  { %765 = vmatpush.msra.mxu0 %v659_v19  ;;  %788 = vmatpush.msra.mxu1 %v660_v20  ;;  %v995_v19 = vld [vmem:[#allocation8 + $0x300] sm:$0xff]  ;;  %v996_v20 = vld [vmem:[#allocation8 + $0x308] sm:$0xff] }
  0xaa   :  { %811 = vmatpush.msra.mxu2 %v661_v21  ;;  %834 = vmatpush.msra.mxu3 %v662_v22  ;;  %v663_v21 = vld [vmem:[#allocation5 + $0x2f0] sm:$0xff]  ;;  %v664_v22 = vld [vmem:[#allocation5 + $0x2f8] sm:$0xff] }
  0xab   :  { %766 = vmatpush.msra.mxu0 %v651_v23  ;;  %789 = vmatpush.msra.mxu1 %v652_v24  ;;  %v987_v23 = vld [vmem:[#allocation8 + $0x2c0] sm:$0xff]  ;;  %v988_v24 = vld [vmem:[#allocation8 + $0x2c8] sm:$0xff] }
  0xac   :  { %812 = vmatpush.msra.mxu2 %v653_v25  ;;  %835 = vmatpush.msra.mxu3 %v654_v26  ;;  %v655_v25 = vld [vmem:[#allocation5 + $0x2b0] sm:$0xff]  ;;  %v656_v26 = vld [vmem:[#allocation5 + $0x2b8] sm:$0xff] }
  0xad   :  { %767 = vmatpush.msra.mxu0 %v643_v27  ;;  %790 = vmatpush.msra.mxu1 %v644_v28  ;;  %v979_v27 = vld [vmem:[#allocation8 + $0x280] sm:$0xff]  ;;  %v980_v28 = vld [vmem:[#allocation8 + $0x288] sm:$0xff] }
  0xae   :  { %813 = vmatpush.msra.mxu2 %v645_v29  ;;  %836 = vmatpush.msra.mxu3 %v646_v30  ;;  %v647_v29 = vld [vmem:[#allocation5 + $0x270] sm:$0xff]  ;;  %v648_v30 = vld [vmem:[#allocation5 + $0x278] sm:$0xff] }
  0xaf   :  { %768 = vmatpush.msra.mxu0 %v635_v31  ;;  %791 = vmatpush.msra.mxu1 %v636_v32  ;;  %v971_v31 = vld [vmem:[#allocation8 + $0x240] sm:$0xff]  ;;  %v972_v32 = vld [vmem:[#allocation8 + $0x248] sm:$0xff] }
  0xb0   :  { %814 = vmatpush.msra.mxu2 %v637_v33  ;;  %837 = vmatpush.msra.mxu3 %v638_v34  ;;  %v639_v33 = vld [vmem:[#allocation5 + $0x230] sm:$0xff]  ;;  %v640_v34 = vld [vmem:[#allocation5 + $0x238] sm:$0xff] }
  0xb1   :  { %769 = vmatpush.msra.mxu0 %v627_v35  ;;  %792 = vmatpush.msra.mxu1 %v628_v36  ;;  %v963_v35 = vld [vmem:[#allocation8 + $0x200] sm:$0xff]  ;;  %v964_v36 = vld [vmem:[#allocation8 + $0x208] sm:$0xff] }
  0xb2   :  { %815 = vmatpush.msra.mxu2 %v629_v37  ;;  %838 = vmatpush.msra.mxu3 %v630_v38  ;;  %v631_v37 = vld [vmem:[#allocation5 + $0x1f0] sm:$0xff]  ;;  %v632_v38 = vld [vmem:[#allocation5 + $0x1f8] sm:$0xff] }
  0xb3   :  { %770 = vmatpush.msra.mxu0 %v619_v39  ;;  %793 = vmatpush.msra.mxu1 %v620_v40  ;;  %v955_v39 = vld [vmem:[#allocation8 + $0x1c0] sm:$0xff]  ;;  %v956_v40 = vld [vmem:[#allocation8 + $0x1c8] sm:$0xff] }
  0xb4   :  { %816 = vmatpush.msra.mxu2 %v621_v41  ;;  %839 = vmatpush.msra.mxu3 %v622_v42  ;;  %v623_v41 = vld [vmem:[#allocation5 + $0x1b0] sm:$0xff]  ;;  %v624_v42 = vld [vmem:[#allocation5 + $0x1b8] sm:$0xff] }
  0xb5   :  { %771 = vmatpush.msra.mxu0 %v611_v43  ;;  %794 = vmatpush.msra.mxu1 %v612_v44  ;;  %v947_v43 = vld [vmem:[#allocation8 + $0x180] sm:$0xff]  ;;  %v948_v44 = vld [vmem:[#allocation8 + $0x188] sm:$0xff] }
  0xb6   :  { %817 = vmatpush.msra.mxu2 %v613_v45  ;;  %840 = vmatpush.msra.mxu3 %v614_v46  ;;  %v615_v45 = vld [vmem:[#allocation5 + $0x170] sm:$0xff]  ;;  %v616_v46 = vld [vmem:[#allocation5 + $0x178] sm:$0xff] }
  0xb7   :  { %476 = vmatmul.f32.gmra.mxu2 %v6604_v47  ;;  %499 = vmatmul.f32.gmra.mxu3 %v6604_v47 }
  0xb8   :  { %772 = vmatpush.msra.mxu0 %v603_v48  ;;  %795 = vmatpush.msra.mxu1 %v604_v49  ;;  %v939_v48 = vld [vmem:[#allocation8 + $0x140] sm:$0xff]  ;;  %v940_v49 = vld [vmem:[#allocation8 + $0x148] sm:$0xff] }
  0xb9   :  { %818 = vmatpush.msra.mxu2 %v605_v50  ;;  %841 = vmatpush.msra.mxu3 %v606_v51  ;;  %v607_v50 = vld [vmem:[#allocation5 + $0x130] sm:$0xff]  ;;  %v608_v51 = vld [vmem:[#allocation5 + $0x138] sm:$0xff] }
  0xba   :  { %366 = vmatmul.f32.gmra.mxu0 %v6604_v47  ;;  %453 = vmatmul.f32.gmra.mxu1 %v6604_v47 }
  0xbb   :  { %773 = vmatpush.msra.mxu0 %v595_v52  ;;  %796 = vmatpush.msra.mxu1 %v596_v53  ;;  %v931_v52 = vld [vmem:[#allocation8 + $0x100] sm:$0xff]  ;;  %v932_v53 = vld [vmem:[#allocation8 + $0x108] sm:$0xff] }
  0xbc   :  { %819 = vmatpush.msra.mxu2 %v597_v54  ;;  %842 = vmatpush.msra.mxu3 %v598_v55  ;;  %v599_v54 = vld [vmem:[#allocation5 + $0xf0] sm:$0xff]  ;;  %v600_v55 = vld [vmem:[#allocation5 + $0xf8] sm:$0xff] }
  0xbd   :  { %774 = vmatpush.msra.mxu0 %v587_v56  ;;  %797 = vmatpush.msra.mxu1 %v588_v57  ;;  %v923_v56 = vld [vmem:[#allocation8 + $0xc0] sm:$0xff]  ;;  %v924_v57 = vld [vmem:[#allocation8 + $0xc8] sm:$0xff] }
  0xbe   :  { %820 = vmatpush.msra.mxu2 %v589_v58  ;;  %843 = vmatpush.msra.mxu3 %v590_v59  ;;  %v591_v58 = vld [vmem:[#allocation5 + $0xb0] sm:$0xff]  ;;  %v592_v59 = vld [vmem:[#allocation5 + $0xb8] sm:$0xff] }
  0xbf   :  { %775 = vmatpush.msra.mxu0 %v579_v60  ;;  %798 = vmatpush.msra.mxu1 %v580_v61  ;;  %v915_v60 = vld [vmem:[#allocation8 + $0x80] sm:$0xff]  ;;  %v916_v61 = vld [vmem:[#allocation8 + $0x88] sm:$0xff] }
  0xc0   :  { %821 = vmatpush.msra.mxu2 %v581_v62  ;;  %844 = vmatpush.msra.mxu3 %v582_v63  ;;  %v583_v62 = vld [vmem:[#allocation5 + $0x70] sm:$0xff]  ;;  %v584_v63 = vld [vmem:[#allocation5 + $0x78] sm:$0xff] }
  0xc1   :  { %731 = vmatmul.f32.vlgmr.msrb.gmra.mxu2 %v6597_v2  ;;  %754 = vmatmul.f32.vlgmr.msrb.gmra.mxu3 %v6597_v2 }
  0xc2   :  { %776 = vmatpush.msra.mxu0 %v571_v0  ;;  %799 = vmatpush.msra.mxu1 %v572_v1  ;;  %v907_v0 = vld [vmem:[#allocation8 + $0x40] sm:$0xff]  ;;  %v908_v1 = vld [vmem:[#allocation8 + $0x48] sm:$0xff] }
  0xc3   :  { %822 = vmatpush.msra.mxu2 %v573_v3  ;;  %845 = vmatpush.msra.mxu3 %v574_v4  ;;  %v575_v3 = vld [vmem:[#allocation5 + $0x30] sm:$0xff]  ;;  %v576_v4 = vld [vmem:[#allocation5 + $0x38] sm:$0xff] }
  0xc4   :  { %519 = vmatmul.f32.vlgmr.msrb.gmra.mxu0 %v6597_v2  ;;  %562 = vmatmul.f32.vlgmr.msrb.gmra.mxu1 %v6597_v2 }
  0xc5   :  { %853 = vmatpush.msrb.mxu0 %v695_v5  ;;  %876 = vmatpush.msrb.mxu1 %v696_v6  ;;  %v899_v5 = vld [vmem:[#allocation8] sm:$0xff]  ;;  %v900_v6 = vld [vmem:[#allocation8 + $0x8] sm:$0xff] }
  0xc6   :  { %1045 = vmatpush.msrb.mxu2 %v1019_v7  ;;  %1068 = vmatpush.msrb.mxu3 %v1020_v8  ;;  %v1021_v7 = vld [vmem:[#allocation8 + $0x3d0] sm:$0xff]  ;;  %v1022_v8 = vld [vmem:[#allocation8 + $0x3d8] sm:$0xff] }
  0xc7   :  { %854 = vmatpush.msrb.mxu0 %v687_v9  ;;  %877 = vmatpush.msrb.mxu1 %v688_v10  ;;  %v1023_v9 = vld [vmem:[#allocation8 + $0x3e0] sm:$0xff]  ;;  %v1024_v10 = vld [vmem:[#allocation8 + $0x3e8] sm:$0xff] }
  0xc8   :  { %1046 = vmatpush.msrb.mxu2 %v1011_v11  ;;  %1069 = vmatpush.msrb.mxu3 %v1012_v12  ;;  %v1013_v11 = vld [vmem:[#allocation8 + $0x390] sm:$0xff]  ;;  %v1014_v12 = vld [vmem:[#allocation8 + $0x398] sm:$0xff] }
  0xc9   :  { %855 = vmatpush.msrb.mxu0 %v679_v13  ;;  %878 = vmatpush.msrb.mxu1 %v680_v14  ;;  %v1015_v13 = vld [vmem:[#allocation8 + $0x3a0] sm:$0xff]  ;;  %v1016_v14 = vld [vmem:[#allocation8 + $0x3a8] sm:$0xff] }
  0xca   :  { %1047 = vmatpush.msrb.mxu2 %v1003_v15  ;;  %1070 = vmatpush.msrb.mxu3 %v1004_v16  ;;  %v1005_v15 = vld [vmem:[#allocation8 + $0x350] sm:$0xff]  ;;  %v1006_v16 = vld [vmem:[#allocation8 + $0x358] sm:$0xff] }
  0xcb   :  { %856 = vmatpush.msrb.mxu0 %v671_v17  ;;  %879 = vmatpush.msrb.mxu1 %v672_v18  ;;  %v1007_v17 = vld [vmem:[#allocation8 + $0x360] sm:$0xff]  ;;  %v1008_v18 = vld [vmem:[#allocation8 + $0x368] sm:$0xff] }
  0xcc   :  { %1048 = vmatpush.msrb.mxu2 %v995_v19  ;;  %1071 = vmatpush.msrb.mxu3 %v996_v20  ;;  %v997_v19 = vld [vmem:[#allocation8 + $0x310] sm:$0xff]  ;;  %v998_v20 = vld [vmem:[#allocation8 + $0x318] sm:$0xff] }
  0xcd   :  { %734 = vmatmul.f32.gmra.mxu2 %v6604_v47  ;;  %757 = vmatmul.f32.gmra.mxu3 %v6604_v47 }
  0xce   :  { %857 = vmatpush.msrb.mxu0 %v663_v21  ;;  %880 = vmatpush.msrb.mxu1 %v664_v22  ;;  %v999_v21 = vld [vmem:[#allocation8 + $0x320] sm:$0xff]  ;;  %v1000_v22 = vld [vmem:[#allocation8 + $0x328] sm:$0xff] }
  0xcf   :  { %1049 = vmatpush.msrb.mxu2 %v987_v23  ;;  %1072 = vmatpush.msrb.mxu3 %v988_v24  ;;  %v989_v23 = vld [vmem:[#allocation8 + $0x2d0] sm:$0xff]  ;;  %v990_v24 = vld [vmem:[#allocation8 + $0x2d8] sm:$0xff] }
  0xd0   :  { %858 = vmatpush.msrb.mxu0 %v655_v25  ;;  %881 = vmatpush.msrb.mxu1 %v656_v26  ;;  %v991_v25 = vld [vmem:[#allocation8 + $0x2e0] sm:$0xff]  ;;  %v992_v26 = vld [vmem:[#allocation8 + $0x2e8] sm:$0xff] }
  0xd1   :  { %1050 = vmatpush.msrb.mxu2 %v979_v27  ;;  %1073 = vmatpush.msrb.mxu3 %v980_v28  ;;  %v981_v27 = vld [vmem:[#allocation8 + $0x290] sm:$0xff]  ;;  %v982_v28 = vld [vmem:[#allocation8 + $0x298] sm:$0xff] }
  0xd2   :  { %859 = vmatpush.msrb.mxu0 %v647_v29  ;;  %882 = vmatpush.msrb.mxu1 %v648_v30  ;;  %v983_v29 = vld [vmem:[#allocation8 + $0x2a0] sm:$0xff]  ;;  %v984_v30 = vld [vmem:[#allocation8 + $0x2a8] sm:$0xff] }
  0xd3   :  { %1051 = vmatpush.msrb.mxu2 %v971_v31  ;;  %1074 = vmatpush.msrb.mxu3 %v972_v32  ;;  %v973_v31 = vld [vmem:[#allocation8 + $0x250] sm:$0xff]  ;;  %v974_v32 = vld [vmem:[#allocation8 + $0x258] sm:$0xff] }
  0xd4   :  { %860 = vmatpush.msrb.mxu0 %v639_v33  ;;  %883 = vmatpush.msrb.mxu1 %v640_v34  ;;  %v975_v33 = vld [vmem:[#allocation8 + $0x260] sm:$0xff]  ;;  %v976_v34 = vld [vmem:[#allocation8 + $0x268] sm:$0xff] }
  0xd5   :  { %1052 = vmatpush.msrb.mxu2 %v963_v35  ;;  %1075 = vmatpush.msrb.mxu3 %v964_v36  ;;  %v965_v35 = vld [vmem:[#allocation8 + $0x210] sm:$0xff]  ;;  %v966_v36 = vld [vmem:[#allocation8 + $0x218] sm:$0xff] }
  0xd6   :  { %823 = vmatmul.f32.vlgmr.msra.gmra.mxu2 %v6597_v2  ;;  %846 = vmatmul.f32.vlgmr.msra.gmra.mxu3 %v6597_v2 }
  0xd7   :  { %861 = vmatpush.msrb.mxu0 %v631_v37  ;;  %884 = vmatpush.msrb.mxu1 %v632_v38  ;;  %v967_v37 = vld [vmem:[#allocation8 + $0x220] sm:$0xff]  ;;  %v968_v38 = vld [vmem:[#allocation8 + $0x228] sm:$0xff] }
  0xd8   :  { %1053 = vmatpush.msrb.mxu2 %v955_v39  ;;  %1076 = vmatpush.msrb.mxu3 %v956_v40  ;;  %v957_v39 = vld [vmem:[#allocation8 + $0x1d0] sm:$0xff]  ;;  %v958_v40 = vld [vmem:[#allocation8 + $0x1d8] sm:$0xff] }
  0xd9   :  { %862 = vmatpush.msrb.mxu0 %v623_v41  ;;  %885 = vmatpush.msrb.mxu1 %v624_v42  ;;  %v959_v41 = vld [vmem:[#allocation8 + $0x1e0] sm:$0xff]  ;;  %v960_v42 = vld [vmem:[#allocation8 + $0x1e8] sm:$0xff] }
  0xda   :  { %1054 = vmatpush.msrb.mxu2 %v947_v43  ;;  %1077 = vmatpush.msrb.mxu3 %v948_v44  ;;  %v949_v43 = vld [vmem:[#allocation8 + $0x190] sm:$0xff]  ;;  %v950_v44 = vld [vmem:[#allocation8 + $0x198] sm:$0xff] }
  0xdb   :  { %863 = vmatpush.msrb.mxu0 %v615_v45  ;;  %886 = vmatpush.msrb.mxu1 %v616_v46  ;;  %v951_v45 = vld [vmem:[#allocation8 + $0x1a0] sm:$0xff]  ;;  %v952_v46 = vld [vmem:[#allocation8 + $0x1a8] sm:$0xff] }
  0xdc   :  { %1055 = vmatpush.msrb.mxu2 %v939_v48  ;;  %1078 = vmatpush.msrb.mxu3 %v940_v49  ;;  %v941_v48 = vld [vmem:[#allocation8 + $0x150] sm:$0xff]  ;;  %v942_v49 = vld [vmem:[#allocation8 + $0x158] sm:$0xff] }
  0xdd   :  { %522 = vmatmul.f32.gmra.mxu0 %v6604_v47  ;;  %565 = vmatmul.f32.gmra.mxu1 %v6604_v47 }
  0xde   :  { %864 = vmatpush.msrb.mxu0 %v607_v50  ;;  %887 = vmatpush.msrb.mxu1 %v608_v51  ;;  %v943_v50 = vld [vmem:[#allocation8 + $0x160] sm:$0xff]  ;;  %v944_v51 = vld [vmem:[#allocation8 + $0x168] sm:$0xff] }
  0xdf   :  { %1056 = vmatpush.msrb.mxu2 %v931_v52  ;;  %1079 = vmatpush.msrb.mxu3 %v932_v53  ;;  %v933_v52 = vld [vmem:[#allocation8 + $0x110] sm:$0xff]  ;;  %v934_v53 = vld [vmem:[#allocation8 + $0x118] sm:$0xff] }
  0xe0   :  { %826 = vmatmul.f32.gmra.mxu2 %v6604_v47  ;;  %849 = vmatmul.f32.gmra.mxu3 %v6604_v47 }
  0xe1   :  { %865 = vmatpush.msrb.mxu0 %v599_v54  ;;  %888 = vmatpush.msrb.mxu1 %v600_v55  ;;  %v935_v54 = vld [vmem:[#allocation8 + $0x120] sm:$0xff]  ;;  %v936_v55 = vld [vmem:[#allocation8 + $0x128] sm:$0xff] }
  0xe2   :  { %1057 = vmatpush.msrb.mxu2 %v923_v56  ;;  %1080 = vmatpush.msrb.mxu3 %v924_v57  ;;  %v925_v56 = vld [vmem:[#allocation8 + $0xd0] sm:$0xff]  ;;  %v926_v57 = vld [vmem:[#allocation8 + $0xd8] sm:$0xff] }
  0xe3   :  { %866 = vmatpush.msrb.mxu0 %v591_v58  ;;  %889 = vmatpush.msrb.mxu1 %v592_v59  ;;  %v927_v58 = vld [vmem:[#allocation8 + $0xe0] sm:$0xff]  ;;  %v928_v59 = vld [vmem:[#allocation8 + $0xe8] sm:$0xff] }
  0xe4   :  { %1058 = vmatpush.msrb.mxu2 %v915_v60  ;;  %1081 = vmatpush.msrb.mxu3 %v916_v61  ;;  %v917_v60 = vld [vmem:[#allocation8 + $0x90] sm:$0xff]  ;;  %v918_v61 = vld [vmem:[#allocation8 + $0x98] sm:$0xff] }
  0xe5   :  { %867 = vmatpush.msrb.mxu0 %v583_v62  ;;  %890 = vmatpush.msrb.mxu1 %v584_v63  ;;  %v919_v62 = vld [vmem:[#allocation8 + $0xa0] sm:$0xff]  ;;  %v920_v63 = vld [vmem:[#allocation8 + $0xa8] sm:$0xff] }
  0xe6   :  { %1059 = vmatpush.msrb.mxu2 %v907_v0  ;;  %1082 = vmatpush.msrb.mxu3 %v908_v1  ;;  %v909_v0 = vld [vmem:[#allocation8 + $0x50] sm:$0xff]  ;;  %v910_v1 = vld [vmem:[#allocation8 + $0x58] sm:$0xff] }
  0xe7   :  { %777 = vmatmul.f32.vlgmr.msra.gmra.mxu0 %v6597_v2  ;;  %800 = vmatmul.f32.vlgmr.msra.gmra.mxu1 %v6597_v2 }
  0xe8   :  { %868 = vmatpush.msrb.mxu0 %v575_v3  ;;  %891 = vmatpush.msrb.mxu1 %v576_v4  ;;  %v911_v3 = vld [vmem:[#allocation8 + $0x60] sm:$0xff]  ;;  %v912_v4 = vld [vmem:[#allocation8 + $0x68] sm:$0xff] }
  0xe9   :  { %1060 = vmatpush.msrb.mxu2 %v899_v5  ;;  %1083 = vmatpush.msrb.mxu3 %v900_v6  ;;  %v901_v5 = vld [vmem:[#allocation8 + $0x10] sm:$0xff]  ;;  %v902_v6 = vld [vmem:[#allocation8 + $0x18] sm:$0xff] }
  0xea   :  { %1061 = vmatmul.f32.vlgmr.msrb.gmra.mxu2 %v6597_v2  ;;  %1084 = vmatmul.f32.vlgmr.msrb.gmra.mxu3 %v6597_v2 }
  0xeb   :  { %1091 = vmatpush.msra.mxu0 %v1021_v7  ;;  %1114 = vmatpush.msra.mxu1 %v1022_v8  ;;  %v903_v7 = vld [vmem:[#allocation8 + $0x20] sm:$0xff]  ;;  %v904_v8 = vld [vmem:[#allocation8 + $0x28] sm:$0xff] }
  0xec   :  { %1137 = vmatpush.msra.mxu2 %v1023_v9  ;;  %1160 = vmatpush.msra.mxu3 %v1024_v10  ;;  %v1025_v9 = vld [vmem:[#allocation8 + $0x3f0] sm:$0xff]  ;;  %v1026_v10 = vld [vmem:[#allocation8 + $0x3f8] sm:$0xff] }
  0xed   :  { %1092 = vmatpush.msra.mxu0 %v1013_v11  ;;  %1115 = vmatpush.msra.mxu1 %v1014_v12  ;;  %v1017_v11 = vld [vmem:[#allocation8 + $0x3b0] sm:$0xff]  ;;  %v1018_v12 = vld [vmem:[#allocation8 + $0x3b8] sm:$0xff] }
  0xee   :  { %1138 = vmatpush.msra.mxu2 %v1015_v13  ;;  %1161 = vmatpush.msra.mxu3 %v1016_v14  ;;  %v1009_v13 = vld [vmem:[#allocation8 + $0x370] sm:$0xff]  ;;  %v1010_v14 = vld [vmem:[#allocation8 + $0x378] sm:$0xff] }
  0xef   :  { %1093 = vmatpush.msra.mxu0 %v1005_v15  ;;  %1116 = vmatpush.msra.mxu1 %v1006_v16  ;;  %v1001_v15 = vld [vmem:[#allocation8 + $0x330] sm:$0xff]  ;;  %v1002_v16 = vld [vmem:[#allocation8 + $0x338] sm:$0xff] }
  0xf0   :  { %1139 = vmatpush.msra.mxu2 %v1007_v17  ;;  %1162 = vmatpush.msra.mxu3 %v1008_v18  ;;  %v993_v17 = vld [vmem:[#allocation8 + $0x2f0] sm:$0xff]  ;;  %v994_v18 = vld [vmem:[#allocation8 + $0x2f8] sm:$0xff] }
  0xf1   :  { %1094 = vmatpush.msra.mxu0 %v997_v19  ;;  %1117 = vmatpush.msra.mxu1 %v998_v20  ;;  %v985_v19 = vld [vmem:[#allocation8 + $0x2b0] sm:$0xff]  ;;  %v986_v20 = vld [vmem:[#allocation8 + $0x2b8] sm:$0xff] }
  0xf2   :  { %1140 = vmatpush.msra.mxu2 %v999_v21  ;;  %1163 = vmatpush.msra.mxu3 %v1000_v22  ;;  %v977_v21 = vld [vmem:[#allocation8 + $0x270] sm:$0xff]  ;;  %v978_v22 = vld [vmem:[#allocation8 + $0x278] sm:$0xff] }
  0xf3   :  { %780 = vmatmul.f32.gmra.mxu0 %v6604_v47  ;;  %803 = vmatmul.f32.gmra.mxu1 %v6604_v47 }
  0xf4   :  { %1064 = vmatmul.f32.gmra.mxu2 %v6604_v47  ;;  %1087 = vmatmul.f32.gmra.mxu3 %v6604_v47 }
  0xf5   :  { %1095 = vmatpush.msra.mxu0 %v989_v23  ;;  %1118 = vmatpush.msra.mxu1 %v990_v24  ;;  %v969_v23 = vld [vmem:[#allocation8 + $0x230] sm:$0xff]  ;;  %v970_v24 = vld [vmem:[#allocation8 + $0x238] sm:$0xff] }
  0xf6   :  { %1141 = vmatpush.msra.mxu2 %v991_v25  ;;  %1164 = vmatpush.msra.mxu3 %v992_v26  ;;  %v961_v25 = vld [vmem:[#allocation8 + $0x1f0] sm:$0xff]  ;;  %v962_v26 = vld [vmem:[#allocation8 + $0x1f8] sm:$0xff] }
  0xf7   :  { %1096 = vmatpush.msra.mxu0 %v981_v27  ;;  %1119 = vmatpush.msra.mxu1 %v982_v28  ;;  %v953_v27 = vld [vmem:[#allocation8 + $0x1b0] sm:$0xff]  ;;  %v954_v28 = vld [vmem:[#allocation8 + $0x1b8] sm:$0xff] }
  0xf8   :  { %1142 = vmatpush.msra.mxu2 %v983_v29  ;;  %1165 = vmatpush.msra.mxu3 %v984_v30  ;;  %v945_v29 = vld [vmem:[#allocation8 + $0x170] sm:$0xff]  ;;  %v946_v30 = vld [vmem:[#allocation8 + $0x178] sm:$0xff] }
  0xf9   :  { %1097 = vmatpush.msra.mxu0 %v973_v31  ;;  %1120 = vmatpush.msra.mxu1 %v974_v32  ;;  %v937_v31 = vld [vmem:[#allocation8 + $0x130] sm:$0xff]  ;;  %v938_v32 = vld [vmem:[#allocation8 + $0x138] sm:$0xff] }
  0xfa   :  { %1143 = vmatpush.msra.mxu2 %v975_v33  ;;  %1166 = vmatpush.msra.mxu3 %v976_v34  ;;  %v1260_v33 = vld [vmem:[%s9676_s8 + $0x78] sm:$0xff] }
  0xfb   :  { %1098 = vmatpush.msra.mxu0 %v965_v35  ;;  %1121 = vmatpush.msra.mxu1 %v966_v36  ;;  %v1276_v34 = vld [vmem:[%s9676_s8 + $0xf8] sm:$0xff]  ;;  %v929_v35 = vld [vmem:[#allocation8 + $0xf0] sm:$0xff] }
  0xfc   :  { %1144 = vmatpush.msra.mxu2 %v967_v37  ;;  %1167 = vmatpush.msra.mxu3 %v968_v38  ;;  %v930_v36 = vld [vmem:[#allocation8 + $0xf8] sm:$0xff]  ;;  %v921_v37 = vld [vmem:[#allocation8 + $0xb0] sm:$0xff] }
  0xfd   :  { %869 = vmatmul.f32.vlgmr.msrb.gmra.mxu0 %v6597_v2  ;;  %892 = vmatmul.f32.vlgmr.msrb.gmra.mxu1 %v6597_v2  ;;  %v922_v38 = vld [vmem:[#allocation8 + $0xb8] sm:$0xff] }
  0xfe   :  { %1099 = vmatpush.msra.mxu0 %v957_v39  ;;  %1122 = vmatpush.msra.mxu1 %v958_v40  ;;  %v913_v39 = vld [vmem:[#allocation8 + $0x70] sm:$0xff]  ;;  %v914_v40 = vld [vmem:[#allocation8 + $0x78] sm:$0xff] }
  0xff   :  { %1145 = vmatpush.msra.mxu2 %v959_v41  ;;  %1168 = vmatpush.msra.mxu3 %v960_v42  ;;  %v905_v41 = vld [vmem:[#allocation8 + $0x30] sm:$0xff]  ;;  %v906_v42 = vld [vmem:[#allocation8 + $0x38] sm:$0xff] }
 0x100   :  { %1100 = vmatpush.msra.mxu0 %v949_v43  ;;  %1123 = vmatpush.msra.mxu1 %v950_v44  ;;  %v1259_v43 = vld [vmem:[%s9676_s8 + $0x70] sm:$0xff] }
 0x101   :  { %1146 = vmatpush.msra.mxu2 %v951_v45  ;;  %1169 = vmatpush.msra.mxu3 %v952_v46  ;;  %v1275_v44 = vld [vmem:[%s9676_s8 + $0xf0] sm:$0xff]  ;;  %v1258_v45 = vld [vmem:[%s9676_s8 + $0x68] sm:$0xff] }
 0x102   :  { %1101 = vmatpush.msra.mxu0 %v941_v48  ;;  %1124 = vmatpush.msra.mxu1 %v942_v49  ;;  %v1274_v49 = vld [vmem:[%s9676_s8 + $0xe8] sm:$0xff] }
 0x103   :  { %1147 = vmatpush.msra.mxu2 %v943_v50  ;;  %1170 = vmatpush.msra.mxu3 %v944_v51  ;;  %v1257_v50 = vld [vmem:[%s9676_s8 + $0x60] sm:$0xff] }
 0x104   :  { %1102 = vmatpush.msra.mxu0 %v933_v52  ;;  %1125 = vmatpush.msra.mxu1 %v934_v53  ;;  %v1273_v51 = vld [vmem:[%s9676_s8 + $0xe0] sm:$0xff]  ;;  %v1256_v52 = vld [vmem:[%s9676_s8 + $0x58] sm:$0xff] }
 0x105   :  { %1148 = vmatpush.msra.mxu2 %v935_v54  ;;  %1171 = vmatpush.msra.mxu3 %v936_v55  ;;  %v1272_v53 = vld [vmem:[%s9676_s8 + $0xd8] sm:$0xff]  ;;  %v1255_v54 = vld [vmem:[%s9676_s8 + $0x50] sm:$0xff] }
 0x106   :  { %872 = vmatmul.f32.gmra.mxu0 %v6604_v47  ;;  %895 = vmatmul.f32.gmra.mxu1 %v6604_v47  ;;  %v1271_v55 = vld [vmem:[%s9676_s8 + $0xd0] sm:$0xff] }
 0x107   :  { %1103 = vmatpush.msra.mxu0 %v925_v56  ;;  %1126 = vmatpush.msra.mxu1 %v926_v57  ;;  %v1254_v56 = vld [vmem:[%s9676_s8 + $0x48] sm:$0xff] }
 0x108   :  { %1149 = vmatpush.msra.mxu2 %v927_v58  ;;  %1172 = vmatpush.msra.mxu3 %v928_v59  ;;  %v1270_v57 = vld [vmem:[%s9676_s8 + $0xc8] sm:$0xff] }
 0x109   :  { %1104 = vmatpush.msra.mxu0 %v917_v60  ;;  %1127 = vmatpush.msra.mxu1 %v918_v61  ;;  %v1253_v60 = vld [vmem:[%s9676_s8 + $0x40] sm:$0xff] }
 0x10a   :  { %1150 = vmatpush.msra.mxu2 %v919_v62  ;;  %1173 = vmatpush.msra.mxu3 %v920_v63  ;;  %v1269_v61 = vld [vmem:[%s9676_s8 + $0xc0] sm:$0xff]  ;;  %v1252_v62 = vld [vmem:[%s9676_s8 + $0x38] sm:$0xff] }
 0x10b   :  { %1105 = vmatpush.msra.mxu0 %v909_v0  ;;  %1128 = vmatpush.msra.mxu1 %v910_v1  ;;  %v1268_v63 = vld [vmem:[%s9676_s8 + $0xb8] sm:$0xff] }
 0x10c   :  { %1151 = vmatpush.msra.mxu2 %v911_v3  ;;  %1174 = vmatpush.msra.mxu3 %v912_v4  ;;  %v1251_v3 = vld [vmem:[%s9676_s8 + $0x30] sm:$0xff] }
 0x10d   :  { %1106 = vmatpush.msra.mxu0 %v901_v5  ;;  %1129 = vmatpush.msra.mxu1 %v902_v6  ;;  %v1267_v4 = vld [vmem:[%s9676_s8 + $0xb0] sm:$0xff]  ;;  %v1250_v5 = vld [vmem:[%s9676_s8 + $0x28] sm:$0xff] }
 0x10e   :  { %1152 = vmatpush.msra.mxu2 %v903_v7  ;;  %1175 = vmatpush.msra.mxu3 %v904_v8  ;;  %v1266_v6 = vld [vmem:[%s9676_s8 + $0xa8] sm:$0xff] }
 0x10f   :  { %1107 = vmatmul.f32.vlgmr.msra.gmra.mxu0 %v6597_v2  ;;  %1130 = vmatmul.f32.vlgmr.msra.gmra.mxu1 %v6597_v2 }
 0x110   :  { %1153 = vmatmul.f32.vlgmr.msra.gmra.mxu2 %v6597_v2  ;;  %1176 = vmatmul.f32.vlgmr.msra.gmra.mxu3 %v6597_v2 }
 0x111   :  { %1183 = vmatpush.msrb.mxu0 %v1025_v9  ;;  %1206 = vmatpush.msrb.mxu1 %v1026_v10  ;;  %v1249_v9 = vld [vmem:[%s9676_s8 + $0x20] sm:$0xff] }
 0x112   :  { %1376 = vmatpush.msrb.mxu2 %v1260_v33  ;;  %1399 = vmatpush.msrb.mxu3 %v1276_v34  ;;  %v1265_v10 = vld [vmem:[%s9676_s8 + $0xa0] sm:$0xff]  ;;  %v1324_v33 = vld [vmem:[%s9676_s8 + $0x278] sm:$0xff] }
 0x113   :  { %1184 = vmatpush.msrb.mxu0 %v1017_v11  ;;  %1207 = vmatpush.msrb.mxu1 %v1018_v12  ;;  %v1292_v11 = vld [vmem:[%s9676_s8 + $0x178] sm:$0xff] }
 0x114   :  { %1377 = vmatpush.msrb.mxu2 %v1259_v43  ;;  %1400 = vmatpush.msrb.mxu3 %v1275_v44  ;;  %v1308_v12 = vld [vmem:[%s9676_s8 + $0x1f8] sm:$0xff]  ;;  %v1322_v43 = vld [vmem:[%s9676_s8 + $0x268] sm:$0xff] }
 0x115   :  { %1185 = vmatpush.msrb.mxu0 %v1009_v13  ;;  %1208 = vmatpush.msrb.mxu1 %v1010_v14  ;;  %v1248_v13 = vld [vmem:[%s9676_s8 + $0x18] sm:$0xff] }
 0x116   :  { %1378 = vmatpush.msrb.mxu2 %v1258_v45  ;;  %1401 = vmatpush.msrb.mxu3 %v1274_v49  ;;  %v1264_v14 = vld [vmem:[%s9676_s8 + $0x98] sm:$0xff]  ;;  %v1338_v49 = vld [vmem:[%s9676_s8 + $0x2e8] sm:$0xff] }
 0x117   :  { %1186 = vmatpush.msrb.mxu0 %v1001_v15  ;;  %1209 = vmatpush.msrb.mxu1 %v1002_v16  ;;  %v1340_v34 = vld [vmem:[%s9676_s8 + $0x2f8] sm:$0xff] }
 0x118   :  { %1110 = vmatmul.f32.gmra.mxu0 %v6604_v47  ;;  %1133 = vmatmul.f32.gmra.mxu1 %v6604_v47 }
 0x119   :  { %1156 = vmatmul.f32.gmra.mxu2 %v6604_v47  ;;  %1179 = vmatmul.f32.gmra.mxu3 %v6604_v47 }
 0x11a   :  { %1187 = vmatpush.msrb.mxu0 %v993_v17  ;;  %1210 = vmatpush.msrb.mxu1 %v994_v18 }
 0x11b   :  { %1379 = vmatpush.msrb.mxu2 %v1257_v50  ;;  %1402 = vmatpush.msrb.mxu3 %v1273_v51  ;;  %v1286_v50 = vld [vmem:[%s9676_s8 + $0x148] sm:$0xff] }
 0x11c   :  { %1188 = vmatpush.msrb.mxu0 %v985_v19  ;;  %1211 = vmatpush.msrb.mxu1 %v986_v20  ;;  %v6708_v0 = vpop.f32.mrf.mxu0  ;;  %v6710_v1 = vpop.f32.mrf.mxu1  ;;  %v1247_v19 = vld [vmem:[%s9676_s8 + $0x10] sm:$0xff]  ;;  %v1302_v51 = vld [vmem:[%s9676_s8 + $0x1c8] sm:$0xff] }
 0x11d   :  { %1380 = vmatpush.msrb.mxu2 %v1256_v52  ;;  %1403 = vmatpush.msrb.mxu3 %v1272_v53  ;;  %v1263_v20 = vld [vmem:[%s9676_s8 + $0x90] sm:$0xff]  ;;  %v1321_v52 = vld [vmem:[%s9676_s8 + $0x260] sm:$0xff] }
 0x11e   :  { %1189 = vmatpush.msrb.mxu0 %v977_v21  ;;  %1212 = vmatpush.msrb.mxu1 %v978_v22  ;;  %v1291_v21 = vld [vmem:[%s9676_s8 + $0x170] sm:$0xff]  ;;  %v1337_v53 = vld [vmem:[%s9676_s8 + $0x2e0] sm:$0xff] }
 0x11f   :  { %1381 = vmatpush.msrb.mxu2 %v1255_v54  ;;  %1404 = vmatpush.msrb.mxu3 %v1271_v55  ;;  %v1307_v22 = vld [vmem:[%s9676_s8 + $0x1f0] sm:$0xff]  ;;  %v1285_v54 = vld [vmem:[%s9676_s8 + $0x140] sm:$0xff] }
 0x120   :  { %1190 = vmatpush.msrb.mxu0 %v969_v23  ;;  %1213 = vmatpush.msrb.mxu1 %v970_v24  ;;  %v1246_v23 = vld [vmem:[%s9676_s8 + $0x8] sm:$0xff]  ;;  %v1301_v55 = vld [vmem:[%s9676_s8 + $0x1c0] sm:$0xff] }
 0x121   :  { %1382 = vmatpush.msrb.mxu2 %v1254_v56  ;;  %1405 = vmatpush.msrb.mxu3 %v1270_v57  ;;  %v1262_v24 = vld [vmem:[%s9676_s8 + $0x88] sm:$0xff]  ;;  %v1320_v56 = vld [vmem:[%s9676_s8 + $0x258] sm:$0xff] }
 0x122   :  { %1191 = vmatpush.msrb.mxu0 %v961_v25  ;;  %1214 = vmatpush.msrb.mxu1 %v962_v26  ;;  %v1290_v25 = vld [vmem:[%s9676_s8 + $0x168] sm:$0xff]  ;;  %v1336_v57 = vld [vmem:[%s9676_s8 + $0x2d8] sm:$0xff] }
 0x123   :  { %v6659_v46 = vpop.f32.mrf.mxu2  ;;  %v6661_v48 = vpop.f32.mrf.mxu3  ;;  %1383 = vmatpush.msrb.mxu2 %v1253_v60  ;;  %1406 = vmatpush.msrb.mxu3 %v1269_v61  ;;  %v1306_v26 = vld [vmem:[%s9676_s8 + $0x1e8] sm:$0xff]  ;;  %v1284_v60 = vld [vmem:[%s9676_s8 + $0x138] sm:$0xff] }
 0x124   :  { %1192 = vmatpush.msrb.mxu0 %v953_v27  ;;  %1215 = vmatpush.msrb.mxu1 %v954_v28  ;;  %v1245_v27 = vld [vmem:[%s9676_s8] sm:$0xff]  ;;  %v1300_v61 = vld [vmem:[%s9676_s8 + $0x1b8] sm:$0xff] }
 0x125   :  { %1384 = vmatpush.msrb.mxu2 %v1252_v62  ;;  %1407 = vmatpush.msrb.mxu3 %v1268_v63  ;;  %v1261_v28 = vld [vmem:[%s9676_s8 + $0x80] sm:$0xff]  ;;  %v1319_v62 = vld [vmem:[%s9676_s8 + $0x250] sm:$0xff] }
 0x126   :  { %1193 = vmatpush.msrb.mxu0 %v945_v29  ;;  %1216 = vmatpush.msrb.mxu1 %v946_v30  ;;  %v1289_v29 = vld [vmem:[%s9676_s8 + $0x160] sm:$0xff]  ;;  %v1335_v63 = vld [vmem:[%s9676_s8 + $0x2d0] sm:$0xff] }
 0x127   :  { %1385 = vmatpush.msrb.mxu2 %v1251_v3  ;;  %1408 = vmatpush.msrb.mxu3 %v1267_v4 }
 0x128   :  { %1194 = vmatpush.msrb.mxu0 %v937_v31  ;;  %1217 = vmatpush.msrb.mxu1 %v938_v32  ;;  %v1305_v32 = vld [vmem:[%s9676_s8 + $0x1e0] sm:$0xff] }
 0x129   :  { %1386 = vmatpush.msrb.mxu2 %v1250_v5  ;;  %1409 = vmatpush.msrb.mxu3 %v1266_v6  ;;  %v1283_v5 = vld [vmem:[%s9676_s8 + $0x130] sm:$0xff] }
 0x12a   :  { %1195 = vmatpush.msrb.mxu0 %v929_v35  ;;  %1218 = vmatpush.msrb.mxu1 %v930_v36  ;;  %v1288_v35 = vld [vmem:[%s9676_s8 + $0x158] sm:$0xff]  ;;  %v1299_v6 = vld [vmem:[%s9676_s8 + $0x1b0] sm:$0xff] }
 0x12b   :  { %1387 = vmatpush.msrb.mxu2 %v1249_v9  ;;  %1410 = vmatpush.msrb.mxu3 %v1265_v10  ;;  %v1304_v36 = vld [vmem:[%s9676_s8 + $0x1d8] sm:$0xff]  ;;  %v1318_v9 = vld [vmem:[%s9676_s8 + $0x248] sm:$0xff] }
 0x12c   :  { %1196 = vmatpush.msrb.mxu0 %v921_v37  ;;  %1219 = vmatpush.msrb.mxu1 %v922_v38  ;;  %v1323_v37 = vld [vmem:[%s9676_s8 + $0x270] sm:$0xff] }
 0x12d   :  { %1388 = vmatpush.msrb.mxu2 %v1248_v13  ;;  %1411 = vmatpush.msrb.mxu3 %v1264_v14  ;;  %v1339_v38 = vld [vmem:[%s9676_s8 + $0x2f0] sm:$0xff]  ;;  %v1282_v13 = vld [vmem:[%s9676_s8 + $0x128] sm:$0xff] }
 0x12e   :  { %1197 = vmatpush.msrb.mxu0 %v913_v39  ;;  %1220 = vmatpush.msrb.mxu1 %v914_v40  ;;  %v6881_v10 = vld [vmem:[#allocation7] sm:$0xff] }
 0x12f   :  { %1389 = vmatpush.msrb.mxu2 %v1247_v19  ;;  %1412 = vmatpush.msrb.mxu3 %v1263_v20  ;;  %v1298_v14 = vld [vmem:[%s9676_s8 + $0x1a8] sm:$0xff] }
 0x130   :  { %1198 = vmatpush.msrb.mxu0 %v905_v41  ;;  %1221 = vmatpush.msrb.mxu1 %v906_v42  ;;  %v1287_v41 = vld [vmem:[%s9676_s8 + $0x150] sm:$0xff] }
 0x131   :  { %1199 = vmatmul.f32.vlgmr.msrb.gmra.mxu0 %v6597_v2  ;;  %1222 = vmatmul.f32.vlgmr.msrb.gmra.mxu1 %v6597_v2  ;;  %v1303_v42 = vld [vmem:[%s9676_s8 + $0x1d0] sm:$0xff] }
 0x132   :  { %1422 = vmatpush.msra.mxu0 %v1292_v11  ;;  %1445 = vmatpush.msra.mxu1 %v1308_v12  ;;  %v6883_v11 = vld [vmem:[#allocation10] sm:$0xff]  ;;  %v1334_v12 = vld [vmem:[%s9676_s8 + $0x2c8] sm:$0xff] }
 0x133   :  { %1390 = vmatpush.msrb.mxu2 %v1246_v23  ;;  %1413 = vmatpush.msrb.mxu3 %v1262_v24  ;;  %v1281_v23 = vld [vmem:[%s9676_s8 + $0x120] sm:$0xff] }
 0x134   :  { %1423 = vmatpush.msra.mxu0 %v1291_v21  ;;  %1446 = vmatpush.msra.mxu1 %v1307_v22  ;;  %v1317_v21 = vld [vmem:[%s9676_s8 + $0x240] sm:$0xff] }
 0x135   :  { %1391 = vmatpush.msrb.mxu2 %v1245_v27  ;;  %1414 = vmatpush.msrb.mxu3 %v1261_v28  ;;  %v1333_v22 = vld [vmem:[%s9676_s8 + $0x2c0] sm:$0xff]  ;;  %v1280_v27 = vld [vmem:[%s9676_s8 + $0x118] sm:$0xff] }
 0x136   :  { %1424 = vmatpush.msra.mxu0 %v1290_v25  ;;  %1447 = vmatpush.msra.mxu1 %v1306_v26  ;;  %v1297_v24 = vld [vmem:[%s9676_s8 + $0x1a0] sm:$0xff]  ;;  %v1316_v25 = vld [vmem:[%s9676_s8 + $0x238] sm:$0xff] }
 0x137   :  { %v6746_v15 = vpop.f32.mrf.mxu0  ;;  %v6748_v16 = vpop.f32.mrf.mxu1  ;;  %1468 = vmatpush.msra.mxu2 %v1324_v33  ;;  %1491 = vmatpush.msra.mxu3 %v1340_v34  ;;  %v1332_v26 = vld [vmem:[%s9676_s8 + $0x2b8] sm:$0xff]  ;;  %v699_v33 = vperm.slane %v6881_v10, 0  ;;  %v700_v34 = vperm.slane %v6881_v10, 1 }
 0x138   :  { %1425 = vmatpush.msra.mxu0 %v1289_v29  ;;  %1448 = vmatpush.msra.mxu1 %v1305_v32  ;;  %v1296_v28 = vld [vmem:[%s9676_s8 + $0x198] sm:$0xff]  ;;  %v1315_v29 = vld [vmem:[%s9676_s8 + $0x230] sm:$0xff] }
 0x139   :  { %1202 = vmatmul.f32.gmra.mxu0 %v6604_v47  ;;  %1225 = vmatmul.f32.gmra.mxu1 %v6604_v47  ;;  %v1331_v32 = vld [vmem:[%s9676_s8 + $0x2b0] sm:$0xff] }
 0x13a   :  { %v6692_v58 = vpop.f32.mrf.mxu2  ;;  %v6694_v59 = vpop.f32.mrf.mxu3  ;;  %1426 = vmatpush.msra.mxu0 %v1288_v35  ;;  %1449 = vmatpush.msra.mxu1 %v1304_v36  ;;  %v1029_v35 = vperm.slane %v6883_v11, 0  ;;  %v1030_v36 = vperm.slane %v6883_v11, 1 }
 0x13b   :  { %1469 = vmatpush.msra.mxu2 %v1323_v37  ;;  %1492 = vmatpush.msra.mxu3 %v1339_v38 }
 0x13c   :  { %1427 = vmatpush.msra.mxu0 %v1287_v41  ;;  %1450 = vmatpush.msra.mxu1 %v1303_v42 }
 0x13d   :  { %1470 = vmatpush.msra.mxu2 %v1322_v43  ;;  %1493 = vmatpush.msra.mxu3 %v1338_v49 }
 0x13e   :  { %1428 = vmatpush.msra.mxu0 %v1286_v50  ;;  %1451 = vmatpush.msra.mxu1 %v1302_v51  ;;  %v1279_v50 = vld [vmem:[%s9676_s8 + $0x110] sm:$0xff] }
 0x13f   :  { %1471 = vmatpush.msra.mxu2 %v1321_v52  ;;  %1494 = vmatpush.msra.mxu3 %v1337_v53  ;;  %v1295_v51 = vld [vmem:[%s9676_s8 + $0x190] sm:$0xff]  ;;  %v1314_v52 = vld [vmem:[%s9676_s8 + $0x228] sm:$0xff] }
 0x140   :  { %1429 = vmatpush.msra.mxu0 %v1285_v54  ;;  %1452 = vmatpush.msra.mxu1 %v1301_v55  ;;  %v1294_v53 = vld [vmem:[%s9676_s8 + $0x188] sm:$0xff] }
 0x141   :  { %v6787_v30 = vpop.f32.mrf.mxu0  ;;  %v6789_v31 = vpop.f32.mrf.mxu1  ;;  %1472 = vmatpush.msra.mxu2 %v1320_v56  ;;  %1495 = vmatpush.msra.mxu3 %v1336_v57 }
 0x142   :  { %1430 = vmatpush.msra.mxu0 %v1284_v60  ;;  %1453 = vmatpush.msra.mxu1 %v1300_v61  ;;  %v1313_v60 = vld [vmem:[%s9676_s8 + $0x220] sm:$0xff] }
 0x143   :  { %1473 = vmatpush.msra.mxu2 %v1319_v62  ;;  %1496 = vmatpush.msra.mxu3 %v1335_v63  ;;  %v1329_v61 = vld [vmem:[%s9676_s8 + $0x2a0] sm:$0xff] }
 0x144   :  { %v6724_v7 = vpop.f32.mrf.mxu2  ;;  %v6726_v8 = vpop.f32.mrf.mxu3  ;;  %1431 = vmatpush.msra.mxu0 %v1283_v5  ;;  %1454 = vmatpush.msra.mxu1 %v1299_v6  ;;  %v1277_v62 = vld [vmem:[%s9676_s8 + $0x100] sm:$0xff]  ;;  %v1312_v5 = vld [vmem:[%s9676_s8 + $0x218] sm:$0xff] }
 0x145   :  { %1474 = vmatpush.msra.mxu2 %v1318_v9  ;;  %1497 = vmatpush.msra.mxu3 %v1334_v12  ;;  %v733_v41 = vadd.f32 %v6724_v7, %v699_v33  ;;  %v756_v42 = vadd.f32 %v6726_v8, %v700_v34  ;;  %v1330_v7 = vld [vmem:[%s9676_s8 + $0x2a8] sm:$0xff]  ;;  %v1293_v63 = vld [vmem:[%s9676_s8 + $0x180] sm:$0xff]  ;;  %v1328_v6 = vld [vmem:[%s9676_s8 + $0x298] sm:$0xff] }
 0x146   :  { %1432 = vmatpush.msra.mxu0 %v1282_v13  ;;  %1455 = vmatpush.msra.mxu1 %v1298_v14  ;;  %v1278_v8 = vld [vmem:[%s9676_s8 + $0x108] sm:$0xff]  ;;  %v1356_v9 = vld [vmem:[%s9676_s8 + $0x378] sm:$0xff]  ;;  %v1311_v13 = vld [vmem:[%s9676_s8 + $0x210] sm:$0xff] }
 0x147   :  { %1475 = vmatpush.msra.mxu2 %v1317_v21  ;;  %1498 = vmatpush.msra.mxu3 %v1333_v22  ;;  %v1372_v12 = vld [vmem:[%s9676_s8 + $0x3f8] sm:$0xff]  ;;  %v1327_v14 = vld [vmem:[%s9676_s8 + $0x290] sm:$0xff] }
 0x148   :  { %1433 = vmatpush.msra.mxu0 %v1281_v23  ;;  %1456 = vmatpush.msra.mxu1 %v1297_v24  ;;  %v1355_v21 = vld [vmem:[%s9676_s8 + $0x370] sm:$0xff]  ;;  %v1310_v24 = vld [vmem:[%s9676_s8 + $0x208] sm:$0xff] }
 0x149   :  { %1476 = vmatpush.msra.mxu2 %v1316_v25  ;;  %1499 = vmatpush.msra.mxu3 %v1332_v26  ;;  %v1371_v22 = vld [vmem:[%s9676_s8 + $0x3f0] sm:$0xff]  ;;  %v1326_v25 = vld [vmem:[%s9676_s8 + $0x288] sm:$0xff] }
 0x14a   :  { %1434 = vmatpush.msra.mxu0 %v1280_v27  ;;  %1457 = vmatpush.msra.mxu1 %v1296_v28  ;;  %v1354_v28 = vld [vmem:[%s9676_s8 + $0x368] sm:$0xff] }
 0x14b   :  { %1477 = vmatpush.msra.mxu2 %v1315_v29  ;;  %1500 = vmatpush.msra.mxu3 %v1331_v32 }
 0x14c   :  { %1435 = vmatpush.msra.mxu0 %v1279_v50  ;;  %1458 = vmatpush.msra.mxu1 %v1295_v51  ;;  %v1351_v50 = vld [vmem:[%s9676_s8 + $0x350] sm:$0xff] }
 0x14d   :  { %1478 = vmatpush.msra.mxu2 %v1314_v52  ;;  %1501 = vmatpush.msra.mxu3 %v1330_v7  ;;  %v1367_v51 = vld [vmem:[%s9676_s8 + $0x3d0] sm:$0xff]  ;;  %v1350_v52 = vld [vmem:[%s9676_s8 + $0x348] sm:$0xff] }
 0x14e   :  { %1436 = vmatpush.msra.mxu0 %v1278_v8  ;;  %1459 = vmatpush.msra.mxu1 %v1294_v53  ;;  %v1366_v7 = vld [vmem:[%s9676_s8 + $0x3c8] sm:$0xff]  ;;  %v1349_v8 = vld [vmem:[%s9676_s8 + $0x340] sm:$0xff] }
 0x14f   :  { %1479 = vmatpush.msra.mxu2 %v1313_v60  ;;  %1502 = vmatpush.msra.mxu3 %v1329_v61  ;;  %v1365_v53 = vld [vmem:[%s9676_s8 + $0x3c0] sm:$0xff]  ;;  %v1348_v60 = vld [vmem:[%s9676_s8 + $0x338] sm:$0xff] }
 0x150   :  { %v6750_v17 = vpop.f32.mrf.mxu2  ;;  %v6752_v18 = vpop.f32.mrf.mxu3  ;;  %1437 = vmatpush.msra.mxu0 %v1277_v62  ;;  %1460 = vmatpush.msra.mxu1 %v1293_v63  ;;  %v1364_v61 = vld [vmem:[%s9676_s8 + $0x3b8] sm:$0xff]  ;;  %v1347_v62 = vld [vmem:[%s9676_s8 + $0x330] sm:$0xff] }
 0x151   :  { %1480 = vmatpush.msra.mxu2 %v1312_v5  ;;  %1503 = vmatpush.msra.mxu3 %v1328_v6  ;;  %v759_v23 = vadd.f32 %v6752_v18, %v700_v34  ;;  %v1370_v18 = vld [vmem:[%s9676_s8 + $0x3e8] sm:$0xff]  ;;  %v736_v29 = vadd.f32 %v6750_v17, %v699_v33  ;;  %v1353_v33 = vld [vmem:[%s9676_s8 + $0x360] sm:$0xff]  ;;  %v1363_v63 = vld [vmem:[%s9676_s8 + $0x3b0] sm:$0xff]  ;;  %v701_v5 = vperm.slane %v6881_v10, 2 }
 0x152   :  { %1514 = vmatpush.msrb.mxu0 %v1356_v9  ;;  %1537 = vmatpush.msrb.mxu1 %v1372_v12  ;;  %v1346_v6 = vld [vmem:[%s9676_s8 + $0x328] sm:$0xff]  ;;  %v702_v12 = vperm.slane %v6881_v10, 3 }
 0x153   :  { %1481 = vmatpush.msra.mxu2 %v1311_v13  ;;  %1504 = vmatpush.msra.mxu3 %v1327_v14  ;;  %v1362_v9 = vld [vmem:[%s9676_s8 + $0x3a8] sm:$0xff]  ;;  %v1031_v13 = vperm.slane %v6883_v11, 2  ;;  %v1032_v14 = vperm.slane %v6883_v11, 3 }
 0x154   :  { %1515 = vmatpush.msrb.mxu0 %v1355_v21  ;;  %1538 = vmatpush.msrb.mxu1 %v1371_v22  ;;  %v1345_v21 = vld [vmem:[%s9676_s8 + $0x320] sm:$0xff] }
 0x155   :  { %1482 = vmatpush.msra.mxu2 %v1310_v24  ;;  %1505 = vmatpush.msra.mxu3 %v1326_v25  ;;  %v1361_v22 = vld [vmem:[%s9676_s8 + $0x3a0] sm:$0xff] }
 0x156   :  { %1516 = vmatpush.msrb.mxu0 %v1354_v28  ;;  %1539 = vmatpush.msrb.mxu1 %v1370_v18 }
 0x158   :  { %1517 = vmatpush.msrb.mxu0 %v1353_v33  ;;  %v1342_v33 = vld [vmem:[%s9676_s8 + $0x308] sm:$0xff] }
 0x159   :  { %v6812_v39 = vpop.f32.mrf.mxu2  ;;  %v6814_v40 = vpop.f32.mrf.mxu3 }
 0x15a   :  { %v6825_v44 = vpop.f32.mrf.mxu0  ;;  %v6827_v45 = vpop.f32.mrf.mxu1 }
 0x163   :  { %v6868_v3 = vpop.f32.mrf.mxu2  ;;  %v6870_v4 = vpop.f32.mrf.mxu3 }
 0x164   :  { %v6894_v19 = vpop.f32.mrf.mxu0  ;;  %v6896_v20 = vpop.f32.mrf.mxu1 }
 0x165   :  { %v802_v28 = vadd.f32 %v6896_v20, %v702_v12  ;;  %v704_v20 = vperm.slane %v6881_v10, 5 }
 0x16d   :  { %v1062_v37 = vpop.f32.mrf.mxu2  ;;  %v1085_v38 = vpop.f32.mrf.mxu3 }
 0x16e   :  { %v1063_v43 = vadd.f32 %v1062_v37, %v1029_v35  ;;  %v1086_v49 = vadd.f32 %v1085_v38, %v1030_v36  ;;  %v1309_v37 = vld [vmem:[%s9676_s8 + $0x200] sm:$0xff] }
 0x16f   :  { %v1325_v38 = vld [vmem:[%s9676_s8 + $0x280] sm:$0xff]  ;;  %1483 = vmatpush.msra.mxu2 %v1309_v37  ;;  %v1343_v37 = vld [vmem:[%s9676_s8 + $0x310] sm:$0xff] }
 0x170   :  { %v1229_v54 = vmul.f32 %v1063_v43, %v733_v41  ;;  %v1230_v55 = vmul.f32 %v1086_v49, %v756_v42  ;;  %v6954_v56 = vpop.f32.mrf.mxu0  ;;  %v6956_v57 = vpop.f32.mrf.mxu1  ;;  %1506 = vmatpush.msra.mxu3 %v1325_v38  ;;  %v1368_v49 = vld [vmem:[%s9676_s8 + $0x3d8] sm:$0xff]  ;;  %v1359_v38 = vld [vmem:[%s9676_s8 + $0x390] sm:$0xff] }
 0x172   :  { %1392 = vmatmul.f32.vlgmr.msrb.gmra.mxu2 %v1229_v54  ;;  %1415 = vmatmul.f32.vlgmr.msrb.gmra.mxu3 %v1230_v55 }
 0x177   :  { %v1065_v26 = vpop.f32.mrf.mxu2  ;;  %v1088_v27 = vpop.f32.mrf.mxu3 }
 0x178   :  { %v1066_v32 = vadd.f32 %v1065_v26, %v1029_v35  ;;  %v1089_v34 = vadd.f32 %v1088_v27, %v1030_v36  ;;  %v1369_v35 = vld [vmem:[%s9676_s8 + $0x3e0] sm:$0xff]  ;;  %v1352_v36 = vld [vmem:[%s9676_s8 + $0x358] sm:$0xff] }
 0x179   :  { %1540 = vmatpush.msrb.mxu1 %v1369_v35  ;;  %1518 = vmatpush.msrb.mxu0 %v1352_v36  ;;  %v1344_v26 = vld [vmem:[%s9676_s8 + $0x318] sm:$0xff]  ;;  %v1358_v35 = vld [vmem:[%s9676_s8 + $0x388] sm:$0xff] }
 0x17a   :  { %v7016_v41 = vpop.f32.mrf.mxu0  ;;  %v7018_v42 = vpop.f32.mrf.mxu1  ;;  %v1237_v43 = vmul.f32 %v1066_v32, %v736_v29  ;;  %v1238_v17 = vmul.f32 %v1089_v34, %v759_v23  ;;  %v779_v23 = vadd.f32 %v6894_v19, %v701_v5  ;;  %v1360_v27 = vld [vmem:[%s9676_s8 + $0x398] sm:$0xff]  ;;  %v703_v32 = vperm.slane %v6881_v10, 4 }
 0x17b   :  { %1541 = vmatpush.msrb.mxu1 %v1368_v49  ;;  %1519 = vmatpush.msrb.mxu0 %v1351_v50 }
 0x17c   :  { %1395 = vmatmul.f32.gmra.mxu2 %v1237_v43  ;;  %1418 = vmatmul.f32.gmra.mxu3 %v1238_v17  ;;  %v1033_v43 = vperm.slane %v6883_v11, 4  ;;  %v1034_v17 = vperm.slane %v6883_v11, 5  ;;  %v825_v36 = vadd.f32 %v6812_v39, %v703_v32  ;;  %v805_v39 = vadd.f32 %v6956_v57, %v702_v12 }
 0x17d   :  { %1542 = vmatpush.msrb.mxu1 %v1367_v51  ;;  %1520 = vmatpush.msrb.mxu0 %v1350_v52  ;;  %v1341_v51 = vld [vmem:[%s9676_s8 + $0x300] sm:$0xff]  ;;  %v848_v52 = vadd.f32 %v6814_v40, %v704_v20  ;;  %v851_v57 = vadd.f32 %v6870_v4, %v704_v20 }
 0x17f   :  { %1543 = vmatpush.msrb.mxu1 %v1366_v7  ;;  %1521 = vmatpush.msrb.mxu0 %v1349_v8 }
 0x181   :  { %1544 = vmatpush.msrb.mxu1 %v1365_v53  ;;  %1522 = vmatpush.msrb.mxu0 %v1348_v60  ;;  %v1357_v53 = vld [vmem:[%s9676_s8 + $0x380] sm:$0xff]  ;;  %v782_v60 = vadd.f32 %v6954_v56, %v701_v5  ;;  %v828_v56 = vadd.f32 %v6868_v3, %v703_v32 }
 0x183   :  { %v7050_v54 = vpop.f32.mrf.mxu0  ;;  %v7052_v55 = vpop.f32.mrf.mxu1  ;;  %1545 = vmatpush.msrb.mxu1 %v1364_v61  ;;  %1523 = vmatpush.msrb.mxu0 %v1347_v62 }
 0x185   :  { %1546 = vmatpush.msrb.mxu1 %v1363_v63  ;;  %1524 = vmatpush.msrb.mxu0 %v1346_v6 }
 0x187   :  { %1547 = vmatpush.msrb.mxu1 %v1362_v9  ;;  %1525 = vmatpush.msrb.mxu0 %v1345_v21 }
 0x189   :  { %1548 = vmatpush.msrb.mxu1 %v1361_v22  ;;  %1526 = vmatpush.msrb.mxu0 %v1344_v26 }
 0x18b   :  { %1549 = vmatpush.msrb.mxu1 %v1360_v27  ;;  %1527 = vmatpush.msrb.mxu0 %v1343_v37  ;;  %v1035_v27 = vperm.slane %v6883_v11, 6 }
 0x18c   :  { %v1108_v24 = vpop.f32.mrf.mxu0  ;;  %v1131_v25 = vpop.f32.mrf.mxu1 }
 0x18d   :  { %v1109_v18 = vadd.f32 %v1108_v24, %v1031_v13  ;;  %v1132_v29 = vadd.f32 %v1131_v25, %v1032_v14  ;;  %1550 = vmatpush.msrb.mxu1 %v1359_v38  ;;  %1528 = vmatpush.msrb.mxu0 %v1342_v33 }
 0x18f   :  { %v1231_v34 = vmul.f32 %v1109_v18, %v779_v23  ;;  %v1232_v19 = vmul.f32 %v1132_v29, %v802_v28  ;;  %1551 = vmatpush.msrb.mxu1 %v1358_v35  ;;  %1529 = vmatpush.msrb.mxu0 %v1341_v51  ;;  %v1036_v28 = vperm.slane %v6883_v11, 7 }
 0x191   :  { %1438 = vmatmul.f32.vlgmr.msra.gmra.mxu0 %v1231_v34  ;;  %1461 = vmatmul.f32.vlgmr.msra.gmra.mxu1 %v1232_v19 }
 0x192   :  { %1552 = vmatpush.msrb.mxu1 %v1357_v53 }
 0x193   :  { %v1154_v49 = vpop.f32.mrf.mxu2  ;;  %v1177_v50 = vpop.f32.mrf.mxu3 }
 0x194   :  { %v1155_v7 = vadd.f32 %v1154_v49, %v1033_v43  ;;  %v1178_v8 = vadd.f32 %v1177_v50, %v1034_v17 }
 0x195   :  { %v1111_v61 = vpop.f32.mrf.mxu0  ;;  %v1134_v62 = vpop.f32.mrf.mxu1 }
 0x196   :  { %v1233_v63 = vmul.f32 %v1155_v7, %v825_v36  ;;  %v1234_v6 = vmul.f32 %v1178_v8, %v848_v52  ;;  %v1112_v9 = vadd.f32 %v1111_v61, %v1031_v13  ;;  %v1135_v21 = vadd.f32 %v1134_v62, %v1032_v14  ;;  %v5186_v36 = vld [vmem:[#allocation17] ss:$0 sm:$0xff] }
 0x197   :  { %v705_v13 = vperm.slane %v6881_v10, 6  ;;  %v706_v14 = vperm.slane %v6881_v10, 7 }
 0x198   :  { %1484 = vmatmul.f32.vlgmr.msra.gmra.mxu2 %v1233_v63  ;;  %1507 = vmatmul.f32.vlgmr.msra.gmra.mxu3 %v1234_v6  ;;  %v1239_v40 = vmul.f32 %v1112_v9, %v782_v60  ;;  %v1240_v22 = vmul.f32 %v1135_v21, %v805_v39 }
 0x199   :  { %v871_v3 = vadd.f32 %v7016_v41, %v705_v13  ;;  %v894_v4 = vadd.f32 %v7018_v42, %v706_v14  ;;  %v874_v10 = vadd.f32 %v7050_v54, %v705_v13 }
 0x19a   :  { %1441 = vmatmul.f32.gmra.mxu0 %v1239_v40  ;;  %1464 = vmatmul.f32.gmra.mxu1 %v1240_v22 }
 0x19c   :  { %v1157_v23 = vpop.f32.mrf.mxu2  ;;  %v1180_v24 = vpop.f32.mrf.mxu3 }
 0x19d   :  { %v1158_v5 = vadd.f32 %v1157_v23, %v1033_v43  ;;  %v1181_v12 = vadd.f32 %v1180_v24, %v1034_v17  ;;  %v897_v43 = vadd.f32 %v7052_v55, %v706_v14 }
 0x19f   :  { %v1241_v25 = vmul.f32 %v1158_v5, %v828_v56  ;;  %v1242_v26 = vmul.f32 %v1181_v12, %v851_v57 }
 0x1a1   :  { %1487 = vmatmul.f32.gmra.mxu2 %v1241_v25  ;;  %1510 = vmatmul.f32.gmra.mxu3 %v1242_v26 }
 0x1ae   :  { %v1200_v18 = vpop.f32.mrf.mxu0  ;;  %v1223_v29 = vpop.f32.mrf.mxu1 }
 0x1af   :  { %v1201_v32 = vadd.f32 %v1200_v18, %v1035_v27  ;;  %v1224_v34 = vadd.f32 %v1223_v29, %v1036_v28 }
 0x1b1   :  { %v1235_v19 = vmul.f32 %v1201_v32, %v871_v3  ;;  %v1236_v37 = vmul.f32 %v1224_v34, %v894_v4 }
 0x1b3   :  { %1530 = vmatmul.f32.vlgmr.msrb.gmra.mxu0 %v1235_v19  ;;  %1553 = vmatmul.f32.vlgmr.msrb.gmra.mxu1 %v1236_v37 }
 0x1b6   :  { %v1203_v38 = vpop.f32.mrf.mxu0  ;;  %v1226_v20 = vpop.f32.mrf.mxu1 }
 0x1b7   :  { %v1204_v17 = vadd.f32 %v1203_v38, %v1035_v27  ;;  %v1227_v11 = vadd.f32 %v1226_v20, %v1036_v28 }
 0x1b9   :  { %v1243_v33 = vmul.f32 %v1204_v17, %v874_v10  ;;  %v1244_v35 = vmul.f32 %v1227_v11, %v897_v43 }
 0x1bb   :  { %1533 = vmatmul.f32.gmra.mxu0 %v1243_v33  ;;  %1556 = vmatmul.f32.gmra.mxu1 %v1244_v35 }
 0x1f5   :  { %v1393_v41 = vpop.f32.mrf.mxu2  ;;  %v1416_v42 = vpop.f32.mrf.mxu3 }
 0x1f6   :  { %v1394_v52 = vadd.f32 %v5186_v36, %v1393_v41 }
 0x1f8   :  { %v1417_v7 = vadd.f32 %v1416_v42, %v1394_v52 }
 0x1ff   :  { %v1396_v49 = vpop.f32.mrf.mxu2  ;;  %v1419_v8 = vpop.f32.mrf.mxu3 }
 0x200   :  { %v1397_v54 = vadd.f32 %v5186_v36, %v1396_v49 }
 0x202   :  { %v1420_v62 = vadd.f32 %v1419_v8, %v1397_v54  ;;  %v1727_v8 = vld [vmem:[#allocation16 + $0x3c8] sm:$0xff]  ;;  %v1718_v54 = vld [vmem:[#allocation16 + $0x380] sm:$0xff] }
 0x203   :  { %1757 = vmatpush.msrb.mxu3 %v1727_v8  ;;  %v1641_v8 = vld [vmem:[#allocation16 + $0x118] sm:$0xff] }
 0x20e   :  { %v1439_v50 = vpop.f32.mrf.mxu0  ;;  %v1462_v51 = vpop.f32.mrf.mxu1 }
 0x20f   :  { %v1440_v53 = vadd.f32 %v1439_v50, %v1417_v7  ;;  %v1726_v7 = vld [vmem:[#allocation16 + $0x3c0] sm:$0xff] }
 0x210   :  { %1734 = vmatpush.msrb.mxu2 %v1726_v7  ;;  %v1640_v7 = vld [vmem:[#allocation16 + $0x110] sm:$0xff] }
 0x211   :  { %v1463_v61 = vadd.f32 %v1462_v51, %v1440_v53  ;;  %v1728_v53 = vld [vmem:[#allocation16 + $0x3d0] sm:$0xff] }
 0x212   :  { %1780 = vmatpush.msra.mxu0 %v1728_v53  ;;  %1735 = vmatpush.msrb.mxu2 %v1718_v54  ;;  %v1630_v53 = vld [vmem:[#allocation16 + $0xc0] sm:$0xff]  ;;  %v1632_v54 = vld [vmem:[#allocation16 + $0xd0] sm:$0xff] }
 0x217   :  { %v1442_v39 = vpop.f32.mrf.mxu0  ;;  %v1465_v55 = vpop.f32.mrf.mxu1 }
 0x218   :  { %v1443_v9 = vadd.f32 %v1442_v39, %v1420_v62  ;;  %v1719_v39 = vld [vmem:[#allocation16 + $0x388] sm:$0xff]  ;;  %v1710_v62 = vld [vmem:[#allocation16 + $0x340] sm:$0xff] }
 0x219   :  { %1758 = vmatpush.msrb.mxu3 %v1719_v39  ;;  %1736 = vmatpush.msrb.mxu2 %v1710_v62  ;;  %v1633_v39 = vld [vmem:[#allocation16 + $0xd8] sm:$0xff]  ;;  %v1624_v62 = vld [vmem:[#allocation16 + $0x90] sm:$0xff] }
 0x21a   :  { %v1466_v24 = vadd.f32 %v1465_v55, %v1443_v9  ;;  %v1720_v55 = vld [vmem:[#allocation16 + $0x390] sm:$0xff]  ;;  %v1713_v9 = vld [vmem:[#allocation16 + $0x358] sm:$0xff] }
 0x21b   :  { %v1485_v60 = vpop.f32.mrf.mxu2  ;;  %v1508_v6 = vpop.f32.mrf.mxu3  ;;  %1781 = vmatpush.msra.mxu0 %v1720_v55  ;;  %v1622_v55 = vld [vmem:[#allocation16 + $0x80] sm:$0xff] }
 0x21c   :  { %v1486_v63 = vadd.f32 %v1485_v60, %v1463_v61  ;;  %v1729_v60 = vld [vmem:[#allocation16 + $0x3d8] sm:$0xff] }
 0x21d   :  { %1803 = vmatpush.msra.mxu1 %v1729_v60  ;;  %v1721_v61 = vld [vmem:[#allocation16 + $0x398] sm:$0xff]  ;;  %v1631_v60 = vld [vmem:[#allocation16 + $0xc8] sm:$0xff] }
 0x21e   :  { %v1509_v21 = vadd.f32 %v1508_v6, %v1486_v63  ;;  %v1711_v63 = vld [vmem:[#allocation16 + $0x348] sm:$0xff]  ;;  %v1712_v6 = vld [vmem:[#allocation16 + $0x350] sm:$0xff] }
 0x21f   :  { %1804 = vmatpush.msra.mxu1 %v1721_v61  ;;  %1759 = vmatpush.msrb.mxu3 %v1711_v63  ;;  %v1623_v61 = vld [vmem:[#allocation16 + $0x88] sm:$0xff]  ;;  %v1625_v63 = vld [vmem:[#allocation16 + $0x98] sm:$0xff] }
 0x220   :  { %1782 = vmatpush.msra.mxu0 %v1712_v6  ;;  %v1614_v6 = vld [vmem:[#allocation16 + $0x40] sm:$0xff] }
 0x221   :  { %1805 = vmatpush.msra.mxu1 %v1713_v9  ;;  %v1615_v9 = vld [vmem:[#allocation16 + $0x48] sm:$0xff] }
 0x224   :  { %v1488_v40 = vpop.f32.mrf.mxu2  ;;  %v1511_v12 = vpop.f32.mrf.mxu3 }
 0x225   :  { %v1489_v57 = vadd.f32 %v1488_v40, %v1466_v24  ;;  %v1703_v40 = vld [vmem:[#allocation16 + $0x308] sm:$0xff]  ;;  %v1694_v24 = vld [vmem:[#allocation16 + $0x2c0] sm:$0xff] }
 0x226   :  { %1760 = vmatpush.msrb.mxu3 %v1703_v40  ;;  %v1617_v40 = vld [vmem:[#allocation16 + $0x58] sm:$0xff] }
 0x227   :  { %v1512_v25 = vadd.f32 %v1511_v12, %v1489_v57  ;;  %v1696_v57 = vld [vmem:[#allocation16 + $0x2d0] sm:$0xff]  ;;  %v1686_v12 = vld [vmem:[#allocation16 + $0x280] sm:$0xff] }
 0x230   :  { %v1531_v22 = vpop.f32.mrf.mxu0  ;;  %v1554_v23 = vpop.f32.mrf.mxu1 }
 0x231   :  { %v1532_v56 = vadd.f32 %v1531_v22, %v1509_v21  ;;  %v1702_v21 = vld [vmem:[#allocation16 + $0x300] sm:$0xff]  ;;  %v1704_v22 = vld [vmem:[#allocation16 + $0x310] sm:$0xff] }
 0x232   :  { %1737 = vmatpush.msrb.mxu2 %v1702_v21  ;;  %1783 = vmatpush.msra.mxu0 %v1704_v22  ;;  %v1616_v21 = vld [vmem:[#allocation16 + $0x50] sm:$0xff]  ;;  %v1606_v22 = vld [vmem:[#allocation16] sm:$0xff] }
 0x233   :  { %v1555_v5 = vadd.f32 %v1554_v23, %v1532_v56  ;;  %v1705_v23 = vld [vmem:[#allocation16 + $0x318] sm:$0xff]  ;;  %v1695_v56 = vld [vmem:[#allocation16 + $0x2c8] sm:$0xff] }
 0x234   :  { %1806 = vmatpush.msra.mxu1 %v1705_v23  ;;  %1738 = vmatpush.msrb.mxu2 %v1694_v24  ;;  %v1607_v23 = vld [vmem:[#allocation16 + $0x8] sm:$0xff] }
 0x235   :  { %1560 = vrot.lane.b32.xlu0 %v1555_v5, %s9677_s1  ;;  %1761 = vmatpush.msrb.mxu3 %v1695_v56  ;;  %v1608_v56 = vld [vmem:[#allocation16 + $0x10] sm:$0xff] }
 0x236   :  { %1784 = vmatpush.msra.mxu0 %v1696_v57  ;;  %1739 = vmatpush.msrb.mxu2 %v1686_v12  ;;  %v1730_v12 = vld [vmem:[#allocation16 + $0x3e0] sm:$0xff] }
 0x238   :  { %v1534_v26 = vpop.f32.mrf.mxu0  ;;  %v1557_v14 = vpop.f32.mrf.mxu1 }
 0x239   :  { %v1535_v13 = vadd.f32 %v1534_v26, %v1512_v25  ;;  %v1687_v25 = vld [vmem:[#allocation16 + $0x288] sm:$0xff]  ;;  %v1688_v26 = vld [vmem:[#allocation16 + $0x290] sm:$0xff] }
 0x23a   :  { %1762 = vmatpush.msrb.mxu3 %v1687_v25  ;;  %1785 = vmatpush.msra.mxu0 %v1688_v26  ;;  %v1731_v25 = vld [vmem:[#allocation16 + $0x3e8] sm:$0xff]  ;;  %v1732_v26 = vld [vmem:[#allocation16 + $0x3f0] sm:$0xff] }
 0x23b   :  { %v1558_v27 = vadd.f32 %v1557_v14, %v1535_v13  ;;  %v1689_v13 = vld [vmem:[#allocation16 + $0x298] sm:$0xff]  ;;  %v1678_v14 = vld [vmem:[#allocation16 + $0x240] sm:$0xff] }
 0x23c   :  { %1740 = vmatpush.msrb.mxu2 %v1678_v14  ;;  %v1722_v14 = vld [vmem:[#allocation16 + $0x3a0] sm:$0xff] }
 0x23d   :  { %1562 = vrot.lane.b32.xlu0 %v1558_v27, %s9677_s1 }
 0x2a7   :  { %v1561_v28 = vpop.permute.xlu0 %1560 }
 0x2a8   :  { %v1564_v18 = vmax.f32 %v1555_v5, %v1561_v28  ;;  %v1680_v28 = vld [vmem:[#allocation16 + $0x250] sm:$0xff] }
 0x2a9   :  { %1786 = vmatpush.msra.mxu0 %v1680_v28  ;;  %v1724_v28 = vld [vmem:[#allocation16 + $0x3b0] sm:$0xff] }
 0x2aa   :  { %1566 = vrot.lane.b32.xlu1 %v1564_v18, %s6093_s29 }
 0x2af   :  { %v1563_v29 = vpop.permute.xlu0 %1562 }
 0x2b0   :  { %v1565_v3 = vmax.f32 %v1558_v27, %v1563_v29  ;;  %v1670_v29 = vld [vmem:[#allocation16 + $0x200] sm:$0xff] }
 0x2b1   :  { %1741 = vmatpush.msrb.mxu2 %v1670_v29  ;;  %v1715_v29 = vld [vmem:[#allocation16 + $0x368] sm:$0xff] }
 0x2b2   :  { %1568 = vrot.lane.b32.xlu1 %v1565_v3, %s6093_s29 }
 0x31c   :  { %v1567_v4 = vpop.permute.xlu1 %1566 }
 0x31d   :  { %v1570_v32 = vmax.f32 %v1564_v18, %v1567_v4  ;;  %v1681_v18 = vld [vmem:[#allocation16 + $0x258] sm:$0xff]  ;;  %v1672_v4 = vld [vmem:[#allocation16 + $0x210] sm:$0xff] }
 0x31e   :  { %1787 = vmatpush.msra.mxu0 %v1672_v4  ;;  %v1717_v4 = vld [vmem:[#allocation16 + $0x378] sm:$0xff] }
 0x31f   :  { %1572 = vrot.lane.b32.xlu2 %v1570_v32, %s6072_s12 }
 0x324   :  { %v1569_v34 = vpop.permute.xlu1 %1568 }
 0x325   :  { %v1571_v19 = vmax.f32 %v1565_v3, %v1569_v34  ;;  %v1671_v3 = vld [vmem:[#allocation16 + $0x208] sm:$0xff]  ;;  %v1662_v34 = vld [vmem:[#allocation16 + $0x1c0] sm:$0xff] }
 0x326   :  { %1742 = vmatpush.msrb.mxu2 %v1662_v34  ;;  %v1707_v34 = vld [vmem:[#allocation16 + $0x328] sm:$0xff] }
 0x327   :  { %1574 = vrot.lane.b32.xlu2 %v1571_v19, %s6072_s12 }
 0x379   :  { %v1573_v37 = vpop.permute.xlu2 %1572 }
 0x37a   :  { %v1576_v38 = vmax.f32 %v1570_v32, %v1573_v37  ;;  %v1673_v32 = vld [vmem:[#allocation16 + $0x218] sm:$0xff]  ;;  %v1664_v37 = vld [vmem:[#allocation16 + $0x1d0] sm:$0xff] }
 0x37b   :  { %1788 = vmatpush.msra.mxu0 %v1664_v37  ;;  %v1709_v37 = vld [vmem:[#allocation16 + $0x338] sm:$0xff] }
 0x37c   :  { %v1578_v20 = vsub.f32 %v1555_v5, %v1576_v38  ;;  %v1697_v5 = vld [vmem:[#allocation16 + $0x2d8] sm:$0xff] }
 0x37d   :  { %1807 = vmatpush.msra.mxu1 %v1697_v5  ;;  %v1665_v38 = vld [vmem:[#allocation16 + $0x1d8] sm:$0xff] }
 0x37e   :  { %v1580_v10 = vmul.f32 1.442695, %v1578_v20  ;;  %v1654_v20 = vld [vmem:[#allocation16 + $0x180] sm:$0xff]  ;;  %v1609_v5 = vld [vmem:[#allocation16 + $0x18] sm:$0xff] }
 0x37f   :  { %1808 = vmatpush.msra.mxu1 %v1689_v13  ;;  %1743 = vmatpush.msrb.mxu2 %v1654_v20  ;;  %v1733_v13 = vld [vmem:[#allocation16 + $0x3f8] sm:$0xff]  ;;  %v1699_v20 = vld [vmem:[#allocation16 + $0x2e8] sm:$0xff] }
 0x380   :  { %5195 = vpow2.f32 %v1580_v10  ;;  %v1655_v10 = vld [vmem:[#allocation16 + $0x188] sm:$0xff] }
 0x381   :  { %v1575_v43 = vpop.permute.xlu2 %1574  ;;  %1809 = vmatpush.msra.mxu1 %v1681_v18  ;;  %v1714_v18 = vld [vmem:[#allocation16 + $0x360] sm:$0xff] }
 0x382   :  { %v1577_v17 = vmax.f32 %v1571_v19, %v1575_v43  ;;  %v1663_v19 = vld [vmem:[#allocation16 + $0x1c8] sm:$0xff]  ;;  %v1656_v43 = vld [vmem:[#allocation16 + $0x190] sm:$0xff] }
 0x383   :  { %1810 = vmatpush.msra.mxu1 %v1673_v32  ;;  %1789 = vmatpush.msra.mxu0 %v1656_v43  ;;  %v1706_v32 = vld [vmem:[#allocation16 + $0x320] sm:$0xff]  ;;  %v1701_v43 = vld [vmem:[#allocation16 + $0x2f8] sm:$0xff] }
 0x384   :  { %v1579_v11 = vsub.f32 %v1558_v27, %v1577_v17  ;;  %v1679_v27 = vld [vmem:[#allocation16 + $0x248] sm:$0xff]  ;;  %v1657_v17 = vld [vmem:[#allocation16 + $0x198] sm:$0xff] }
 0x385   :  { %1763 = vmatpush.msrb.mxu3 %v1679_v27  ;;  %1811 = vmatpush.msra.mxu1 %v1665_v38  ;;  %v1723_v27 = vld [vmem:[#allocation16 + $0x3a8] sm:$0xff]  ;;  %v1698_v38 = vld [vmem:[#allocation16 + $0x2e0] sm:$0xff] }
 0x386   :  { %v7132_v33 = vpop.eup %5195  ;;  %v1582_v35 = vmul.f32 1.442695, %v1579_v11  ;;  %v1646_v11 = vld [vmem:[#allocation16 + $0x140] sm:$0xff] }
 0x387   :  { %1584 = vrot.lane.b32.xlu0 %v7132_v33, %s9677_s1  ;;  %1764 = vmatpush.msrb.mxu3 %v1671_v3  ;;  %v1716_v3 = vld [vmem:[#allocation16 + $0x370] sm:$0xff] }
 0x388   :  { %5197 = vpow2.f32 %v1582_v35  ;;  %v1647_v35 = vld [vmem:[#allocation16 + $0x148] sm:$0xff]  ;;  %1812 = vmatpush.msra.mxu1 %v1657_v17  ;;  %1744 = vmatpush.msrb.mxu2 %v1646_v11  ;;  %v1690_v17 = vld [vmem:[#allocation16 + $0x2a0] sm:$0xff] }
 0x389   :  { %1765 = vmatpush.msrb.mxu3 %v1663_v19  ;;  %v1708_v19 = vld [vmem:[#allocation16 + $0x330] sm:$0xff]  ;;  %v1691_v11 = vld [vmem:[#allocation16 + $0x2a8] sm:$0xff] }
 0x38b   :  { %1766 = vmatpush.msrb.mxu3 %v1655_v10  ;;  %v1700_v10 = vld [vmem:[#allocation16 + $0x2f0] sm:$0xff] }
 0x38d   :  { %1767 = vmatpush.msrb.mxu3 %v1647_v35  ;;  %v1692_v35 = vld [vmem:[#allocation16 + $0x2b0] sm:$0xff] }
 0x38e   :  { %v7136_v41 = vpop.eup %5197 }
 0x38f   :  { %1586 = vrot.lane.b32.xlu1 %v7136_v41, %s9677_s1 }
 0x3f9   :  { %v1585_v42 = vpop.permute.xlu0 %1584 }
 0x3fa   :  { %v1588_v36 = vadd.f32 %v7132_v33, %v1585_v42  ;;  %v1648_v42 = vld [vmem:[#allocation16 + $0x150] sm:$0xff] }
 0x3fb   :  { %1790 = vmatpush.msra.mxu0 %v1648_v42  ;;  %v1693_v42 = vld [vmem:[#allocation16 + $0x2b8] sm:$0xff] }
 0x3fc   :  { %1590 = vrot.lane.b32.xlu2 %v1588_v36, %s6093_s29 }
 0x3fd   :  { %1791 = vmatpush.msra.mxu0 %v1640_v7  ;;  %v1685_v7 = vld [vmem:[#allocation16 + $0x278] sm:$0xff] }
 0x3ff   :  { %1792 = vmatpush.msra.mxu0 %v1632_v54  ;;  %v1677_v54 = vld [vmem:[#allocation16 + $0x238] sm:$0xff] }
 0x401   :  { %v1587_v49 = vpop.permute.xlu1 %1586  ;;  %1793 = vmatpush.msra.mxu0 %v1624_v62  ;;  %v1669_v62 = vld [vmem:[#allocation16 + $0x1f8] sm:$0xff] }
 0x402   :  { %v7143_v50 = vadd.f32 %v7136_v41, %v1587_v49  ;;  %v1638_v49 = vld [vmem:[#allocation16 + $0x100] sm:$0xff] }
 0x403   :  { %1745 = vmatpush.msrb.mxu2 %v1638_v49  ;;  %1794 = vmatpush.msra.mxu0 %v1616_v21  ;;  %v1683_v49 = vld [vmem:[#allocation16 + $0x268] sm:$0xff]  ;;  %v1661_v21 = vld [vmem:[#allocation16 + $0x1b8] sm:$0xff] }
 0x404   :  { %1592 = vrot.lane.b32.xlu0 %v7143_v50, %s6093_s29 }
 0x405   :  { %1746 = vmatpush.msrb.mxu2 %v1630_v53  ;;  %1795 = vmatpush.msra.mxu0 %v1608_v56  ;;  %v1675_v53 = vld [vmem:[#allocation16 + $0x228] sm:$0xff]  ;;  %v1642_v56 = vld [vmem:[#allocation16 + $0x120] sm:$0xff] }
 0x407   :  { %1747 = vmatpush.msrb.mxu2 %v1622_v55  ;;  %1872 = vmatpush.msrb.mxu0 %v1732_v26  ;;  %v1667_v55 = vld [vmem:[#allocation16 + $0x1e8] sm:$0xff]  ;;  %v1634_v26 = vld [vmem:[#allocation16 + $0xe0] sm:$0xff] }
 0x409   :  { %1748 = vmatpush.msrb.mxu2 %v1614_v6  ;;  %1873 = vmatpush.msrb.mxu0 %v1724_v28  ;;  %v1659_v6 = vld [vmem:[#allocation16 + $0x1a8] sm:$0xff]  ;;  %v1626_v28 = vld [vmem:[#allocation16 + $0xa0] sm:$0xff] }
 0x40b   :  { %1749 = vmatpush.msrb.mxu2 %v1606_v22  ;;  %1874 = vmatpush.msrb.mxu0 %v1716_v3  ;;  %v1651_v22 = vld [vmem:[#allocation16 + $0x168] sm:$0xff]  ;;  %v1618_v3 = vld [vmem:[#allocation16 + $0x60] sm:$0xff] }
 0x40d   :  { %1826 = vmatpush.msra.mxu2 %v1730_v12  ;;  %1875 = vmatpush.msrb.mxu0 %v1708_v19  ;;  %v1644_v12 = vld [vmem:[#allocation16 + $0x130] sm:$0xff]  ;;  %v1610_v19 = vld [vmem:[#allocation16 + $0x20] sm:$0xff] }
 0x40f   :  { %1827 = vmatpush.msra.mxu2 %v1722_v14  ;;  %1876 = vmatpush.msrb.mxu0 %v1700_v10  ;;  %v1636_v14 = vld [vmem:[#allocation16 + $0xf0] sm:$0xff] }
 0x411   :  { %1828 = vmatpush.msra.mxu2 %v1714_v18  ;;  %1877 = vmatpush.msrb.mxu0 %v1692_v35  ;;  %v1628_v18 = vld [vmem:[#allocation16 + $0xb0] sm:$0xff] }
 0x413   :  { %1829 = vmatpush.msra.mxu2 %v1706_v32  ;;  %v1620_v32 = vld [vmem:[#allocation16 + $0x70] sm:$0xff] }
 0x415   :  { %1830 = vmatpush.msra.mxu2 %v1698_v38  ;;  %v1612_v38 = vld [vmem:[#allocation16 + $0x30] sm:$0xff] }
 0x417   :  { %1831 = vmatpush.msra.mxu2 %v1690_v17 }
 0x456   :  { %v1591_v51 = vpop.permute.xlu2 %1590 }
 0x457   :  { %v7147_v52 = vadd.f32 %v1591_v51, %v1588_v36  ;;  %v1649_v36 = vld [vmem:[#allocation16 + $0x158] sm:$0xff]  ;;  %v1639_v51 = vld [vmem:[#allocation16 + $0x108] sm:$0xff] }
 0x458   :  { %1813 = vmatpush.msra.mxu1 %v1649_v36  ;;  %1768 = vmatpush.msrb.mxu3 %v1639_v51  ;;  %v1682_v36 = vld [vmem:[#allocation16 + $0x260] sm:$0xff]  ;;  %v1684_v51 = vld [vmem:[#allocation16 + $0x270] sm:$0xff] }
 0x459   :  { %1596 = vrot.lane.b32.xlu1 %v7147_v52, %s6072_s12  ;;  %1832 = vmatpush.msra.mxu2 %v1682_v36  ;;  %v2038_v36 = vld [vmem:[#allocation11 + $0x3c0] sm:$0xff] }
 0x45a   :  { %1814 = vmatpush.msra.mxu1 %v1641_v8  ;;  %1769 = vmatpush.msrb.mxu3 %v1631_v60  ;;  %v1674_v8 = vld [vmem:[#allocation16 + $0x220] sm:$0xff]  ;;  %v1676_v60 = vld [vmem:[#allocation16 + $0x230] sm:$0xff] }
 0x45b   :  { %1878 = vmatpush.msrb.mxu0 %v1684_v51  ;;  %1833 = vmatpush.msra.mxu2 %v1674_v8  ;;  %v2040_v51 = vld [vmem:[#allocation11 + $0x3d0] sm:$0xff]  ;;  %v2031_v8 = vld [vmem:[#allocation11 + $0x388] sm:$0xff] }
 0x45c   :  { %1815 = vmatpush.msra.mxu1 %v1633_v39  ;;  %1770 = vmatpush.msrb.mxu3 %v1623_v61  ;;  %v1666_v39 = vld [vmem:[#allocation16 + $0x1e0] sm:$0xff]  ;;  %v1668_v61 = vld [vmem:[#allocation16 + $0x1f0] sm:$0xff] }
 0x45d   :  { %1879 = vmatpush.msrb.mxu0 %v1676_v60  ;;  %1834 = vmatpush.msra.mxu2 %v1666_v39  ;;  %v2023_v60 = vld [vmem:[#allocation11 + $0x348] sm:$0xff]  ;;  %v2025_v39 = vld [vmem:[#allocation11 + $0x358] sm:$0xff] }
 0x45e   :  { %1816 = vmatpush.msra.mxu1 %v1625_v63  ;;  %1771 = vmatpush.msrb.mxu3 %v1615_v9  ;;  %v1658_v63 = vld [vmem:[#allocation16 + $0x1a0] sm:$0xff]  ;;  %v1660_v9 = vld [vmem:[#allocation16 + $0x1b0] sm:$0xff] }
 0x45f   :  { %1880 = vmatpush.msrb.mxu0 %v1668_v61  ;;  %1835 = vmatpush.msra.mxu2 %v1658_v63  ;;  %v2014_v61 = vld [vmem:[#allocation11 + $0x300] sm:$0xff] }
 0x460   :  { %1817 = vmatpush.msra.mxu1 %v1617_v40  ;;  %1772 = vmatpush.msrb.mxu3 %v1607_v23  ;;  %v1650_v40 = vld [vmem:[#allocation16 + $0x160] sm:$0xff]  ;;  %v1652_v23 = vld [vmem:[#allocation16 + $0x170] sm:$0xff] }
 0x461   :  { %1881 = vmatpush.msrb.mxu0 %v1660_v9  ;;  %1836 = vmatpush.msra.mxu2 %v1650_v40  ;;  %v2017_v9 = vld [vmem:[#allocation11 + $0x318] sm:$0xff]  ;;  %v2007_v40 = vld [vmem:[#allocation11 + $0x2c8] sm:$0xff] }
 0x462   :  { %1818 = vmatpush.msra.mxu1 %v1609_v5  ;;  %1849 = vmatpush.msra.mxu3 %v1731_v25  ;;  %v1643_v5 = vld [vmem:[#allocation16 + $0x128] sm:$0xff]  ;;  %v1645_v25 = vld [vmem:[#allocation16 + $0x138] sm:$0xff] }
 0x463   :  { %1882 = vmatpush.msrb.mxu0 %v1652_v23  ;;  %1837 = vmatpush.msra.mxu2 %v1642_v56  ;;  %v2009_v23 = vld [vmem:[#allocation11 + $0x2d8] sm:$0xff]  ;;  %v2000_v56 = vld [vmem:[#allocation11 + $0x290] sm:$0xff] }
 0x464   :  { %1895 = vmatpush.msrb.mxu1 %v1733_v13  ;;  %1850 = vmatpush.msra.mxu3 %v1723_v27  ;;  %v1635_v13 = vld [vmem:[#allocation16 + $0xe8] sm:$0xff]  ;;  %v1637_v27 = vld [vmem:[#allocation16 + $0xf8] sm:$0xff] }
 0x465   :  { %1883 = vmatpush.msrb.mxu0 %v1644_v12  ;;  %1838 = vmatpush.msra.mxu2 %v1634_v26  ;;  %v1990_v12 = vld [vmem:[#allocation11 + $0x240] sm:$0xff]  ;;  %v1992_v26 = vld [vmem:[#allocation11 + $0x250] sm:$0xff] }
 0x466   :  { %1851 = vmatpush.msra.mxu3 %v1715_v29  ;;  %v1629_v29 = vld [vmem:[#allocation16 + $0xb8] sm:$0xff] }
 0x467   :  { %1884 = vmatpush.msrb.mxu0 %v1636_v14  ;;  %1839 = vmatpush.msra.mxu2 %v1626_v28  ;;  %v1982_v14 = vld [vmem:[#allocation11 + $0x200] sm:$0xff]  ;;  %v1984_v28 = vld [vmem:[#allocation11 + $0x210] sm:$0xff] }
 0x468   :  { %1852 = vmatpush.msra.mxu3 %v1707_v34  ;;  %v1621_v34 = vld [vmem:[#allocation16 + $0x78] sm:$0xff] }
 0x469   :  { %1885 = vmatpush.msrb.mxu0 %v1628_v18  ;;  %1840 = vmatpush.msra.mxu2 %v1618_v3  ;;  %v1974_v18 = vld [vmem:[#allocation11 + $0x1c0] sm:$0xff]  ;;  %v1976_v3 = vld [vmem:[#allocation11 + $0x1d0] sm:$0xff] }
 0x46a   :  { %1853 = vmatpush.msra.mxu3 %v1699_v20  ;;  %v1613_v20 = vld [vmem:[#allocation16 + $0x38] sm:$0xff] }
 0x46b   :  { %1886 = vmatpush.msrb.mxu0 %v1620_v32  ;;  %1841 = vmatpush.msra.mxu2 %v1610_v19  ;;  %v1966_v32 = vld [vmem:[#allocation11 + $0x180] sm:$0xff]  ;;  %v1968_v19 = vld [vmem:[#allocation11 + $0x190] sm:$0xff] }
 0x46c   :  { %1854 = vmatpush.msra.mxu3 %v1691_v11 }
 0x46d   :  { %1887 = vmatpush.msrb.mxu0 %v1612_v38  ;;  %v1958_v38 = vld [vmem:[#allocation11 + $0x140] sm:$0xff] }
 0x46e   :  { %1855 = vmatpush.msra.mxu3 %v1683_v49  ;;  %v2039_v49 = vld [vmem:[#allocation11 + $0x3c8] sm:$0xff] }
 0x470   :  { %1856 = vmatpush.msra.mxu3 %v1675_v53  ;;  %v2022_v53 = vld [vmem:[#allocation11 + $0x340] sm:$0xff] }
 0x472   :  { %1857 = vmatpush.msra.mxu3 %v1667_v55 }
 0x474   :  { %1858 = vmatpush.msra.mxu3 %v1659_v6  ;;  %v2016_v6 = vld [vmem:[#allocation11 + $0x310] sm:$0xff] }
 0x476   :  { %v1593_v24 = vpop.permute.xlu0 %1592  ;;  %1859 = vmatpush.msra.mxu3 %v1651_v22  ;;  %v2008_v22 = vld [vmem:[#allocation11 + $0x2d0] sm:$0xff] }
 0x477   :  { %v7152_v57 = vadd.f32 %v1593_v24, %v7143_v50  ;;  %v1725_v50 = vld [vmem:[#allocation16 + $0x3b8] sm:$0xff] }
 0x478   :  { %1896 = vmatpush.msrb.mxu1 %v1725_v50  ;;  %v1653_v24 = vld [vmem:[#allocation16 + $0x178] sm:$0xff]  ;;  %1860 = vmatpush.msra.mxu3 %v1643_v5  ;;  %v1627_v50 = vld [vmem:[#allocation16 + $0xa8] sm:$0xff] }
 0x479   :  { %1598 = vrot.lane.b32.xlu2 %v7152_v57, %s6072_s12  ;;  %v2001_v5 = vld [vmem:[#allocation11 + $0x298] sm:$0xff] }
 0x47a   :  { %1897 = vmatpush.msrb.mxu1 %v1717_v4  ;;  %1861 = vmatpush.msra.mxu3 %v1635_v13  ;;  %v1619_v4 = vld [vmem:[#allocation16 + $0x68] sm:$0xff] }
 0x47b   :  { %v1993_v13 = vld [vmem:[#allocation11 + $0x258] sm:$0xff] }
 0x47c   :  { %1898 = vmatpush.msrb.mxu1 %v1709_v37  ;;  %1862 = vmatpush.msra.mxu3 %v1627_v50  ;;  %v1611_v37 = vld [vmem:[#allocation16 + $0x28] sm:$0xff] }
 0x47d   :  { %v1985_v50 = vld [vmem:[#allocation11 + $0x218] sm:$0xff] }
 0x47e   :  { %1899 = vmatpush.msrb.mxu1 %v1701_v43  ;;  %1863 = vmatpush.msra.mxu3 %v1619_v4  ;;  %v1977_v4 = vld [vmem:[#allocation11 + $0x1d8] sm:$0xff] }
 0x480   :  { %1900 = vmatpush.msrb.mxu1 %v1693_v42  ;;  %1864 = vmatpush.msra.mxu3 %v1611_v37  ;;  %v1969_v37 = vld [vmem:[#allocation11 + $0x198] sm:$0xff] }
 0x482   :  { %1901 = vmatpush.msrb.mxu1 %v1685_v7  ;;  %v2041_v7 = vld [vmem:[#allocation11 + $0x3d8] sm:$0xff] }
 0x484   :  { %1902 = vmatpush.msrb.mxu1 %v1677_v54  ;;  %v2024_v54 = vld [vmem:[#allocation11 + $0x350] sm:$0xff] }
 0x486   :  { %1903 = vmatpush.msrb.mxu1 %v1669_v62  ;;  %v2015_v62 = vld [vmem:[#allocation11 + $0x308] sm:$0xff] }
 0x488   :  { %1904 = vmatpush.msrb.mxu1 %v1661_v21  ;;  %v2006_v21 = vld [vmem:[#allocation11 + $0x2c0] sm:$0xff] }
 0x48a   :  { %1905 = vmatpush.msrb.mxu1 %v1653_v24  ;;  %v1999_v24 = vld [vmem:[#allocation11 + $0x288] sm:$0xff] }
 0x48c   :  { %1906 = vmatpush.msrb.mxu1 %v1645_v25  ;;  %v1991_v25 = vld [vmem:[#allocation11 + $0x248] sm:$0xff] }
 0x48e   :  { %1907 = vmatpush.msrb.mxu1 %v1637_v27  ;;  %v1983_v27 = vld [vmem:[#allocation11 + $0x208] sm:$0xff] }
 0x490   :  { %1908 = vmatpush.msrb.mxu1 %v1629_v29  ;;  %v1975_v29 = vld [vmem:[#allocation11 + $0x1c8] sm:$0xff] }
 0x492   :  { %1909 = vmatpush.msrb.mxu1 %v1621_v34  ;;  %v1967_v34 = vld [vmem:[#allocation11 + $0x188] sm:$0xff] }
 0x494   :  { %1910 = vmatpush.msrb.mxu1 %v1613_v20  ;;  %v1959_v20 = vld [vmem:[#allocation11 + $0x148] sm:$0xff] }
 0x4cb   :  { %v1597_v10 = vpop.permute.xlu1 %1596 }
 0x4cc   :  { %v1600_v43 = vadd.f32 %v1597_v10, %v7147_v52  ;;  %v2030_v52 = vld [vmem:[#allocation11 + $0x380] sm:$0xff]  ;;  %v1960_v10 = vld [vmem:[#allocation11 + $0x150] sm:$0xff] }
 0x4ce   :  { %5199 = vrcp.f32 %v1600_v43  ;;  %v1961_v43 = vld [vmem:[#allocation11 + $0x158] sm:$0xff] }
 0x4d3   :  { %v1599_v17 = vpop.permute.xlu2 %1598 }
 0x4d4   :  { %v5200_v11 = vpop.eup %5199  ;;  %v1601_v35 = vadd.f32 %v1599_v17, %v7152_v57  ;;  %v2032_v57 = vld [vmem:[#allocation11 + $0x390] sm:$0xff]  ;;  %v1950_v17 = vld [vmem:[#allocation11 + $0x100] sm:$0xff] }
 0x4d5   :  { %v7159_v42 = vmul.f32 %v5200_v11, %v7132_v33  ;;  %v2033_v33 = vld [vmem:[#allocation11 + $0x398] sm:$0xff]  ;;  %v1951_v11 = vld [vmem:[#allocation11 + $0x108] sm:$0xff] }
 0x4d6   :  { %5201 = vrcp.f32 %v1601_v35  ;;  %v1952_v35 = vld [vmem:[#allocation11 + $0x110] sm:$0xff] }
 0x4d7   :  { %1750 = vmatmul.f32.vlgmr.msrb.gmra.mxu2 %v7159_v42  ;;  %1773 = vmatmul.f32.vlgmr.msrb.gmra.mxu3 %v7159_v42 }
 0x4d8   :  { %1796 = vmatmul.f32.vlgmr.msra.gmra.mxu0 %v7159_v42  ;;  %1819 = vmatmul.f32.vlgmr.msra.gmra.mxu1 %v7159_v42 }
 0x4d9   :  { %2064 = vmatpush.msrb.mxu2 %v2038_v36  ;;  %2087 = vmatpush.msrb.mxu3 %v2039_v49  ;;  %v1942_v36 = vld [vmem:[#allocation11 + $0xc0] sm:$0xff]  ;;  %v1943_v49 = vld [vmem:[#allocation11 + $0xc8] sm:$0xff] }
 0x4da   :  { %2110 = vmatpush.msra.mxu0 %v2040_v51  ;;  %2133 = vmatpush.msra.mxu1 %v2041_v7  ;;  %v1944_v51 = vld [vmem:[#allocation11 + $0xd0] sm:$0xff]  ;;  %v1945_v7 = vld [vmem:[#allocation11 + $0xd8] sm:$0xff] }
 0x4db   :  { %2065 = vmatpush.msrb.mxu2 %v2030_v52  ;;  %2088 = vmatpush.msrb.mxu3 %v2031_v8  ;;  %v1934_v52 = vld [vmem:[#allocation11 + $0x80] sm:$0xff]  ;;  %v1935_v8 = vld [vmem:[#allocation11 + $0x88] sm:$0xff] }
 0x4dc   :  { %v5202_v55 = vpop.eup %5201  ;;  %2111 = vmatpush.msra.mxu0 %v2032_v57  ;;  %2134 = vmatpush.msra.mxu1 %v2033_v33  ;;  %v1936_v57 = vld [vmem:[#allocation11 + $0x90] sm:$0xff]  ;;  %v1937_v33 = vld [vmem:[#allocation11 + $0x98] sm:$0xff] }
 0x4dd   :  { %v7166_v63 = vmul.f32 %v5202_v55, %v7136_v41  ;;  %2066 = vmatpush.msrb.mxu2 %v2022_v53  ;;  %2089 = vmatpush.msrb.mxu3 %v2023_v60  ;;  %v1998_v41 = vld [vmem:[#allocation11 + $0x280] sm:$0xff]  ;;  %v1927_v60 = vld [vmem:[#allocation11 + $0x48] sm:$0xff] }
 0x4de   :  { %2112 = vmatpush.msra.mxu0 %v2024_v54  ;;  %2135 = vmatpush.msra.mxu1 %v2025_v39  ;;  %v1926_v53 = vld [vmem:[#allocation11 + $0x40] sm:$0xff]  ;;  %v1928_v54 = vld [vmem:[#allocation11 + $0x50] sm:$0xff]  ;;  %v1929_v39 = vld [vmem:[#allocation11 + $0x58] sm:$0xff] }
 0x4df   :  { %2067 = vmatpush.msrb.mxu2 %v2014_v61  ;;  %2090 = vmatpush.msrb.mxu3 %v2015_v62  ;;  %v1918_v55 = vld [vmem:[#allocation11] sm:$0xff]  ;;  %v1919_v61 = vld [vmem:[#allocation11 + $0x8] sm:$0xff]  ;;  %v1920_v62 = vld [vmem:[#allocation11 + $0x10] sm:$0xff] }
 0x4e0   :  { %2113 = vmatpush.msra.mxu0 %v2016_v6  ;;  %2136 = vmatpush.msra.mxu1 %v2017_v9  ;;  %v2042_v6 = vld [vmem:[#allocation11 + $0x3e0] sm:$0xff]  ;;  %v2043_v9 = vld [vmem:[#allocation11 + $0x3e8] sm:$0xff] }
 0x4e1   :  { %1753 = vmatmul.f32.gmra.mxu2 %v7166_v63  ;;  %1776 = vmatmul.f32.gmra.mxu3 %v7166_v63 }
 0x4e2   :  { %1799 = vmatmul.f32.gmra.mxu0 %v7166_v63  ;;  %1822 = vmatmul.f32.gmra.mxu1 %v7166_v63 }
 0x4e3   :  { %2068 = vmatpush.msrb.mxu2 %v2006_v21  ;;  %2091 = vmatpush.msrb.mxu3 %v2007_v40  ;;  %v2044_v21 = vld [vmem:[#allocation11 + $0x3f0] sm:$0xff]  ;;  %v2045_v40 = vld [vmem:[#allocation11 + $0x3f8] sm:$0xff] }
 0x4e4   :  { %2114 = vmatpush.msra.mxu0 %v2008_v22  ;;  %2137 = vmatpush.msra.mxu1 %v2009_v23  ;;  %v2034_v22 = vld [vmem:[#allocation11 + $0x3a0] sm:$0xff]  ;;  %v2035_v23 = vld [vmem:[#allocation11 + $0x3a8] sm:$0xff] }
 0x4e5   :  { %2069 = vmatpush.msrb.mxu2 %v1998_v41  ;;  %2092 = vmatpush.msrb.mxu3 %v1999_v24  ;;  %v2036_v41 = vld [vmem:[#allocation11 + $0x3b0] sm:$0xff]  ;;  %v2037_v24 = vld [vmem:[#allocation11 + $0x3b8] sm:$0xff] }
 0x4e6   :  { %2115 = vmatpush.msra.mxu0 %v2000_v56  ;;  %2138 = vmatpush.msra.mxu1 %v2001_v5  ;;  %v2026_v56 = vld [vmem:[#allocation11 + $0x360] sm:$0xff]  ;;  %v2027_v5 = vld [vmem:[#allocation11 + $0x368] sm:$0xff] }
 0x4e7   :  { %2070 = vmatpush.msrb.mxu2 %v1990_v12  ;;  %2093 = vmatpush.msrb.mxu3 %v1991_v25  ;;  %v2028_v12 = vld [vmem:[#allocation11 + $0x370] sm:$0xff]  ;;  %v2029_v25 = vld [vmem:[#allocation11 + $0x378] sm:$0xff] }
 0x4e8   :  { %2116 = vmatpush.msra.mxu0 %v1992_v26  ;;  %2139 = vmatpush.msra.mxu1 %v1993_v13  ;;  %v2018_v26 = vld [vmem:[#allocation11 + $0x320] sm:$0xff]  ;;  %v2019_v13 = vld [vmem:[#allocation11 + $0x328] sm:$0xff] }
 0x4e9   :  { %2071 = vmatpush.msrb.mxu2 %v1982_v14  ;;  %2094 = vmatpush.msrb.mxu3 %v1983_v27  ;;  %v2020_v14 = vld [vmem:[#allocation11 + $0x330] sm:$0xff]  ;;  %v2021_v27 = vld [vmem:[#allocation11 + $0x338] sm:$0xff] }
 0x4ea   :  { %2117 = vmatpush.msra.mxu0 %v1984_v28  ;;  %2140 = vmatpush.msra.mxu1 %v1985_v50  ;;  %v2010_v28 = vld [vmem:[#allocation11 + $0x2e0] sm:$0xff]  ;;  %v2011_v50 = vld [vmem:[#allocation11 + $0x2e8] sm:$0xff] }
 0x4eb   :  { %1842 = vmatmul.f32.vlgmr.msra.gmra.mxu2 %v7159_v42  ;;  %1865 = vmatmul.f32.vlgmr.msra.gmra.mxu3 %v7159_v42 }
 0x4ec   :  { %1888 = vmatmul.f32.vlgmr.msrb.gmra.mxu0 %v7159_v42  ;;  %1911 = vmatmul.f32.vlgmr.msrb.gmra.mxu1 %v7159_v42  ;;  %v1953_v42 = vld [vmem:[#allocation11 + $0x118] sm:$0xff] }
 0x4ed   :  { %2072 = vmatpush.msrb.mxu2 %v1974_v18  ;;  %2095 = vmatpush.msrb.mxu3 %v1975_v29  ;;  %v2012_v18 = vld [vmem:[#allocation11 + $0x2f0] sm:$0xff]  ;;  %v2013_v29 = vld [vmem:[#allocation11 + $0x2f8] sm:$0xff] }
 0x4ee   :  { %2118 = vmatpush.msra.mxu0 %v1976_v3  ;;  %2141 = vmatpush.msra.mxu1 %v1977_v4  ;;  %v2002_v3 = vld [vmem:[#allocation11 + $0x2a0] sm:$0xff]  ;;  %v2003_v4 = vld [vmem:[#allocation11 + $0x2a8] sm:$0xff] }
 0x4ef   :  { %2073 = vmatpush.msrb.mxu2 %v1966_v32  ;;  %2096 = vmatpush.msrb.mxu3 %v1967_v34  ;;  %v2004_v32 = vld [vmem:[#allocation11 + $0x2b0] sm:$0xff]  ;;  %v2005_v34 = vld [vmem:[#allocation11 + $0x2b8] sm:$0xff] }
 0x4f0   :  { %2119 = vmatpush.msra.mxu0 %v1968_v19  ;;  %2142 = vmatpush.msra.mxu1 %v1969_v37  ;;  %v1994_v19 = vld [vmem:[#allocation11 + $0x260] sm:$0xff]  ;;  %v1995_v37 = vld [vmem:[#allocation11 + $0x268] sm:$0xff] }
 0x4f1   :  { %2074 = vmatpush.msrb.mxu2 %v1958_v38  ;;  %2097 = vmatpush.msrb.mxu3 %v1959_v20  ;;  %v1996_v38 = vld [vmem:[#allocation11 + $0x270] sm:$0xff]  ;;  %v1997_v20 = vld [vmem:[#allocation11 + $0x278] sm:$0xff] }
 0x4f2   :  { %2120 = vmatpush.msra.mxu0 %v1960_v10  ;;  %2143 = vmatpush.msra.mxu1 %v1961_v43  ;;  %v1986_v10 = vld [vmem:[#allocation11 + $0x220] sm:$0xff]  ;;  %v1987_v43 = vld [vmem:[#allocation11 + $0x228] sm:$0xff] }
 0x4f3   :  { %2075 = vmatpush.msrb.mxu2 %v1950_v17  ;;  %2098 = vmatpush.msrb.mxu3 %v1951_v11  ;;  %v1988_v17 = vld [vmem:[#allocation11 + $0x230] sm:$0xff]  ;;  %v1989_v11 = vld [vmem:[#allocation11 + $0x238] sm:$0xff] }
 0x4f4   :  { %2121 = vmatpush.msra.mxu0 %v1952_v35  ;;  %2144 = vmatpush.msra.mxu1 %v1953_v42  ;;  %v1978_v35 = vld [vmem:[#allocation11 + $0x1e0] sm:$0xff]  ;;  %v1979_v42 = vld [vmem:[#allocation11 + $0x1e8] sm:$0xff] }
 0x4f5   :  { %1845 = vmatmul.f32.gmra.mxu2 %v7166_v63  ;;  %1868 = vmatmul.f32.gmra.mxu3 %v7166_v63 }
 0x4f6   :  { %1891 = vmatmul.f32.gmra.mxu0 %v7166_v63  ;;  %1914 = vmatmul.f32.gmra.mxu1 %v7166_v63  ;;  %v1921_v63 = vld [vmem:[#allocation11 + $0x18] sm:$0xff] }
 0x4f7   :  { %2076 = vmatpush.msrb.mxu2 %v1942_v36  ;;  %2099 = vmatpush.msrb.mxu3 %v1943_v49  ;;  %v1980_v36 = vld [vmem:[#allocation11 + $0x1f0] sm:$0xff]  ;;  %v1981_v49 = vld [vmem:[#allocation11 + $0x1f8] sm:$0xff] }
 0x4f8   :  { %2122 = vmatpush.msra.mxu0 %v1944_v51  ;;  %2145 = vmatpush.msra.mxu1 %v1945_v7  ;;  %v1970_v51 = vld [vmem:[#allocation11 + $0x1a0] sm:$0xff]  ;;  %v1971_v7 = vld [vmem:[#allocation11 + $0x1a8] sm:$0xff] }
 0x4f9   :  { %2077 = vmatpush.msrb.mxu2 %v1934_v52  ;;  %2100 = vmatpush.msrb.mxu3 %v1935_v8  ;;  %v1972_v52 = vld [vmem:[#allocation11 + $0x1b0] sm:$0xff]  ;;  %v1973_v8 = vld [vmem:[#allocation11 + $0x1b8] sm:$0xff] }
 0x4fa   :  { %2123 = vmatpush.msra.mxu0 %v1936_v57  ;;  %2146 = vmatpush.msra.mxu1 %v1937_v33  ;;  %v1962_v57 = vld [vmem:[#allocation11 + $0x160] sm:$0xff]  ;;  %v1963_v33 = vld [vmem:[#allocation11 + $0x168] sm:$0xff] }
 0x4fb   :  { %2078 = vmatpush.msrb.mxu2 %v1926_v53  ;;  %2101 = vmatpush.msrb.mxu3 %v1927_v60  ;;  %v1964_v53 = vld [vmem:[#allocation11 + $0x170] sm:$0xff]  ;;  %v1965_v60 = vld [vmem:[#allocation11 + $0x178] sm:$0xff] }
 0x4fc   :  { %2124 = vmatpush.msra.mxu0 %v1928_v54  ;;  %2147 = vmatpush.msra.mxu1 %v1929_v39  ;;  %v1954_v54 = vld [vmem:[#allocation11 + $0x120] sm:$0xff]  ;;  %v1955_v39 = vld [vmem:[#allocation11 + $0x128] sm:$0xff] }
 0x4fd   :  { %2079 = vmatpush.msrb.mxu2 %v1918_v55  ;;  %2102 = vmatpush.msrb.mxu3 %v1919_v61  ;;  %v1956_v55 = vld [vmem:[#allocation11 + $0x130] sm:$0xff]  ;;  %v1957_v61 = vld [vmem:[#allocation11 + $0x138] sm:$0xff] }
 0x4fe   :  { %2125 = vmatpush.msra.mxu0 %v1920_v62  ;;  %2148 = vmatpush.msra.mxu1 %v1921_v63  ;;  %v1946_v62 = vld [vmem:[#allocation11 + $0xe0] sm:$0xff]  ;;  %v1947_v63 = vld [vmem:[#allocation11 + $0xe8] sm:$0xff] }
 0x4ff   :  { %2156 = vmatpush.msra.mxu2 %v2042_v6  ;;  %2179 = vmatpush.msra.mxu3 %v2043_v9  ;;  %v1948_v6 = vld [vmem:[#allocation11 + $0xf0] sm:$0xff]  ;;  %v1949_v9 = vld [vmem:[#allocation11 + $0xf8] sm:$0xff] }
 0x500   :  { %2202 = vmatpush.msrb.mxu0 %v2044_v21  ;;  %2225 = vmatpush.msrb.mxu1 %v2045_v40  ;;  %v1938_v21 = vld [vmem:[#allocation11 + $0xa0] sm:$0xff]  ;;  %v1939_v40 = vld [vmem:[#allocation11 + $0xa8] sm:$0xff] }
 0x501   :  { %2080 = vmatmul.f32.vlgmr.msrb.gmra.mxu2 %v6597_v2  ;;  %2103 = vmatmul.f32.vlgmr.msrb.gmra.mxu3 %v6597_v2 }
 0x502   :  { %2126 = vmatmul.f32.vlgmr.msra.gmra.mxu0 %v6597_v2  ;;  %2149 = vmatmul.f32.vlgmr.msra.gmra.mxu1 %v6597_v2 }
 0x503   :  { %2157 = vmatpush.msra.mxu2 %v2034_v22  ;;  %2180 = vmatpush.msra.mxu3 %v2035_v23  ;;  %v1940_v22 = vld [vmem:[#allocation11 + $0xb0] sm:$0xff]  ;;  %v1941_v23 = vld [vmem:[#allocation11 + $0xb8] sm:$0xff] }
 0x504   :  { %2203 = vmatpush.msrb.mxu0 %v2036_v41  ;;  %2226 = vmatpush.msrb.mxu1 %v2037_v24  ;;  %v1930_v41 = vld [vmem:[#allocation11 + $0x60] sm:$0xff]  ;;  %v1931_v24 = vld [vmem:[#allocation11 + $0x68] sm:$0xff] }
 0x505   :  { %2158 = vmatpush.msra.mxu2 %v2026_v56  ;;  %2181 = vmatpush.msra.mxu3 %v2027_v5  ;;  %v1932_v56 = vld [vmem:[#allocation11 + $0x70] sm:$0xff]  ;;  %v1933_v5 = vld [vmem:[#allocation11 + $0x78] sm:$0xff] }
 0x506   :  { %2204 = vmatpush.msrb.mxu0 %v2028_v12  ;;  %2227 = vmatpush.msrb.mxu1 %v2029_v25  ;;  %v1922_v12 = vld [vmem:[#allocation11 + $0x20] sm:$0xff]  ;;  %v1923_v25 = vld [vmem:[#allocation11 + $0x28] sm:$0xff] }
 0x507   :  { %2159 = vmatpush.msra.mxu2 %v2018_v26  ;;  %2182 = vmatpush.msra.mxu3 %v2019_v13  ;;  %v1924_v26 = vld [vmem:[#allocation11 + $0x30] sm:$0xff]  ;;  %v1925_v13 = vld [vmem:[#allocation11 + $0x38] sm:$0xff] }
 0x508   :  { %2205 = vmatpush.msrb.mxu0 %v2020_v14  ;;  %2228 = vmatpush.msrb.mxu1 %v2021_v27  ;;  %v2311_v14 = vld [vmem:[%s9678_s11 + $0x178] sm:$0xff] }
 0x509   :  { %2160 = vmatpush.msra.mxu2 %v2010_v28  ;;  %2183 = vmatpush.msra.mxu3 %v2011_v50  ;;  %v2327_v27 = vld [vmem:[%s9678_s11 + $0x1f8] sm:$0xff]  ;;  %v2310_v28 = vld [vmem:[%s9678_s11 + $0x170] sm:$0xff] }
 0x50a   :  { %2206 = vmatpush.msrb.mxu0 %v2012_v18  ;;  %2229 = vmatpush.msrb.mxu1 %v2013_v29  ;;  %v2326_v50 = vld [vmem:[%s9678_s11 + $0x1f0] sm:$0xff]  ;;  %v2309_v18 = vld [vmem:[%s9678_s11 + $0x168] sm:$0xff] }
 0x50b   :  { %2083 = vmatmul.f32.gmra.mxu2 %v6604_v47  ;;  %2106 = vmatmul.f32.gmra.mxu3 %v6604_v47  ;;  %v2325_v29 = vld [vmem:[%s9678_s11 + $0x1e8] sm:$0xff] }
 0x50c   :  { %2129 = vmatmul.f32.gmra.mxu0 %v6604_v47  ;;  %2152 = vmatmul.f32.gmra.mxu1 %v6604_v47 }
 0x50d   :  { %2161 = vmatpush.msra.mxu2 %v2002_v3  ;;  %2184 = vmatpush.msra.mxu3 %v2003_v4  ;;  %v2279_v3 = vld [vmem:[%s9678_s11 + $0x78] sm:$0xff] }
 0x50e   :  { %2207 = vmatpush.msrb.mxu0 %v2004_v32  ;;  %2230 = vmatpush.msrb.mxu1 %v2005_v34  ;;  %v2295_v4 = vld [vmem:[%s9678_s11 + $0xf8] sm:$0xff]  ;;  %v2308_v32 = vld [vmem:[%s9678_s11 + $0x160] sm:$0xff] }
 0x50f   :  { %2162 = vmatpush.msra.mxu2 %v1994_v19  ;;  %2185 = vmatpush.msra.mxu3 %v1995_v37  ;;  %v2324_v34 = vld [vmem:[%s9678_s11 + $0x1e0] sm:$0xff]  ;;  %v2278_v19 = vld [vmem:[%s9678_s11 + $0x70] sm:$0xff] }
 0x510   :  { %2208 = vmatpush.msrb.mxu0 %v1996_v38  ;;  %2231 = vmatpush.msrb.mxu1 %v1997_v20  ;;  %v2294_v37 = vld [vmem:[%s9678_s11 + $0xf0] sm:$0xff]  ;;  %v2307_v38 = vld [vmem:[%s9678_s11 + $0x158] sm:$0xff] }
 0x511   :  { %2163 = vmatpush.msra.mxu2 %v1986_v10  ;;  %2186 = vmatpush.msra.mxu3 %v1987_v43  ;;  %v2323_v20 = vld [vmem:[%s9678_s11 + $0x1d8] sm:$0xff]  ;;  %v2277_v10 = vld [vmem:[%s9678_s11 + $0x68] sm:$0xff] }
 0x512   :  { %2209 = vmatpush.msrb.mxu0 %v1988_v17  ;;  %2232 = vmatpush.msrb.mxu1 %v1989_v11  ;;  %v2293_v43 = vld [vmem:[%s9678_s11 + $0xe8] sm:$0xff]  ;;  %v2306_v17 = vld [vmem:[%s9678_s11 + $0x150] sm:$0xff] }
 0x513   :  { %2164 = vmatpush.msra.mxu2 %v1978_v35  ;;  %2187 = vmatpush.msra.mxu3 %v1979_v42  ;;  %v2322_v11 = vld [vmem:[%s9678_s11 + $0x1d0] sm:$0xff]  ;;  %v2276_v35 = vld [vmem:[%s9678_s11 + $0x60] sm:$0xff] }
 0x514   :  { %2210 = vmatpush.msrb.mxu0 %v1980_v36  ;;  %2233 = vmatpush.msrb.mxu1 %v1981_v49  ;;  %v2292_v42 = vld [vmem:[%s9678_s11 + $0xe0] sm:$0xff]  ;;  %v2305_v36 = vld [vmem:[%s9678_s11 + $0x148] sm:$0xff] }
 0x515   :  { %2165 = vmatpush.msra.mxu2 %v1970_v51  ;;  %2188 = vmatpush.msra.mxu3 %v1971_v7  ;;  %v2321_v49 = vld [vmem:[%s9678_s11 + $0x1c8] sm:$0xff]  ;;  %v2275_v51 = vld [vmem:[%s9678_s11 + $0x58] sm:$0xff] }
 0x516   :  { %2211 = vmatpush.msrb.mxu0 %v1972_v52  ;;  %2234 = vmatpush.msrb.mxu1 %v1973_v8  ;;  %v2291_v7 = vld [vmem:[%s9678_s11 + $0xd8] sm:$0xff]  ;;  %v2304_v52 = vld [vmem:[%s9678_s11 + $0x140] sm:$0xff] }
 0x517   :  { %2166 = vmatpush.msra.mxu2 %v1962_v57  ;;  %2189 = vmatpush.msra.mxu3 %v1963_v33  ;;  %v2320_v8 = vld [vmem:[%s9678_s11 + $0x1c0] sm:$0xff]  ;;  %v2274_v57 = vld [vmem:[%s9678_s11 + $0x50] sm:$0xff] }
 0x518   :  { %2212 = vmatpush.msrb.mxu0 %v1964_v53  ;;  %2235 = vmatpush.msrb.mxu1 %v1965_v60  ;;  %v2290_v33 = vld [vmem:[%s9678_s11 + $0xd0] sm:$0xff]  ;;  %v2303_v53 = vld [vmem:[%s9678_s11 + $0x138] sm:$0xff] }
 0x519   :  { %2167 = vmatpush.msra.mxu2 %v1954_v54  ;;  %2190 = vmatpush.msra.mxu3 %v1955_v39  ;;  %v2319_v60 = vld [vmem:[%s9678_s11 + $0x1b8] sm:$0xff]  ;;  %v2273_v54 = vld [vmem:[%s9678_s11 + $0x48] sm:$0xff] }
 0x51a   :  { %2213 = vmatpush.msrb.mxu0 %v1956_v55  ;;  %2236 = vmatpush.msrb.mxu1 %v1957_v61  ;;  %v2289_v39 = vld [vmem:[%s9678_s11 + $0xc8] sm:$0xff]  ;;  %v2302_v55 = vld [vmem:[%s9678_s11 + $0x130] sm:$0xff] }
 0x51b   :  { %2168 = vmatpush.msra.mxu2 %v1946_v62  ;;  %2191 = vmatpush.msra.mxu3 %v1947_v63  ;;  %v2318_v61 = vld [vmem:[%s9678_s11 + $0x1b0] sm:$0xff]  ;;  %v2272_v62 = vld [vmem:[%s9678_s11 + $0x40] sm:$0xff] }
 0x51c   :  { %2214 = vmatpush.msrb.mxu0 %v1948_v6  ;;  %2237 = vmatpush.msrb.mxu1 %v1949_v9  ;;  %v2288_v63 = vld [vmem:[%s9678_s11 + $0xc0] sm:$0xff]  ;;  %v2301_v6 = vld [vmem:[%s9678_s11 + $0x128] sm:$0xff] }
 0x51d   :  { %2169 = vmatpush.msra.mxu2 %v1938_v21  ;;  %2192 = vmatpush.msra.mxu3 %v1939_v40  ;;  %v2317_v9 = vld [vmem:[%s9678_s11 + $0x1a8] sm:$0xff]  ;;  %v2271_v21 = vld [vmem:[%s9678_s11 + $0x38] sm:$0xff] }
 0x51e   :  { %2215 = vmatpush.msrb.mxu0 %v1940_v22  ;;  %2238 = vmatpush.msrb.mxu1 %v1941_v23  ;;  %v2287_v40 = vld [vmem:[%s9678_s11 + $0xb8] sm:$0xff]  ;;  %v2300_v22 = vld [vmem:[%s9678_s11 + $0x120] sm:$0xff] }
 0x51f   :  { %2170 = vmatpush.msra.mxu2 %v1930_v41  ;;  %2193 = vmatpush.msra.mxu3 %v1931_v24  ;;  %v2316_v23 = vld [vmem:[%s9678_s11 + $0x1a0] sm:$0xff]  ;;  %v2270_v41 = vld [vmem:[%s9678_s11 + $0x30] sm:$0xff] }
 0x520   :  { %2216 = vmatpush.msrb.mxu0 %v1932_v56  ;;  %2239 = vmatpush.msrb.mxu1 %v1933_v5  ;;  %v2286_v24 = vld [vmem:[%s9678_s11 + $0xb0] sm:$0xff]  ;;  %v2299_v56 = vld [vmem:[%s9678_s11 + $0x118] sm:$0xff] }
 0x521   :  { %2171 = vmatpush.msra.mxu2 %v1922_v12  ;;  %2194 = vmatpush.msra.mxu3 %v1923_v25  ;;  %v2315_v5 = vld [vmem:[%s9678_s11 + $0x198] sm:$0xff] }
 0x522   :  { %2217 = vmatpush.msrb.mxu0 %v1924_v26  ;;  %2240 = vmatpush.msrb.mxu1 %v1925_v13  ;;  %v2269_v26 = vld [vmem:[%s9678_s11 + $0x28] sm:$0xff] }
 0x523   :  { %2172 = vmatmul.f32.vlgmr.msra.gmra.mxu2 %v6597_v2  ;;  %2195 = vmatmul.f32.vlgmr.msra.gmra.mxu3 %v6597_v2  ;;  %v2285_v13 = vld [vmem:[%s9678_s11 + $0xa8] sm:$0xff] }
 0x524   :  { %2218 = vmatmul.f32.vlgmr.msrb.gmra.mxu0 %v6597_v2  ;;  %2241 = vmatmul.f32.vlgmr.msrb.gmra.mxu1 %v6597_v2 }
 0x525   :  { %2438 = vmatpush.msra.mxu0 %v2311_v14  ;;  %2461 = vmatpush.msra.mxu1 %v2327_v27  ;;  %v2298_v14 = vld [vmem:[%s9678_s11 + $0x110] sm:$0xff] }
 0x526   :  { %2392 = vmatpush.msrb.mxu2 %v2279_v3  ;;  %2415 = vmatpush.msrb.mxu3 %v2295_v4  ;;  %v2314_v27 = vld [vmem:[%s9678_s11 + $0x190] sm:$0xff]  ;;  %v2268_v3 = vld [vmem:[%s9678_s11 + $0x20] sm:$0xff] }
 0x527   :  { %2439 = vmatpush.msra.mxu0 %v2310_v28  ;;  %2462 = vmatpush.msra.mxu1 %v2326_v50  ;;  %v2284_v4 = vld [vmem:[%s9678_s11 + $0xa0] sm:$0xff] }
 0x528   :  { %2393 = vmatpush.msrb.mxu2 %v2278_v19  ;;  %2416 = vmatpush.msrb.mxu3 %v2294_v37  ;;  %v2267_v19 = vld [vmem:[%s9678_s11 + $0x18] sm:$0xff] }
 0x529   :  { %2440 = vmatpush.msra.mxu0 %v2309_v18  ;;  %2463 = vmatpush.msra.mxu1 %v2325_v29  ;;  %v2283_v37 = vld [vmem:[%s9678_s11 + $0x98] sm:$0xff] }
 0x52a   :  { %2394 = vmatpush.msrb.mxu2 %v2277_v10  ;;  %2417 = vmatpush.msrb.mxu3 %v2293_v43  ;;  %v2375_v10 = vld [vmem:[%s9678_s11 + $0x378] sm:$0xff] }
 0x52b   :  { %2175 = vmatmul.f32.gmra.mxu2 %v6604_v47  ;;  %2198 = vmatmul.f32.gmra.mxu3 %v6604_v47  ;;  %v2391_v43 = vld [vmem:[%s9678_s11 + $0x3f8] sm:$0xff] }
 0x52c   :  { %2221 = vmatmul.f32.gmra.mxu0 %v6604_v47  ;;  %2244 = vmatmul.f32.gmra.mxu1 %v6604_v47 }
 0x52d   :  { %2441 = vmatpush.msra.mxu0 %v2308_v32  ;;  %2464 = vmatpush.msra.mxu1 %v2324_v34  ;;  %v2297_v32 = vld [vmem:[%s9678_s11 + $0x108] sm:$0xff] }
 0x52e   :  { %2395 = vmatpush.msrb.mxu2 %v2276_v35  ;;  %2418 = vmatpush.msrb.mxu3 %v2292_v42  ;;  %v2313_v34 = vld [vmem:[%s9678_s11 + $0x188] sm:$0xff] }
 0x52f   :  { %2442 = vmatpush.msra.mxu0 %v2307_v38  ;;  %2465 = vmatpush.msra.mxu1 %v2323_v20  ;;  %v2296_v38 = vld [vmem:[%s9678_s11 + $0x100] sm:$0xff] }
 0x530   :  { %2396 = vmatpush.msrb.mxu2 %v2275_v51  ;;  %2419 = vmatpush.msrb.mxu3 %v2291_v7  ;;  %v2312_v20 = vld [vmem:[%s9678_s11 + $0x180] sm:$0xff]  ;;  %v2265_v51 = vld [vmem:[%s9678_s11 + $0x8] sm:$0xff] }
 0x531   :  { %2443 = vmatpush.msra.mxu0 %v2306_v17  ;;  %2466 = vmatpush.msra.mxu1 %v2322_v11  ;;  %v2266_v17 = vld [vmem:[%s9678_s11 + $0x10] sm:$0xff]  ;;  %v2281_v7 = vld [vmem:[%s9678_s11 + $0x88] sm:$0xff] }
 0x532   :  { %2397 = vmatpush.msrb.mxu2 %v2274_v57  ;;  %2420 = vmatpush.msrb.mxu3 %v2290_v33  ;;  %v2282_v11 = vld [vmem:[%s9678_s11 + $0x90] sm:$0xff] }
 0x533   :  { %2444 = vmatpush.msra.mxu0 %v2305_v36  ;;  %2467 = vmatpush.msra.mxu1 %v2321_v49  ;;  %v2374_v36 = vld [vmem:[%s9678_s11 + $0x370] sm:$0xff] }
 0x534   :  { %2398 = vmatpush.msrb.mxu2 %v2273_v54  ;;  %2421 = vmatpush.msrb.mxu3 %v2289_v39  ;;  %v2390_v49 = vld [vmem:[%s9678_s11 + $0x3f0] sm:$0xff]  ;;  %v2343_v54 = vld [vmem:[%s9678_s11 + $0x278] sm:$0xff] }
 0x535   :  { %2445 = vmatpush.msra.mxu0 %v2304_v52  ;;  %2468 = vmatpush.msra.mxu1 %v2320_v8  ;;  %v2373_v52 = vld [vmem:[%s9678_s11 + $0x368] sm:$0xff]  ;;  %v2359_v39 = vld [vmem:[%s9678_s11 + $0x2f8] sm:$0xff] }
 0x536   :  { %2399 = vmatpush.msrb.mxu2 %v2272_v62  ;;  %2422 = vmatpush.msrb.mxu3 %v2288_v63  ;;  %v2389_v8 = vld [vmem:[%s9678_s11 + $0x3e8] sm:$0xff]  ;;  %v2342_v62 = vld [vmem:[%s9678_s11 + $0x270] sm:$0xff] }
 0x537   :  { %2446 = vmatpush.msra.mxu0 %v2303_v53  ;;  %2469 = vmatpush.msra.mxu1 %v2319_v60  ;;  %v2264_v53 = vld [vmem:[%s9678_s11] sm:$0xff]  ;;  %v2358_v63 = vld [vmem:[%s9678_s11 + $0x2f0] sm:$0xff] }
 0x538   :  { %2400 = vmatpush.msrb.mxu2 %v2271_v21  ;;  %2423 = vmatpush.msrb.mxu3 %v2287_v40  ;;  %v2280_v60 = vld [vmem:[%s9678_s11 + $0x80] sm:$0xff]  ;;  %v2341_v21 = vld [vmem:[%s9678_s11 + $0x268] sm:$0xff] }
 0x539   :  { %2447 = vmatpush.msra.mxu0 %v2302_v55  ;;  %2470 = vmatpush.msra.mxu1 %v2318_v61  ;;  %v2372_v55 = vld [vmem:[%s9678_s11 + $0x360] sm:$0xff]  ;;  %v2357_v40 = vld [vmem:[%s9678_s11 + $0x2e8] sm:$0xff] }
 0x53a   :  { %2401 = vmatpush.msrb.mxu2 %v2270_v41  ;;  %2424 = vmatpush.msrb.mxu3 %v2286_v24  ;;  %v2388_v61 = vld [vmem:[%s9678_s11 + $0x3e0] sm:$0xff]  ;;  %v2386_v24 = vld [vmem:[%s9678_s11 + $0x3d0] sm:$0xff] }
 0x53b   :  { %2448 = vmatpush.msra.mxu0 %v2301_v6  ;;  %2471 = vmatpush.msra.mxu1 %v2317_v9  ;;  %v2371_v6 = vld [vmem:[%s9678_s11 + $0x358] sm:$0xff] }
 0x53c   :  { %2402 = vmatpush.msrb.mxu2 %v2269_v26  ;;  %2425 = vmatpush.msrb.mxu3 %v2285_v13  ;;  %v2387_v9 = vld [vmem:[%s9678_s11 + $0x3d8] sm:$0xff]  ;;  %v2369_v26 = vld [vmem:[%s9678_s11 + $0x348] sm:$0xff] }
 0x53d   :  { %2449 = vmatpush.msra.mxu0 %v2300_v22  ;;  %2472 = vmatpush.msra.mxu1 %v2316_v23  ;;  %v2370_v22 = vld [vmem:[%s9678_s11 + $0x350] sm:$0xff]  ;;  %v2385_v13 = vld [vmem:[%s9678_s11 + $0x3c8] sm:$0xff] }
 0x53e   :  { %2403 = vmatpush.msrb.mxu2 %v2268_v3  ;;  %2426 = vmatpush.msrb.mxu3 %v2284_v4  ;;  %v2368_v3 = vld [vmem:[%s9678_s11 + $0x340] sm:$0xff] }
 0x53f   :  { %2450 = vmatpush.msra.mxu0 %v2299_v56  ;;  %2473 = vmatpush.msra.mxu1 %v2315_v5  ;;  %v2340_v56 = vld [vmem:[%s9678_s11 + $0x260] sm:$0xff] }
 0x540   :  { %2404 = vmatpush.msrb.mxu2 %v2267_v19  ;;  %2427 = vmatpush.msrb.mxu3 %v2283_v37  ;;  %v2356_v5 = vld [vmem:[%s9678_s11 + $0x2e0] sm:$0xff] }
 0x541   :  { %2451 = vmatpush.msra.mxu0 %v2298_v14  ;;  %2474 = vmatpush.msra.mxu1 %v2314_v27  ;;  %v2339_v14 = vld [vmem:[%s9678_s11 + $0x258] sm:$0xff]  ;;  %v2384_v4 = vld [vmem:[%s9678_s11 + $0x3c0] sm:$0xff] }
 0x542   :  { %2405 = vmatpush.msrb.mxu2 %v2266_v17  ;;  %2428 = vmatpush.msrb.mxu3 %v2282_v11  ;;  %v2355_v27 = vld [vmem:[%s9678_s11 + $0x2d8] sm:$0xff]  ;;  %v2366_v17 = vld [vmem:[%s9678_s11 + $0x330] sm:$0xff] }
 0x543   :  { %2452 = vmatpush.msra.mxu0 %v2297_v32  ;;  %2475 = vmatpush.msra.mxu1 %v2313_v34  ;;  %v2338_v32 = vld [vmem:[%s9678_s11 + $0x250] sm:$0xff] }
 0x544   :  { %2406 = vmatpush.msrb.mxu2 %v2265_v51  ;;  %2429 = vmatpush.msrb.mxu3 %v2281_v7  ;;  %v2354_v34 = vld [vmem:[%s9678_s11 + $0x2d0] sm:$0xff]  ;;  %v2365_v7 = vld [vmem:[%s9678_s11 + $0x328] sm:$0xff] }
 0x545   :  { %2453 = vmatpush.msra.mxu0 %v2296_v38  ;;  %2476 = vmatpush.msra.mxu1 %v2312_v20  ;;  %v2367_v38 = vld [vmem:[%s9678_s11 + $0x338] sm:$0xff]  ;;  %v2382_v11 = vld [vmem:[%s9678_s11 + $0x3b0] sm:$0xff] }
 0x546   :  { %2407 = vmatpush.msrb.mxu2 %v2264_v53  ;;  %2430 = vmatpush.msrb.mxu3 %v2280_v60  ;;  %v2383_v20 = vld [vmem:[%s9678_s11 + $0x3b8] sm:$0xff]  ;;  %v7524_v51 = vld [vmem:[#allocation13] sm:$0xff] }
 0x547   :  { %2530 = vmatpush.msrb.mxu0 %v2375_v10  ;;  %2553 = vmatpush.msrb.mxu1 %v2391_v43  ;;  %v2337_v10 = vld [vmem:[%s9678_s11 + $0x248] sm:$0xff]  ;;  %v2335_v60 = vld [vmem:[%s9678_s11 + $0x238] sm:$0xff] }
 0x548   :  { %2484 = vmatpush.msra.mxu2 %v2343_v54  ;;  %2507 = vmatpush.msra.mxu3 %v2359_v39  ;;  %v2353_v43 = vld [vmem:[%s9678_s11 + $0x2c8] sm:$0xff]  ;;  %v2351_v54 = vld [vmem:[%s9678_s11 + $0x2b8] sm:$0xff]  ;;  %v2364_v39 = vld [vmem:[%s9678_s11 + $0x320] sm:$0xff] }
 0x549   :  { %2531 = vmatpush.msrb.mxu0 %v2374_v36  ;;  %2554 = vmatpush.msrb.mxu1 %v2390_v49  ;;  %v2336_v36 = vld [vmem:[%s9678_s11 + $0x240] sm:$0xff] }
 0x54a   :  { %2485 = vmatpush.msra.mxu2 %v2342_v62  ;;  %2508 = vmatpush.msra.mxu3 %v2358_v63  ;;  %v2352_v49 = vld [vmem:[%s9678_s11 + $0x2c0] sm:$0xff]  ;;  %v2051_v62 = vperm.slane %v7524_v51, 3  ;;  %v2334_v63 = vld [vmem:[%s9678_s11 + $0x230] sm:$0xff] }
 0x54b   :  { %2532 = vmatpush.msrb.mxu0 %v2373_v52  ;;  %2555 = vmatpush.msrb.mxu1 %v2389_v8  ;;  %v2381_v52 = vld [vmem:[%s9678_s11 + $0x3a8] sm:$0xff] }
 0x54c   :  { %2486 = vmatpush.msra.mxu2 %v2341_v21  ;;  %2509 = vmatpush.msra.mxu3 %v2357_v40  ;;  %v2379_v21 = vld [vmem:[%s9678_s11 + $0x398] sm:$0xff] }
 0x54d   :  { %2533 = vmatpush.msrb.mxu0 %v2372_v55  ;;  %2556 = vmatpush.msrb.mxu1 %v2388_v61  ;;  %v2380_v55 = vld [vmem:[%s9678_s11 + $0x3a0] sm:$0xff]  ;;  %v2050_v61 = vperm.slane %v7524_v51, 2 }
 0x54e   :  { %2487 = vmatpush.msra.mxu2 %v2340_v56  ;;  %2510 = vmatpush.msra.mxu3 %v2356_v5  ;;  %v2333_v5 = vld [vmem:[%s9678_s11 + $0x228] sm:$0xff] }
 0x54f   :  { %2534 = vmatpush.msrb.mxu0 %v2371_v6  ;;  %2557 = vmatpush.msrb.mxu1 %v2387_v9  ;;  %v2350_v6 = vld [vmem:[%s9678_s11 + $0x2b0] sm:$0xff]  ;;  %v2363_v9 = vld [vmem:[%s9678_s11 + $0x318] sm:$0xff] }
 0x550   :  { %2488 = vmatpush.msra.mxu2 %v2339_v14  ;;  %2511 = vmatpush.msra.mxu3 %v2355_v27  ;;  %v2048_v14 = vperm.slane %v7524_v51, 0  ;;  %v2049_v27 = vperm.slane %v7524_v51, 1 }
 0x551   :  { %2535 = vmatpush.msrb.mxu0 %v2370_v22  ;;  %2558 = vmatpush.msrb.mxu1 %v2386_v24 }
 0x552   :  { %2489 = vmatpush.msra.mxu2 %v2338_v32  ;;  %2512 = vmatpush.msra.mxu3 %v2354_v34  ;;  %v2332_v34 = vld [vmem:[%s9678_s11 + $0x220] sm:$0xff] }
 0x553   :  { %2536 = vmatpush.msrb.mxu0 %v2369_v26  ;;  %2559 = vmatpush.msrb.mxu1 %v2385_v13  ;;  %v2349_v26 = vld [vmem:[%s9678_s11 + $0x2a8] sm:$0xff]  ;;  %v2362_v13 = vld [vmem:[%s9678_s11 + $0x310] sm:$0xff] }
 0x554   :  { %2490 = vmatpush.msra.mxu2 %v2337_v10  ;;  %2513 = vmatpush.msra.mxu3 %v2353_v43  ;;  %v2331_v43 = vld [vmem:[%s9678_s11 + $0x218] sm:$0xff] }
 0x555   :  { %v7334_v12 = vpop.f32.mrf.mxu0  ;;  %v7336_v25 = vpop.f32.mrf.mxu1  ;;  %2537 = vmatpush.msrb.mxu0 %v2368_v3  ;;  %2560 = vmatpush.msrb.mxu1 %v2384_v4  ;;  %v2378_v3 = vld [vmem:[%s9678_s11 + $0x390] sm:$0xff] }
 0x556   :  { %2491 = vmatpush.msra.mxu2 %v2336_v36  ;;  %2514 = vmatpush.msra.mxu3 %v2352_v49 }
 0x557   :  { %2538 = vmatpush.msrb.mxu0 %v2367_v38  ;;  %2561 = vmatpush.msrb.mxu1 %v2383_v20  ;;  %v2348_v38 = vld [vmem:[%s9678_s11 + $0x2a0] sm:$0xff]  ;;  %v2361_v20 = vld [vmem:[%s9678_s11 + $0x308] sm:$0xff] }
 0x558   :  { %2492 = vmatpush.msra.mxu2 %v2335_v60  ;;  %2515 = vmatpush.msra.mxu3 %v2351_v54  ;;  %v2346_v60 = vld [vmem:[%s9678_s11 + $0x290] sm:$0xff] }
 0x559   :  { %2539 = vmatpush.msrb.mxu0 %v2366_v17  ;;  %2562 = vmatpush.msrb.mxu1 %v2382_v11  ;;  %v2347_v17 = vld [vmem:[%s9678_s11 + $0x298] sm:$0xff]  ;;  %v2360_v11 = vld [vmem:[%s9678_s11 + $0x300] sm:$0xff] }
 0x55a   :  { %v7350_v28 = vpop.f32.mrf.mxu2  ;;  %v7352_v50 = vpop.f32.mrf.mxu3  ;;  %2493 = vmatpush.msra.mxu2 %v2334_v63  ;;  %2516 = vmatpush.msra.mxu3 %v2350_v6  ;;  %v2345_v63 = vld [vmem:[%s9678_s11 + $0x288] sm:$0xff] }
 0x55b   :  { %2540 = vmatpush.msrb.mxu0 %v2365_v7  ;;  %2563 = vmatpush.msrb.mxu1 %v2381_v52  ;;  %v2376_v7 = vld [vmem:[%s9678_s11 + $0x380] sm:$0xff]  ;;  %v2330_v52 = vld [vmem:[%s9678_s11 + $0x210] sm:$0xff] }
 0x55c   :  { %2494 = vmatpush.msra.mxu2 %v2333_v5  ;;  %2517 = vmatpush.msra.mxu3 %v2349_v26 }
 0x55d   :  { %2541 = vmatpush.msrb.mxu0 %v2364_v39  ;;  %2564 = vmatpush.msrb.mxu1 %v2380_v55  ;;  %v2329_v55 = vld [vmem:[%s9678_s11 + $0x208] sm:$0xff] }
 0x55e   :  { %2495 = vmatpush.msra.mxu2 %v2332_v34  ;;  %2518 = vmatpush.msra.mxu3 %v2348_v38  ;;  %v2052_v38 = vperm.slane %v7524_v51, 4 }
 0x55f   :  { %v7354_v18 = vpop.f32.mrf.mxu0  ;;  %v7356_v29 = vpop.f32.mrf.mxu1  ;;  %2542 = vmatpush.msrb.mxu0 %v2363_v9  ;;  %2565 = vmatpush.msrb.mxu1 %v2379_v21  ;;  %v2328_v21 = vld [vmem:[%s9678_s11 + $0x200] sm:$0xff] }
 0x560   :  { %2496 = vmatpush.msra.mxu2 %v2331_v43  ;;  %2519 = vmatpush.msra.mxu3 %v2347_v17 }
 0x561   :  { %2543 = vmatpush.msrb.mxu0 %v2362_v13  ;;  %2566 = vmatpush.msrb.mxu1 %v2378_v3  ;;  %v2054_v3 = vperm.slane %v7524_v51, 6 }
 0x562   :  { %2497 = vmatpush.msra.mxu2 %v2330_v52  ;;  %2520 = vmatpush.msra.mxu3 %v2346_v60 }
 0x563   :  { %2544 = vmatpush.msrb.mxu0 %v2361_v20  ;;  %v2053_v20 = vperm.slane %v7524_v51, 5 }
 0x564   :  { %v7394_v35 = vpop.f32.mrf.mxu2  ;;  %v7396_v42 = vpop.f32.mrf.mxu3  ;;  %2498 = vmatpush.msra.mxu2 %v2329_v55  ;;  %2521 = vmatpush.msra.mxu3 %v2345_v63  ;;  %v2585_v55 = vld [vmem:[%s9679_s14 + $0x48] sm:$0xff]  ;;  %v2584_v63 = vld [vmem:[%s9679_s14 + $0x40] sm:$0xff] }
 0x565   :  { %2545 = vmatpush.msrb.mxu0 %v2360_v11 }
 0x566   :  { %2499 = vmatpush.msra.mxu2 %v2328_v21  ;;  %v2579_v21 = vld [vmem:[%s9679_s14 + $0x18] sm:$0xff] }
 0x569   :  { %v7416_v57 = vpop.f32.mrf.mxu0  ;;  %v7418_v33 = vpop.f32.mrf.mxu1 }
 0x56e   :  { %v7459_v23 = vpop.f32.mrf.mxu2  ;;  %v7461_v41 = vpop.f32.mrf.mxu3 }
 0x573   :  { %v7496_v19 = vpop.f32.mrf.mxu0  ;;  %v7498_v37 = vpop.f32.mrf.mxu1 }
 0x578   :  { %v7532_v8 = vpop.f32.mrf.mxu2  ;;  %v7534_v53 = vpop.f32.mrf.mxu3 }
 0x57f   :  { %v2127_v40 = vpop.f32.mrf.mxu0  ;;  %v2150_v22 = vpop.f32.mrf.mxu1 }
 0x580   :  { %v2128_v24 = vadd.f32 %v2127_v40, %v2050_v61  ;;  %v2151_v56 = vadd.f32 %v2150_v22, %v2051_v62  ;;  %v2344_v40 = vld [vmem:[%s9678_s11 + $0x280] sm:$0xff] }
 0x581   :  { %2522 = vmatpush.msra.mxu3 %v2344_v40  ;;  %v2578_v40 = vld [vmem:[%s9679_s14 + $0x10] sm:$0xff] }
 0x582   :  { %v2250_v4 = vmul.f32 %v2128_v24, %v7334_v12  ;;  %v2251_v32 = vmul.f32 %v2151_v56, %v7336_v25  ;;  %v2377_v12 = vld [vmem:[%s9678_s11 + $0x388] sm:$0xff] }
 0x583   :  { %2567 = vmatpush.msrb.mxu1 %v2377_v12 }
 0x584   :  { %2454 = vmatmul.f32.vlgmr.msra.gmra.mxu0 %v2250_v4  ;;  %2477 = vmatmul.f32.vlgmr.msra.gmra.mxu1 %v2251_v32  ;;  %v2081_v25 = vpop.f32.mrf.mxu2  ;;  %v2104_v10 = vpop.f32.mrf.mxu3 }
 0x585   :  { %v2082_v36 = vadd.f32 %v2081_v25, %v2048_v14  ;;  %v2105_v49 = vadd.f32 %v2104_v10, %v2049_v27  ;;  %2568 = vmatpush.msrb.mxu1 %v2376_v7 }
 0x587   :  { %v2248_v54 = vmul.f32 %v2082_v36, %v7350_v28  ;;  %v2249_v39 = vmul.f32 %v2105_v49, %v7352_v50 }
 0x589   :  { %v2130_v6 = vpop.f32.mrf.mxu0  ;;  %v2153_v9 = vpop.f32.mrf.mxu1  ;;  %2408 = vmatmul.f32.vlgmr.msrb.gmra.mxu2 %v2248_v54  ;;  %2431 = vmatmul.f32.vlgmr.msrb.gmra.mxu3 %v2249_v39  ;;  %v2591_v54 = vld [vmem:[%s9679_s14 + $0x78] sm:$0xff]  ;;  %v2586_v39 = vld [vmem:[%s9679_s14 + $0x50] sm:$0xff] }
 0x58a   :  { %v2131_v28 = vadd.f32 %v2130_v6, %v2050_v61  ;;  %v2154_v50 = vadd.f32 %v2153_v9, %v2051_v62  ;;  %2596 = vmatpush.msrb.mxu2 %v2591_v54  ;;  %v2583_v6 = vld [vmem:[%s9679_s14 + $0x38] sm:$0xff]  ;;  %v2582_v9 = vld [vmem:[%s9679_s14 + $0x30] sm:$0xff]  ;;  %v2656_v54 = vld [vmem:[%s9628_s13 + $0x128] sm:$0xff] }
 0x58c   :  { %v2258_v22 = vmul.f32 %v2131_v28, %v7354_v18  ;;  %v2259_v24 = vmul.f32 %v2154_v50, %v7356_v29  ;;  %v2055_v18 = vperm.slane %v7524_v51, 7  ;;  %v2581_v28 = vld [vmem:[%s9679_s14 + $0x28] sm:$0xff]  ;;  %v2580_v50 = vld [vmem:[%s9679_s14 + $0x20] sm:$0xff] }
 0x58e   :  { %2457 = vmatmul.f32.gmra.mxu0 %v2258_v22  ;;  %2480 = vmatmul.f32.gmra.mxu1 %v2259_v24  ;;  %v2084_v61 = vpop.f32.mrf.mxu2  ;;  %v2107_v62 = vpop.f32.mrf.mxu3  ;;  %v2577_v22 = vld [vmem:[%s9679_s14 + $0x8] sm:$0xff]  ;;  %v2576_v24 = vld [vmem:[%s9679_s14] sm:$0xff] }
 0x58f   :  { %v2085_v56 = vadd.f32 %v2084_v61, %v2048_v14  ;;  %v2108_v5 = vadd.f32 %v2107_v62, %v2049_v27 }
 0x591   :  { %v2256_v26 = vmul.f32 %v2085_v56, %v7394_v35  ;;  %v2257_v13 = vmul.f32 %v2108_v5, %v7396_v42  ;;  %v2679_v5 = vld [vmem:[%s9628_s13 + $0x1e0] sm:$0xff] }
 0x592   :  { %2683 = vmatpush.msrb.mxu3 %v2679_v5 }
 0x593   :  { %2411 = vmatmul.f32.gmra.mxu2 %v2256_v26  ;;  %2434 = vmatmul.f32.gmra.mxu3 %v2257_v13  ;;  %v2680_v26 = vld [vmem:[%s9628_s13 + $0x1e8] sm:$0xff]  ;;  %v2681_v13 = vld [vmem:[%s9628_s13 + $0x1f0] sm:$0xff] }
 0x594   :  { %2706 = vmatpush.msra.mxu0 %v2680_v26  ;;  %2729 = vmatpush.msra.mxu1 %v2681_v13  ;;  %v2645_v26 = vld [vmem:[%s9628_s13 + $0xd0] sm:$0xff]  ;;  %v2646_v13 = vld [vmem:[%s9628_s13 + $0xd8] sm:$0xff] }
 0x5a1   :  { %v2219_v4 = vpop.f32.mrf.mxu0  ;;  %v2242_v29 = vpop.f32.mrf.mxu1 }
 0x5a2   :  { %v2220_v32 = vadd.f32 %v2219_v4, %v2054_v3  ;;  %v2243_v34 = vadd.f32 %v2242_v29, %v2055_v18  ;;  %v2675_v4 = vld [vmem:[%s9628_s13 + $0x1c0] sm:$0xff]  ;;  %v2676_v29 = vld [vmem:[%s9628_s13 + $0x1c8] sm:$0xff] }
 0x5a3   :  { %2684 = vmatpush.msrb.mxu3 %v2675_v4  ;;  %2707 = vmatpush.msra.mxu0 %v2676_v29  ;;  %v2639_v4 = vld [vmem:[%s9628_s13 + $0xa0] sm:$0xff]  ;;  %v2640_v29 = vld [vmem:[%s9628_s13 + $0xa8] sm:$0xff] }
 0x5a4   :  { %v2254_v14 = vmul.f32 %v2220_v32, %v7416_v57  ;;  %v2255_v35 = vmul.f32 %v2243_v34, %v7418_v33  ;;  %v2677_v32 = vld [vmem:[%s9628_s13 + $0x1d0] sm:$0xff]  ;;  %v2678_v34 = vld [vmem:[%s9628_s13 + $0x1d8] sm:$0xff] }
 0x5a5   :  { %2730 = vmatpush.msra.mxu1 %v2677_v32 }
 0x5a6   :  { %2546 = vmatmul.f32.vlgmr.msrb.gmra.mxu0 %v2254_v14  ;;  %2569 = vmatmul.f32.vlgmr.msrb.gmra.mxu1 %v2255_v35  ;;  %v2173_v42 = vpop.f32.mrf.mxu2  ;;  %v2196_v27 = vpop.f32.mrf.mxu3  ;;  %v2673_v14 = vld [vmem:[%s9628_s13 + $0x1b0] sm:$0xff]  ;;  %v2674_v35 = vld [vmem:[%s9628_s13 + $0x1b8] sm:$0xff] }
 0x5a7   :  { %v2174_v12 = vadd.f32 %v2173_v42, %v2052_v38  ;;  %v2197_v25 = vadd.f32 %v2196_v27, %v2053_v20  ;;  %v2667_v42 = vld [vmem:[%s9628_s13 + $0x180] sm:$0xff]  ;;  %v2668_v27 = vld [vmem:[%s9628_s13 + $0x188] sm:$0xff]  ;;  %2731 = vmatpush.msra.mxu1 %v2673_v14 }
 0x5a8   :  { %v2635_v14 = vld [vmem:[%s9628_s13 + $0x80] sm:$0xff] }
 0x5a9   :  { %v2252_v10 = vmul.f32 %v2174_v12, %v7459_v23  ;;  %v2253_v43 = vmul.f32 %v2197_v25, %v7461_v41  ;;  %v2222_v17 = vpop.f32.mrf.mxu0  ;;  %v2245_v11 = vpop.f32.mrf.mxu1  ;;  %v2669_v12 = vld [vmem:[%s9628_s13 + $0x190] sm:$0xff]  ;;  %v2670_v25 = vld [vmem:[%s9628_s13 + $0x198] sm:$0xff] }
 0x5aa   :  { %v2223_v36 = vadd.f32 %v2222_v17, %v2054_v3  ;;  %v2246_v49 = vadd.f32 %v2245_v11, %v2055_v18  ;;  %v2682_v18 = vld [vmem:[%s9628_s13 + $0x1f8] sm:$0xff]  ;;  %v2664_v17 = vld [vmem:[%s9628_s13 + $0x168] sm:$0xff]  ;;  %2732 = vmatpush.msra.mxu1 %v2669_v12 }
 0x5ab   :  { %2500 = vmatmul.f32.vlgmr.msra.gmra.mxu2 %v2252_v10  ;;  %2523 = vmatmul.f32.vlgmr.msra.gmra.mxu3 %v2253_v43  ;;  %v2663_v43 = vld [vmem:[%s9628_s13 + $0x160] sm:$0xff] }
 0x5ac   :  { %v2262_v57 = vmul.f32 %v2223_v36, %v7496_v19  ;;  %v2263_v33 = vmul.f32 %v2246_v49, %v7498_v37  ;;  %v2590_v19 = vld [vmem:[%s9679_s14 + $0x70] sm:$0xff]  ;;  %v2589_v37 = vld [vmem:[%s9679_s14 + $0x68] sm:$0xff] }
 0x5ad   :  { %2597 = vmatpush.msrb.mxu2 %v2590_v19  ;;  %v2665_v49 = vld [vmem:[%s9628_s13 + $0x170] sm:$0xff] }
 0x5ae   :  { %2549 = vmatmul.f32.gmra.mxu0 %v2262_v57  ;;  %2572 = vmatmul.f32.gmra.mxu1 %v2263_v33  ;;  %v2176_v51 = vpop.f32.mrf.mxu2  ;;  %v2199_v7 = vpop.f32.mrf.mxu3  ;;  %v2666_v57 = vld [vmem:[%s9628_s13 + $0x178] sm:$0xff]  ;;  %v2659_v33 = vld [vmem:[%s9628_s13 + $0x140] sm:$0xff] }
 0x5af   :  { %v2177_v52 = vadd.f32 %v2176_v51, %v2052_v38  ;;  %v2200_v60 = vadd.f32 %v2199_v7, %v2053_v20  ;;  %2598 = vmatpush.msrb.mxu2 %v2589_v37  ;;  %v2671_v38 = vld [vmem:[%s9628_s13 + $0x1a0] sm:$0xff]  ;;  %v2672_v20 = vld [vmem:[%s9628_s13 + $0x1a8] sm:$0xff]  ;;  %2733 = vmatpush.msra.mxu1 %v2665_v49  ;;  %v2657_v37 = vld [vmem:[%s9628_s13 + $0x130] sm:$0xff] }
 0x5b0   :  { %2685 = vmatpush.msrb.mxu3 %v2671_v38  ;;  %2708 = vmatpush.msra.mxu0 %v2672_v20  ;;  %v2660_v51 = vld [vmem:[%s9628_s13 + $0x148] sm:$0xff]  ;;  %v2642_v38 = vld [vmem:[%s9628_s13 + $0xb8] sm:$0xff] }
 0x5b1   :  { %v2260_v23 = vmul.f32 %v2177_v52, %v7532_v8  ;;  %v2261_v41 = vmul.f32 %v2200_v60, %v7534_v53  ;;  %v2588_v8 = vld [vmem:[%s9679_s14 + $0x60] sm:$0xff]  ;;  %v2587_v53 = vld [vmem:[%s9679_s14 + $0x58] sm:$0xff]  ;;  %v2661_v52 = vld [vmem:[%s9628_s13 + $0x150] sm:$0xff] }
 0x5b2   :  { %2599 = vmatpush.msrb.mxu2 %v2588_v8  ;;  %2686 = vmatpush.msrb.mxu3 %v2667_v42  ;;  %v2662_v60 = vld [vmem:[%s9628_s13 + $0x158] sm:$0xff]  ;;  %v2637_v42 = vld [vmem:[%s9628_s13 + $0x90] sm:$0xff] }
 0x5b3   :  { %2503 = vmatmul.f32.gmra.mxu2 %v2260_v23  ;;  %2526 = vmatmul.f32.gmra.mxu3 %v2261_v41  ;;  %v2655_v41 = vld [vmem:[%s9628_s13 + $0x120] sm:$0xff]  ;;  %v2658_v8 = vld [vmem:[%s9628_s13 + $0x138] sm:$0xff] }
 0x5b4   :  { %2600 = vmatpush.msrb.mxu2 %v2587_v53  ;;  %2709 = vmatpush.msra.mxu0 %v2668_v27  ;;  %v2651_v53 = vld [vmem:[%s9628_s13 + $0x100] sm:$0xff]  ;;  %v2634_v49 = vld [vmem:[%s9628_s13 + $0x78] sm:$0xff] }
 0x5b5   :  { %2687 = vmatpush.msrb.mxu3 %v2663_v43  ;;  %2734 = vmatpush.msra.mxu1 %v2661_v52 }
 0x5b6   :  { %2601 = vmatpush.msrb.mxu2 %v2586_v39  ;;  %2710 = vmatpush.msra.mxu0 %v2664_v17  ;;  %v2652_v39 = vld [vmem:[%s9628_s13 + $0x108] sm:$0xff] }
 0x5b7   :  { %2688 = vmatpush.msrb.mxu3 %v2659_v33  ;;  %2735 = vmatpush.msra.mxu1 %v2657_v37  ;;  %v2632_v17 = vld [vmem:[%s9628_s13 + $0x68] sm:$0xff]  ;;  %v2623_v37 = vld [vmem:[%s9628_s13 + $0x20] sm:$0xff] }
 0x5b8   :  { %2602 = vmatpush.msrb.mxu2 %v2585_v55  ;;  %2711 = vmatpush.msra.mxu0 %v2660_v51  ;;  %v2653_v55 = vld [vmem:[%s9628_s13 + $0x110] sm:$0xff]  ;;  %v2628_v51 = vld [vmem:[%s9628_s13 + $0x48] sm:$0xff] }
 0x5b9   :  { %2689 = vmatpush.msrb.mxu3 %v2655_v41  ;;  %2736 = vmatpush.msra.mxu1 %v2653_v55  ;;  %v2619_v55 = vld [vmem:[%s9628_s13] sm:$0xff] }
 0x5ba   :  { %2603 = vmatpush.msrb.mxu2 %v2584_v63  ;;  %2712 = vmatpush.msra.mxu0 %v2656_v54  ;;  %v2654_v63 = vld [vmem:[%s9628_s13 + $0x118] sm:$0xff] }
 0x5bb   :  { %2690 = vmatpush.msrb.mxu3 %v2651_v53  ;;  %v2625_v53 = vld [vmem:[%s9628_s13 + $0x30] sm:$0xff] }
 0x5bc   :  { %2604 = vmatpush.msrb.mxu2 %v2583_v6  ;;  %2713 = vmatpush.msra.mxu0 %v2652_v39  ;;  %v2626_v39 = vld [vmem:[%s9628_s13 + $0x38] sm:$0xff] }
 0x5be   :  { %2605 = vmatpush.msrb.mxu2 %v2582_v9 }
 0x5c0   :  { %2606 = vmatpush.msrb.mxu2 %v2581_v28  ;;  %v2647_v28 = vld [vmem:[%s9628_s13 + $0xe0] sm:$0xff] }
 0x5c1   :  { %2691 = vmatpush.msrb.mxu3 %v2647_v28  ;;  %v2798_v28 = vld [vmem:[%s9680_s30 + $0x78] sm:$0xff] }
 0x5c2   :  { %2607 = vmatpush.msrb.mxu2 %v2580_v50  ;;  %v2648_v50 = vld [vmem:[%s9628_s13 + $0xe8] sm:$0xff] }
 0x5c3   :  { %2714 = vmatpush.msra.mxu0 %v2648_v50  ;;  %v2797_v50 = vld [vmem:[%s9680_s30 + $0x70] sm:$0xff] }
 0x5c4   :  { %2608 = vmatpush.msrb.mxu2 %v2579_v21 }
 0x5c6   :  { %2609 = vmatpush.msrb.mxu2 %v2578_v40 }
 0x5c8   :  { %2610 = vmatpush.msrb.mxu2 %v2577_v22  ;;  %v2649_v22 = vld [vmem:[%s9628_s13 + $0xf0] sm:$0xff] }
 0x5c9   :  { %2737 = vmatpush.msra.mxu1 %v2649_v22  ;;  %v2830_v22 = vld [vmem:[%s9680_s30 + $0x178] sm:$0xff] }
 0x5ca   :  { %2611 = vmatpush.msrb.mxu2 %v2576_v24  ;;  %v2650_v24 = vld [vmem:[%s9628_s13 + $0xf8] sm:$0xff] }
 0x5cb   :  { %2738 = vmatpush.msra.mxu1 %v2645_v26  ;;  %v2811_v26 = vld [vmem:[%s9680_s30 + $0xe0] sm:$0xff] }
 0x5cc   :  { %2752 = vmatpush.msra.mxu2 %v2682_v18 }
 0x5ce   :  { %2753 = vmatpush.msra.mxu2 %v2678_v34  ;;  %v2641_v34 = vld [vmem:[%s9628_s13 + $0xb0] sm:$0xff] }
 0x5cf   :  { %2739 = vmatpush.msra.mxu1 %v2641_v34  ;;  %v2792_v34 = vld [vmem:[%s9680_s30 + $0x48] sm:$0xff] }
 0x5d0   :  { %2754 = vmatpush.msra.mxu2 %v2674_v35  ;;  %v2636_v35 = vld [vmem:[%s9628_s13 + $0x88] sm:$0xff] }
 0x5d1   :  { %2740 = vmatpush.msra.mxu1 %v2637_v42  ;;  %v2807_v42 = vld [vmem:[%s9680_s30 + $0xc0] sm:$0xff] }
 0x5d2   :  { %2755 = vmatpush.msra.mxu2 %v2670_v25  ;;  %v2638_v25 = vld [vmem:[%s9628_s13 + $0x98] sm:$0xff] }
 0x5d4   :  { %2756 = vmatpush.msra.mxu2 %v2666_v57  ;;  %v2627_v57 = vld [vmem:[%s9628_s13 + $0x40] sm:$0xff] }
 0x5d6   :  { %2757 = vmatpush.msra.mxu2 %v2662_v60  ;;  %v2630_v60 = vld [vmem:[%s9628_s13 + $0x58] sm:$0xff] }
 0x5d8   :  { %2758 = vmatpush.msra.mxu2 %v2658_v8  ;;  %v2624_v8 = vld [vmem:[%s9628_s13 + $0x28] sm:$0xff] }
 0x5da   :  { %2759 = vmatpush.msra.mxu2 %v2654_v63  ;;  %v2620_v63 = vld [vmem:[%s9628_s13 + $0x8] sm:$0xff] }
 0x5dc   :  { %2760 = vmatpush.msra.mxu2 %v2650_v24  ;;  %v2813_v24 = vld [vmem:[%s9680_s30 + $0xf0] sm:$0xff] }
 0x5de   :  { %2761 = vmatpush.msra.mxu2 %v2646_v13  ;;  %v2794_v13 = vld [vmem:[%s9680_s30 + $0x58] sm:$0xff] }
 0x5e0   :  { %2762 = vmatpush.msra.mxu2 %v2642_v38  ;;  %v2825_v38 = vld [vmem:[%s9680_s30 + $0x150] sm:$0xff] }
 0x5e2   :  { %2763 = vmatpush.msra.mxu2 %v2638_v25  ;;  %v2823_v25 = vld [vmem:[%s9680_s30 + $0x140] sm:$0xff] }
 0x5e4   :  { %2764 = vmatpush.msra.mxu2 %v2634_v49  ;;  %v5187_v49 = vld [vmem:[#allocation14] ss:$0 sm:$0xff] }
 0x5e6   :  { %2765 = vmatpush.msra.mxu2 %v2630_v60 }
 0x5e8   :  { %2766 = vmatpush.msra.mxu2 %v2626_v39  ;;  %v2818_v39 = vld [vmem:[%s9680_s30 + $0x118] sm:$0xff] }
 0x601   :  { %v2455_v56 = vpop.f32.mrf.mxu0  ;;  %v7703_v3 = vpop.f32.mrf.mxu1 }
 0x60b   :  { %v2458_v7 = vpop.f32.mrf.mxu0  ;;  %v2481_v19 = vpop.f32.mrf.mxu1 }
 0x60c   :  { %v2409_v61 = vpop.f32.mrf.mxu2  ;;  %v2432_v62 = vpop.f32.mrf.mxu3 }
 0x60d   :  { %v2433_v10 = vadd.f32 %v2432_v62, %v2409_v61  ;;  %v2643_v62 = vld [vmem:[%s9628_s13 + $0xc0] sm:$0xff] }
 0x60e   :  { %2692 = vmatpush.msrb.mxu3 %v2643_v62  ;;  %v2812_v62 = vld [vmem:[%s9680_s30 + $0xe8] sm:$0xff] }
 0x60f   :  { %v2456_v23 = vadd.f32 %v2455_v56, %v2433_v10  ;;  %v2644_v56 = vld [vmem:[%s9628_s13 + $0xc8] sm:$0xff]  ;;  %v2631_v10 = vld [vmem:[%s9628_s13 + $0x60] sm:$0xff] }
 0x610   :  { %2715 = vmatpush.msra.mxu0 %v2644_v56  ;;  %2693 = vmatpush.msrb.mxu3 %v2639_v4  ;;  %v2795_v56 = vld [vmem:[%s9680_s30 + $0x60] sm:$0xff]  ;;  %v2793_v4 = vld [vmem:[%s9680_s30 + $0x50] sm:$0xff] }
 0x611   :  { %v2479_v9 = vadd.f32 %v7703_v3, %v2456_v23 }
 0x612   :  { %2716 = vmatpush.msra.mxu0 %v2640_v29  ;;  %2694 = vmatpush.msrb.mxu3 %v2635_v14  ;;  %v2826_v29 = vld [vmem:[%s9680_s30 + $0x158] sm:$0xff]  ;;  %v2791_v14 = vld [vmem:[%s9680_s30 + $0x40] sm:$0xff] }
 0x614   :  { %2717 = vmatpush.msra.mxu0 %v2636_v35  ;;  %2695 = vmatpush.msrb.mxu3 %v2631_v10  ;;  %v2824_v35 = vld [vmem:[%s9680_s30 + $0x148] sm:$0xff]  ;;  %v2837_v10 = vld [vmem:[%s9680_s30 + $0x1b0] sm:$0xff] }
 0x616   :  { %v2412_v11 = vpop.f32.mrf.mxu2  ;;  %v2435_v36 = vpop.f32.mrf.mxu3  ;;  %2718 = vmatpush.msra.mxu0 %v2632_v17  ;;  %2696 = vmatpush.msrb.mxu3 %v2627_v57  ;;  %v2789_v17 = vld [vmem:[%s9680_s30 + $0x30] sm:$0xff] }
 0x617   :  { %v2436_v6 = vadd.f32 %v2435_v36, %v2412_v11  ;;  %v2633_v11 = vld [vmem:[%s9628_s13 + $0x70] sm:$0xff] }
 0x618   :  { %2741 = vmatpush.msra.mxu1 %v2633_v11  ;;  %2719 = vmatpush.msra.mxu0 %v2628_v51  ;;  %v2822_v11 = vld [vmem:[%s9680_s30 + $0x138] sm:$0xff]  ;;  %v2805_v57 = vld [vmem:[%s9680_s30 + $0xb0] sm:$0xff] }
 0x619   :  { %v2459_v3 = vadd.f32 %v2458_v7, %v2436_v6  ;;  %v2629_v7 = vld [vmem:[%s9628_s13 + $0x50] sm:$0xff]  ;;  %2697 = vmatpush.msrb.mxu3 %v2623_v37  ;;  %v2819_v37 = vld [vmem:[%s9680_s30 + $0x120] sm:$0xff] }
 0x61a   :  { %2742 = vmatpush.msra.mxu1 %v2629_v7  ;;  %2720 = vmatpush.msra.mxu0 %v2624_v8  ;;  %v2621_v6 = vld [vmem:[%s9628_s13 + $0x10] sm:$0xff]  ;;  %v2804_v7 = vld [vmem:[%s9680_s30 + $0xa8] sm:$0xff]  ;;  %v2802_v8 = vld [vmem:[%s9680_s30 + $0x98] sm:$0xff] }
 0x61b   :  { %v2482_v12 = vadd.f32 %v2481_v19, %v2459_v3  ;;  %2698 = vmatpush.msrb.mxu3 %v2619_v55  ;;  %v2827_v3 = vld [vmem:[%s9680_s30 + $0x160] sm:$0xff]  ;;  %v2821_v51 = vld [vmem:[%s9680_s30 + $0x130] sm:$0xff] }
 0x61c   :  { %2743 = vmatpush.msra.mxu1 %v2625_v53  ;;  %2721 = vmatpush.msra.mxu0 %v2620_v63  ;;  %v2785_v53 = vld [vmem:[%s9680_s30 + $0x10] sm:$0xff] }
 0x61d   :  { %2846 = vmatpush.msra.mxu3 %v2798_v28  ;;  %v2801_v55 = vld [vmem:[%s9680_s30 + $0x90] sm:$0xff] }
 0x61e   :  { %2744 = vmatpush.msra.mxu1 %v2621_v6  ;;  %v2817_v28 = vld [vmem:[%s9680_s30 + $0x110] sm:$0xff] }
 0x61f   :  { %2847 = vmatpush.msra.mxu3 %v2797_v50  ;;  %v2783_v50 = vld [vmem:[%s9680_s30] sm:$0xff] }
 0x620   :  { %2892 = vmatpush.msrb.mxu1 %v2830_v22  ;;  %v2953_v22 = vld [vmem:[%s9631_s16 + $0x68] sm:$0xff] }
 0x623   :  { %v2547_v5 = vpop.f32.mrf.mxu0  ;;  %v2570_v32 = vpop.f32.mrf.mxu1 }
 0x62b   :  { %v2550_v23 = vpop.f32.mrf.mxu0  ;;  %v2573_v54 = vpop.f32.mrf.mxu1 }
 0x62e   :  { %v2501_v21 = vpop.f32.mrf.mxu2  ;;  %v2524_v40 = vpop.f32.mrf.mxu3 }
 0x62f   :  { %v2502_v61 = vadd.f32 %v2501_v21, %v2479_v9  ;;  %v2622_v9 = vld [vmem:[%s9628_s13 + $0x18] sm:$0xff] }
 0x630   :  { %2767 = vmatpush.msra.mxu2 %v2622_v9  ;;  %v2814_v21 = vld [vmem:[%s9680_s30 + $0xf8] sm:$0xff]  ;;  %v2784_v9 = vld [vmem:[%s9680_s30 + $0x8] sm:$0xff] }
 0x631   :  { %v2525_v18 = vadd.f32 %v2524_v40, %v2502_v61  ;;  %v2796_v40 = vld [vmem:[%s9680_s30 + $0x68] sm:$0xff]  ;;  %2869 = vmatpush.msrb.mxu0 %v2814_v21  ;;  %v2829_v61 = vld [vmem:[%s9680_s30 + $0x170] sm:$0xff]  ;;  %v2955_v21 = vld [vmem:[%s9631_s16 + $0x78] sm:$0xff] }
 0x632   :  { %2848 = vmatpush.msra.mxu3 %v2796_v40  ;;  %2893 = vmatpush.msrb.mxu1 %v2829_v61  ;;  %v2954_v40 = vld [vmem:[%s9631_s16 + $0x70] sm:$0xff]  ;;  %v2816_v61 = vld [vmem:[%s9680_s30 + $0x108] sm:$0xff] }
 0x633   :  { %v2548_v20 = vadd.f32 %v2547_v5, %v2525_v18  ;;  %2870 = vmatpush.msrb.mxu0 %v2813_v24  ;;  %v2828_v5 = vld [vmem:[%s9680_s30 + $0x168] sm:$0xff]  ;;  %v2810_v18 = vld [vmem:[%s9680_s30 + $0xd8] sm:$0xff] }
 0x634   :  { %2849 = vmatpush.msra.mxu3 %v2795_v56  ;;  %2894 = vmatpush.msrb.mxu1 %v2828_v5  ;;  %v2800_v24 = vld [vmem:[%s9680_s30 + $0x88] sm:$0xff]  ;;  %v2952_v56 = vld [vmem:[%s9631_s16 + $0x60] sm:$0xff] }
 0x635   :  { %v2571_v27 = vadd.f32 %v2570_v32, %v2548_v20  ;;  %2871 = vmatpush.msrb.mxu0 %v2812_v62  ;;  %v2809_v32 = vld [vmem:[%s9680_s30 + $0xd0] sm:$0xff]  ;;  %v2808_v20 = vld [vmem:[%s9680_s30 + $0xc8] sm:$0xff]  ;;  %v2835_v62 = vld [vmem:[%s9680_s30 + $0x1a0] sm:$0xff] }
 0x636   :  { %v2504_v43 = vpop.f32.mrf.mxu2  ;;  %v2527_v33 = vpop.f32.mrf.mxu3  ;;  %2850 = vmatpush.msra.mxu3 %v2794_v13  ;;  %2895 = vmatpush.msrb.mxu1 %v2827_v3  ;;  %v2799_v5 = vld [vmem:[%s9680_s30 + $0x80] sm:$0xff]  ;;  %v2834_v13 = vld [vmem:[%s9680_s30 + $0x198] sm:$0xff] }
 0x637   :  { %v2505_v36 = vadd.f32 %v2504_v43, %v2482_v12  ;;  %2612 = vmatmul.f32.vlgmr.msrb.gmra.mxu2 %v2571_v27  ;;  %2872 = vmatpush.msrb.mxu0 %v2811_v26  ;;  %v2838_v27 = vld [vmem:[%s9680_s30 + $0x1b8] sm:$0xff]  ;;  %v2815_v26 = vld [vmem:[%s9680_s30 + $0x100] sm:$0xff] }
 0x638   :  { %2851 = vmatpush.msra.mxu3 %v2793_v4  ;;  %2896 = vmatpush.msrb.mxu1 %v2826_v29  ;;  %v2790_v12 = vld [vmem:[%s9680_s30 + $0x38] sm:$0xff]  ;;  %v2950_v4 = vld [vmem:[%s9631_s16 + $0x50] sm:$0xff]  ;;  %v2832_v29 = vld [vmem:[%s9680_s30 + $0x188] sm:$0xff] }
 0x639   :  { %v2528_v52 = vadd.f32 %v2527_v33, %v2505_v36  ;;  %2873 = vmatpush.msrb.mxu0 %v2810_v18  ;;  %2923 = vmatpush.msrb.mxu2 %v2838_v27  ;;  %v2806_v43 = vld [vmem:[%s9680_s30 + $0xb8] sm:$0xff]  ;;  %v2836_v36 = vld [vmem:[%s9680_s30 + $0x1a8] sm:$0xff]  ;;  %v2833_v18 = vld [vmem:[%s9680_s30 + $0x190] sm:$0xff] }
 0x63a   :  { %2852 = vmatpush.msra.mxu3 %v2792_v34  ;;  %2897 = vmatpush.msrb.mxu1 %v2825_v38  ;;  %v2788_v33 = vld [vmem:[%s9680_s30 + $0x28] sm:$0xff]  ;;  %v2951_v3 = vld [vmem:[%s9631_s16 + $0x58] sm:$0xff]  ;;  %v2831_v34 = vld [vmem:[%s9680_s30 + $0x180] sm:$0xff] }
 0x63b   :  { %v2551_v41 = vadd.f32 %v2550_v23, %v2528_v52  ;;  %2874 = vmatpush.msrb.mxu0 %v2809_v32  ;;  %2924 = vmatpush.msrb.mxu2 %v2837_v10  ;;  %v2787_v23 = vld [vmem:[%s9680_s30 + $0x20] sm:$0xff]  ;;  %v2949_v32 = vld [vmem:[%s9631_s16 + $0x48] sm:$0xff]  ;;  %v2943_v27 = vld [vmem:[%s9631_s16 + $0x18] sm:$0xff] }
 0x63c   :  { %2853 = vmatpush.msra.mxu3 %v2791_v14  ;;  %2898 = vmatpush.msrb.mxu1 %v2824_v35  ;;  %v2948_v38 = vld [vmem:[%s9631_s16 + $0x40] sm:$0xff]  ;;  %v2946_v14 = vld [vmem:[%s9631_s16 + $0x30] sm:$0xff]  ;;  %v2945_v35 = vld [vmem:[%s9631_s16 + $0x28] sm:$0xff] }
 0x63d   :  { %v2574_v19 = vadd.f32 %v2573_v54, %v2551_v41  ;;  %2875 = vmatpush.msrb.mxu0 %v2808_v20  ;;  %2925 = vmatpush.msrb.mxu2 %v2836_v36  ;;  %v2820_v41 = vld [vmem:[%s9680_s30 + $0x128] sm:$0xff]  ;;  %v2803_v54 = vld [vmem:[%s9680_s30 + $0xa0] sm:$0xff]  ;;  %v2947_v20 = vld [vmem:[%s9631_s16 + $0x38] sm:$0xff] }
 0x63e   :  { %2854 = vmatpush.msra.mxu3 %v2790_v12  ;;  %2899 = vmatpush.msrb.mxu1 %v2823_v25  ;;  %v2942_v12 = vld [vmem:[%s9631_s16 + $0x10] sm:$0xff]  ;;  %v2941_v25 = vld [vmem:[%s9631_s16 + $0x8] sm:$0xff]  ;;  %v2940_v10 = vld [vmem:[%s9631_s16] sm:$0xff] }
 0x63f   :  { %2615 = vmatmul.f32.gmra.mxu2 %v2574_v19  ;;  %2876 = vmatpush.msrb.mxu0 %v2807_v42  ;;  %v2786_v19 = vld [vmem:[%s9680_s30 + $0x18] sm:$0xff]  ;;  %v2944_v42 = vld [vmem:[%s9631_s16 + $0x20] sm:$0xff]  ;;  %v3108_v36 = vld [vmem:[#allocation5 + $0x7c0] sm:$0xff] }
 0x640   :  { %2855 = vmatpush.msra.mxu3 %v2789_v17  ;;  %2900 = vmatpush.msrb.mxu1 %v2822_v11 }
 0x641   :  { %2877 = vmatpush.msrb.mxu0 %v2806_v43  ;;  %2926 = vmatpush.msrb.mxu2 %v2835_v62  ;;  %v3095_v62 = vld [vmem:[#allocation5 + $0x758] sm:$0xff] }
 0x642   :  { %2856 = vmatpush.msra.mxu3 %v2788_v33  ;;  %2901 = vmatpush.msrb.mxu1 %v2821_v51  ;;  %v3100_v51 = vld [vmem:[#allocation5 + $0x780] sm:$0xff] }
 0x643   :  { %2878 = vmatpush.msrb.mxu0 %v2805_v57  ;;  %2927 = vmatpush.msrb.mxu2 %v2834_v13  ;;  %v3110_v57 = vld [vmem:[#allocation5 + $0x7d0] sm:$0xff]  ;;  %v3087_v13 = vld [vmem:[#allocation5 + $0x718] sm:$0xff] }
 0x644   :  { %2857 = vmatpush.msra.mxu3 %v2787_v23  ;;  %2902 = vmatpush.msrb.mxu1 %v2820_v41  ;;  %v3092_v23 = vld [vmem:[#allocation5 + $0x740] sm:$0xff]  ;;  %v3093_v41 = vld [vmem:[#allocation5 + $0x748] sm:$0xff] }
 0x645   :  { %2879 = vmatpush.msrb.mxu0 %v2804_v7  ;;  %2928 = vmatpush.msrb.mxu2 %v2833_v18  ;;  %v3101_v7 = vld [vmem:[#allocation5 + $0x788] sm:$0xff] }
 0x646   :  { %2858 = vmatpush.msra.mxu3 %v2786_v19  ;;  %2903 = vmatpush.msrb.mxu1 %v2819_v37  ;;  %v3084_v19 = vld [vmem:[#allocation5 + $0x700] sm:$0xff] }
 0x647   :  { %2880 = vmatpush.msrb.mxu0 %v2803_v54  ;;  %2929 = vmatpush.msrb.mxu2 %v2832_v29  ;;  %v3094_v54 = vld [vmem:[#allocation5 + $0x750] sm:$0xff] }
 0x648   :  { %2859 = vmatpush.msra.mxu3 %v2785_v53  ;;  %2904 = vmatpush.msrb.mxu1 %v2818_v39 }
 0x649   :  { %2881 = vmatpush.msrb.mxu0 %v2802_v8  ;;  %2930 = vmatpush.msrb.mxu2 %v2831_v34  ;;  %v3085_v8 = vld [vmem:[#allocation5 + $0x708] sm:$0xff]  ;;  %v3079_v34 = vld [vmem:[#allocation5 + $0x6d8] sm:$0xff] }
 0x64a   :  { %2860 = vmatpush.msra.mxu3 %v2784_v9  ;;  %2905 = vmatpush.msrb.mxu1 %v2817_v28  ;;  %v3086_v28 = vld [vmem:[#allocation5 + $0x710] sm:$0xff] }
 0x64b   :  { %2882 = vmatpush.msrb.mxu0 %v2801_v55  ;;  %v3111_v55 = vld [vmem:[#allocation5 + $0x7d8] sm:$0xff] }
 0x64c   :  { %2861 = vmatpush.msra.mxu3 %v2783_v50  ;;  %2906 = vmatpush.msrb.mxu1 %v2816_v61  ;;  %v3077_v61 = vld [vmem:[#allocation5 + $0x6c8] sm:$0xff] }
 0x64d   :  { %2883 = vmatpush.msrb.mxu0 %v2800_v24  ;;  %v3076_v24 = vld [vmem:[#allocation5 + $0x6c0] sm:$0xff] }
 0x64e   :  { %2907 = vmatpush.msrb.mxu1 %v2815_v26  ;;  %v3069_v26 = vld [vmem:[#allocation5 + $0x688] sm:$0xff] }
 0x64f   :  { %2884 = vmatpush.msrb.mxu0 %v2799_v5  ;;  %v3068_v5 = vld [vmem:[#allocation5 + $0x680] sm:$0xff] }
 0x6ba   :  { %v2613_v52 = vpop.f32.mrf.mxu2 }
 0x6bb   :  { %v7994_v60 = vadd.f32 %v5187_v49, %v2613_v52  ;;  %v3102_v52 = vld [vmem:[#allocation5 + $0x790] sm:$0xff] }
 0x6bd   :  { %2699 = vmatmul.f32.vlgmr.msrb.gmra.mxu3 %v7994_v60  ;;  %2722 = vmatmul.f32.vlgmr.msra.gmra.mxu0 %v7994_v60 }
 0x6be   :  { %2745 = vmatmul.f32.vlgmr.msra.gmra.mxu1 %v7994_v60  ;;  %2768 = vmatmul.f32.vlgmr.msra.gmra.mxu2 %v7994_v60 }
 0x6bf   :  { %2956 = vmatpush.msrb.mxu3 %v2955_v21  ;;  %3135 = vmatpush.msra.mxu2 %v3108_v36  ;;  %v3036_v36 = vld [vmem:[#allocation5 + $0x580] sm:$0xff] }
 0x6c0   :  { %3181 = vmatpush.msra.mxu1 %v3110_v57  ;;  %v3047_v57 = vld [vmem:[#allocation5 + $0x5d8] sm:$0xff] }
 0x6c1   :  { %2957 = vmatpush.msrb.mxu3 %v2954_v40  ;;  %3136 = vmatpush.msra.mxu2 %v3100_v51  ;;  %v3103_v40 = vld [vmem:[#allocation5 + $0x798] sm:$0xff]  ;;  %v3028_v51 = vld [vmem:[#allocation5 + $0x540] sm:$0xff] }
 0x6c2   :  { %v2616_v63 = vpop.f32.mrf.mxu2  ;;  %3182 = vmatpush.msra.mxu1 %v3102_v52  ;;  %v3039_v52 = vld [vmem:[#allocation5 + $0x598] sm:$0xff] }
 0x6c3   :  { %v8027_v6 = vadd.f32 %v5187_v49, %v2616_v63  ;;  %2958 = vmatpush.msrb.mxu3 %v2953_v22  ;;  %v3109_v49 = vld [vmem:[#allocation5 + $0x7c8] sm:$0xff]  ;;  %3137 = vmatpush.msra.mxu2 %v3092_v23  ;;  %v3030_v23 = vld [vmem:[#allocation5 + $0x550] sm:$0xff] }
 0x6c4   :  { %3158 = vmatpush.msra.mxu0 %v3109_v49  ;;  %3183 = vmatpush.msra.mxu1 %v3094_v54  ;;  %v3037_v49 = vld [vmem:[#allocation5 + $0x588] sm:$0xff] }
 0x6c5   :  { %2702 = vmatmul.f32.gmra.mxu3 %v8027_v6  ;;  %2725 = vmatmul.f32.gmra.mxu0 %v8027_v6  ;;  %v3021_v54 = vld [vmem:[#allocation5 + $0x508] sm:$0xff] }
 0x6c6   :  { %2748 = vmatmul.f32.gmra.mxu1 %v8027_v6  ;;  %2771 = vmatmul.f32.gmra.mxu2 %v8027_v6 }
 0x6c7   :  { %2959 = vmatpush.msrb.mxu3 %v2952_v56  ;;  %3159 = vmatpush.msra.mxu0 %v3101_v7  ;;  %v3078_v56 = vld [vmem:[#allocation5 + $0x6d0] sm:$0xff]  ;;  %v3029_v7 = vld [vmem:[#allocation5 + $0x548] sm:$0xff] }
 0x6c8   :  { %3138 = vmatpush.msra.mxu2 %v3084_v19  ;;  %3184 = vmatpush.msra.mxu1 %v3086_v28  ;;  %v3031_v19 = vld [vmem:[#allocation5 + $0x558] sm:$0xff]  ;;  %v3005_v28 = vld [vmem:[#allocation5 + $0x488] sm:$0xff] }
 0x6c9   :  { %2960 = vmatpush.msrb.mxu3 %v2951_v3  ;;  %3160 = vmatpush.msra.mxu0 %v3093_v41  ;;  %v3070_v3 = vld [vmem:[#allocation5 + $0x690] sm:$0xff]  ;;  %v3020_v41 = vld [vmem:[#allocation5 + $0x500] sm:$0xff] }
 0x6ca   :  { %3139 = vmatpush.msra.mxu2 %v3076_v24  ;;  %3185 = vmatpush.msra.mxu1 %v3078_v56  ;;  %v2998_v24 = vld [vmem:[#allocation5 + $0x450] sm:$0xff]  ;;  %v2989_v56 = vld [vmem:[#allocation5 + $0x408] sm:$0xff] }
 0x6cb   :  { %2961 = vmatpush.msrb.mxu3 %v2950_v4  ;;  %3161 = vmatpush.msra.mxu0 %v3085_v8  ;;  %v3060_v4 = vld [vmem:[#allocation5 + $0x640] sm:$0xff] }
 0x6cc   :  { %3140 = vmatpush.msra.mxu2 %v3068_v5  ;;  %3186 = vmatpush.msra.mxu1 %v3070_v3  ;;  %v3012_v8 = vld [vmem:[#allocation5 + $0x4c0] sm:$0xff]  ;;  %v2990_v5 = vld [vmem:[#allocation5 + $0x410] sm:$0xff]  ;;  %v3113_v3 = vld [vmem:[#allocation5 + $0x7e8] sm:$0xff] }
 0x6cd   :  { %2962 = vmatpush.msrb.mxu3 %v2949_v32  ;;  %3162 = vmatpush.msra.mxu0 %v3077_v61  ;;  %v2999_v61 = vld [vmem:[#allocation5 + $0x458] sm:$0xff] }
 0x6ce   :  { %3141 = vmatpush.msra.mxu2 %v3060_v4  ;;  %v3115_v4 = vld [vmem:[#allocation5 + $0x7f8] sm:$0xff] }
 0x6cf   :  { %2963 = vmatpush.msrb.mxu3 %v2948_v38  ;;  %3163 = vmatpush.msra.mxu0 %v3069_v26  ;;  %v2991_v26 = vld [vmem:[#allocation5 + $0x418] sm:$0xff] }
 0x6d1   :  { %2964 = vmatpush.msrb.mxu3 %v2947_v20  ;;  %v3061_v20 = vld [vmem:[#allocation5 + $0x648] sm:$0xff] }
 0x6d2   :  { %3164 = vmatpush.msra.mxu0 %v3061_v20  ;;  %v3096_v20 = vld [vmem:[#allocation5 + $0x760] sm:$0xff] }
 0x6d3   :  { %2965 = vmatpush.msrb.mxu3 %v2946_v14  ;;  %v3062_v14 = vld [vmem:[#allocation5 + $0x650] sm:$0xff] }
 0x6d4   :  { %3187 = vmatpush.msra.mxu1 %v3062_v14  ;;  %v3097_v14 = vld [vmem:[#allocation5 + $0x768] sm:$0xff] }
 0x6d5   :  { %2966 = vmatpush.msrb.mxu3 %v2945_v35  ;;  %v3071_v35 = vld [vmem:[#allocation5 + $0x698] sm:$0xff] }
 0x6d7   :  { %2967 = vmatpush.msrb.mxu3 %v2944_v42  ;;  %v3052_v42 = vld [vmem:[#allocation5 + $0x600] sm:$0xff] }
 0x6d8   :  { %3142 = vmatpush.msra.mxu2 %v3052_v42  ;;  %v3099_v42 = vld [vmem:[#allocation5 + $0x778] sm:$0xff] }
 0x6d9   :  { %2968 = vmatpush.msrb.mxu3 %v2943_v27  ;;  %v3053_v27 = vld [vmem:[#allocation5 + $0x608] sm:$0xff] }
 0x6da   :  { %3165 = vmatpush.msra.mxu0 %v3053_v27  ;;  %v3088_v27 = vld [vmem:[#allocation5 + $0x720] sm:$0xff] }
 0x6db   :  { %2969 = vmatpush.msrb.mxu3 %v2942_v12  ;;  %v3054_v12 = vld [vmem:[#allocation5 + $0x610] sm:$0xff] }
 0x6dc   :  { %3188 = vmatpush.msra.mxu1 %v3054_v12  ;;  %v3089_v12 = vld [vmem:[#allocation5 + $0x728] sm:$0xff] }
 0x6dd   :  { %2970 = vmatpush.msrb.mxu3 %v2941_v25  ;;  %v3063_v25 = vld [vmem:[#allocation5 + $0x658] sm:$0xff] }
 0x6df   :  { %2971 = vmatpush.msrb.mxu3 %v2940_v10  ;;  %v3044_v10 = vld [vmem:[#allocation5 + $0x5c0] sm:$0xff] }
 0x6e0   :  { %3143 = vmatpush.msra.mxu2 %v3044_v10  ;;  %v3091_v10 = vld [vmem:[#allocation5 + $0x738] sm:$0xff] }
 0x6e2   :  { %3144 = vmatpush.msra.mxu2 %v3036_v36  ;;  %v3083_v36 = vld [vmem:[#allocation5 + $0x6f8] sm:$0xff] }
 0x6e4   :  { %3145 = vmatpush.msra.mxu2 %v3028_v51  ;;  %v3075_v51 = vld [vmem:[#allocation5 + $0x6b8] sm:$0xff] }
 0x6e6   :  { %3146 = vmatpush.msra.mxu2 %v3020_v41  ;;  %v3067_v41 = vld [vmem:[#allocation5 + $0x678] sm:$0xff] }
 0x6e8   :  { %3147 = vmatpush.msra.mxu2 %v3012_v8  ;;  %v3059_v8 = vld [vmem:[#allocation5 + $0x638] sm:$0xff] }
 0x73a   :  { %v2723_v43 = vpop.f32.mrf.mxu0 }
 0x73b   :  { %v2776_v17 = vmul.f32 %v2723_v43, %v6659_v46  ;;  %v2746_v11 = vpop.f32.mrf.mxu1  ;;  %v3045_v43 = vld [vmem:[#allocation5 + $0x5c8] sm:$0xff] }
 0x73c   :  { %v2777_v33 = vmul.f32 %v2746_v11, %v6661_v48  ;;  %v3055_v11 = vld [vmem:[#allocation5 + $0x618] sm:$0xff]  ;;  %3166 = vmatpush.msra.mxu0 %v3045_v43  ;;  %v3080_v43 = vld [vmem:[#allocation5 + $0x6e0] sm:$0xff] }
 0x73d   :  { %2885 = vmatmul.f32.vlgmr.msrb.gmra.mxu0 %v2776_v17  ;;  %v3046_v17 = vld [vmem:[#allocation5 + $0x5d0] sm:$0xff] }
 0x73e   :  { %2908 = vmatmul.f32.vlgmr.msrb.gmra.mxu1 %v2777_v33  ;;  %v3038_v33 = vld [vmem:[#allocation5 + $0x590] sm:$0xff]  ;;  %3167 = vmatpush.msra.mxu0 %v3037_v49  ;;  %v3072_v49 = vld [vmem:[#allocation5 + $0x6a0] sm:$0xff] }
 0x73f   :  { %3189 = vmatpush.msra.mxu1 %v3046_v17  ;;  %v3081_v17 = vld [vmem:[#allocation5 + $0x6e8] sm:$0xff] }
 0x740   :  { %v2700_v37 = vpop.f32.mrf.mxu3  ;;  %3168 = vmatpush.msra.mxu0 %v3029_v7  ;;  %v3064_v7 = vld [vmem:[#allocation5 + $0x660] sm:$0xff] }
 0x741   :  { %v2775_v53 = vmul.f32 %v2700_v37, %v6710_v1  ;;  %v2769_v39 = vpop.f32.mrf.mxu2  ;;  %3190 = vmatpush.msra.mxu1 %v3038_v33  ;;  %v3022_v37 = vld [vmem:[#allocation5 + $0x510] sm:$0xff] }
 0x742   :  { %v2778_v63 = vmul.f32 %v2769_v39, %v6787_v30  ;;  %v2726_v9 = vpop.f32.mrf.mxu0  ;;  %3169 = vmatpush.msra.mxu0 %v3021_v54  ;;  %v3023_v39 = vld [vmem:[#allocation5 + $0x518] sm:$0xff]  ;;  %v3074_v33 = vld [vmem:[#allocation5 + $0x6b0] sm:$0xff]  ;;  %v3056_v54 = vld [vmem:[#allocation5 + $0x620] sm:$0xff] }
 0x743   :  { %v2780_v50 = vmul.f32 %v2726_v9, %v6692_v58  ;;  %v2749_v21 = vpop.f32.mrf.mxu1  ;;  %2862 = vmatmul.f32.vlgmr.msra.gmra.mxu3 %v2775_v53  ;;  %3191 = vmatpush.msra.mxu1 %v3030_v23  ;;  %v3013_v53 = vld [vmem:[#allocation5 + $0x4c8] sm:$0xff]  ;;  %v3015_v9 = vld [vmem:[#allocation5 + $0x4d8] sm:$0xff]  ;;  %v3066_v23 = vld [vmem:[#allocation5 + $0x670] sm:$0xff] }
 0x744   :  { %v2781_v22 = vmul.f32 %v2749_v21, %v6694_v59  ;;  %5071 = vmatmul.msk.f32.vlgmr.msrb.gmra.mxu2 %vm2839_vm0, %v2778_v63  ;;  %3204 = vmatpush.msra.mxu3 %v3111_v55  ;;  %v3014_v55 = vld [vmem:[#allocation5 + $0x4d0] sm:$0xff]  ;;  %v3004_v63 = vld [vmem:[#allocation5 + $0x480] sm:$0xff]  ;;  %v3007_v21 = vld [vmem:[#allocation5 + $0x498] sm:$0xff] }
 0x745   :  { %2888 = vmatmul.f32.gmra.mxu0 %v2780_v50  ;;  %3192 = vmatpush.msra.mxu1 %v3022_v37  ;;  %v3006_v50 = vld [vmem:[#allocation5 + $0x490] sm:$0xff] }
 0x746   :  { %2911 = vmatmul.f32.gmra.mxu1 %v2781_v22  ;;  %3205 = vmatpush.msra.mxu3 %v3103_v40  ;;  %v2996_v40 = vld [vmem:[#allocation5 + $0x440] sm:$0xff]  ;;  %v2997_v22 = vld [vmem:[#allocation5 + $0x448] sm:$0xff]  ;;  %v3058_v37 = vld [vmem:[#allocation5 + $0x630] sm:$0xff] }
 0x747   :  { %3170 = vmatpush.msra.mxu0 %v3013_v53  ;;  %3193 = vmatpush.msra.mxu1 %v3014_v55  ;;  %v3048_v53 = vld [vmem:[#allocation5 + $0x5e0] sm:$0xff]  ;;  %v3050_v55 = vld [vmem:[#allocation5 + $0x5f0] sm:$0xff] }
 0x748   :  { %v2703_v18 = vpop.f32.mrf.mxu3  ;;  %3206 = vmatpush.msra.mxu3 %v3095_v62  ;;  %3148 = vmatpush.msra.mxu2 %v3004_v63  ;;  %v2988_v62 = vld [vmem:[#allocation5 + $0x400] sm:$0xff]  ;;  %v3051_v63 = vld [vmem:[#allocation5 + $0x5f8] sm:$0xff] }
 0x749   :  { %v2779_v29 = vmul.f32 %v2703_v18, %v6748_v16  ;;  %v2772_v32 = vpop.f32.mrf.mxu2  ;;  %3171 = vmatpush.msra.mxu0 %v3005_v28  ;;  %3194 = vmatpush.msra.mxu1 %v3006_v50  ;;  %v3114_v18 = vld [vmem:[#allocation5 + $0x7f0] sm:$0xff]  ;;  %v3041_v28 = vld [vmem:[#allocation5 + $0x5a8] sm:$0xff] }
 0x74a   :  { %v2782_v38 = vmul.f32 %v2772_v32, %v6825_v44  ;;  %3207 = vmatpush.msra.mxu3 %v3087_v13  ;;  %3149 = vmatpush.msra.mxu2 %v2996_v40  ;;  %v3112_v13 = vld [vmem:[#allocation5 + $0x7e0] sm:$0xff]  ;;  %v3105_v32 = vld [vmem:[#allocation5 + $0x7a8] sm:$0xff]  ;;  %v3042_v50 = vld [vmem:[#allocation5 + $0x5b0] sm:$0xff] }
 0x74b   :  { %2865 = vmatmul.f32.gmra.mxu3 %v2779_v29  ;;  %3172 = vmatpush.msra.mxu0 %v2997_v22  ;;  %v3104_v29 = vld [vmem:[#allocation5 + $0x7a0] sm:$0xff]  ;;  %v3033_v22 = vld [vmem:[#allocation5 + $0x568] sm:$0xff] }
 0x74c   :  { %5072 = vmatmul.msk.f32.gmra.mxu2 %vm2839_vm0, %v2782_v38  ;;  %3208 = vmatpush.msra.mxu3 %v3079_v34  ;;  %v3106_v34 = vld [vmem:[#allocation5 + $0x7b0] sm:$0xff]  ;;  %v3107_v38 = vld [vmem:[#allocation5 + $0x7b8] sm:$0xff]  ;;  %v3032_v40 = vld [vmem:[#allocation5 + $0x560] sm:$0xff] }
 0x74d   :  { %3195 = vmatpush.msra.mxu1 %v2998_v24  ;;  %3150 = vmatpush.msra.mxu2 %v2988_v62  ;;  %v3034_v24 = vld [vmem:[#allocation5 + $0x570] sm:$0xff]  ;;  %v3024_v62 = vld [vmem:[#allocation5 + $0x520] sm:$0xff] }
 0x74e   :  { %3209 = vmatpush.msra.mxu3 %v3071_v35  ;;  %3173 = vmatpush.msra.mxu0 %v2989_v56  ;;  %v3098_v35 = vld [vmem:[#allocation5 + $0x770] sm:$0xff]  ;;  %v3025_v56 = vld [vmem:[#allocation5 + $0x528] sm:$0xff] }
 0x74f   :  { %3196 = vmatpush.msra.mxu1 %v2990_v5  ;;  %3227 = vmatpush.msrb.mxu2 %v3112_v13  ;;  %v3026_v5 = vld [vmem:[#allocation5 + $0x530] sm:$0xff]  ;;  %v3016_v13 = vld [vmem:[#allocation5 + $0x4e0] sm:$0xff] }
 0x750   :  { %3210 = vmatpush.msra.mxu3 %v3063_v25  ;;  %3250 = vmatpush.msrb.mxu0 %v3113_v3  ;;  %v3090_v25 = vld [vmem:[#allocation5 + $0x730] sm:$0xff]  ;;  %v3017_v3 = vld [vmem:[#allocation5 + $0x4e8] sm:$0xff] }
 0x751   :  { %3273 = vmatpush.msrb.mxu1 %v3114_v18  ;;  %3228 = vmatpush.msrb.mxu2 %v3104_v29  ;;  %v3018_v18 = vld [vmem:[#allocation5 + $0x4f0] sm:$0xff]  ;;  %v3008_v29 = vld [vmem:[#allocation5 + $0x4a0] sm:$0xff] }
 0x752   :  { %3211 = vmatpush.msra.mxu3 %v3055_v11  ;;  %3251 = vmatpush.msrb.mxu0 %v3105_v32  ;;  %v3082_v11 = vld [vmem:[#allocation5 + $0x6f0] sm:$0xff]  ;;  %v3009_v32 = vld [vmem:[#allocation5 + $0x4a8] sm:$0xff] }
 0x753   :  { %2972 = vmatmul.f32.vlgmr.msrb.gmra.mxu3 %v7994_v60  ;;  %3274 = vmatpush.msrb.mxu1 %v3106_v34  ;;  %v3010_v34 = vld [vmem:[#allocation5 + $0x4b0] sm:$0xff] }
 0x754   :  { %3212 = vmatpush.msra.mxu3 %v3047_v57  ;;  %3229 = vmatpush.msrb.mxu2 %v3096_v20  ;;  %v3073_v57 = vld [vmem:[#allocation5 + $0x6a8] sm:$0xff]  ;;  %v3000_v20 = vld [vmem:[#allocation5 + $0x460] sm:$0xff] }
 0x755   :  { %3252 = vmatpush.msrb.mxu0 %v3097_v14  ;;  %3275 = vmatpush.msrb.mxu1 %v3098_v35  ;;  %v3001_v14 = vld [vmem:[#allocation5 + $0x468] sm:$0xff]  ;;  %v3002_v35 = vld [vmem:[#allocation5 + $0x470] sm:$0xff] }
 0x756   :  { %3213 = vmatpush.msra.mxu3 %v3039_v52  ;;  %3230 = vmatpush.msrb.mxu2 %v3088_v27  ;;  %v3065_v52 = vld [vmem:[#allocation5 + $0x668] sm:$0xff]  ;;  %v2992_v27 = vld [vmem:[#allocation5 + $0x420] sm:$0xff] }
 0x757   :  { %3253 = vmatpush.msrb.mxu0 %v3089_v12  ;;  %3276 = vmatpush.msrb.mxu1 %v3090_v25  ;;  %v2993_v12 = vld [vmem:[#allocation5 + $0x428] sm:$0xff]  ;;  %v2994_v25 = vld [vmem:[#allocation5 + $0x430] sm:$0xff] }
 0x758   :  { %3214 = vmatpush.msra.mxu3 %v3031_v19  ;;  %3231 = vmatpush.msrb.mxu2 %v3080_v43  ;;  %v3057_v19 = vld [vmem:[#allocation5 + $0x628] sm:$0xff] }
 0x759   :  { %3254 = vmatpush.msrb.mxu0 %v3081_v17  ;;  %3277 = vmatpush.msrb.mxu1 %v3082_v11 }
 0x75a   :  { %3215 = vmatpush.msra.mxu3 %v3023_v39  ;;  %3232 = vmatpush.msrb.mxu2 %v3072_v49  ;;  %v3049_v39 = vld [vmem:[#allocation5 + $0x5e8] sm:$0xff] }
 0x75b   :  { %2975 = vmatmul.f32.gmra.mxu3 %v8027_v6  ;;  %3255 = vmatpush.msrb.mxu0 %v3073_v57 }
 0x75c   :  { %3216 = vmatpush.msra.mxu3 %v3015_v9  ;;  %3278 = vmatpush.msrb.mxu1 %v3074_v33  ;;  %v3040_v9 = vld [vmem:[#allocation5 + $0x5a0] sm:$0xff] }
 0x75d   :  { %3233 = vmatpush.msrb.mxu2 %v3064_v7  ;;  %3256 = vmatpush.msrb.mxu0 %v3065_v52  ;;  %v3441_v7 = vld [vmem:[#allocation8 + $0x7c8] sm:$0xff]  ;;  %v3442_v52 = vld [vmem:[#allocation8 + $0x7d0] sm:$0xff] }
 0x75e   :  { %3217 = vmatpush.msra.mxu3 %v3007_v21  ;;  %3279 = vmatpush.msrb.mxu1 %v3066_v23  ;;  %v3043_v21 = vld [vmem:[#allocation5 + $0x5b8] sm:$0xff]  ;;  %v3443_v23 = vld [vmem:[#allocation8 + $0x7d8] sm:$0xff] }
 0x75f   :  { %3234 = vmatpush.msrb.mxu2 %v3056_v54  ;;  %3257 = vmatpush.msrb.mxu0 %v3057_v19  ;;  %v3432_v54 = vld [vmem:[#allocation8 + $0x780] sm:$0xff]  ;;  %v3434_v19 = vld [vmem:[#allocation8 + $0x790] sm:$0xff] }
 0x760   :  { %3218 = vmatpush.msra.mxu3 %v2999_v61  ;;  %3280 = vmatpush.msrb.mxu1 %v3058_v37  ;;  %v3035_v61 = vld [vmem:[#allocation5 + $0x578] sm:$0xff]  ;;  %v3435_v37 = vld [vmem:[#allocation8 + $0x798] sm:$0xff] }
 0x761   :  { %3235 = vmatpush.msrb.mxu2 %v3048_v53  ;;  %3258 = vmatpush.msrb.mxu0 %v3049_v39  ;;  %v3425_v53 = vld [vmem:[#allocation8 + $0x748] sm:$0xff] }
 0x762   :  { %3219 = vmatpush.msra.mxu3 %v2991_v26  ;;  %3281 = vmatpush.msrb.mxu1 %v3050_v55  ;;  %v3027_v26 = vld [vmem:[#allocation5 + $0x538] sm:$0xff]  ;;  %v3426_v55 = vld [vmem:[#allocation8 + $0x750] sm:$0xff] }
 0x763   :  { %3236 = vmatpush.msrb.mxu2 %v3040_v9  ;;  %3259 = vmatpush.msrb.mxu0 %v3041_v28  ;;  %v3416_v9 = vld [vmem:[#allocation8 + $0x700] sm:$0xff]  ;;  %v3417_v28 = vld [vmem:[#allocation8 + $0x708] sm:$0xff] }
 0x764   :  { %3296 = vmatpush.msrb.mxu3 %v3115_v4  ;;  %3282 = vmatpush.msrb.mxu1 %v3042_v50  ;;  %v3019_v4 = vld [vmem:[#allocation5 + $0x4f8] sm:$0xff] }
 0x765   :  { %3237 = vmatpush.msrb.mxu2 %v3032_v40  ;;  %3260 = vmatpush.msrb.mxu0 %v3033_v22  ;;  %v3410_v40 = vld [vmem:[#allocation8 + $0x6d0] sm:$0xff]  ;;  %v3411_v22 = vld [vmem:[#allocation8 + $0x6d8] sm:$0xff] }
 0x766   :  { %3297 = vmatpush.msrb.mxu3 %v3107_v38  ;;  %3283 = vmatpush.msrb.mxu1 %v3034_v24  ;;  %v3011_v38 = vld [vmem:[#allocation5 + $0x4b8] sm:$0xff]  ;;  %v3400_v24 = vld [vmem:[#allocation8 + $0x680] sm:$0xff] }
 0x767   :  { %3238 = vmatpush.msrb.mxu2 %v3024_v62  ;;  %3261 = vmatpush.msrb.mxu0 %v3025_v56  ;;  %v3402_v62 = vld [vmem:[#allocation8 + $0x690] sm:$0xff]  ;;  %v3403_v56 = vld [vmem:[#allocation8 + $0x698] sm:$0xff] }
 0x768   :  { %3298 = vmatpush.msrb.mxu3 %v3099_v42  ;;  %3284 = vmatpush.msrb.mxu1 %v3026_v5  ;;  %v3003_v42 = vld [vmem:[#allocation5 + $0x478] sm:$0xff]  ;;  %v3392_v5 = vld [vmem:[#allocation8 + $0x640] sm:$0xff] }
 0x769   :  { %3239 = vmatpush.msrb.mxu2 %v3016_v13  ;;  %3262 = vmatpush.msrb.mxu0 %v3017_v3  ;;  %v3394_v13 = vld [vmem:[#allocation8 + $0x650] sm:$0xff]  ;;  %v3395_v3 = vld [vmem:[#allocation8 + $0x658] sm:$0xff] }
 0x76a   :  { %3299 = vmatpush.msrb.mxu3 %v3091_v10  ;;  %3285 = vmatpush.msrb.mxu1 %v3018_v18  ;;  %v2995_v10 = vld [vmem:[#allocation5 + $0x438] sm:$0xff]  ;;  %v3384_v18 = vld [vmem:[#allocation8 + $0x600] sm:$0xff] }
 0x76b   :  { %3240 = vmatpush.msrb.mxu2 %v3008_v29  ;;  %3263 = vmatpush.msrb.mxu0 %v3009_v32  ;;  %v3386_v29 = vld [vmem:[#allocation8 + $0x610] sm:$0xff]  ;;  %v3387_v32 = vld [vmem:[#allocation8 + $0x618] sm:$0xff] }
 0x76c   :  { %3300 = vmatpush.msrb.mxu3 %v3083_v36  ;;  %3286 = vmatpush.msrb.mxu1 %v3010_v34  ;;  %v2979_v36 = vmul.f32 %v7994_v60, %v6708_v0  ;;  %v3433_v0 = vld [vmem:[#allocation8 + $0x788] sm:$0xff]  ;;  %v3376_v34 = vld [vmem:[#allocation8 + $0x5c0] sm:$0xff] }
 0x76d   :  { %3241 = vmatpush.msrb.mxu2 %v3000_v20  ;;  %3264 = vmatpush.msrb.mxu0 %v3001_v14  ;;  %v3378_v20 = vld [vmem:[#allocation8 + $0x5d0] sm:$0xff]  ;;  %v3379_v14 = vld [vmem:[#allocation8 + $0x5d8] sm:$0xff] }
 0x76e   :  { %3301 = vmatpush.msrb.mxu3 %v3075_v51  ;;  %3287 = vmatpush.msrb.mxu1 %v3002_v35  ;;  %v3440_v51 = vld [vmem:[#allocation8 + $0x7c0] sm:$0xff] }
 0x76f   :  { %3242 = vmatpush.msrb.mxu2 %v2992_v27  ;;  %3265 = vmatpush.msrb.mxu0 %v2993_v12  ;;  %v3368_v35 = vld [vmem:[#allocation8 + $0x580] sm:$0xff]  ;;  %v3370_v27 = vld [vmem:[#allocation8 + $0x590] sm:$0xff]  ;;  %v3371_v12 = vld [vmem:[#allocation8 + $0x598] sm:$0xff] }
 0x770   :  { %3302 = vmatpush.msrb.mxu3 %v3067_v41  ;;  %3288 = vmatpush.msrb.mxu1 %v2994_v25  ;;  %v3360_v25 = vld [vmem:[#allocation8 + $0x540] sm:$0xff] }
 0x772   :  { %3303 = vmatpush.msrb.mxu3 %v3059_v8  ;;  %v3424_v8 = vld [vmem:[#allocation8 + $0x740] sm:$0xff] }
 0x774   :  { %3304 = vmatpush.msrb.mxu3 %v3051_v63  ;;  %v3427_v63 = vld [vmem:[#allocation8 + $0x758] sm:$0xff] }
 0x776   :  { %3305 = vmatpush.msrb.mxu3 %v3043_v21  ;;  %v3409_v21 = vld [vmem:[#allocation8 + $0x6c8] sm:$0xff] }
 0x778   :  { %3306 = vmatpush.msrb.mxu3 %v3035_v61  ;;  %v3401_v61 = vld [vmem:[#allocation8 + $0x688] sm:$0xff] }
 0x77a   :  { %3307 = vmatpush.msrb.mxu3 %v3027_v26  ;;  %v3393_v26 = vld [vmem:[#allocation8 + $0x648] sm:$0xff] }
 0x77c   :  { %3308 = vmatpush.msrb.mxu3 %v3019_v4  ;;  %v3385_v4 = vld [vmem:[#allocation8 + $0x608] sm:$0xff] }
 0x77e   :  { %3309 = vmatpush.msrb.mxu3 %v3011_v38  ;;  %v3377_v38 = vld [vmem:[#allocation8 + $0x5c8] sm:$0xff] }
 0x780   :  { %3310 = vmatpush.msrb.mxu3 %v3003_v42  ;;  %v3369_v42 = vld [vmem:[#allocation8 + $0x588] sm:$0xff] }
 0x782   :  { %3311 = vmatpush.msrb.mxu3 %v2995_v10  ;;  %v3361_v10 = vld [vmem:[#allocation8 + $0x548] sm:$0xff] }
 0x7c6   :  { %v8129_v43 = vpop.f32.mrf.mxu3 }
 0x7ce   :  { %v8131_v17 = vpop.f32.mrf.mxu3 }
 0x7d6   :  { %v2973_v11 = vpop.f32.mrf.mxu3 }
 0x7d7   :  { %v2981_v49 = vmul.f32 %v6597_v2, %v2973_v11  ;;  %v2980_v2 = vmul.f32 %v8027_v6, %v6746_v15  ;;  %v3419_v15 = vld [vmem:[#allocation8 + $0x718] sm:$0xff]  ;;  %v3408_v6 = vld [vmem:[#allocation8 + $0x6c0] sm:$0xff]  ;;  %v3362_v11 = vld [vmem:[#allocation8 + $0x550] sm:$0xff] }
 0x7d9   :  { %v2983_v57 = vadd.f32 %v2981_v49, %v2979_v36  ;;  %v3363_v36 = vld [vmem:[#allocation8 + $0x558] sm:$0xff]  ;;  %v3352_v49 = vld [vmem:[#allocation8 + $0x500] sm:$0xff] }
 0x7db   :  { %v8136_v33 = vmul.f32 0.14285715, %v2983_v57  ;;  %v3353_v57 = vld [vmem:[#allocation8 + $0x508] sm:$0xff] }
 0x7dd   :  { %3151 = vmatmul.f32.vlgmr.msra.gmra.mxu2 %v8136_v33  ;;  %3174 = vmatmul.f32.vlgmr.msra.gmra.mxu0 %v8136_v33 }
 0x7de   :  { %3197 = vmatmul.f32.vlgmr.msra.gmra.mxu1 %v8136_v33  ;;  %3220 = vmatmul.f32.vlgmr.msra.gmra.mxu3 %v8136_v33  ;;  %v2976_v41 = vpop.f32.mrf.mxu3 }
 0x7df   :  { %3467 = vmatpush.msra.mxu2 %v3440_v51  ;;  %3490 = vmatpush.msra.mxu0 %v3441_v7  ;;  %v2982_v60 = vmul.f32 %v6604_v47, %v2976_v41  ;;  %v3418_v47 = vld [vmem:[#allocation8 + $0x710] sm:$0xff]  ;;  %v3355_v7 = vld [vmem:[#allocation8 + $0x518] sm:$0xff] }
 0x7e0   :  { %3513 = vmatpush.msra.mxu1 %v3442_v52  ;;  %3536 = vmatpush.msra.mxu3 %v3443_v23  ;;  %v3354_v51 = vld [vmem:[#allocation8 + $0x510] sm:$0xff]  ;;  %v3344_v52 = vld [vmem:[#allocation8 + $0x4c0] sm:$0xff]  ;;  %v3345_v23 = vld [vmem:[#allocation8 + $0x4c8] sm:$0xff] }
 0x7e1   :  { %v2984_v39 = vadd.f32 %v2982_v60, %v2980_v2  ;;  %3468 = vmatpush.msra.mxu2 %v3432_v54  ;;  %3491 = vmatpush.msra.mxu0 %v3433_v0  ;;  %v3346_v41 = vld [vmem:[#allocation8 + $0x4d0] sm:$0xff]  ;;  %v3347_v54 = vld [vmem:[#allocation8 + $0x4d8] sm:$0xff]  ;;  %v3336_v0 = vld [vmem:[#allocation8 + $0x480] sm:$0xff] }
 0x7e2   :  { %3514 = vmatpush.msra.mxu1 %v3434_v19  ;;  %3537 = vmatpush.msra.mxu3 %v3435_v37  ;;  %v3337_v2 = vld [vmem:[#allocation8 + $0x488] sm:$0xff]  ;;  %v3338_v60 = vld [vmem:[#allocation8 + $0x490] sm:$0xff]  ;;  %v3339_v19 = vld [vmem:[#allocation8 + $0x498] sm:$0xff] }
 0x7e3   :  { %v8145_v50 = vmul.f32 0.14285715, %v2984_v39  ;;  %3469 = vmatpush.msra.mxu2 %v3424_v8  ;;  %3492 = vmatpush.msra.mxu0 %v3425_v53  ;;  %v3328_v37 = vld [vmem:[#allocation8 + $0x440] sm:$0xff]  ;;  %v3329_v8 = vld [vmem:[#allocation8 + $0x448] sm:$0xff]  ;;  %v3330_v53 = vld [vmem:[#allocation8 + $0x450] sm:$0xff] }
 0x7e4   :  { %3515 = vmatpush.msra.mxu1 %v3426_v55  ;;  %3538 = vmatpush.msra.mxu3 %v3427_v63  ;;  %v3331_v39 = vld [vmem:[#allocation8 + $0x458] sm:$0xff]  ;;  %v3320_v55 = vld [vmem:[#allocation8 + $0x400] sm:$0xff]  ;;  %v3321_v63 = vld [vmem:[#allocation8 + $0x408] sm:$0xff] }
 0x7e5   :  { %3470 = vmatpush.msra.mxu2 %v3416_v9  ;;  %3493 = vmatpush.msra.mxu0 %v3417_v28  ;;  %v3322_v9 = vld [vmem:[#allocation8 + $0x410] sm:$0xff]  ;;  %v3323_v28 = vld [vmem:[#allocation8 + $0x418] sm:$0xff] }
 0x7e6   :  { %3516 = vmatpush.msra.mxu1 %v3418_v47  ;;  %3539 = vmatpush.msra.mxu3 %v3419_v15  ;;  %v3444_v47 = vld [vmem:[#allocation8 + $0x7e0] sm:$0xff]  ;;  %v3445_v15 = vld [vmem:[#allocation8 + $0x7e8] sm:$0xff] }
 0x7e7   :  { %3154 = vmatmul.f32.gmra.mxu2 %v8145_v50  ;;  %3177 = vmatmul.f32.gmra.mxu0 %v8145_v50 }
 0x7e8   :  { %3200 = vmatmul.f32.gmra.mxu1 %v8145_v50  ;;  %3223 = vmatmul.f32.gmra.mxu3 %v8145_v50 }
 0x7e9   :  { %3471 = vmatpush.msra.mxu2 %v3408_v6  ;;  %3494 = vmatpush.msra.mxu0 %v3409_v21  ;;  %v3446_v6 = vld [vmem:[#allocation8 + $0x7f0] sm:$0xff]  ;;  %v3447_v21 = vld [vmem:[#allocation8 + $0x7f8] sm:$0xff] }
 0x7ea   :  { %3517 = vmatpush.msra.mxu1 %v3410_v40  ;;  %3540 = vmatpush.msra.mxu3 %v3411_v22  ;;  %v3436_v40 = vld [vmem:[#allocation8 + $0x7a0] sm:$0xff]  ;;  %v3437_v22 = vld [vmem:[#allocation8 + $0x7a8] sm:$0xff] }
 0x7eb   :  { %3472 = vmatpush.msra.mxu2 %v3400_v24  ;;  %3495 = vmatpush.msra.mxu0 %v3401_v61  ;;  %v3438_v24 = vld [vmem:[#allocation8 + $0x7b0] sm:$0xff]  ;;  %v3439_v61 = vld [vmem:[#allocation8 + $0x7b8] sm:$0xff] }
 0x7ec   :  { %3518 = vmatpush.msra.mxu1 %v3402_v62  ;;  %3541 = vmatpush.msra.mxu3 %v3403_v56  ;;  %v3428_v62 = vld [vmem:[#allocation8 + $0x760] sm:$0xff]  ;;  %v3429_v56 = vld [vmem:[#allocation8 + $0x768] sm:$0xff] }
 0x7ed   :  { %3473 = vmatpush.msra.mxu2 %v3392_v5  ;;  %3496 = vmatpush.msra.mxu0 %v3393_v26  ;;  %v3430_v5 = vld [vmem:[#allocation8 + $0x770] sm:$0xff]  ;;  %v3431_v26 = vld [vmem:[#allocation8 + $0x778] sm:$0xff] }
 0x7ee   :  { %3519 = vmatpush.msra.mxu1 %v3394_v13  ;;  %3542 = vmatpush.msra.mxu3 %v3395_v3  ;;  %v3420_v13 = vld [vmem:[#allocation8 + $0x720] sm:$0xff]  ;;  %v3421_v3 = vld [vmem:[#allocation8 + $0x728] sm:$0xff] }
 0x7ef   :  { %3474 = vmatpush.msra.mxu2 %v3384_v18  ;;  %3497 = vmatpush.msra.mxu0 %v3385_v4  ;;  %v3422_v18 = vld [vmem:[#allocation8 + $0x730] sm:$0xff]  ;;  %v3423_v4 = vld [vmem:[#allocation8 + $0x738] sm:$0xff] }
 0x7f0   :  { %3520 = vmatpush.msra.mxu1 %v3386_v29  ;;  %3543 = vmatpush.msra.mxu3 %v3387_v32  ;;  %v3412_v29 = vld [vmem:[#allocation8 + $0x6e0] sm:$0xff]  ;;  %v3413_v32 = vld [vmem:[#allocation8 + $0x6e8] sm:$0xff] }
 0x7f1   :  { %3243 = vmatmul.f32.vlgmr.msrb.gmra.mxu2 %v8136_v33  ;;  %3266 = vmatmul.f32.vlgmr.msrb.gmra.mxu0 %v8136_v33 }
 0x7f2   :  { %3289 = vmatmul.f32.vlgmr.msrb.gmra.mxu1 %v8136_v33  ;;  %3312 = vmatmul.f32.vlgmr.msrb.gmra.mxu3 %v8136_v33 }
 0x7f3   :  { %3475 = vmatpush.msra.mxu2 %v3376_v34  ;;  %3498 = vmatpush.msra.mxu0 %v3377_v38  ;;  %v3414_v34 = vld [vmem:[#allocation8 + $0x6f0] sm:$0xff]  ;;  %v3415_v38 = vld [vmem:[#allocation8 + $0x6f8] sm:$0xff] }
 0x7f4   :  { %3521 = vmatpush.msra.mxu1 %v3378_v20  ;;  %3544 = vmatpush.msra.mxu3 %v3379_v14  ;;  %v3404_v20 = vld [vmem:[#allocation8 + $0x6a0] sm:$0xff]  ;;  %v3405_v14 = vld [vmem:[#allocation8 + $0x6a8] sm:$0xff] }
 0x7f5   :  { %3476 = vmatpush.msra.mxu2 %v3368_v35  ;;  %3499 = vmatpush.msra.mxu0 %v3369_v42  ;;  %v3406_v35 = vld [vmem:[#allocation8 + $0x6b0] sm:$0xff]  ;;  %v3407_v42 = vld [vmem:[#allocation8 + $0x6b8] sm:$0xff] }
 0x7f6   :  { %3522 = vmatpush.msra.mxu1 %v3370_v27  ;;  %3545 = vmatpush.msra.mxu3 %v3371_v12  ;;  %v3396_v27 = vld [vmem:[#allocation8 + $0x660] sm:$0xff]  ;;  %v3397_v12 = vld [vmem:[#allocation8 + $0x668] sm:$0xff] }
 0x7f7   :  { %3477 = vmatpush.msra.mxu2 %v3360_v25  ;;  %3500 = vmatpush.msra.mxu0 %v3361_v10  ;;  %v3398_v25 = vld [vmem:[#allocation8 + $0x670] sm:$0xff]  ;;  %v3399_v10 = vld [vmem:[#allocation8 + $0x678] sm:$0xff] }
 0x7f8   :  { %3523 = vmatpush.msra.mxu1 %v3362_v11  ;;  %3546 = vmatpush.msra.mxu3 %v3363_v36  ;;  %v3388_v11 = vld [vmem:[#allocation8 + $0x620] sm:$0xff]  ;;  %v3389_v36 = vld [vmem:[#allocation8 + $0x628] sm:$0xff] }
 0x7f9   :  { %3478 = vmatpush.msra.mxu2 %v3352_v49  ;;  %3501 = vmatpush.msra.mxu0 %v3353_v57  ;;  %v3390_v49 = vld [vmem:[#allocation8 + $0x630] sm:$0xff]  ;;  %v3391_v57 = vld [vmem:[#allocation8 + $0x638] sm:$0xff] }
 0x7fa   :  { %3524 = vmatpush.msra.mxu1 %v3354_v51  ;;  %3547 = vmatpush.msra.mxu3 %v3355_v7  ;;  %v3380_v51 = vld [vmem:[#allocation8 + $0x5e0] sm:$0xff]  ;;  %v3381_v7 = vld [vmem:[#allocation8 + $0x5e8] sm:$0xff] }
 0x7fb   :  { %3246 = vmatmul.f32.gmra.mxu2 %v8145_v50  ;;  %3269 = vmatmul.f32.gmra.mxu0 %v8145_v50 }
 0x7fc   :  { %3292 = vmatmul.f32.gmra.mxu1 %v8145_v50  ;;  %3315 = vmatmul.f32.gmra.mxu3 %v8145_v50 }
 0x7fd   :  { %3479 = vmatpush.msra.mxu2 %v3344_v52  ;;  %3502 = vmatpush.msra.mxu0 %v3345_v23  ;;  %v3382_v52 = vld [vmem:[#allocation8 + $0x5f0] sm:$0xff]  ;;  %v3383_v23 = vld [vmem:[#allocation8 + $0x5f8] sm:$0xff] }
 0x7fe   :  { %3525 = vmatpush.msra.mxu1 %v3346_v41  ;;  %3548 = vmatpush.msra.mxu3 %v3347_v54  ;;  %v3372_v41 = vld [vmem:[#allocation8 + $0x5a0] sm:$0xff]  ;;  %v3373_v54 = vld [vmem:[#allocation8 + $0x5a8] sm:$0xff] }
 0x7ff   :  { %3480 = vmatpush.msra.mxu2 %v3336_v0  ;;  %3503 = vmatpush.msra.mxu0 %v3337_v2  ;;  %v3374_v0 = vld [vmem:[#allocation8 + $0x5b0] sm:$0xff]  ;;  %v3375_v2 = vld [vmem:[#allocation8 + $0x5b8] sm:$0xff] }
 0x800   :  { %3526 = vmatpush.msra.mxu1 %v3338_v60  ;;  %3549 = vmatpush.msra.mxu3 %v3339_v19  ;;  %v3364_v60 = vld [vmem:[#allocation8 + $0x560] sm:$0xff]  ;;  %v3365_v19 = vld [vmem:[#allocation8 + $0x568] sm:$0xff] }
 0x801   :  { %3481 = vmatpush.msra.mxu2 %v3328_v37  ;;  %3504 = vmatpush.msra.mxu0 %v3329_v8  ;;  %v3366_v37 = vld [vmem:[#allocation8 + $0x570] sm:$0xff]  ;;  %v3367_v8 = vld [vmem:[#allocation8 + $0x578] sm:$0xff] }
 0x802   :  { %3527 = vmatpush.msra.mxu1 %v3330_v53  ;;  %3550 = vmatpush.msra.mxu3 %v3331_v39  ;;  %v3356_v53 = vld [vmem:[#allocation8 + $0x520] sm:$0xff]  ;;  %v3357_v39 = vld [vmem:[#allocation8 + $0x528] sm:$0xff] }
 0x803   :  { %3482 = vmatpush.msra.mxu2 %v3320_v55  ;;  %3505 = vmatpush.msra.mxu0 %v3321_v63  ;;  %v3358_v55 = vld [vmem:[#allocation8 + $0x530] sm:$0xff]  ;;  %v3359_v63 = vld [vmem:[#allocation8 + $0x538] sm:$0xff] }
 0x804   :  { %3528 = vmatpush.msra.mxu1 %v3322_v9  ;;  %3551 = vmatpush.msra.mxu3 %v3323_v28  ;;  %v3348_v9 = vld [vmem:[#allocation8 + $0x4e0] sm:$0xff]  ;;  %v3349_v28 = vld [vmem:[#allocation8 + $0x4e8] sm:$0xff] }
 0x805   :  { %3559 = vmatpush.msrb.mxu2 %v3444_v47  ;;  %3582 = vmatpush.msrb.mxu0 %v3445_v15  ;;  %v3350_v47 = vld [vmem:[#allocation8 + $0x4f0] sm:$0xff]  ;;  %v3351_v15 = vld [vmem:[#allocation8 + $0x4f8] sm:$0xff] }
 0x806   :  { %3605 = vmatpush.msrb.mxu1 %v3446_v6  ;;  %3628 = vmatpush.msrb.mxu3 %v3447_v21  ;;  %v3340_v6 = vld [vmem:[#allocation8 + $0x4a0] sm:$0xff]  ;;  %v3341_v21 = vld [vmem:[#allocation8 + $0x4a8] sm:$0xff] }
 0x807   :  { %3483 = vmatmul.f32.vlgmr.msra.gmra.mxu2 %v8136_v33  ;;  %3506 = vmatmul.f32.vlgmr.msra.gmra.mxu0 %v8136_v33 }
 0x808   :  { %3529 = vmatmul.f32.vlgmr.msra.gmra.mxu1 %v8136_v33  ;;  %3552 = vmatmul.f32.vlgmr.msra.gmra.mxu3 %v8136_v33 }
 0x809   :  { %3560 = vmatpush.msrb.mxu2 %v3436_v40  ;;  %3583 = vmatpush.msrb.mxu0 %v3437_v22  ;;  %v3342_v40 = vld [vmem:[#allocation8 + $0x4b0] sm:$0xff]  ;;  %v3343_v22 = vld [vmem:[#allocation8 + $0x4b8] sm:$0xff] }
 0x80a   :  { %3606 = vmatpush.msrb.mxu1 %v3438_v24  ;;  %3629 = vmatpush.msrb.mxu3 %v3439_v61  ;;  %v3332_v24 = vld [vmem:[#allocation8 + $0x460] sm:$0xff]  ;;  %v3333_v61 = vld [vmem:[#allocation8 + $0x468] sm:$0xff] }
 0x80b   :  { %3561 = vmatpush.msrb.mxu2 %v3428_v62  ;;  %3584 = vmatpush.msrb.mxu0 %v3429_v56  ;;  %v3334_v62 = vld [vmem:[#allocation8 + $0x470] sm:$0xff]  ;;  %v3335_v56 = vld [vmem:[#allocation8 + $0x478] sm:$0xff] }
 0x80c   :  { %3607 = vmatpush.msrb.mxu1 %v3430_v5  ;;  %3630 = vmatpush.msrb.mxu3 %v3431_v26  ;;  %v3324_v5 = vld [vmem:[#allocation8 + $0x420] sm:$0xff]  ;;  %v3325_v26 = vld [vmem:[#allocation8 + $0x428] sm:$0xff] }
 0x80d   :  { %3562 = vmatpush.msrb.mxu2 %v3420_v13  ;;  %3585 = vmatpush.msrb.mxu0 %v3421_v3  ;;  %v3326_v13 = vld [vmem:[#allocation8 + $0x430] sm:$0xff]  ;;  %v3327_v3 = vld [vmem:[#allocation8 + $0x438] sm:$0xff] }
 0x80e   :  { %3608 = vmatpush.msrb.mxu1 %v3422_v18  ;;  %3631 = vmatpush.msrb.mxu3 %v3423_v4  ;;  %v5219_v18 = vld [vmem:[%s9676_s8 + $0xf8] sm:$0xff] }
 0x80f   :  { %3563 = vmatpush.msrb.mxu2 %v3412_v29  ;;  %3586 = vmatpush.msrb.mxu0 %v3413_v32  ;;  %v5220_v4 = vld [vmem:[%s9676_s8 + $0x178] sm:$0xff] }
 0x810   :  { %3609 = vmatpush.msrb.mxu1 %v3414_v34  ;;  %3632 = vmatpush.msrb.mxu3 %v3415_v38  ;;  %v5221_v29 = vld [vmem:[%s9676_s8 + $0x78] sm:$0xff]  ;;  %v5223_v34 = vld [vmem:[%s9676_s8 + $0xf0] sm:$0xff] }
 0x811   :  { %3486 = vmatmul.f32.gmra.mxu2 %v8145_v50  ;;  %3509 = vmatmul.f32.gmra.mxu0 %v8145_v50  ;;  %v5222_v32 = vld [vmem:[%s9676_s8 + $0x1f8] sm:$0xff]  ;;  %v5224_v38 = vld [vmem:[%s9676_s8 + $0x170] sm:$0xff] }
 0x812   :  { %3532 = vmatmul.f32.gmra.mxu1 %v8145_v50  ;;  %3555 = vmatmul.f32.gmra.mxu3 %v8145_v50 }
 0x813   :  { %3564 = vmatpush.msrb.mxu2 %v3404_v20  ;;  %3587 = vmatpush.msrb.mxu0 %v3405_v14  ;;  %v5225_v20 = vld [vmem:[%s9676_s8 + $0x70] sm:$0xff] }
 0x814   :  { %3610 = vmatpush.msrb.mxu1 %v3406_v35  ;;  %3633 = vmatpush.msrb.mxu3 %v3407_v42  ;;  %v5226_v14 = vld [vmem:[%s9676_s8 + $0x1f0] sm:$0xff]  ;;  %v5227_v35 = vld [vmem:[%s9676_s8 + $0xe8] sm:$0xff] }
 0x815   :  { %3565 = vmatpush.msrb.mxu2 %v3396_v27  ;;  %3588 = vmatpush.msrb.mxu0 %v3397_v12  ;;  %v5228_v42 = vld [vmem:[%s9676_s8 + $0x168] sm:$0xff] }
 0x816   :  { %3611 = vmatpush.msrb.mxu1 %v3398_v25  ;;  %3634 = vmatpush.msrb.mxu3 %v3399_v10  ;;  %v5229_v27 = vld [vmem:[%s9676_s8 + $0x68] sm:$0xff]  ;;  %v5231_v25 = vld [vmem:[%s9676_s8 + $0xe0] sm:$0xff] }
 0x817   :  { %3566 = vmatpush.msrb.mxu2 %v3388_v11  ;;  %3589 = vmatpush.msrb.mxu0 %v3389_v36  ;;  %v5230_v12 = vld [vmem:[%s9676_s8 + $0x1e8] sm:$0xff]  ;;  %v5232_v10 = vld [vmem:[%s9676_s8 + $0x160] sm:$0xff] }
 0x818   :  { %3612 = vmatpush.msrb.mxu1 %v3390_v49  ;;  %3635 = vmatpush.msrb.mxu3 %v3391_v57  ;;  %v5233_v11 = vld [vmem:[%s9676_s8 + $0x60] sm:$0xff]  ;;  %v5235_v49 = vld [vmem:[%s9676_s8 + $0xd8] sm:$0xff] }
 0x819   :  { %3567 = vmatpush.msrb.mxu2 %v3380_v51  ;;  %3590 = vmatpush.msrb.mxu0 %v3381_v7  ;;  %v5234_v36 = vld [vmem:[%s9676_s8 + $0x1e0] sm:$0xff]  ;;  %v5236_v57 = vld [vmem:[%s9676_s8 + $0x158] sm:$0xff] }
 0x81a   :  { %3613 = vmatpush.msrb.mxu1 %v3382_v52  ;;  %3636 = vmatpush.msrb.mxu3 %v3383_v23  ;;  %v5237_v51 = vld [vmem:[%s9676_s8 + $0x58] sm:$0xff]  ;;  %v5239_v52 = vld [vmem:[%s9676_s8 + $0xd0] sm:$0xff] }
 0x81b   :  { %3568 = vmatpush.msrb.mxu2 %v3372_v41  ;;  %3591 = vmatpush.msrb.mxu0 %v3373_v54  ;;  %v5238_v7 = vld [vmem:[%s9676_s8 + $0x1d8] sm:$0xff]  ;;  %v5240_v23 = vld [vmem:[%s9676_s8 + $0x150] sm:$0xff] }
 0x81c   :  { %3614 = vmatpush.msrb.mxu1 %v3374_v0  ;;  %3637 = vmatpush.msrb.mxu3 %v3375_v2  ;;  %v5241_v41 = vld [vmem:[%s9676_s8 + $0x50] sm:$0xff]  ;;  %v5243_v0 = vld [vmem:[%s9676_s8 + $0xc8] sm:$0xff] }
 0x81d   :  { %3569 = vmatpush.msrb.mxu2 %v3364_v60  ;;  %3592 = vmatpush.msrb.mxu0 %v3365_v19  ;;  %v5242_v54 = vld [vmem:[%s9676_s8 + $0x1d0] sm:$0xff]  ;;  %v5244_v2 = vld [vmem:[%s9676_s8 + $0x148] sm:$0xff] }
 0x81e   :  { %3615 = vmatpush.msrb.mxu1 %v3366_v37  ;;  %3638 = vmatpush.msrb.mxu3 %v3367_v8  ;;  %v5245_v60 = vld [vmem:[%s9676_s8 + $0x48] sm:$0xff]  ;;  %v5247_v37 = vld [vmem:[%s9676_s8 + $0xc0] sm:$0xff] }
 0x81f   :  { %3570 = vmatpush.msrb.mxu2 %v3356_v53  ;;  %3593 = vmatpush.msrb.mxu0 %v3357_v39  ;;  %v5246_v19 = vld [vmem:[%s9676_s8 + $0x1c8] sm:$0xff]  ;;  %v5248_v8 = vld [vmem:[%s9676_s8 + $0x140] sm:$0xff] }
 0x820   :  { %3616 = vmatpush.msrb.mxu1 %v3358_v55  ;;  %3639 = vmatpush.msrb.mxu3 %v3359_v63  ;;  %v5249_v53 = vld [vmem:[%s9676_s8 + $0x40] sm:$0xff]  ;;  %v5251_v55 = vld [vmem:[%s9676_s8 + $0xb8] sm:$0xff] }
 0x821   :  { %3571 = vmatpush.msrb.mxu2 %v3348_v9  ;;  %3594 = vmatpush.msrb.mxu0 %v3349_v28  ;;  %v5250_v39 = vld [vmem:[%s9676_s8 + $0x1c0] sm:$0xff]  ;;  %v5252_v63 = vld [vmem:[%s9676_s8 + $0x138] sm:$0xff] }
 0x822   :  { %3617 = vmatpush.msrb.mxu1 %v3350_v47  ;;  %3640 = vmatpush.msrb.mxu3 %v3351_v15  ;;  %v5253_v9 = vld [vmem:[%s9676_s8 + $0x38] sm:$0xff]  ;;  %v5255_v47 = vld [vmem:[%s9676_s8 + $0xb0] sm:$0xff] }
 0x823   :  { %3572 = vmatpush.msrb.mxu2 %v3340_v6  ;;  %3595 = vmatpush.msrb.mxu0 %v3341_v21  ;;  %v5254_v28 = vld [vmem:[%s9676_s8 + $0x1b8] sm:$0xff]  ;;  %v5256_v15 = vld [vmem:[%s9676_s8 + $0x130] sm:$0xff] }
 0x824   :  { %3618 = vmatpush.msrb.mxu1 %v3342_v40  ;;  %3641 = vmatpush.msrb.mxu3 %v3343_v22  ;;  %v5257_v6 = vld [vmem:[%s9676_s8 + $0x30] sm:$0xff]  ;;  %v5259_v40 = vld [vmem:[%s9676_s8 + $0xa8] sm:$0xff] }
 0x825   :  { %3573 = vmatpush.msrb.mxu2 %v3332_v24  ;;  %3596 = vmatpush.msrb.mxu0 %v3333_v61  ;;  %v5258_v21 = vld [vmem:[%s9676_s8 + $0x1b0] sm:$0xff]  ;;  %v5260_v22 = vld [vmem:[%s9676_s8 + $0x128] sm:$0xff] }
 0x826   :  { %3619 = vmatpush.msrb.mxu1 %v3334_v62  ;;  %3642 = vmatpush.msrb.mxu3 %v3335_v56  ;;  %v5261_v24 = vld [vmem:[%s9676_s8 + $0x28] sm:$0xff]  ;;  %v5263_v62 = vld [vmem:[%s9676_s8 + $0xa0] sm:$0xff] }
 0x827   :  { %3574 = vmatpush.msrb.mxu2 %v3324_v5  ;;  %3597 = vmatpush.msrb.mxu0 %v3325_v26  ;;  %v5262_v61 = vld [vmem:[%s9676_s8 + $0x1a8] sm:$0xff]  ;;  %v5264_v56 = vld [vmem:[%s9676_s8 + $0x120] sm:$0xff] }
 0x828   :  { %3620 = vmatpush.msrb.mxu1 %v3326_v13  ;;  %3643 = vmatpush.msrb.mxu3 %v3327_v3  ;;  %v5265_v5 = vld [vmem:[%s9676_s8 + $0x20] sm:$0xff]  ;;  %v5267_v13 = vld [vmem:[%s9676_s8 + $0x98] sm:$0xff] }
 0x829   :  { %3575 = vmatmul.f32.vlgmr.msrb.gmra.mxu2 %v8136_v33  ;;  %3598 = vmatmul.f32.vlgmr.msrb.gmra.mxu0 %v8136_v33  ;;  %v5266_v26 = vld [vmem:[%s9676_s8 + $0x1a0] sm:$0xff]  ;;  %v5268_v3 = vld [vmem:[%s9676_s8 + $0x118] sm:$0xff] }
 0x82a   :  { %3621 = vmatmul.f32.vlgmr.msrb.gmra.mxu1 %v8136_v33  ;;  %3644 = vmatmul.f32.vlgmr.msrb.gmra.mxu3 %v8136_v33 }
 0x82b   :  { %3690 = vmatpush.msra.mxu0 %v5219_v18  ;;  %3713 = vmatpush.msra.mxu1 %v5220_v4  ;;  %v5269_v18 = vld [vmem:[%s9676_s8 + $0x18] sm:$0xff] }
 0x82c   :  { %3667 = vmatpush.msra.mxu2 %v5221_v29  ;;  %3736 = vmatpush.msra.mxu3 %v5222_v32  ;;  %v5270_v4 = vld [vmem:[%s9676_s8 + $0x198] sm:$0xff]  ;;  %v5271_v29 = vld [vmem:[%s9676_s8 + $0x90] sm:$0xff] }
 0x82d   :  { %3691 = vmatpush.msra.mxu0 %v5223_v34  ;;  %3714 = vmatpush.msra.mxu1 %v5224_v38  ;;  %v5272_v32 = vld [vmem:[%s9676_s8 + $0x110] sm:$0xff] }
 0x82e   :  { %3668 = vmatpush.msra.mxu2 %v5225_v20  ;;  %3737 = vmatpush.msra.mxu3 %v5226_v14  ;;  %v5273_v34 = vld [vmem:[%s9676_s8 + $0x10] sm:$0xff]  ;;  %v5275_v20 = vld [vmem:[%s9676_s8 + $0x88] sm:$0xff] }
 0x82f   :  { %3692 = vmatpush.msra.mxu0 %v5227_v35  ;;  %3715 = vmatpush.msra.mxu1 %v5228_v42  ;;  %v5274_v38 = vld [vmem:[%s9676_s8 + $0x190] sm:$0xff]  ;;  %v5276_v14 = vld [vmem:[%s9676_s8 + $0x108] sm:$0xff]  ;;  %v8349_v35 = vpop.f32.mrf.mxu0 }
 0x830   :  { %3669 = vmatpush.msra.mxu2 %v5229_v27  ;;  %3738 = vmatpush.msra.mxu3 %v5230_v12  ;;  %v5277_v42 = vld [vmem:[%s9676_s8 + $0x8] sm:$0xff]  ;;  %v8357_v12 = vpop.f32.mrf.mxu1 }
 0x831   :  { %3578 = vmatmul.f32.gmra.mxu2 %v8145_v50  ;;  %3601 = vmatmul.f32.gmra.mxu0 %v8145_v50  ;;  %v5278_v27 = vld [vmem:[%s9676_s8 + $0x188] sm:$0xff] }
 0x832   :  { %3624 = vmatmul.f32.gmra.mxu1 %v8145_v50  ;;  %3647 = vmatmul.f32.gmra.mxu3 %v8145_v50 }
 0x833   :  { %3693 = vmatpush.msra.mxu0 %v5231_v25  ;;  %3716 = vmatpush.msra.mxu1 %v5232_v10  ;;  %v5279_v25 = vld [vmem:[%s9676_s8 + $0x80] sm:$0xff] }
 0x834   :  { %3670 = vmatpush.msra.mxu2 %v5233_v11  ;;  %3739 = vmatpush.msra.mxu3 %v5234_v36  ;;  %v5280_v10 = vld [vmem:[%s9676_s8 + $0x100] sm:$0xff]  ;;  %v5281_v11 = vld [vmem:[%s9676_s8 + $0x2f8] sm:$0xff] }
 0x835   :  { %3694 = vmatpush.msra.mxu0 %v5235_v49  ;;  %3717 = vmatpush.msra.mxu1 %v5236_v57  ;;  %v5282_v36 = vld [vmem:[%s9676_s8 + $0x378] sm:$0xff]  ;;  %v5283_v49 = vld [vmem:[%s9676_s8] sm:$0xff] }
 0x836   :  { %3671 = vmatpush.msra.mxu2 %v5237_v51  ;;  %3740 = vmatpush.msra.mxu3 %v5238_v7  ;;  %v5284_v57 = vld [vmem:[%s9676_s8 + $0x180] sm:$0xff]  ;;  %v5285_v51 = vld [vmem:[%s9676_s8 + $0x2f0] sm:$0xff] }
 0x837   :  { %3695 = vmatpush.msra.mxu0 %v5239_v52  ;;  %3718 = vmatpush.msra.mxu1 %v5240_v23  ;;  %v5286_v7 = vld [vmem:[%s9676_s8 + $0x370] sm:$0xff]  ;;  %v5287_v52 = vld [vmem:[%s9676_s8 + $0x278] sm:$0xff] }
 0x838   :  { %3672 = vmatpush.msra.mxu2 %v5241_v41  ;;  %3741 = vmatpush.msra.mxu3 %v5242_v54  ;;  %v5288_v23 = vld [vmem:[%s9676_s8 + $0x3f8] sm:$0xff]  ;;  %v8389_v41 = vpop.f32.mrf.mxu2  ;;  %v5289_v54 = vld [vmem:[%s9676_s8 + $0x2e8] sm:$0xff] }
 0x839   :  { %3696 = vmatpush.msra.mxu0 %v5243_v0  ;;  %3719 = vmatpush.msra.mxu1 %v5244_v2  ;;  %v5290_v0 = vld [vmem:[%s9676_s8 + $0x368] sm:$0xff]  ;;  %v5291_v2 = vld [vmem:[%s9676_s8 + $0x270] sm:$0xff] }
 0x83a   :  { %3673 = vmatpush.msra.mxu2 %v5245_v60  ;;  %3742 = vmatpush.msra.mxu3 %v5246_v19  ;;  %v5292_v60 = vld [vmem:[%s9676_s8 + $0x3f0] sm:$0xff]  ;;  %v5293_v19 = vld [vmem:[%s9676_s8 + $0x2e0] sm:$0xff] }
 0x83b   :  { %3697 = vmatpush.msra.mxu0 %v5247_v37  ;;  %3720 = vmatpush.msra.mxu1 %v5248_v8  ;;  %v5294_v37 = vld [vmem:[%s9676_s8 + $0x360] sm:$0xff]  ;;  %v5295_v8 = vld [vmem:[%s9676_s8 + $0x268] sm:$0xff] }
 0x83c   :  { %3674 = vmatpush.msra.mxu2 %v5249_v53  ;;  %3743 = vmatpush.msra.mxu3 %v5250_v39  ;;  %v5296_v53 = vld [vmem:[%s9676_s8 + $0x3e8] sm:$0xff]  ;;  %v8415_v39 = vpop.f32.mrf.mxu0 }
 0x83d   :  { %3698 = vmatpush.msra.mxu0 %v5251_v55  ;;  %3721 = vmatpush.msra.mxu1 %v5252_v63  ;;  %v5297_v55 = vld [vmem:[%s9676_s8 + $0x2d8] sm:$0xff] }
 0x83e   :  { %3675 = vmatpush.msra.mxu2 %v5253_v9  ;;  %3744 = vmatpush.msra.mxu3 %v5254_v28  ;;  %v5298_v63 = vld [vmem:[%s9676_s8 + $0x358] sm:$0xff]  ;;  %v8423_v9 = vpop.f32.mrf.mxu1  ;;  %v5299_v28 = vld [vmem:[%s9676_s8 + $0x260] sm:$0xff] }
 0x83f   :  { %3699 = vmatpush.msra.mxu0 %v5255_v47  ;;  %3722 = vmatpush.msra.mxu1 %v5256_v15  ;;  %v5300_v47 = vld [vmem:[%s9676_s8 + $0x3e0] sm:$0xff]  ;;  %v5301_v15 = vld [vmem:[%s9676_s8 + $0x2d0] sm:$0xff] }
 0x840   :  { %3676 = vmatpush.msra.mxu2 %v5257_v6  ;;  %3745 = vmatpush.msra.mxu3 %v5258_v21  ;;  %v5302_v6 = vld [vmem:[%s9676_s8 + $0x350] sm:$0xff]  ;;  %v5303_v21 = vld [vmem:[%s9676_s8 + $0x258] sm:$0xff] }
 0x841   :  { %3700 = vmatpush.msra.mxu0 %v5259_v40  ;;  %3723 = vmatpush.msra.mxu1 %v5260_v22  ;;  %v5304_v40 = vld [vmem:[%s9676_s8 + $0x3d8] sm:$0xff]  ;;  %v5305_v22 = vld [vmem:[%s9676_s8 + $0x2c8] sm:$0xff] }
 0x842   :  { %3677 = vmatpush.msra.mxu2 %v5261_v24  ;;  %3746 = vmatpush.msra.mxu3 %v5262_v61  ;;  %v5306_v24 = vld [vmem:[%s9676_s8 + $0x348] sm:$0xff]  ;;  %v5307_v61 = vld [vmem:[%s9676_s8 + $0x250] sm:$0xff] }
 0x843   :  { %3701 = vmatpush.msra.mxu0 %v5263_v62  ;;  %3724 = vmatpush.msra.mxu1 %v5264_v56  ;;  %v5308_v62 = vld [vmem:[%s9676_s8 + $0x3d0] sm:$0xff]  ;;  %v8455_v56 = vpop.f32.mrf.mxu2 }
 0x844   :  { %3678 = vmatpush.msra.mxu2 %v5265_v5  ;;  %3747 = vmatpush.msra.mxu3 %v5266_v26  ;;  %v5309_v5 = vld [vmem:[%s9676_s8 + $0x2c0] sm:$0xff] }
 0x845   :  { %3702 = vmatpush.msra.mxu0 %v5267_v13  ;;  %3725 = vmatpush.msra.mxu1 %v5268_v3  ;;  %v5310_v26 = vld [vmem:[%s9676_s8 + $0x340] sm:$0xff]  ;;  %v5311_v13 = vld [vmem:[%s9676_s8 + $0x248] sm:$0xff] }
 0x846   :  { %3679 = vmatpush.msra.mxu2 %v5269_v18  ;;  %3748 = vmatpush.msra.mxu3 %v5270_v4  ;;  %v5312_v3 = vld [vmem:[%s9676_s8 + $0x3c8] sm:$0xff]  ;;  %v5313_v4 = vld [vmem:[%s9676_s8 + $0x2b8] sm:$0xff] }
 0x847   :  { %3703 = vmatpush.msra.mxu0 %v5271_v29  ;;  %3726 = vmatpush.msra.mxu1 %v5272_v32  ;;  %v5314_v29 = vld [vmem:[%s9676_s8 + $0x338] sm:$0xff] }
 0x848   :  { %3680 = vmatpush.msra.mxu2 %v5273_v34  ;;  %3749 = vmatpush.msra.mxu3 %v5274_v38  ;;  %v5315_v34 = vld [vmem:[%s9676_s8 + $0x240] sm:$0xff] }
 0x849   :  { %3704 = vmatpush.msra.mxu0 %v5275_v20  ;;  %3727 = vmatpush.msra.mxu1 %v5276_v14  ;;  %v5316_v38 = vld [vmem:[%s9676_s8 + $0x3c0] sm:$0xff]  ;;  %v5317_v20 = vld [vmem:[%s9676_s8 + $0x2b0] sm:$0xff] }
 0x84a   :  { %3681 = vmatpush.msra.mxu2 %v5277_v42  ;;  %3750 = vmatpush.msra.mxu3 %v5278_v27  ;;  %v5318_v14 = vld [vmem:[%s9676_s8 + $0x330] sm:$0xff]  ;;  %v5319_v42 = vld [vmem:[%s9676_s8 + $0x238] sm:$0xff] }
 0x84b   :  { %3705 = vmatpush.msra.mxu0 %v5279_v25  ;;  %3728 = vmatpush.msra.mxu1 %v5280_v10  ;;  %v5320_v27 = vld [vmem:[%s9676_s8 + $0x3b8] sm:$0xff]  ;;  %v5321_v25 = vld [vmem:[%s9676_s8 + $0x2a8] sm:$0xff] }
 0x84c   :  { %3682 = vmatpush.msra.mxu2 %v5283_v49  ;;  %3751 = vmatpush.msra.mxu3 %v5284_v57  ;;  %v5322_v10 = vld [vmem:[%s9676_s8 + $0x328] sm:$0xff]  ;;  %v5325_v57 = vld [vmem:[%s9676_s8 + $0x2a0] sm:$0xff] }
 0x84d   :  { %3782 = vmatpush.msrb.mxu0 %v5281_v11  ;;  %3805 = vmatpush.msrb.mxu1 %v5282_v36  ;;  %v5323_v11 = vld [vmem:[%s9676_s8 + $0x230] sm:$0xff] }
 0x84e   :  { %3759 = vmatpush.msrb.mxu2 %v5287_v52  ;;  %3828 = vmatpush.msrb.mxu3 %v5288_v23  ;;  %v5324_v36 = vld [vmem:[%s9676_s8 + $0x3b0] sm:$0xff]  ;;  %v5327_v52 = vld [vmem:[%s9676_s8 + $0x228] sm:$0xff] }
 0x84f   :  { %3783 = vmatpush.msrb.mxu0 %v5285_v51  ;;  %3806 = vmatpush.msrb.mxu1 %v5286_v7  ;;  %v5326_v51 = vld [vmem:[%s9676_s8 + $0x320] sm:$0xff]  ;;  %v5328_v23 = vld [vmem:[%s9676_s8 + $0x3a8] sm:$0xff] }
 0x850   :  { %3760 = vmatpush.msrb.mxu2 %v5291_v2  ;;  %3829 = vmatpush.msrb.mxu3 %v5292_v60  ;;  %v5331_v2 = vld [vmem:[%s9676_s8 + $0x220] sm:$0xff] }
 0x851   :  { %3784 = vmatpush.msrb.mxu0 %v5289_v54  ;;  %3807 = vmatpush.msrb.mxu1 %v5290_v0  ;;  %v5329_v54 = vld [vmem:[%s9676_s8 + $0x298] sm:$0xff]  ;;  %v5332_v60 = vld [vmem:[%s9676_s8 + $0x3a0] sm:$0xff] }
 0x852   :  { %3761 = vmatpush.msrb.mxu2 %v5295_v8  ;;  %3830 = vmatpush.msrb.mxu3 %v5296_v53  ;;  %v5330_v0 = vld [vmem:[%s9676_s8 + $0x318] sm:$0xff]  ;;  %v5334_v8 = vld [vmem:[%s9676_s8 + $0x310] sm:$0xff] }
 0x853   :  { %3785 = vmatpush.msrb.mxu0 %v5293_v19  ;;  %3808 = vmatpush.msrb.mxu1 %v5294_v37  ;;  %v5333_v37 = vld [vmem:[%s9676_s8 + $0x290] sm:$0xff] }
 0x854   :  { %3762 = vmatpush.msrb.mxu2 %v5299_v28  ;;  %3831 = vmatpush.msrb.mxu3 %v5300_v47  ;;  %v5337_v28 = vld [vmem:[%s9676_s8 + $0x288] sm:$0xff] }
 0x855   :  { %3786 = vmatpush.msrb.mxu0 %v5297_v55  ;;  %3809 = vmatpush.msrb.mxu1 %v5298_v63  ;;  %v5335_v55 = vld [vmem:[%s9676_s8 + $0x218] sm:$0xff]  ;;  %v5338_v47 = vld [vmem:[%s9676_s8 + $0x308] sm:$0xff] }
 0x856   :  { %3763 = vmatpush.msrb.mxu2 %v5303_v21  ;;  %3832 = vmatpush.msrb.mxu3 %v5304_v40  ;;  %v5336_v63 = vld [vmem:[%s9676_s8 + $0x398] sm:$0xff]  ;;  %v5341_v21 = vld [vmem:[%s9676_s8 + $0x280] sm:$0xff] }
 0x857   :  { %3787 = vmatpush.msrb.mxu0 %v5301_v15  ;;  %3810 = vmatpush.msrb.mxu1 %v5302_v6  ;;  %v5339_v15 = vld [vmem:[%s9676_s8 + $0x210] sm:$0xff]  ;;  %v5342_v40 = vld [vmem:[%s9676_s8 + $0x300] sm:$0xff] }
 0x858   :  { %3764 = vmatpush.msrb.mxu2 %v5307_v61  ;;  %3833 = vmatpush.msrb.mxu3 %v5308_v62  ;;  %v5340_v6 = vld [vmem:[%s9676_s8 + $0x390] sm:$0xff] }
 0x859   :  { %3788 = vmatpush.msrb.mxu0 %v5305_v22  ;;  %3811 = vmatpush.msrb.mxu1 %v5306_v24  ;;  %v5343_v22 = vld [vmem:[%s9676_s8 + $0x208] sm:$0xff] }
 0x85a   :  { %3765 = vmatpush.msrb.mxu2 %v5311_v13  ;;  %3834 = vmatpush.msrb.mxu3 %v5312_v3  ;;  %v8469_v18 = vpop.f32.mrf.mxu0  ;;  %v5344_v24 = vld [vmem:[%s9676_s8 + $0x388] sm:$0xff] }
 0x85b   :  { %3789 = vmatpush.msrb.mxu0 %v5309_v5  ;;  %3812 = vmatpush.msrb.mxu1 %v5310_v26  ;;  %v8477_v32 = vpop.f32.mrf.mxu1  ;;  %v5345_v5 = vld [vmem:[%s9676_s8 + $0x200] sm:$0xff] }
 0x85c   :  { %3766 = vmatpush.msrb.mxu2 %v5315_v34  ;;  %3835 = vmatpush.msrb.mxu3 %v5316_v38  ;;  %v5346_v26 = vld [vmem:[%s9676_s8 + $0x380] sm:$0xff] }
 0x85d   :  { %3790 = vmatpush.msrb.mxu0 %v5313_v4  ;;  %3813 = vmatpush.msrb.mxu1 %v5314_v29 }
 0x85e   :  { %3767 = vmatpush.msrb.mxu2 %v5319_v42  ;;  %3836 = vmatpush.msrb.mxu3 %v5320_v27 }
 0x85f   :  { %3791 = vmatpush.msrb.mxu0 %v5317_v20  ;;  %3814 = vmatpush.msrb.mxu1 %v5318_v14  ;;  %v8599_v20 = vld [vmem:[#allocation7 + $0x8] sm:$0xff]  ;;  %v8601_v14 = vld [vmem:[#allocation10 + $0x8] sm:$0xff] }
 0x860   :  { %3768 = vmatpush.msrb.mxu2 %v5323_v11  ;;  %3837 = vmatpush.msrb.mxu3 %v5324_v36  ;;  %v8509_v49 = vpop.f32.mrf.mxu2  ;;  %v3120_v27 = vperm.slane %v8599_v20, 1  ;;  %v3121_v11 = vperm.slane %v8599_v20, 2  ;;  %v3453_v36 = vperm.slane %v8601_v14, 2 }
 0x861   :  { %3792 = vmatpush.msrb.mxu0 %v5321_v25  ;;  %3815 = vmatpush.msrb.mxu1 %v5322_v10  ;;  %v8517_v7 = vpop.f32.mrf.mxu3  ;;  %v3452_v10 = vperm.slane %v8601_v14, 1 }
 0x862   :  { %3769 = vmatpush.msrb.mxu2 %v5327_v52  ;;  %3838 = vmatpush.msrb.mxu3 %v5328_v23 }
 0x863   :  { %3793 = vmatpush.msrb.mxu0 %v5325_v57  ;;  %3816 = vmatpush.msrb.mxu1 %v5326_v51  ;;  %v3176_v51 = vadd.f32 %v8469_v18, %v3120_v27 }
 0x864   :  { %3770 = vmatpush.msrb.mxu2 %v5331_v2  ;;  %3839 = vmatpush.msrb.mxu3 %v5332_v60  ;;  %v8537_v19 = vpop.f32.mrf.mxu0  ;;  %v3119_v2 = vperm.slane %v8599_v20, 0 }
 0x865   :  { %3794 = vmatpush.msrb.mxu0 %v5329_v54  ;;  %3817 = vmatpush.msrb.mxu1 %v5330_v0  ;;  %v8545_v53 = vpop.f32.mrf.mxu1  ;;  %v3199_v54 = vadd.f32 %v8477_v32, %v3121_v11 }
 0x866   :  { %3771 = vmatpush.msrb.mxu2 %v5335_v55  ;;  %3840 = vmatpush.msrb.mxu3 %v5336_v63  ;;  %v3454_v63 = vperm.slane %v8601_v14, 3  ;;  %v3153_v18 = vadd.f32 %v8509_v49, %v3119_v2 }
 0x867   :  { %3795 = vmatpush.msrb.mxu0 %v5333_v37  ;;  %3818 = vmatpush.msrb.mxu1 %v5334_v8  ;;  %v3451_v37 = vperm.slane %v8601_v14, 0  ;;  %v3122_v8 = vperm.slane %v8599_v20, 3 }
 0x868   :  { %3772 = vmatpush.msrb.mxu2 %v5339_v15  ;;  %3841 = vmatpush.msrb.mxu3 %v5340_v6  ;;  %v5348_v6 = vld [vmem:[#allocation16 + $0x3d0] sm:$0xff] }
 0x869   :  { %3796 = vmatpush.msrb.mxu0 %v5337_v28  ;;  %3819 = vmatpush.msrb.mxu1 %v5338_v47  ;;  %v5347_v47 = vld [vmem:[#allocation16 + $0x3c8] sm:$0xff] }
 0x86a   :  { %3773 = vmatpush.msrb.mxu2 %v5343_v22  ;;  %3842 = vmatpush.msrb.mxu3 %v5344_v24  ;;  %v8577_v61 = vpop.f32.mrf.mxu2  ;;  %v5349_v22 = vld [vmem:[#allocation16 + $0x388] sm:$0xff] }
 0x86b   :  { %3797 = vmatpush.msrb.mxu0 %v5341_v21  ;;  %3820 = vmatpush.msrb.mxu1 %v5342_v40  ;;  %v8579_v62 = vpop.f32.mrf.mxu3  ;;  %v3222_v21 = vadd.f32 %v8517_v7, %v3122_v8 }
 0x86c   :  { %3774 = vmatpush.msrb.mxu2 %v5345_v5  ;;  %3843 = vmatpush.msrb.mxu3 %v5346_v26  ;;  %v5350_v5 = vld [vmem:[#allocation16 + $0x390] sm:$0xff] }
 0x86e   :  { %v8587_v13 = vpop.f32.mrf.mxu0 }
 0x86f   :  { %v8589_v3 = vpop.f32.mrf.mxu1 }
 0x874   :  { %v8591_v4 = vpop.f32.mrf.mxu2 }
 0x875   :  { %v8593_v29 = vpop.f32.mrf.mxu3 }
 0x878   :  { %v8595_v34 = vpop.f32.mrf.mxu0 }
 0x879   :  { %v8597_v38 = vpop.f32.mrf.mxu1 }
 0x87e   :  { %v8603_v42 = vpop.f32.mrf.mxu2 }
 0x87f   :  { %v8606_v25 = vpop.f32.mrf.mxu3 }
 0x884   :  { %v3507_v57 = vpop.f32.mrf.mxu0 }
 0x885   :  { %v3508_v52 = vadd.f32 %v3507_v57, %v3452_v10  ;;  %v3530_v23 = vpop.f32.mrf.mxu1 }
 0x886   :  { %v3531_v0 = vadd.f32 %v3530_v23, %v3453_v36 }
 0x887   :  { %v3652_v60 = vmul.f32 %v3508_v52, %v3176_v51  ;;  %v5351_v51 = vld [vmem:[#allocation16 + $0x348] sm:$0xff]  ;;  %v3179_v52 = vadd.f32 %v8537_v19, %v3120_v27  ;;  %v5357_v19 = vld [vmem:[#allocation16 + $0x310] sm:$0xff]  ;;  %v5358_v27 = vld [vmem:[#allocation16 + $0x398] sm:$0xff] }
 0x888   :  { %v3653_v55 = vmul.f32 %v3531_v0, %v3199_v54  ;;  %v5352_v54 = vld [vmem:[#allocation16 + $0x350] sm:$0xff]  ;;  %v3202_v0 = vadd.f32 %v8545_v53, %v3121_v11  ;;  %v5359_v53 = vld [vmem:[#allocation16 + $0x340] sm:$0xff]  ;;  %v3156_v11 = vadd.f32 %v8577_v61, %v3119_v2 }
 0x889   :  { %3706 = vmatmul.f32.vlgmr.msra.gmra.mxu0 %v3652_v60  ;;  %v5353_v60 = vld [vmem:[#allocation16 + $0x3c0] sm:$0xff]  ;;  %v5367_v2 = vld [vmem:[#allocation16 + $0x290] sm:$0xff] }
 0x88a   :  { %3729 = vmatmul.f32.vlgmr.msra.gmra.mxu1 %v3653_v55  ;;  %v3484_v28 = vpop.f32.mrf.mxu2  ;;  %3920 = vmatpush.msra.mxu0 %v5347_v47  ;;  %v5355_v47 = vld [vmem:[#allocation16 + $0x308] sm:$0xff]  ;;  %v5366_v61 = vld [vmem:[#allocation16 + $0x2c0] sm:$0xff] }
 0x88b   :  { %v3485_v15 = vadd.f32 %v3484_v28, %v3451_v37  ;;  %v3553_v32 = vpop.f32.mrf.mxu3  ;;  %3943 = vmatpush.msra.mxu1 %v5348_v6  ;;  %v5354_v28 = vld [vmem:[#allocation16 + $0x3d8] sm:$0xff] }
 0x88c   :  { %v3554_v40 = vadd.f32 %v3553_v32, %v3454_v63  ;;  %3921 = vmatpush.msra.mxu0 %v5349_v22  ;;  %v5360_v6 = vld [vmem:[#allocation16 + $0x358] sm:$0xff] }
 0x88d   :  { %v3651_v24 = vmul.f32 %v3485_v15, %v3153_v18  ;;  %3944 = vmatpush.msra.mxu1 %v5350_v5  ;;  %v5356_v15 = vld [vmem:[#allocation16 + $0x380] sm:$0xff]  ;;  %v5363_v5 = vld [vmem:[#allocation16 + $0x2d0] sm:$0xff] }
 0x88e   :  { %v3654_v26 = vmul.f32 %v3554_v40, %v3222_v21  ;;  %v3510_v57 = vpop.f32.mrf.mxu0  ;;  %3922 = vmatpush.msra.mxu0 %v5351_v51  ;;  %v5361_v21 = vld [vmem:[#allocation16 + $0x2c8] sm:$0xff]  ;;  %v3225_v40 = vadd.f32 %v8579_v62, %v3122_v8  ;;  %v5369_v62 = vld [vmem:[#allocation16 + $0x280] sm:$0xff]  ;;  %v5370_v8 = vld [vmem:[#allocation16 + $0x298] sm:$0xff] }
 0x88f   :  { %v3511_v23 = vadd.f32 %v3510_v57, %v3452_v10  ;;  %v3533_v49 = vpop.f32.mrf.mxu1  ;;  %3683 = vmatmul.f32.vlgmr.msra.gmra.mxu2 %v3651_v24  ;;  %3945 = vmatpush.msra.mxu1 %v5352_v54  ;;  %v5362_v24 = vld [vmem:[#allocation16 + $0x300] sm:$0xff]  ;;  %v5364_v57 = vld [vmem:[#allocation16 + $0x318] sm:$0xff]  ;;  %v5365_v51 = vld [vmem:[#allocation16 + $0x288] sm:$0xff] }
 0x890   :  { %v3534_v7 = vadd.f32 %v3533_v49, %v3453_v36  ;;  %3752 = vmatmul.f32.vlgmr.msra.gmra.mxu3 %v3654_v26  ;;  %3897 = vmatpush.msra.mxu2 %v5353_v60  ;;  %v5373_v49 = vld [vmem:[#allocation16 + $0x250] sm:$0xff]  ;;  %v5374_v54 = vld [vmem:[#allocation16 + $0x258] sm:$0xff] }
 0x891   :  { %v3660_v55 = vmul.f32 %v3511_v23, %v3179_v52  ;;  %3966 = vmatpush.msra.mxu3 %v5354_v28  ;;  %3923 = vmatpush.msra.mxu0 %v5355_v47  ;;  %v5372_v23 = vld [vmem:[#allocation16 + $0x240] sm:$0xff]  ;;  %v5377_v60 = vld [vmem:[#allocation16 + $0x210] sm:$0xff]  ;;  %v5379_v28 = vld [vmem:[#allocation16 + $0x1c8] sm:$0xff] }
 0x892   :  { %v3661_v18 = vmul.f32 %v3534_v7, %v3202_v0  ;;  %3898 = vmatpush.msra.mxu2 %v5356_v15  ;;  %3946 = vmatpush.msra.mxu1 %v5357_v19  ;;  %v5375_v0 = vld [vmem:[#allocation16 + $0x208] sm:$0xff]  ;;  %v5376_v7 = vld [vmem:[#allocation16 + $0x200] sm:$0xff]  ;;  %v5382_v15 = vld [vmem:[#allocation16 + $0x1d8] sm:$0xff] }
 0x893   :  { %3709 = vmatmul.f32.gmra.mxu0 %v3660_v55  ;;  %3967 = vmatpush.msra.mxu3 %v5358_v27  ;;  %v5378_v55 = vld [vmem:[#allocation16 + $0x218] sm:$0xff]  ;;  %v5380_v47 = vld [vmem:[#allocation16 + $0x1c0] sm:$0xff]  ;;  %v5383_v19 = vld [vmem:[#allocation16 + $0x188] sm:$0xff] }
 0x894   :  { %3732 = vmatmul.f32.gmra.mxu1 %v3661_v18  ;;  %v3487_v10 = vpop.f32.mrf.mxu2  ;;  %3899 = vmatpush.msra.mxu2 %v5359_v53  ;;  %v5381_v18 = vld [vmem:[#allocation16 + $0x1d0] sm:$0xff]  ;;  %v5384_v27 = vld [vmem:[#allocation16 + $0x180] sm:$0xff]  ;;  %v3124_v53 = vperm.slane %v8599_v20, 5 }
 0x895   :  { %v3488_v36 = vadd.f32 %v3487_v10, %v3451_v37  ;;  %v3556_v32 = vpop.f32.mrf.mxu3  ;;  %3968 = vmatpush.msra.mxu3 %v5360_v6  ;;  %3924 = vmatpush.msra.mxu0 %v5361_v21  ;;  %v5368_v37 = vld [vmem:[#allocation16 + $0x2d8] sm:$0xff]  ;;  %v5385_v10 = vld [vmem:[#allocation16 + $0x190] sm:$0xff]  ;;  %v3125_v6 = vperm.slane %v8599_v20, 6  ;;  %v3457_v21 = vperm.slane %v8601_v14, 6 }
 0x896   :  { %v3557_v22 = vadd.f32 %v3556_v32, %v3454_v63  ;;  %3900 = vmatpush.msra.mxu2 %v5362_v24  ;;  %3947 = vmatpush.msra.mxu1 %v5363_v5  ;;  %v5371_v63 = vld [vmem:[#allocation16 + $0x248] sm:$0xff]  ;;  %v5390_v24 = vld [vmem:[#allocation16 + $0x158] sm:$0xff] }
 0x897   :  { %v3659_v26 = vmul.f32 %v3488_v36, %v3156_v11  ;;  %3969 = vmatpush.msra.mxu3 %v5364_v57  ;;  %3925 = vmatpush.msra.mxu0 %v5365_v51  ;;  %v3456_v11 = vperm.slane %v8601_v14, 5  ;;  %v5386_v36 = vld [vmem:[#allocation16 + $0x198] sm:$0xff]  ;;  %v5387_v32 = vld [vmem:[#allocation16 + $0x148] sm:$0xff]  ;;  %v5392_v57 = vld [vmem:[#allocation16 + $0x100] sm:$0xff] }
 0x898   :  { %v3662_v52 = vmul.f32 %v3557_v22, %v3225_v40  ;;  %3901 = vmatpush.msra.mxu2 %v5366_v61  ;;  %3948 = vmatpush.msra.mxu1 %v5367_v2  ;;  %v5388_v40 = vld [vmem:[#allocation16 + $0x140] sm:$0xff]  ;;  %v5389_v22 = vld [vmem:[#allocation16 + $0x150] sm:$0xff]  ;;  %v5391_v5 = vld [vmem:[#allocation16 + $0x108] sm:$0xff] }
 0x899   :  { %3686 = vmatmul.f32.gmra.mxu2 %v3659_v26  ;;  %3970 = vmatpush.msra.mxu3 %v5368_v37  ;;  %v5393_v51 = vld [vmem:[#allocation16 + $0x110] sm:$0xff]  ;;  %v5394_v37 = vld [vmem:[#allocation16 + $0x118] sm:$0xff] }
 0x89a   :  { %3755 = vmatmul.f32.gmra.mxu3 %v3662_v52  ;;  %3902 = vmatpush.msra.mxu2 %v5369_v62  ;;  %v3268_v52 = vadd.f32 %v8587_v13, %v3124_v53  ;;  %v5395_v62 = vld [vmem:[#allocation16 + $0xc8] sm:$0xff]  ;;  %v3123_v13 = vperm.slane %v8599_v20, 4 }
 0x89b   :  { %3971 = vmatpush.msra.mxu3 %v5370_v8  ;;  %3926 = vmatpush.msra.mxu0 %v5371_v63  ;;  %v3291_v8 = vadd.f32 %v8589_v3, %v3125_v6  ;;  %v3458_v3 = vperm.slane %v8601_v14, 7 }
 0x89c   :  { %3903 = vmatpush.msra.mxu2 %v5372_v23  ;;  %3949 = vmatpush.msra.mxu1 %v5373_v49  ;;  %v5396_v23 = vld [vmem:[#allocation16 + $0xc0] sm:$0xff]  ;;  %v5397_v49 = vld [vmem:[#allocation16 + $0xd0] sm:$0xff] }
 0x89d   :  { %3972 = vmatpush.msra.mxu3 %v5374_v54  ;;  %3927 = vmatpush.msra.mxu0 %v5375_v0  ;;  %v3455_v0 = vperm.slane %v8601_v14, 4  ;;  %v5425_v14 = vld [vmem:[#allocation16 + $0x330] sm:$0xff] }
 0x89e   :  { %3904 = vmatpush.msra.mxu2 %v5376_v7  ;;  %3950 = vmatpush.msra.mxu1 %v5377_v60  ;;  %v5398_v7 = vld [vmem:[#allocation16 + $0xd8] sm:$0xff]  ;;  %v5399_v60 = vld [vmem:[#allocation16 + $0x88] sm:$0xff] }
 0x89f   :  { %3973 = vmatpush.msra.mxu3 %v5378_v55  ;;  %3928 = vmatpush.msra.mxu0 %v5379_v28  ;;  %v3126_v55 = vperm.slane %v8599_v20, 7  ;;  %v5424_v20 = vld [vmem:[#allocation16 + $0x328] sm:$0xff] }
 0x8a0   :  { %3905 = vmatpush.msra.mxu2 %v5380_v47  ;;  %3951 = vmatpush.msra.mxu1 %v5381_v18  ;;  %v5400_v47 = vld [vmem:[#allocation16 + $0x80] sm:$0xff]  ;;  %v5401_v18 = vld [vmem:[#allocation16 + $0x90] sm:$0xff] }
 0x8a1   :  { %3974 = vmatpush.msra.mxu3 %v5382_v15  ;;  %3929 = vmatpush.msra.mxu0 %v5383_v19  ;;  %v5402_v15 = vld [vmem:[#allocation16 + $0x98] sm:$0xff] }
 0x8a2   :  { %3906 = vmatpush.msra.mxu2 %v5384_v27  ;;  %3952 = vmatpush.msra.mxu1 %v5385_v10  ;;  %v5403_v27 = vld [vmem:[#allocation16 + $0x40] sm:$0xff]  ;;  %v3245_v10 = vadd.f32 %v8591_v4, %v3123_v13  ;;  %v3271_v4 = vadd.f32 %v8595_v34, %v3124_v53  ;;  %v5411_v34 = vld [vmem:[#allocation16 + $0x3e8] sm:$0xff] }
 0x8a3   :  { %3975 = vmatpush.msra.mxu3 %v5386_v36  ;;  %3930 = vmatpush.msra.mxu0 %v5387_v32 }
 0x8a4   :  { %3907 = vmatpush.msra.mxu2 %v5388_v40  ;;  %3953 = vmatpush.msra.mxu1 %v5389_v22  ;;  %v5404_v40 = vld [vmem:[#allocation16 + $0x48] sm:$0xff]  ;;  %v5405_v22 = vld [vmem:[#allocation16 + $0x50] sm:$0xff] }
 0x8a5   :  { %3976 = vmatpush.msra.mxu3 %v5390_v24  ;;  %3931 = vmatpush.msra.mxu0 %v5391_v5  ;;  %v3314_v24 = vadd.f32 %v8593_v29, %v3126_v55  ;;  %v5409_v29 = vld [vmem:[#allocation16 + $0x10] sm:$0xff] }
 0x8a6   :  { %v3599_v26 = vpop.f32.mrf.mxu0  ;;  %3908 = vmatpush.msra.mxu2 %v5392_v57  ;;  %3954 = vmatpush.msra.mxu1 %v5393_v51  ;;  %v5406_v57 = vld [vmem:[#allocation16 + $0x58] sm:$0xff]  ;;  %v5407_v51 = vld [vmem:[#allocation16] sm:$0xff] }
 0x8a7   :  { %v3600_v61 = vadd.f32 %v3599_v26, %v3456_v11  ;;  %v3622_v2 = vpop.f32.mrf.mxu1  ;;  %3977 = vmatpush.msra.mxu3 %v5394_v37  ;;  %3932 = vmatpush.msra.mxu0 %v5395_v62  ;;  %v5408_v37 = vld [vmem:[#allocation16 + $0x8] sm:$0xff]  ;;  %v3294_v62 = vadd.f32 %v8597_v38, %v3125_v6  ;;  %v5415_v6 = vld [vmem:[#allocation16 + $0x3a0] sm:$0xff] }
 0x8a8   :  { %v3623_v63 = vadd.f32 %v3622_v2, %v3457_v21  ;;  %3909 = vmatpush.msra.mxu2 %v5396_v23  ;;  %3955 = vmatpush.msra.mxu1 %v5397_v49  ;;  %v5410_v23 = vld [vmem:[#allocation16 + $0x18] sm:$0xff] }
 0x8a9   :  { %v3656_v54 = vmul.f32 %v3600_v61, %v3268_v52  ;;  %3978 = vmatpush.msra.mxu3 %v5398_v7  ;;  %3933 = vmatpush.msra.mxu0 %v5399_v60  ;;  %v5414_v7 = vld [vmem:[#allocation16 + $0x3f8] sm:$0xff] }
 0x8aa   :  { %v3657_v28 = vmul.f32 %v3623_v63, %v3291_v8  ;;  %3910 = vmatpush.msra.mxu2 %v5400_v47  ;;  %3956 = vmatpush.msra.mxu1 %v5401_v18  ;;  %v5416_v47 = vld [vmem:[#allocation16 + $0x3a8] sm:$0xff]  ;;  %v5417_v18 = vld [vmem:[#allocation16 + $0x3b0] sm:$0xff] }
 0x8ab   :  { %3798 = vmatmul.f32.vlgmr.msrb.gmra.mxu0 %v3656_v54  ;;  %3979 = vmatpush.msra.mxu3 %v5402_v15  ;;  %v5413_v54 = vld [vmem:[#allocation16 + $0x3e0] sm:$0xff]  ;;  %v3317_v15 = vadd.f32 %v8606_v25, %v3126_v55  ;;  %v5426_v25 = vld [vmem:[#allocation16 + $0x338] sm:$0xff] }
 0x8ac   :  { %3821 = vmatmul.f32.vlgmr.msrb.gmra.mxu1 %v3657_v28  ;;  %v3576_v19 = vpop.f32.mrf.mxu2  ;;  %3911 = vmatpush.msra.mxu2 %v5403_v27  ;;  %v5418_v27 = vld [vmem:[#allocation16 + $0x3b8] sm:$0xff]  ;;  %v5427_v55 = vld [vmem:[#allocation16 + $0x2e0] sm:$0xff] }
 0x8ad   :  { %v3577_v36 = vadd.f32 %v3576_v19, %v3455_v0  ;;  %v3645_v32 = vpop.f32.mrf.mxu3  ;;  %3934 = vmatpush.msra.mxu0 %v5404_v40  ;;  %3957 = vmatpush.msra.mxu1 %v5405_v22  ;;  %v5423_v40 = vld [vmem:[#allocation16 + $0x320] sm:$0xff]  ;;  %v5429_v22 = vld [vmem:[#allocation16 + $0x2f0] sm:$0xff] }
 0x8ae   :  { %v3646_v5 = vadd.f32 %v3645_v32, %v3458_v3  ;;  %v3602_v26 = vpop.f32.mrf.mxu0  ;;  %3980 = vmatpush.msra.mxu3 %v5406_v57  ;;  %3912 = vmatpush.msra.mxu2 %v5407_v51  ;;  %v5422_v32 = vld [vmem:[#allocation16 + $0x378] sm:$0xff]  ;;  %v5433_v57 = vld [vmem:[#allocation16 + $0x2b0] sm:$0xff] }
 0x8af   :  { %v3655_v52 = vmul.f32 %v3577_v36, %v3245_v10  ;;  %v3603_v61 = vadd.f32 %v3602_v26, %v3456_v11  ;;  %v3625_v2 = vpop.f32.mrf.mxu1  ;;  %3935 = vmatpush.msra.mxu0 %v5408_v37  ;;  %3958 = vmatpush.msra.mxu1 %v5409_v29  ;;  %v5412_v11 = vld [vmem:[#allocation16 + $0x3f0] sm:$0xff]  ;;  %v5419_v10 = vld [vmem:[#allocation16 + $0x360] sm:$0xff]  ;;  %v5432_v26 = vld [vmem:[#allocation16 + $0x2a8] sm:$0xff] }
 0x8b0   :  { %v3658_v8 = vmul.f32 %v3646_v5, %v3314_v24  ;;  %v3626_v63 = vadd.f32 %v3625_v2, %v3457_v21  ;;  %3981 = vmatpush.msra.mxu3 %v5410_v23  ;;  %v3248_v21 = vadd.f32 %v8603_v42, %v3123_v13  ;;  %v5420_v13 = vld [vmem:[#allocation16 + $0x368] sm:$0xff]  ;;  %v5430_v24 = vld [vmem:[#allocation16 + $0x2f8] sm:$0xff]  ;;  %v5431_v5 = vld [vmem:[#allocation16 + $0x2a0] sm:$0xff] }
 0x8b1   :  { %4012 = vmatpush.msrb.mxu0 %v5411_v34  ;;  %v3664_v53 = vmul.f32 %v3603_v61, %v3271_v4  ;;  %3775 = vmatmul.f32.vlgmr.msrb.gmra.mxu2 %v3655_v52  ;;  %v5434_v51 = vld [vmem:[#allocation16 + $0x2b8] sm:$0xff]  ;;  %v5435_v4 = vld [vmem:[#allocation16 + $0x260] sm:$0xff]  ;;  %v5436_v52 = vld [vmem:[#allocation16 + $0x268] sm:$0xff] }
 0x8b2   :  { %4035 = vmatpush.msrb.mxu1 %v5412_v11  ;;  %v3665_v49 = vmul.f32 %v3626_v63, %v3294_v62  ;;  %3844 = vmatmul.f32.vlgmr.msrb.gmra.mxu3 %v3658_v8  ;;  %v5437_v61 = vld [vmem:[#allocation16 + $0x270] sm:$0xff]  ;;  %v5438_v2 = vld [vmem:[#allocation16 + $0x278] sm:$0xff]  ;;  %v5439_v37 = vld [vmem:[#allocation16 + $0x220] sm:$0xff] }
 0x8b3   :  { %3989 = vmatpush.msrb.mxu2 %v5413_v54  ;;  %3801 = vmatmul.f32.gmra.mxu0 %v3664_v53  ;;  %v5440_v29 = vld [vmem:[#allocation16 + $0x228] sm:$0xff]  ;;  %v5441_v62 = vld [vmem:[#allocation16 + $0x230] sm:$0xff]  ;;  %v5442_v8 = vld [vmem:[#allocation16 + $0x238] sm:$0xff] }
 0x8b4   :  { %4058 = vmatpush.msrb.mxu3 %v5414_v7  ;;  %3824 = vmatmul.f32.gmra.mxu1 %v3665_v49  ;;  %v3579_v38 = vpop.f32.mrf.mxu2  ;;  %v5443_v63 = vld [vmem:[#allocation16 + $0x1e0] sm:$0xff]  ;;  %v5444_v23 = vld [vmem:[#allocation16 + $0x1e8] sm:$0xff]  ;;  %v5445_v34 = vld [vmem:[#allocation16 + $0x1f0] sm:$0xff] }
 0x8b5   :  { %3990 = vmatpush.msrb.mxu2 %v5415_v6  ;;  %v3580_v60 = vadd.f32 %v3579_v38, %v3455_v0  ;;  %v3648_v28 = vpop.f32.mrf.mxu3  ;;  %4013 = vmatpush.msrb.mxu0 %v5416_v47  ;;  %v5421_v0 = vld [vmem:[#allocation16 + $0x370] sm:$0xff]  ;;  %v5446_v53 = vld [vmem:[#allocation16 + $0x1f8] sm:$0xff]  ;;  %v5447_v11 = vld [vmem:[#allocation16 + $0x1a0] sm:$0xff] }
 0x8b6   :  { %4036 = vmatpush.msrb.mxu1 %v5417_v18  ;;  %v3649_v19 = vadd.f32 %v3648_v28, %v3458_v3  ;;  %4059 = vmatpush.msrb.mxu3 %v5418_v27  ;;  %v5428_v3 = vld [vmem:[#allocation16 + $0x2e8] sm:$0xff]  ;;  %v5449_v54 = vld [vmem:[#allocation16 + $0x1b0] sm:$0xff]  ;;  %v5450_v7 = vld [vmem:[#allocation16 + $0x1b8] sm:$0xff] }
 0x8b7   :  { %3991 = vmatpush.msrb.mxu2 %v5419_v10  ;;  %v3663_v42 = vmul.f32 %v3580_v60, %v3248_v21  ;;  %4014 = vmatpush.msrb.mxu0 %v5420_v13  ;;  %v5448_v49 = vld [vmem:[#allocation16 + $0x1a8] sm:$0xff]  ;;  %v5451_v38 = vld [vmem:[#allocation16 + $0x160] sm:$0xff]  ;;  %v5453_v21 = vld [vmem:[#allocation16 + $0x170] sm:$0xff] }
 0x8b8   :  { %4037 = vmatpush.msrb.mxu1 %v5421_v0  ;;  %v3666_v36 = vmul.f32 %v3649_v19, %v3317_v15  ;;  %4060 = vmatpush.msrb.mxu3 %v5422_v32  ;;  %v5452_v6 = vld [vmem:[#allocation16 + $0x168] sm:$0xff]  ;;  %v5454_v60 = vld [vmem:[#allocation16 + $0x178] sm:$0xff]  ;;  %v5455_v28 = vld [vmem:[#allocation16 + $0x120] sm:$0xff] }
 0x8b9   :  { %3992 = vmatpush.msrb.mxu2 %v5423_v40  ;;  %4015 = vmatpush.msrb.mxu0 %v5424_v20  ;;  %v5456_v47 = vld [vmem:[#allocation16 + $0x128] sm:$0xff]  ;;  %v5457_v18 = vld [vmem:[#allocation16 + $0x130] sm:$0xff]  ;;  %v5458_v15 = vld [vmem:[#allocation16 + $0x138] sm:$0xff] }
 0x8ba   :  { %3778 = vmatmul.f32.gmra.mxu2 %v3663_v42  ;;  %3847 = vmatmul.f32.gmra.mxu3 %v3666_v36  ;;  %v5459_v19 = vld [vmem:[#allocation16 + $0xe0] sm:$0xff]  ;;  %v5460_v27 = vld [vmem:[#allocation16 + $0xe8] sm:$0xff]  ;;  %v5461_v10 = vld [vmem:[#allocation16 + $0xf0] sm:$0xff] }
 0x8bb   :  { %4038 = vmatpush.msrb.mxu1 %v5425_v14  ;;  %4061 = vmatpush.msrb.mxu3 %v5426_v25  ;;  %v5462_v42 = vld [vmem:[#allocation16 + $0xf8] sm:$0xff]  ;;  %v5463_v13 = vld [vmem:[#allocation16 + $0xa0] sm:$0xff]  ;;  %v5464_v0 = vld [vmem:[#allocation16 + $0xa8] sm:$0xff] }
 0x8bc   :  { %3993 = vmatpush.msrb.mxu2 %v5427_v55  ;;  %4016 = vmatpush.msrb.mxu0 %v5428_v3  ;;  %v5465_v36 = vld [vmem:[#allocation16 + $0xb0] sm:$0xff]  ;;  %v5466_v32 = vld [vmem:[#allocation16 + $0xb8] sm:$0xff]  ;;  %v5467_v40 = vld [vmem:[#allocation16 + $0x60] sm:$0xff] }
 0x8bd   :  { %4039 = vmatpush.msrb.mxu1 %v5429_v22  ;;  %4062 = vmatpush.msrb.mxu3 %v5430_v24  ;;  %v5468_v20 = vld [vmem:[#allocation16 + $0x68] sm:$0xff]  ;;  %v5469_v14 = vld [vmem:[#allocation16 + $0x70] sm:$0xff]  ;;  %v5470_v25 = vld [vmem:[#allocation16 + $0x78] sm:$0xff] }
 0x8be   :  { %3994 = vmatpush.msrb.mxu2 %v5431_v5  ;;  %4017 = vmatpush.msrb.mxu0 %v5432_v26  ;;  %v5471_v55 = vld [vmem:[#allocation16 + $0x20] sm:$0xff]  ;;  %v5472_v3 = vld [vmem:[#allocation16 + $0x28] sm:$0xff]  ;;  %v5473_v22 = vld [vmem:[#allocation16 + $0x30] sm:$0xff] }
 0x8bf   :  { %4040 = vmatpush.msrb.mxu1 %v5433_v57  ;;  %4063 = vmatpush.msrb.mxu3 %v5434_v51  ;;  %v5474_v24 = vld [vmem:[#allocation16 + $0x38] sm:$0xff] }
 0x8c0   :  { %3995 = vmatpush.msrb.mxu2 %v5435_v4  ;;  %4018 = vmatpush.msrb.mxu0 %v5436_v52  ;;  %v5475_v4 = vld [vmem:[#allocation17] ss:$0 sm:$0xff] }
 0x8c1   :  { %4041 = vmatpush.msrb.mxu1 %v5437_v61  ;;  %4064 = vmatpush.msrb.mxu3 %v5438_v2 }
 0x8c2   :  { %3996 = vmatpush.msrb.mxu2 %v5439_v37  ;;  %4019 = vmatpush.msrb.mxu0 %v5440_v29 }
 0x8c3   :  { %4042 = vmatpush.msrb.mxu1 %v5441_v62  ;;  %4065 = vmatpush.msrb.mxu3 %v5442_v8 }
 0x8c4   :  { %3997 = vmatpush.msrb.mxu2 %v5443_v63  ;;  %4020 = vmatpush.msrb.mxu0 %v5444_v23 }
 0x8c5   :  { %4043 = vmatpush.msrb.mxu1 %v5445_v34  ;;  %4066 = vmatpush.msrb.mxu3 %v5446_v53 }
 0x8c6   :  { %3998 = vmatpush.msrb.mxu2 %v5447_v11  ;;  %4021 = vmatpush.msrb.mxu0 %v5448_v49 }
 0x8c7   :  { %4044 = vmatpush.msrb.mxu1 %v5449_v54  ;;  %4067 = vmatpush.msrb.mxu3 %v5450_v7 }
 0x8c8   :  { %3999 = vmatpush.msrb.mxu2 %v5451_v38  ;;  %4022 = vmatpush.msrb.mxu0 %v5452_v6 }
 0x8c9   :  { %4045 = vmatpush.msrb.mxu1 %v5453_v21  ;;  %4068 = vmatpush.msrb.mxu3 %v5454_v60 }
 0x8ca   :  { %4000 = vmatpush.msrb.mxu2 %v5455_v28  ;;  %4023 = vmatpush.msrb.mxu0 %v5456_v47 }
 0x8cb   :  { %4046 = vmatpush.msrb.mxu1 %v5457_v18  ;;  %4069 = vmatpush.msrb.mxu3 %v5458_v15 }
 0x8cc   :  { %4001 = vmatpush.msrb.mxu2 %v5459_v19  ;;  %4024 = vmatpush.msrb.mxu0 %v5460_v27 }
 0x8cd   :  { %4047 = vmatpush.msrb.mxu1 %v5461_v10  ;;  %4070 = vmatpush.msrb.mxu3 %v5462_v42 }
 0x8ce   :  { %4002 = vmatpush.msrb.mxu2 %v5463_v13  ;;  %4025 = vmatpush.msrb.mxu0 %v5464_v0 }
 0x8cf   :  { %4048 = vmatpush.msrb.mxu1 %v5465_v36  ;;  %4071 = vmatpush.msrb.mxu3 %v5466_v32 }
 0x8d0   :  { %4003 = vmatpush.msrb.mxu2 %v5467_v40  ;;  %4026 = vmatpush.msrb.mxu0 %v5468_v20 }
 0x8d1   :  { %4049 = vmatpush.msrb.mxu1 %v5469_v14  ;;  %4072 = vmatpush.msrb.mxu3 %v5470_v25 }
 0x8d2   :  { %4004 = vmatpush.msrb.mxu2 %v5471_v55  ;;  %4027 = vmatpush.msrb.mxu0 %v5472_v3 }
 0x8d3   :  { %4050 = vmatpush.msrb.mxu1 %v5473_v22  ;;  %4073 = vmatpush.msrb.mxu3 %v5474_v24 }
 0x906   :  { %v3707_v5 = vpop.f32.mrf.mxu0 }
 0x907   :  { %v3730_v57 = vpop.f32.mrf.mxu1 }
 0x910   :  { %v3710_v2 = vpop.f32.mrf.mxu0 }
 0x911   :  { %v3733_v29 = vpop.f32.mrf.mxu1 }
 0x912   :  { %v3684_v26 = vpop.f32.mrf.mxu2 }
 0x913   :  { %v3753_v51 = vpop.f32.mrf.mxu3  ;;  %v3685_v52 = vadd.f32 %v5475_v4, %v3684_v26 }
 0x915   :  { %v3708_v61 = vadd.f32 %v3707_v5, %v3685_v52 }
 0x917   :  { %v3731_v62 = vadd.f32 %v3730_v57, %v3708_v61 }
 0x919   :  { %v3754_v23 = vadd.f32 %v3753_v51, %v3731_v62 }
 0x91c   :  { %v3687_v37 = vpop.f32.mrf.mxu2 }
 0x91d   :  { %v3688_v8 = vadd.f32 %v5475_v4, %v3687_v37  ;;  %v3756_v63 = vpop.f32.mrf.mxu3 }
 0x91f   :  { %v3711_v34 = vadd.f32 %v3710_v2, %v3688_v8 }
 0x921   :  { %v3734_v7 = vadd.f32 %v3733_v29, %v3711_v34 }
 0x923   :  { %v3757_v60 = vadd.f32 %v3756_v63, %v3734_v7 }
 0x928   :  { %v3799_v53 = vpop.f32.mrf.mxu0 }
 0x929   :  { %v3822_v54 = vpop.f32.mrf.mxu1 }
 0x930   :  { %v3802_v15 = vpop.f32.mrf.mxu0 }
 0x931   :  { %v3825_v27 = vpop.f32.mrf.mxu1 }
 0x934   :  { %v3776_v11 = vpop.f32.mrf.mxu2 }
 0x935   :  { %v3777_v49 = vadd.f32 %v3776_v11, %v3754_v23  ;;  %v3845_v6 = vpop.f32.mrf.mxu3 }
 0x937   :  { %v3800_v38 = vadd.f32 %v3799_v53, %v3777_v49 }
 0x939   :  { %v3823_v21 = vadd.f32 %v3822_v54, %v3800_v38 }
 0x93b   :  { %v3846_v28 = vadd.f32 %v3845_v6, %v3823_v21  ;;  %v4202_v6 = vld [vmem:[#allocation11 + $0x7c0] sm:$0xff]  ;;  %v4203_v21 = vld [vmem:[#allocation11 + $0x7c8] sm:$0xff] }
 0x93d   :  { %v3779_v47 = vpop.f32.mrf.mxu2  ;;  %3851 = vrot.lane.b32.xlu0 %v3846_v28, %s9677_s1  ;;  %v3848_v42 = vpop.f32.mrf.mxu3 }
 0x93e   :  { %v3780_v18 = vadd.f32 %v3779_v47, %v3757_v60  ;;  %v4204_v60 = vld [vmem:[#allocation11 + $0x7d0] sm:$0xff]  ;;  %v4194_v47 = vld [vmem:[#allocation11 + $0x780] sm:$0xff] }
 0x940   :  { %v3803_v19 = vadd.f32 %v3802_v15, %v3780_v18  ;;  %v4195_v18 = vld [vmem:[#allocation11 + $0x788] sm:$0xff]  ;;  %v4196_v15 = vld [vmem:[#allocation11 + $0x790] sm:$0xff] }
 0x942   :  { %v3826_v10 = vadd.f32 %v3825_v27, %v3803_v19  ;;  %v4197_v19 = vld [vmem:[#allocation11 + $0x798] sm:$0xff]  ;;  %v4186_v27 = vld [vmem:[#allocation11 + $0x740] sm:$0xff] }
 0x944   :  { %v3849_v13 = vadd.f32 %v3848_v42, %v3826_v10  ;;  %v4187_v10 = vld [vmem:[#allocation11 + $0x748] sm:$0xff]  ;;  %v4188_v42 = vld [vmem:[#allocation11 + $0x750] sm:$0xff] }
 0x946   :  { %3853 = vrot.lane.b32.xlu1 %v3849_v13, %s9677_s1 }
 0x9af   :  { %v3852_v0 = vpop.permute.xlu0 %3851 }
 0x9b0   :  { %v3855_v36 = vmax.f32 %v3846_v28, %v3852_v0 }
 0x9b2   :  { %3857 = vrot.lane.b32.xlu2 %v3855_v36, %s6093_s29 }
 0x9b8   :  { %v3854_v32 = vpop.permute.xlu1 %3853 }
 0x9b9   :  { %v3856_v40 = vmax.f32 %v3849_v13, %v3854_v32  ;;  %v4179_v32 = vld [vmem:[#allocation11 + $0x708] sm:$0xff] }
 0x9bb   :  { %3859 = vrot.lane.b32.xlu0 %v3856_v40, %s6093_s29 }
 0xa0c   :  { %v3858_v20 = vpop.permute.xlu2 %3857 }
 0xa0d   :  { %v3861_v14 = vmax.f32 %v3855_v36, %v3858_v20  ;;  %v4178_v36 = vld [vmem:[#allocation11 + $0x700] sm:$0xff]  ;;  %v4180_v20 = vld [vmem:[#allocation11 + $0x710] sm:$0xff] }
 0xa0f   :  { %3863 = vrot.lane.b32.xlu1 %v3861_v14, %s6072_s12 }
 0xa2d   :  { %v3860_v25 = vpop.permute.xlu0 %3859 }
 0xa2e   :  { %v3862_v55 = vmax.f32 %v3856_v40, %v3860_v25  ;;  %v4170_v25 = vld [vmem:[#allocation11 + $0x6c0] sm:$0xff] }
 0xa30   :  { %3865 = vrot.lane.b32.xlu2 %v3862_v55, %s6072_s12 }
 0xa81   :  { %v3864_v3 = vpop.permute.xlu1 %3863 }
 0xa82   :  { %v3867_v22 = vmax.f32 %v3861_v14, %v3864_v3  ;;  %v4181_v14 = vld [vmem:[#allocation11 + $0x718] sm:$0xff]  ;;  %v4172_v3 = vld [vmem:[#allocation11 + $0x6d0] sm:$0xff] }
 0xa84   :  { %v3869_v24 = vsub.f32 %v3846_v28, %v3867_v22  ;;  %v4205_v28 = vld [vmem:[#allocation11 + $0x7d8] sm:$0xff] }
 0xa85   :  { %v4173_v22 = vld [vmem:[#allocation11 + $0x6d8] sm:$0xff] }
 0xa86   :  { %v3871_v5 = vmul.f32 1.442695, %v3869_v24  ;;  %v4162_v24 = vld [vmem:[#allocation11 + $0x680] sm:$0xff] }
 0xa88   :  { %5203 = vpow2.f32 %v3871_v5  ;;  %v4163_v5 = vld [vmem:[#allocation11 + $0x688] sm:$0xff] }
 0xa8a   :  { %v3866_v26 = vpop.permute.xlu2 %3865 }
 0xa8b   :  { %v3868_v57 = vmax.f32 %v3862_v55, %v3866_v26  ;;  %v4171_v55 = vld [vmem:[#allocation11 + $0x6c8] sm:$0xff]  ;;  %v4164_v26 = vld [vmem:[#allocation11 + $0x690] sm:$0xff] }
 0xa8d   :  { %v3870_v51 = vsub.f32 %v3849_v13, %v3868_v57  ;;  %v4189_v13 = vld [vmem:[#allocation11 + $0x758] sm:$0xff] }
 0xa8e   :  { %v5204_v4 = vpop.eup %5203  ;;  %v4165_v57 = vld [vmem:[#allocation11 + $0x698] sm:$0xff] }
 0xa8f   :  { %v3873_v52 = vmul.f32 1.442695, %v3870_v51  ;;  %3875 = vrot.lane.b32.xlu0 %v5204_v4, %s9677_s1  ;;  %v4154_v51 = vld [vmem:[#allocation11 + $0x640] sm:$0xff] }
 0xa91   :  { %5205 = vpow2.f32 %v3873_v52  ;;  %v4156_v52 = vld [vmem:[#allocation11 + $0x650] sm:$0xff] }
 0xa97   :  { %v5206_v61 = vpop.eup %5205 }
 0xa98   :  { %3877 = vrot.lane.b32.xlu1 %v5206_v61, %s9677_s1 }
 0xb01   :  { %v3876_v2 = vpop.permute.xlu0 %3875 }
 0xb02   :  { %v3879_v37 = vadd.f32 %v5204_v4, %v3876_v2  ;;  %v4146_v2 = vld [vmem:[#allocation11 + $0x600] sm:$0xff] }
 0xb04   :  { %3881 = vrot.lane.b32.xlu2 %v3879_v37, %s6093_s29 }
 0xb0a   :  { %v3878_v29 = vpop.permute.xlu1 %3877 }
 0xb0b   :  { %v3880_v62 = vadd.f32 %v5206_v61, %v3878_v29  ;;  %v4148_v29 = vld [vmem:[#allocation11 + $0x610] sm:$0xff] }
 0xb0d   :  { %3883 = vrot.lane.b32.xlu0 %v3880_v62, %s6093_s29 }
 0xb5e   :  { %v3882_v8 = vpop.permute.xlu2 %3881 }
 0xb5f   :  { %v3885_v63 = vadd.f32 %v3882_v8, %v3879_v37  ;;  %v4147_v37 = vld [vmem:[#allocation11 + $0x608] sm:$0xff]  ;;  %v4138_v8 = vld [vmem:[#allocation11 + $0x5c0] sm:$0xff] }
 0xb61   :  { %3887 = vrot.lane.b32.xlu1 %v3885_v63, %s6072_s12 }
 0xb7f   :  { %v3884_v23 = vpop.permute.xlu0 %3883 }
 0xb80   :  { %v3886_v34 = vadd.f32 %v3884_v23, %v3880_v62  ;;  %v4149_v62 = vld [vmem:[#allocation11 + $0x618] sm:$0xff]  ;;  %v4140_v23 = vld [vmem:[#allocation11 + $0x5d0] sm:$0xff] }
 0xb82   :  { %3889 = vrot.lane.b32.xlu2 %v3886_v34, %s6072_s12 }
 0xbd3   :  { %v3888_v53 = vpop.permute.xlu1 %3887 }
 0xbd4   :  { %v3891_v11 = vadd.f32 %v3888_v53, %v3885_v63  ;;  %v4139_v63 = vld [vmem:[#allocation11 + $0x5c8] sm:$0xff]  ;;  %v4130_v53 = vld [vmem:[#allocation11 + $0x580] sm:$0xff] }
 0xbd6   :  { %5207 = vrcp.f32 %v3891_v11  ;;  %v4131_v11 = vld [vmem:[#allocation11 + $0x588] sm:$0xff] }
 0xbdc   :  { %v3890_v49 = vpop.permute.xlu2 %3889  ;;  %v5208_v54 = vpop.eup %5207 }
 0xbdd   :  { %v3892_v7 = vadd.f32 %v3890_v49, %v3886_v34  ;;  %v8683_v38 = vmul.f32 %v5208_v54, %v5204_v4  ;;  %v4155_v4 = vld [vmem:[#allocation11 + $0x648] sm:$0xff]  ;;  %v4141_v34 = vld [vmem:[#allocation11 + $0x5d8] sm:$0xff]  ;;  %v4132_v49 = vld [vmem:[#allocation11 + $0x590] sm:$0xff] }
 0xbde   :  { %v4133_v54 = vld [vmem:[#allocation11 + $0x598] sm:$0xff] }
 0xbdf   :  { %5209 = vrcp.f32 %v3892_v7  ;;  %3913 = vmatmul.f32.vlgmr.msra.gmra.mxu2 %v8683_v38  ;;  %3936 = vmatmul.f32.vlgmr.msra.gmra.mxu0 %v8683_v38  ;;  %v4122_v7 = vld [vmem:[#allocation11 + $0x540] sm:$0xff] }
 0xbe0   :  { %3959 = vmatmul.f32.vlgmr.msra.gmra.mxu1 %v8683_v38  ;;  %3982 = vmatmul.f32.vlgmr.msra.gmra.mxu3 %v8683_v38 }
 0xbe1   :  { %4229 = vmatpush.msra.mxu2 %v4202_v6  ;;  %4252 = vmatpush.msra.mxu0 %v4203_v21  ;;  %v4123_v6 = vld [vmem:[#allocation11 + $0x548] sm:$0xff]  ;;  %v4124_v21 = vld [vmem:[#allocation11 + $0x550] sm:$0xff] }
 0xbe2   :  { %4275 = vmatpush.msra.mxu1 %v4204_v60  ;;  %4298 = vmatpush.msra.mxu3 %v4205_v28  ;;  %v4125_v60 = vld [vmem:[#allocation11 + $0x558] sm:$0xff]  ;;  %v4114_v28 = vld [vmem:[#allocation11 + $0x500] sm:$0xff] }
 0xbe3   :  { %4230 = vmatpush.msra.mxu2 %v4194_v47  ;;  %4253 = vmatpush.msra.mxu0 %v4195_v18  ;;  %v4115_v47 = vld [vmem:[#allocation11 + $0x508] sm:$0xff]  ;;  %v4117_v18 = vld [vmem:[#allocation11 + $0x518] sm:$0xff] }
 0xbe4   :  { %4276 = vmatpush.msra.mxu1 %v4196_v15  ;;  %4299 = vmatpush.msra.mxu3 %v4197_v19  ;;  %v4106_v15 = vld [vmem:[#allocation11 + $0x4c0] sm:$0xff]  ;;  %v4107_v19 = vld [vmem:[#allocation11 + $0x4c8] sm:$0xff] }
 0xbe5   :  { %v5210_v0 = vpop.eup %5209  ;;  %4231 = vmatpush.msra.mxu2 %v4186_v27  ;;  %4254 = vmatpush.msra.mxu0 %v4187_v10  ;;  %v4108_v27 = vld [vmem:[#allocation11 + $0x4d0] sm:$0xff]  ;;  %v4109_v10 = vld [vmem:[#allocation11 + $0x4d8] sm:$0xff] }
 0xbe6   :  { %v8689_v40 = vmul.f32 %v5210_v0, %v5206_v61  ;;  %4277 = vmatpush.msra.mxu1 %v4188_v42  ;;  %4300 = vmatpush.msra.mxu3 %v4189_v13  ;;  %v4157_v61 = vld [vmem:[#allocation11 + $0x658] sm:$0xff]  ;;  %v4098_v42 = vld [vmem:[#allocation11 + $0x480] sm:$0xff]  ;;  %v4099_v13 = vld [vmem:[#allocation11 + $0x488] sm:$0xff] }
 0xbe7   :  { %4232 = vmatpush.msra.mxu2 %v4178_v36  ;;  %4255 = vmatpush.msra.mxu0 %v4179_v32  ;;  %v4100_v0 = vld [vmem:[#allocation11 + $0x490] sm:$0xff]  ;;  %v4101_v36 = vld [vmem:[#allocation11 + $0x498] sm:$0xff]  ;;  %v4090_v32 = vld [vmem:[#allocation11 + $0x440] sm:$0xff] }
 0xbe8   :  { %4278 = vmatpush.msra.mxu1 %v4180_v20  ;;  %4301 = vmatpush.msra.mxu3 %v4181_v14  ;;  %v4091_v20 = vld [vmem:[#allocation11 + $0x448] sm:$0xff]  ;;  %v4092_v14 = vld [vmem:[#allocation11 + $0x450] sm:$0xff] }
 0xbe9   :  { %3916 = vmatmul.f32.gmra.mxu2 %v8689_v40  ;;  %3939 = vmatmul.f32.gmra.mxu0 %v8689_v40 }
 0xbea   :  { %3962 = vmatmul.f32.gmra.mxu1 %v8689_v40  ;;  %3985 = vmatmul.f32.gmra.mxu3 %v8689_v40 }
 0xbeb   :  { %4233 = vmatpush.msra.mxu2 %v4170_v25  ;;  %4256 = vmatpush.msra.mxu0 %v4171_v55  ;;  %v4093_v25 = vld [vmem:[#allocation11 + $0x458] sm:$0xff]  ;;  %v4082_v55 = vld [vmem:[#allocation11 + $0x400] sm:$0xff] }
 0xbec   :  { %4279 = vmatpush.msra.mxu1 %v4172_v3  ;;  %4302 = vmatpush.msra.mxu3 %v4173_v22  ;;  %v4083_v3 = vld [vmem:[#allocation11 + $0x408] sm:$0xff]  ;;  %v4085_v22 = vld [vmem:[#allocation11 + $0x418] sm:$0xff] }
 0xbed   :  { %4234 = vmatpush.msra.mxu2 %v4162_v24  ;;  %4257 = vmatpush.msra.mxu0 %v4163_v5  ;;  %v4206_v24 = vld [vmem:[#allocation11 + $0x7e0] sm:$0xff]  ;;  %v4207_v5 = vld [vmem:[#allocation11 + $0x7e8] sm:$0xff] }
 0xbee   :  { %4280 = vmatpush.msra.mxu1 %v4164_v26  ;;  %4303 = vmatpush.msra.mxu3 %v4165_v57  ;;  %v4208_v26 = vld [vmem:[#allocation11 + $0x7f0] sm:$0xff]  ;;  %v4209_v57 = vld [vmem:[#allocation11 + $0x7f8] sm:$0xff] }
 0xbef   :  { %4235 = vmatpush.msra.mxu2 %v4154_v51  ;;  %4258 = vmatpush.msra.mxu0 %v4155_v4  ;;  %v4198_v51 = vld [vmem:[#allocation11 + $0x7a0] sm:$0xff]  ;;  %v4199_v4 = vld [vmem:[#allocation11 + $0x7a8] sm:$0xff] }
 0xbf0   :  { %4281 = vmatpush.msra.mxu1 %v4156_v52  ;;  %4304 = vmatpush.msra.mxu3 %v4157_v61  ;;  %v4200_v52 = vld [vmem:[#allocation11 + $0x7b0] sm:$0xff]  ;;  %v4201_v61 = vld [vmem:[#allocation11 + $0x7b8] sm:$0xff] }
 0xbf1   :  { %4236 = vmatpush.msra.mxu2 %v4146_v2  ;;  %4259 = vmatpush.msra.mxu0 %v4147_v37  ;;  %v4190_v2 = vld [vmem:[#allocation11 + $0x760] sm:$0xff]  ;;  %v4191_v37 = vld [vmem:[#allocation11 + $0x768] sm:$0xff] }
 0xbf2   :  { %4282 = vmatpush.msra.mxu1 %v4148_v29  ;;  %4305 = vmatpush.msra.mxu3 %v4149_v62  ;;  %v4192_v29 = vld [vmem:[#allocation11 + $0x770] sm:$0xff]  ;;  %v4193_v62 = vld [vmem:[#allocation11 + $0x778] sm:$0xff] }
 0xbf3   :  { %4005 = vmatmul.f32.vlgmr.msrb.gmra.mxu2 %v8683_v38  ;;  %4028 = vmatmul.f32.vlgmr.msrb.gmra.mxu0 %v8683_v38 }
 0xbf4   :  { %4051 = vmatmul.f32.vlgmr.msrb.gmra.mxu1 %v8683_v38  ;;  %4074 = vmatmul.f32.vlgmr.msrb.gmra.mxu3 %v8683_v38  ;;  %v4116_v38 = vld [vmem:[#allocation11 + $0x510] sm:$0xff] }
 0xbf5   :  { %4237 = vmatpush.msra.mxu2 %v4138_v8  ;;  %4260 = vmatpush.msra.mxu0 %v4139_v63  ;;  %v4182_v8 = vld [vmem:[#allocation11 + $0x720] sm:$0xff]  ;;  %v4183_v63 = vld [vmem:[#allocation11 + $0x728] sm:$0xff] }
 0xbf6   :  { %4283 = vmatpush.msra.mxu1 %v4140_v23  ;;  %4306 = vmatpush.msra.mxu3 %v4141_v34  ;;  %v4184_v23 = vld [vmem:[#allocation11 + $0x730] sm:$0xff]  ;;  %v4185_v34 = vld [vmem:[#allocation11 + $0x738] sm:$0xff] }
 0xbf7   :  { %4238 = vmatpush.msra.mxu2 %v4130_v53  ;;  %4261 = vmatpush.msra.mxu0 %v4131_v11  ;;  %v4174_v53 = vld [vmem:[#allocation11 + $0x6e0] sm:$0xff]  ;;  %v4175_v11 = vld [vmem:[#allocation11 + $0x6e8] sm:$0xff] }
 0xbf8   :  { %4284 = vmatpush.msra.mxu1 %v4132_v49  ;;  %4307 = vmatpush.msra.mxu3 %v4133_v54  ;;  %v4176_v49 = vld [vmem:[#allocation11 + $0x6f0] sm:$0xff]  ;;  %v4177_v54 = vld [vmem:[#allocation11 + $0x6f8] sm:$0xff] }
 0xbf9   :  { %4239 = vmatpush.msra.mxu2 %v4122_v7  ;;  %4262 = vmatpush.msra.mxu0 %v4123_v6  ;;  %v4166_v7 = vld [vmem:[#allocation11 + $0x6a0] sm:$0xff]  ;;  %v4167_v6 = vld [vmem:[#allocation11 + $0x6a8] sm:$0xff] }
 0xbfa   :  { %4285 = vmatpush.msra.mxu1 %v4124_v21  ;;  %4308 = vmatpush.msra.mxu3 %v4125_v60  ;;  %v4168_v21 = vld [vmem:[#allocation11 + $0x6b0] sm:$0xff]  ;;  %v4169_v60 = vld [vmem:[#allocation11 + $0x6b8] sm:$0xff] }
 0xbfb   :  { %4240 = vmatpush.msra.mxu2 %v4114_v28  ;;  %4263 = vmatpush.msra.mxu0 %v4115_v47  ;;  %v4158_v28 = vld [vmem:[#allocation11 + $0x660] sm:$0xff]  ;;  %v4159_v47 = vld [vmem:[#allocation11 + $0x668] sm:$0xff] }
 0xbfc   :  { %4286 = vmatpush.msra.mxu1 %v4116_v38  ;;  %4309 = vmatpush.msra.mxu3 %v4117_v18  ;;  %v4160_v38 = vld [vmem:[#allocation11 + $0x670] sm:$0xff]  ;;  %v4161_v18 = vld [vmem:[#allocation11 + $0x678] sm:$0xff] }
 0xbfd   :  { %4008 = vmatmul.f32.gmra.mxu2 %v8689_v40  ;;  %4031 = vmatmul.f32.gmra.mxu0 %v8689_v40 }
 0xbfe   :  { %4054 = vmatmul.f32.gmra.mxu1 %v8689_v40  ;;  %4077 = vmatmul.f32.gmra.mxu3 %v8689_v40  ;;  %v4084_v40 = vld [vmem:[#allocation11 + $0x410] sm:$0xff] }
 0xbff   :  { %4241 = vmatpush.msra.mxu2 %v4106_v15  ;;  %4264 = vmatpush.msra.mxu0 %v4107_v19  ;;  %v4150_v15 = vld [vmem:[#allocation11 + $0x620] sm:$0xff]  ;;  %v4151_v19 = vld [vmem:[#allocation11 + $0x628] sm:$0xff] }
 0xc00   :  { %4287 = vmatpush.msra.mxu1 %v4108_v27  ;;  %4310 = vmatpush.msra.mxu3 %v4109_v10  ;;  %v4152_v27 = vld [vmem:[#allocation11 + $0x630] sm:$0xff]  ;;  %v4153_v10 = vld [vmem:[#allocation11 + $0x638] sm:$0xff] }
 0xc01   :  { %4242 = vmatpush.msra.mxu2 %v4098_v42  ;;  %4265 = vmatpush.msra.mxu0 %v4099_v13  ;;  %v4142_v42 = vld [vmem:[#allocation11 + $0x5e0] sm:$0xff]  ;;  %v4143_v13 = vld [vmem:[#allocation11 + $0x5e8] sm:$0xff] }
 0xc02   :  { %4288 = vmatpush.msra.mxu1 %v4100_v0  ;;  %4311 = vmatpush.msra.mxu3 %v4101_v36  ;;  %v4144_v0 = vld [vmem:[#allocation11 + $0x5f0] sm:$0xff]  ;;  %v4145_v36 = vld [vmem:[#allocation11 + $0x5f8] sm:$0xff] }
 0xc03   :  { %4243 = vmatpush.msra.mxu2 %v4090_v32  ;;  %4266 = vmatpush.msra.mxu0 %v4091_v20  ;;  %v4134_v32 = vld [vmem:[#allocation11 + $0x5a0] sm:$0xff]  ;;  %v4135_v20 = vld [vmem:[#allocation11 + $0x5a8] sm:$0xff] }
 0xc04   :  { %4289 = vmatpush.msra.mxu1 %v4092_v14  ;;  %4312 = vmatpush.msra.mxu3 %v4093_v25  ;;  %v4136_v14 = vld [vmem:[#allocation11 + $0x5b0] sm:$0xff]  ;;  %v4137_v25 = vld [vmem:[#allocation11 + $0x5b8] sm:$0xff] }
 0xc05   :  { %4244 = vmatpush.msra.mxu2 %v4082_v55  ;;  %4267 = vmatpush.msra.mxu0 %v4083_v3  ;;  %v4126_v55 = vld [vmem:[#allocation11 + $0x560] sm:$0xff]  ;;  %v4127_v3 = vld [vmem:[#allocation11 + $0x568] sm:$0xff] }
 0xc06   :  { %4290 = vmatpush.msra.mxu1 %v4084_v40  ;;  %4313 = vmatpush.msra.mxu3 %v4085_v22  ;;  %v4128_v40 = vld [vmem:[#allocation11 + $0x570] sm:$0xff]  ;;  %v4129_v22 = vld [vmem:[#allocation11 + $0x578] sm:$0xff] }
 0xc07   :  { %4321 = vmatpush.msrb.mxu2 %v4206_v24  ;;  %4344 = vmatpush.msrb.mxu0 %v4207_v5  ;;  %v4118_v24 = vld [vmem:[#allocation11 + $0x520] sm:$0xff]  ;;  %v4119_v5 = vld [vmem:[#allocation11 + $0x528] sm:$0xff] }
 0xc08   :  { %4367 = vmatpush.msrb.mxu1 %v4208_v26  ;;  %4390 = vmatpush.msrb.mxu3 %v4209_v57  ;;  %v4120_v26 = vld [vmem:[#allocation11 + $0x530] sm:$0xff]  ;;  %v4121_v57 = vld [vmem:[#allocation11 + $0x538] sm:$0xff] }
 0xc09   :  { %4245 = vmatmul.f32.vlgmr.msra.gmra.mxu2 %v8136_v33  ;;  %4268 = vmatmul.f32.vlgmr.msra.gmra.mxu0 %v8136_v33 }
 0xc0a   :  { %4291 = vmatmul.f32.vlgmr.msra.gmra.mxu1 %v8136_v33  ;;  %4314 = vmatmul.f32.vlgmr.msra.gmra.mxu3 %v8136_v33 }
 0xc0b   :  { %4322 = vmatpush.msrb.mxu2 %v4198_v51  ;;  %4345 = vmatpush.msrb.mxu0 %v4199_v4  ;;  %v4110_v51 = vld [vmem:[#allocation11 + $0x4e0] sm:$0xff]  ;;  %v4111_v4 = vld [vmem:[#allocation11 + $0x4e8] sm:$0xff] }
 0xc0c   :  { %4368 = vmatpush.msrb.mxu1 %v4200_v52  ;;  %4391 = vmatpush.msrb.mxu3 %v4201_v61  ;;  %v4112_v52 = vld [vmem:[#allocation11 + $0x4f0] sm:$0xff]  ;;  %v4113_v61 = vld [vmem:[#allocation11 + $0x4f8] sm:$0xff] }
 0xc0d   :  { %4323 = vmatpush.msrb.mxu2 %v4190_v2  ;;  %4346 = vmatpush.msrb.mxu0 %v4191_v37  ;;  %v4102_v2 = vld [vmem:[#allocation11 + $0x4a0] sm:$0xff]  ;;  %v4103_v37 = vld [vmem:[#allocation11 + $0x4a8] sm:$0xff] }
 0xc0e   :  { %4369 = vmatpush.msrb.mxu1 %v4192_v29  ;;  %4392 = vmatpush.msrb.mxu3 %v4193_v62  ;;  %v4104_v29 = vld [vmem:[#allocation11 + $0x4b0] sm:$0xff]  ;;  %v4105_v62 = vld [vmem:[#allocation11 + $0x4b8] sm:$0xff] }
 0xc0f   :  { %4324 = vmatpush.msrb.mxu2 %v4182_v8  ;;  %4347 = vmatpush.msrb.mxu0 %v4183_v63  ;;  %v4094_v8 = vld [vmem:[#allocation11 + $0x460] sm:$0xff]  ;;  %v4095_v63 = vld [vmem:[#allocation11 + $0x468] sm:$0xff] }
 0xc10   :  { %4370 = vmatpush.msrb.mxu1 %v4184_v23  ;;  %4393 = vmatpush.msrb.mxu3 %v4185_v34  ;;  %v4096_v23 = vld [vmem:[#allocation11 + $0x470] sm:$0xff]  ;;  %v4097_v34 = vld [vmem:[#allocation11 + $0x478] sm:$0xff] }
 0xc11   :  { %4325 = vmatpush.msrb.mxu2 %v4174_v53  ;;  %4348 = vmatpush.msrb.mxu0 %v4175_v11  ;;  %v4086_v53 = vld [vmem:[#allocation11 + $0x420] sm:$0xff]  ;;  %v4087_v11 = vld [vmem:[#allocation11 + $0x428] sm:$0xff] }
 0xc12   :  { %4371 = vmatpush.msrb.mxu1 %v4176_v49  ;;  %4394 = vmatpush.msrb.mxu3 %v4177_v54  ;;  %v4088_v49 = vld [vmem:[#allocation11 + $0x430] sm:$0xff]  ;;  %v4089_v54 = vld [vmem:[#allocation11 + $0x438] sm:$0xff] }
 0xc13   :  { %4248 = vmatmul.f32.gmra.mxu2 %v8145_v50  ;;  %4271 = vmatmul.f32.gmra.mxu0 %v8145_v50 }
 0xc14   :  { %4294 = vmatmul.f32.gmra.mxu1 %v8145_v50  ;;  %4317 = vmatmul.f32.gmra.mxu3 %v8145_v50 }
 0xc15   :  { %4326 = vmatpush.msrb.mxu2 %v4166_v7  ;;  %4349 = vmatpush.msrb.mxu0 %v4167_v6  ;;  %v5476_v7 = vld [vmem:[%s9678_s11 + $0xf8] sm:$0xff] }
 0xc16   :  { %4372 = vmatpush.msrb.mxu1 %v4168_v21  ;;  %4395 = vmatpush.msrb.mxu3 %v4169_v60  ;;  %v5477_v6 = vld [vmem:[%s9678_s11 + $0x178] sm:$0xff] }
 0xc17   :  { %4327 = vmatpush.msrb.mxu2 %v4158_v28  ;;  %4350 = vmatpush.msrb.mxu0 %v4159_v47  ;;  %v5478_v21 = vld [vmem:[%s9678_s11 + $0x78] sm:$0xff]  ;;  %v5481_v28 = vld [vmem:[%s9678_s11 + $0x170] sm:$0xff] }
 0xc18   :  { %4373 = vmatpush.msrb.mxu1 %v4160_v38  ;;  %4396 = vmatpush.msrb.mxu3 %v4161_v18  ;;  %v5479_v60 = vld [vmem:[%s9678_s11 + $0x1f8] sm:$0xff]  ;;  %v5482_v47 = vld [vmem:[%s9678_s11 + $0x70] sm:$0xff]  ;;  %v5484_v18 = vld [vmem:[%s9678_s11 + $0xe8] sm:$0xff] }
 0xc19   :  { %4328 = vmatpush.msrb.mxu2 %v4150_v15  ;;  %4351 = vmatpush.msrb.mxu0 %v4151_v19  ;;  %v5483_v38 = vld [vmem:[%s9678_s11 + $0x1f0] sm:$0xff]  ;;  %v5485_v15 = vld [vmem:[%s9678_s11 + $0x168] sm:$0xff] }
 0xc1a   :  { %4374 = vmatpush.msrb.mxu1 %v4152_v27  ;;  %4397 = vmatpush.msrb.mxu3 %v4153_v10  ;;  %v5486_v19 = vld [vmem:[%s9678_s11 + $0x68] sm:$0xff]  ;;  %v5488_v10 = vld [vmem:[%s9678_s11 + $0xe0] sm:$0xff] }
 0xc1b   :  { %4329 = vmatpush.msrb.mxu2 %v4142_v42  ;;  %4352 = vmatpush.msrb.mxu0 %v4143_v13  ;;  %v5487_v27 = vld [vmem:[%s9678_s11 + $0x1e8] sm:$0xff]  ;;  %v5489_v42 = vld [vmem:[%s9678_s11 + $0x160] sm:$0xff] }
 0xc1c   :  { %4375 = vmatpush.msrb.mxu1 %v4144_v0  ;;  %4398 = vmatpush.msrb.mxu3 %v4145_v36  ;;  %v5490_v13 = vld [vmem:[%s9678_s11 + $0x60] sm:$0xff]  ;;  %v5493_v36 = vld [vmem:[%s9678_s11 + $0x158] sm:$0xff] }
 0xc1d   :  { %4330 = vmatpush.msrb.mxu2 %v4134_v32  ;;  %4353 = vmatpush.msrb.mxu0 %v4135_v20  ;;  %v5491_v0 = vld [vmem:[%s9678_s11 + $0x1e0] sm:$0xff]  ;;  %v5494_v32 = vld [vmem:[%s9678_s11 + $0x58] sm:$0xff] }
 0xc1e   :  { %4376 = vmatpush.msrb.mxu1 %v4136_v14  ;;  %4399 = vmatpush.msrb.mxu3 %v4137_v25  ;;  %v5495_v20 = vld [vmem:[%s9678_s11 + $0x1d8] sm:$0xff]  ;;  %v5496_v14 = vld [vmem:[%s9678_s11 + $0xd0] sm:$0xff] }
 0xc1f   :  { %4331 = vmatpush.msrb.mxu2 %v4126_v55  ;;  %4354 = vmatpush.msrb.mxu0 %v4127_v3  ;;  %v5497_v25 = vld [vmem:[%s9678_s11 + $0x150] sm:$0xff] }
 0xc20   :  { %4377 = vmatpush.msrb.mxu1 %v4128_v40  ;;  %4400 = vmatpush.msrb.mxu3 %v4129_v22  ;;  %v5498_v55 = vld [vmem:[%s9678_s11 + $0x50] sm:$0xff]  ;;  %v5500_v40 = vld [vmem:[%s9678_s11 + $0xc8] sm:$0xff] }
 0xc21   :  { %4332 = vmatpush.msrb.mxu2 %v4118_v24  ;;  %4355 = vmatpush.msrb.mxu0 %v4119_v5  ;;  %v5499_v3 = vld [vmem:[%s9678_s11 + $0x1d0] sm:$0xff]  ;;  %v5501_v22 = vld [vmem:[%s9678_s11 + $0x148] sm:$0xff] }
 0xc22   :  { %4378 = vmatpush.msrb.mxu1 %v4120_v26  ;;  %4401 = vmatpush.msrb.mxu3 %v4121_v57  ;;  %v5502_v24 = vld [vmem:[%s9678_s11 + $0x48] sm:$0xff]  ;;  %v5504_v26 = vld [vmem:[%s9678_s11 + $0xc0] sm:$0xff] }
 0xc23   :  { %4333 = vmatpush.msrb.mxu2 %v4110_v51  ;;  %4356 = vmatpush.msrb.mxu0 %v4111_v4  ;;  %v5503_v5 = vld [vmem:[%s9678_s11 + $0x1c8] sm:$0xff]  ;;  %v5505_v57 = vld [vmem:[%s9678_s11 + $0x140] sm:$0xff] }
 0xc24   :  { %4379 = vmatpush.msrb.mxu1 %v4112_v52  ;;  %4402 = vmatpush.msrb.mxu3 %v4113_v61  ;;  %v5506_v51 = vld [vmem:[%s9678_s11 + $0x40] sm:$0xff]  ;;  %v5508_v52 = vld [vmem:[%s9678_s11 + $0xb8] sm:$0xff] }
 0xc25   :  { %4334 = vmatpush.msrb.mxu2 %v4102_v2  ;;  %4357 = vmatpush.msrb.mxu0 %v4103_v37  ;;  %v5507_v4 = vld [vmem:[%s9678_s11 + $0x1c0] sm:$0xff]  ;;  %v5509_v61 = vld [vmem:[%s9678_s11 + $0x138] sm:$0xff] }
 0xc26   :  { %4380 = vmatpush.msrb.mxu1 %v4104_v29  ;;  %4403 = vmatpush.msrb.mxu3 %v4105_v62  ;;  %v5510_v2 = vld [vmem:[%s9678_s11 + $0x38] sm:$0xff]  ;;  %v5512_v29 = vld [vmem:[%s9678_s11 + $0xb0] sm:$0xff] }
 0xc27   :  { %4335 = vmatpush.msrb.mxu2 %v4094_v8  ;;  %4358 = vmatpush.msrb.mxu0 %v4095_v63  ;;  %v5511_v37 = vld [vmem:[%s9678_s11 + $0x1b8] sm:$0xff]  ;;  %v5513_v62 = vld [vmem:[%s9678_s11 + $0x130] sm:$0xff] }
 0xc28   :  { %4381 = vmatpush.msrb.mxu1 %v4096_v23  ;;  %4404 = vmatpush.msrb.mxu3 %v4097_v34  ;;  %v5514_v8 = vld [vmem:[%s9678_s11 + $0x30] sm:$0xff]  ;;  %v5516_v23 = vld [vmem:[%s9678_s11 + $0xa8] sm:$0xff] }
 0xc29   :  { %4336 = vmatpush.msrb.mxu2 %v4086_v53  ;;  %4359 = vmatpush.msrb.mxu0 %v4087_v11  ;;  %v5515_v63 = vld [vmem:[%s9678_s11 + $0x1b0] sm:$0xff]  ;;  %v5517_v34 = vld [vmem:[%s9678_s11 + $0x128] sm:$0xff] }
 0xc2a   :  { %4382 = vmatpush.msrb.mxu1 %v4088_v49  ;;  %4405 = vmatpush.msrb.mxu3 %v4089_v54  ;;  %v5518_v53 = vld [vmem:[%s9678_s11 + $0x28] sm:$0xff]  ;;  %v5520_v49 = vld [vmem:[%s9678_s11 + $0xa0] sm:$0xff] }
 0xc2b   :  { %4337 = vmatmul.f32.vlgmr.msrb.gmra.mxu2 %v8136_v33  ;;  %4360 = vmatmul.f32.vlgmr.msrb.gmra.mxu0 %v8136_v33  ;;  %v5519_v11 = vld [vmem:[%s9678_s11 + $0x1a8] sm:$0xff]  ;;  %v5521_v54 = vld [vmem:[%s9678_s11 + $0x120] sm:$0xff] }
 0xc2c   :  { %4383 = vmatmul.f32.vlgmr.msrb.gmra.mxu1 %v8136_v33  ;;  %4406 = vmatmul.f32.vlgmr.msrb.gmra.mxu3 %v8136_v33  ;;  %v5480_v33 = vld [vmem:[%s9678_s11 + $0xf0] sm:$0xff] }
 0xc2d   :  { %4452 = vmatpush.msra.mxu0 %v5476_v7  ;;  %4475 = vmatpush.msra.mxu1 %v5477_v6  ;;  %v5522_v7 = vld [vmem:[%s9678_s11 + $0x20] sm:$0xff] }
 0xc2e   :  { %4429 = vmatpush.msra.mxu2 %v5478_v21  ;;  %4498 = vmatpush.msra.mxu3 %v5479_v60  ;;  %v5523_v6 = vld [vmem:[%s9678_s11 + $0x1a0] sm:$0xff]  ;;  %v5524_v21 = vld [vmem:[%s9678_s11 + $0x98] sm:$0xff] }
 0xc2f   :  { %4453 = vmatpush.msra.mxu0 %v5480_v33  ;;  %4476 = vmatpush.msra.mxu1 %v5481_v28  ;;  %v5525_v60 = vld [vmem:[%s9678_s11 + $0x118] sm:$0xff] }
 0xc30   :  { %4430 = vmatpush.msra.mxu2 %v5482_v47  ;;  %4499 = vmatpush.msra.mxu3 %v5483_v38  ;;  %v5526_v33 = vld [vmem:[%s9678_s11 + $0x18] sm:$0xff]  ;;  %v5528_v47 = vld [vmem:[%s9678_s11 + $0x90] sm:$0xff] }
 0xc31   :  { %4454 = vmatpush.msra.mxu0 %v5484_v18  ;;  %4477 = vmatpush.msra.mxu1 %v5485_v15  ;;  %v5527_v28 = vld [vmem:[%s9678_s11 + $0x198] sm:$0xff]  ;;  %v5529_v38 = vld [vmem:[%s9678_s11 + $0x110] sm:$0xff] }
 0xc32   :  { %4431 = vmatpush.msra.mxu2 %v5486_v19  ;;  %4500 = vmatpush.msra.mxu3 %v5487_v27  ;;  %v5530_v18 = vld [vmem:[%s9678_s11 + $0x10] sm:$0xff]  ;;  %v5532_v19 = vld [vmem:[%s9678_s11 + $0x88] sm:$0xff] }
 0xc33   :  { %4340 = vmatmul.f32.gmra.mxu2 %v8145_v50  ;;  %4363 = vmatmul.f32.gmra.mxu0 %v8145_v50  ;;  %v5531_v15 = vld [vmem:[%s9678_s11 + $0x190] sm:$0xff]  ;;  %v5533_v27 = vld [vmem:[%s9678_s11 + $0x108] sm:$0xff] }
 0xc34   :  { %4386 = vmatmul.f32.gmra.mxu1 %v8145_v50  ;;  %4409 = vmatmul.f32.gmra.mxu3 %v8145_v50  ;;  %v5492_v50 = vld [vmem:[%s9678_s11 + $0xd8] sm:$0xff] }
 0xc35   :  { %4455 = vmatpush.msra.mxu0 %v5488_v10  ;;  %4478 = vmatpush.msra.mxu1 %v5489_v42  ;;  %v5534_v10 = vld [vmem:[%s9678_s11 + $0x8] sm:$0xff] }
 0xc36   :  { %4432 = vmatpush.msra.mxu2 %v5490_v13  ;;  %4501 = vmatpush.msra.mxu3 %v5491_v0  ;;  %v5535_v42 = vld [vmem:[%s9678_s11 + $0x188] sm:$0xff]  ;;  %v5536_v13 = vld [vmem:[%s9678_s11 + $0x80] sm:$0xff] }
 0xc37   :  { %4456 = vmatpush.msra.mxu0 %v5492_v50  ;;  %4479 = vmatpush.msra.mxu1 %v5493_v36  ;;  %v5537_v0 = vld [vmem:[%s9678_s11 + $0x100] sm:$0xff]  ;;  %v5538_v50 = vld [vmem:[%s9678_s11 + $0x2f8] sm:$0xff] }
 0xc38   :  { %4433 = vmatpush.msra.mxu2 %v5494_v32  ;;  %4502 = vmatpush.msra.mxu3 %v5495_v20  ;;  %v5539_v36 = vld [vmem:[%s9678_s11 + $0x378] sm:$0xff]  ;;  %v5540_v32 = vld [vmem:[%s9678_s11] sm:$0xff] }
 0xc39   :  { %4457 = vmatpush.msra.mxu0 %v5496_v14  ;;  %4480 = vmatpush.msra.mxu1 %v5497_v25  ;;  %v5541_v20 = vld [vmem:[%s9678_s11 + $0x180] sm:$0xff]  ;;  %v5542_v14 = vld [vmem:[%s9678_s11 + $0x2f0] sm:$0xff] }
 0xc3a   :  { %4434 = vmatpush.msra.mxu2 %v5498_v55  ;;  %4503 = vmatpush.msra.mxu3 %v5499_v3  ;;  %v5543_v25 = vld [vmem:[%s9678_s11 + $0x370] sm:$0xff]  ;;  %v5544_v55 = vld [vmem:[%s9678_s11 + $0x278] sm:$0xff] }
 0xc3b   :  { %4458 = vmatpush.msra.mxu0 %v5500_v40  ;;  %4481 = vmatpush.msra.mxu1 %v5501_v22  ;;  %v5545_v3 = vld [vmem:[%s9678_s11 + $0x3f8] sm:$0xff]  ;;  %v5546_v40 = vld [vmem:[%s9678_s11 + $0x2e8] sm:$0xff] }
 0xc3c   :  { %4435 = vmatpush.msra.mxu2 %v5502_v24  ;;  %4504 = vmatpush.msra.mxu3 %v5503_v5  ;;  %v5547_v22 = vld [vmem:[%s9678_s11 + $0x368] sm:$0xff]  ;;  %v5548_v24 = vld [vmem:[%s9678_s11 + $0x270] sm:$0xff] }
 0xc3d   :  { %4459 = vmatpush.msra.mxu0 %v5504_v26  ;;  %4482 = vmatpush.msra.mxu1 %v5505_v57  ;;  %v5549_v5 = vld [vmem:[%s9678_s11 + $0x3f0] sm:$0xff]  ;;  %v5550_v26 = vld [vmem:[%s9678_s11 + $0x2e0] sm:$0xff] }
 0xc3e   :  { %4436 = vmatpush.msra.mxu2 %v5506_v51  ;;  %4505 = vmatpush.msra.mxu3 %v5507_v4  ;;  %v5551_v57 = vld [vmem:[%s9678_s11 + $0x360] sm:$0xff]  ;;  %v5552_v51 = vld [vmem:[%s9678_s11 + $0x268] sm:$0xff] }
 0xc3f   :  { %4460 = vmatpush.msra.mxu0 %v5508_v52  ;;  %4483 = vmatpush.msra.mxu1 %v5509_v61  ;;  %v5553_v4 = vld [vmem:[%s9678_s11 + $0x3e8] sm:$0xff]  ;;  %v5554_v52 = vld [vmem:[%s9678_s11 + $0x2d8] sm:$0xff] }
 0xc40   :  { %4437 = vmatpush.msra.mxu2 %v5510_v2  ;;  %4506 = vmatpush.msra.mxu3 %v5511_v37  ;;  %v5555_v61 = vld [vmem:[%s9678_s11 + $0x358] sm:$0xff]  ;;  %v5556_v2 = vld [vmem:[%s9678_s11 + $0x260] sm:$0xff] }
 0xc41   :  { %4461 = vmatpush.msra.mxu0 %v5512_v29  ;;  %4484 = vmatpush.msra.mxu1 %v5513_v62  ;;  %v5557_v37 = vld [vmem:[%s9678_s11 + $0x3e0] sm:$0xff]  ;;  %v5558_v29 = vld [vmem:[%s9678_s11 + $0x2d0] sm:$0xff] }
 0xc42   :  { %4438 = vmatpush.msra.mxu2 %v5514_v8  ;;  %4507 = vmatpush.msra.mxu3 %v5515_v63  ;;  %v5559_v62 = vld [vmem:[%s9678_s11 + $0x350] sm:$0xff]  ;;  %v5560_v8 = vld [vmem:[%s9678_s11 + $0x258] sm:$0xff] }
 0xc43   :  { %4462 = vmatpush.msra.mxu0 %v5516_v23  ;;  %4485 = vmatpush.msra.mxu1 %v5517_v34  ;;  %v5561_v63 = vld [vmem:[%s9678_s11 + $0x3d8] sm:$0xff]  ;;  %v5562_v23 = vld [vmem:[%s9678_s11 + $0x2c8] sm:$0xff] }
 0xc44   :  { %4439 = vmatpush.msra.mxu2 %v5518_v53  ;;  %4508 = vmatpush.msra.mxu3 %v5519_v11  ;;  %v5563_v34 = vld [vmem:[%s9678_s11 + $0x348] sm:$0xff]  ;;  %v5564_v53 = vld [vmem:[%s9678_s11 + $0x250] sm:$0xff] }
 0xc45   :  { %4463 = vmatpush.msra.mxu0 %v5520_v49  ;;  %4486 = vmatpush.msra.mxu1 %v5521_v54  ;;  %v5565_v11 = vld [vmem:[%s9678_s11 + $0x3d0] sm:$0xff]  ;;  %v5566_v49 = vld [vmem:[%s9678_s11 + $0x2c0] sm:$0xff] }
 0xc46   :  { %4440 = vmatpush.msra.mxu2 %v5522_v7  ;;  %4509 = vmatpush.msra.mxu3 %v5523_v6  ;;  %v5567_v54 = vld [vmem:[%s9678_s11 + $0x340] sm:$0xff]  ;;  %v5568_v7 = vld [vmem:[%s9678_s11 + $0x248] sm:$0xff] }
 0xc47   :  { %4464 = vmatpush.msra.mxu0 %v5524_v21  ;;  %4487 = vmatpush.msra.mxu1 %v5525_v60  ;;  %v5569_v6 = vld [vmem:[%s9678_s11 + $0x3c8] sm:$0xff]  ;;  %v5570_v60 = vld [vmem:[%s9678_s11 + $0x2b8] sm:$0xff] }
 0xc48   :  { %4441 = vmatpush.msra.mxu2 %v5526_v33  ;;  %4510 = vmatpush.msra.mxu3 %v5527_v28  ;;  %v5571_v33 = vld [vmem:[%s9678_s11 + $0x338] sm:$0xff] }
 0xc49   :  { %4465 = vmatpush.msra.mxu0 %v5528_v47  ;;  %4488 = vmatpush.msra.mxu1 %v5529_v38  ;;  %v5572_v47 = vld [vmem:[%s9678_s11 + $0x240] sm:$0xff] }
 0xc4a   :  { %4442 = vmatpush.msra.mxu2 %v5530_v18  ;;  %4511 = vmatpush.msra.mxu3 %v5531_v15  ;;  %v5573_v38 = vld [vmem:[%s9678_s11 + $0x3c0] sm:$0xff]  ;;  %v5574_v18 = vld [vmem:[%s9678_s11 + $0x2b0] sm:$0xff] }
 0xc4b   :  { %4466 = vmatpush.msra.mxu0 %v5532_v19  ;;  %4489 = vmatpush.msra.mxu1 %v5533_v27  ;;  %v5575_v15 = vld [vmem:[%s9678_s11 + $0x330] sm:$0xff]  ;;  %v5576_v19 = vld [vmem:[%s9678_s11 + $0x238] sm:$0xff] }
 0xc4c   :  { %4443 = vmatpush.msra.mxu2 %v5534_v10  ;;  %4512 = vmatpush.msra.mxu3 %v5535_v42  ;;  %v5577_v27 = vld [vmem:[%s9678_s11 + $0x3b8] sm:$0xff]  ;;  %v5578_v10 = vld [vmem:[%s9678_s11 + $0x2a8] sm:$0xff] }
 0xc4d   :  { %4467 = vmatpush.msra.mxu0 %v5536_v13  ;;  %4490 = vmatpush.msra.mxu1 %v5537_v0  ;;  %v5579_v42 = vld [vmem:[%s9678_s11 + $0x328] sm:$0xff]  ;;  %v5580_v13 = vld [vmem:[%s9678_s11 + $0x230] sm:$0xff] }
 0xc4e   :  { %4444 = vmatpush.msra.mxu2 %v5540_v32  ;;  %4513 = vmatpush.msra.mxu3 %v5541_v20  ;;  %v5581_v0 = vld [vmem:[%s9678_s11 + $0x3b0] sm:$0xff]  ;;  %v5583_v32 = vld [vmem:[%s9678_s11 + $0x320] sm:$0xff] }
 0xc4f   :  { %4544 = vmatpush.msrb.mxu0 %v5538_v50  ;;  %4567 = vmatpush.msrb.mxu1 %v5539_v36  ;;  %v5582_v36 = vld [vmem:[%s9678_s11 + $0x2a0] sm:$0xff] }
 0xc50   :  { %4521 = vmatpush.msrb.mxu2 %v5544_v55  ;;  %4590 = vmatpush.msrb.mxu3 %v5545_v3  ;;  %v5586_v55 = vld [vmem:[%s9678_s11 + $0x298] sm:$0xff] }
 0xc51   :  { %4545 = vmatpush.msrb.mxu0 %v5542_v14  ;;  %4568 = vmatpush.msrb.mxu1 %v5543_v25  ;;  %v5584_v14 = vld [vmem:[%s9678_s11 + $0x228] sm:$0xff]  ;;  %v5587_v3 = vld [vmem:[%s9678_s11 + $0x318] sm:$0xff] }
 0xc52   :  { %4522 = vmatpush.msrb.mxu2 %v5548_v24  ;;  %4591 = vmatpush.msrb.mxu3 %v5549_v5  ;;  %v5585_v25 = vld [vmem:[%s9678_s11 + $0x3a8] sm:$0xff]  ;;  %v5590_v5 = vld [vmem:[%s9678_s11 + $0x290] sm:$0xff] }
 0xc53   :  { %4546 = vmatpush.msrb.mxu0 %v5546_v40  ;;  %4569 = vmatpush.msrb.mxu1 %v5547_v22  ;;  %v5588_v40 = vld [vmem:[%s9678_s11 + $0x220] sm:$0xff] }
 0xc54   :  { %4523 = vmatpush.msrb.mxu2 %v5552_v51  ;;  %4592 = vmatpush.msrb.mxu3 %v5553_v4  ;;  %v5589_v22 = vld [vmem:[%s9678_s11 + $0x3a0] sm:$0xff]  ;;  %v5592_v51 = vld [vmem:[%s9678_s11 + $0x218] sm:$0xff] }
 0xc55   :  { %4547 = vmatpush.msrb.mxu0 %v5550_v26  ;;  %4570 = vmatpush.msrb.mxu1 %v5551_v57  ;;  %v5591_v26 = vld [vmem:[%s9678_s11 + $0x310] sm:$0xff]  ;;  %v5593_v4 = vld [vmem:[%s9678_s11 + $0x398] sm:$0xff] }
 0xc56   :  { %4524 = vmatpush.msrb.mxu2 %v5556_v2  ;;  %4593 = vmatpush.msrb.mxu3 %v5557_v37  ;;  %v5596_v2 = vld [vmem:[%s9678_s11 + $0x210] sm:$0xff] }
 0xc57   :  { %4548 = vmatpush.msrb.mxu0 %v5554_v52  ;;  %4571 = vmatpush.msrb.mxu1 %v5555_v61  ;;  %v5594_v52 = vld [vmem:[%s9678_s11 + $0x288] sm:$0xff]  ;;  %v5597_v37 = vld [vmem:[%s9678_s11 + $0x390] sm:$0xff] }
 0xc58   :  { %4525 = vmatpush.msrb.mxu2 %v5560_v8  ;;  %4594 = vmatpush.msrb.mxu3 %v5561_v63  ;;  %v5595_v61 = vld [vmem:[%s9678_s11 + $0x308] sm:$0xff] }
 0xc59   :  { %4549 = vmatpush.msrb.mxu0 %v5558_v29  ;;  %4572 = vmatpush.msrb.mxu1 %v5559_v62  ;;  %v5598_v29 = vld [vmem:[%s9678_s11 + $0x280] sm:$0xff]  ;;  %v5600_v8 = vld [vmem:[%s9678_s11 + $0x208] sm:$0xff] }
 0xc5a   :  { %4526 = vmatpush.msrb.mxu2 %v5564_v53  ;;  %4595 = vmatpush.msrb.mxu3 %v5565_v11  ;;  %v5599_v62 = vld [vmem:[%s9678_s11 + $0x300] sm:$0xff]  ;;  %v5601_v63 = vld [vmem:[%s9678_s11 + $0x388] sm:$0xff] }
 0xc5b   :  { %4550 = vmatpush.msrb.mxu0 %v5562_v23  ;;  %4573 = vmatpush.msrb.mxu1 %v5563_v34  ;;  %v5602_v53 = vld [vmem:[%s9678_s11 + $0x200] sm:$0xff] }
 0xc5c   :  { %4527 = vmatpush.msrb.mxu2 %v5568_v7  ;;  %4596 = vmatpush.msrb.mxu3 %v5569_v6  ;;  %v9001_v21 = vpop.f32.mrf.mxu0  ;;  %v5603_v11 = vld [vmem:[%s9678_s11 + $0x380] sm:$0xff] }
 0xc5d   :  { %4551 = vmatpush.msrb.mxu0 %v5566_v49  ;;  %4574 = vmatpush.msrb.mxu1 %v5567_v54  ;;  %v9009_v28 = vpop.f32.mrf.mxu1 }
 0xc5e   :  { %4528 = vmatpush.msrb.mxu2 %v5572_v47  ;;  %4597 = vmatpush.msrb.mxu3 %v5573_v38  ;;  %v9131_v47 = vld [vmem:[#allocation13 + $0x8] sm:$0xff] }
 0xc5f   :  { %4552 = vmatpush.msrb.mxu0 %v5570_v60  ;;  %4575 = vmatpush.msrb.mxu1 %v5571_v33 }
 0xc60   :  { %4529 = vmatpush.msrb.mxu2 %v5576_v19  ;;  %4598 = vmatpush.msrb.mxu3 %v5577_v27  ;;  %v4215_v19 = vperm.slane %v9131_v47, 2 }
 0xc61   :  { %4553 = vmatpush.msrb.mxu0 %v5574_v18  ;;  %4576 = vmatpush.msrb.mxu1 %v5575_v15  ;;  %v4214_v15 = vperm.slane %v9131_v47, 1 }
 0xc62   :  { %4530 = vmatpush.msrb.mxu2 %v5580_v13  ;;  %4599 = vmatpush.msrb.mxu3 %v5581_v0  ;;  %v9041_v50 = vpop.f32.mrf.mxu2 }
 0xc63   :  { %4554 = vmatpush.msrb.mxu0 %v5578_v10  ;;  %4577 = vmatpush.msrb.mxu1 %v5579_v42  ;;  %v9049_v20 = vpop.f32.mrf.mxu3 }
 0xc64   :  { %4531 = vmatpush.msrb.mxu2 %v5584_v14  ;;  %4600 = vmatpush.msrb.mxu3 %v5585_v25  ;;  %v4216_v14 = vperm.slane %v9131_v47, 3 }
 0xc65   :  { %4555 = vmatpush.msrb.mxu0 %v5582_v36  ;;  %4578 = vmatpush.msrb.mxu1 %v5583_v32  ;;  %v4213_v36 = vperm.slane %v9131_v47, 0 }
 0xc66   :  { %4532 = vmatpush.msrb.mxu2 %v5588_v40  ;;  %4601 = vmatpush.msrb.mxu3 %v5589_v22  ;;  %v9069_v24 = vpop.f32.mrf.mxu0 }
 0xc67   :  { %4556 = vmatpush.msrb.mxu0 %v5586_v55  ;;  %4579 = vmatpush.msrb.mxu1 %v5587_v3  ;;  %v9077_v57 = vpop.f32.mrf.mxu1  ;;  %v5604_v55 = vld [vmem:[%s9628_s13 + $0x1e0] sm:$0xff] }
 0xc68   :  { %4533 = vmatpush.msrb.mxu2 %v5592_v51  ;;  %4602 = vmatpush.msrb.mxu3 %v5593_v4 }
 0xc69   :  { %4557 = vmatpush.msrb.mxu0 %v5590_v5  ;;  %4580 = vmatpush.msrb.mxu1 %v5591_v26  ;;  %v5607_v26 = vld [vmem:[%s9628_s13 + $0x1c8] sm:$0xff] }
 0xc6a   :  { %4534 = vmatpush.msrb.mxu2 %v5596_v2  ;;  %4603 = vmatpush.msrb.mxu3 %v5597_v37 }
 0xc6b   :  { %4558 = vmatpush.msrb.mxu0 %v5594_v52  ;;  %4581 = vmatpush.msrb.mxu1 %v5595_v61  ;;  %v5608_v52 = vld [vmem:[%s9628_s13 + $0x1a0] sm:$0xff] }
 0xc6c   :  { %4535 = vmatpush.msrb.mxu2 %v5600_v8  ;;  %4604 = vmatpush.msrb.mxu3 %v5601_v63  ;;  %v9109_v23 = vpop.f32.mrf.mxu2  ;;  %v5612_v8 = vld [vmem:[%s9628_s13 + $0x188] sm:$0xff] }
 0xc6d   :  { %4559 = vmatpush.msrb.mxu0 %v5598_v29  ;;  %4582 = vmatpush.msrb.mxu1 %v5599_v62  ;;  %v9111_v34 = vpop.f32.mrf.mxu3  ;;  %v5611_v62 = vld [vmem:[%s9628_s13 + $0x1f0] sm:$0xff] }
 0xc6e   :  { %4536 = vmatpush.msrb.mxu2 %v5602_v53  ;;  %4605 = vmatpush.msrb.mxu3 %v5603_v11  ;;  %v5613_v53 = vld [vmem:[%s9628_s13 + $0x160] sm:$0xff] }
 0xc70   :  { %v9119_v49 = vpop.f32.mrf.mxu0 }
 0xc71   :  { %v9121_v54 = vpop.f32.mrf.mxu1 }
 0xc76   :  { %v9123_v7 = vpop.f32.mrf.mxu2 }
 0xc77   :  { %v9125_v6 = vpop.f32.mrf.mxu3 }
 0xc7a   :  { %v9127_v60 = vpop.f32.mrf.mxu0 }
 0xc7b   :  { %v9129_v33 = vpop.f32.mrf.mxu1 }
 0xc80   :  { %v9133_v38 = vpop.f32.mrf.mxu2 }
 0xc81   :  { %v9135_v18 = vpop.f32.mrf.mxu3 }
 0xc86   :  { %v4269_v27 = vpop.f32.mrf.mxu0 }
 0xc87   :  { %v4270_v10 = vadd.f32 %v4269_v27, %v4214_v15  ;;  %v4292_v42 = vpop.f32.mrf.mxu1  ;;  %v5616_v27 = vld [vmem:[%s9628_s13 + $0x1b0] sm:$0xff] }
 0xc88   :  { %v4293_v13 = vadd.f32 %v4292_v42, %v4215_v19 }
 0xc89   :  { %v4414_v0 = vmul.f32 %v4270_v10, %v9001_v21  ;;  %v5605_v21 = vld [vmem:[%s9628_s13 + $0x1e8] sm:$0xff] }
 0xc8a   :  { %v4415_v32 = vmul.f32 %v4293_v13, %v9009_v28  ;;  %v5606_v28 = vld [vmem:[%s9628_s13 + $0x1c0] sm:$0xff]  ;;  %v5617_v10 = vld [vmem:[%s9628_s13 + $0x168] sm:$0xff] }
 0xc8b   :  { %4468 = vmatmul.f32.vlgmr.msra.gmra.mxu0 %v4414_v0  ;;  %v5618_v13 = vld [vmem:[%s9628_s13 + $0x120] sm:$0xff] }
 0xc8c   :  { %4491 = vmatmul.f32.vlgmr.msra.gmra.mxu1 %v4415_v32  ;;  %v4246_v25 = vpop.f32.mrf.mxu2  ;;  %4658 = vmatpush.msra.mxu0 %v5604_v55  ;;  %v5620_v32 = vld [vmem:[%s9628_s13 + $0x148] sm:$0xff] }
 0xc8d   :  { %v4247_v3 = vadd.f32 %v4246_v25, %v4213_v36  ;;  %v4315_v40 = vpop.f32.mrf.mxu3  ;;  %4681 = vmatpush.msra.mxu1 %v5605_v21  ;;  %v5623_v55 = vld [vmem:[%s9628_s13 + $0x128] sm:$0xff]  ;;  %v5627_v21 = vld [vmem:[%s9628_s13 + $0x130] sm:$0xff] }
 0xc8e   :  { %v4316_v22 = vadd.f32 %v4315_v40, %v4216_v14  ;;  %4659 = vmatpush.msra.mxu0 %v5606_v28  ;;  %v5626_v40 = vld [vmem:[%s9628_s13 + $0x108] sm:$0xff] }
 0xc8f   :  { %v4413_v5 = vmul.f32 %v4247_v3, %v9041_v50  ;;  %4682 = vmatpush.msra.mxu1 %v5607_v26  ;;  %v5609_v50 = vld [vmem:[%s9628_s13 + $0x1a8] sm:$0xff]  ;;  %v5625_v3 = vld [vmem:[%s9628_s13 + $0xe0] sm:$0xff] }
 0xc90   :  { %v4416_v51 = vmul.f32 %v4316_v22, %v9049_v20  ;;  %v4272_v4 = vpop.f32.mrf.mxu0  ;;  %4660 = vmatpush.msra.mxu0 %v5608_v52  ;;  %v5610_v20 = vld [vmem:[%s9628_s13 + $0x180] sm:$0xff]  ;;  %v5629_v28 = vld [vmem:[%s9628_s13 + $0xe8] sm:$0xff] }
 0xc91   :  { %v4273_v61 = vadd.f32 %v4272_v4, %v4214_v15  ;;  %v4295_v2 = vpop.f32.mrf.mxu1  ;;  %4445 = vmatmul.f32.vlgmr.msra.gmra.mxu2 %v4413_v5  ;;  %4683 = vmatpush.msra.mxu1 %v5609_v50  ;;  %v5615_v15 = vld [vmem:[%s9628_s13 + $0x140] sm:$0xff]  ;;  %v5630_v5 = vld [vmem:[%s9628_s13 + $0x110] sm:$0xff] }
 0xc92   :  { %v4296_v37 = vadd.f32 %v4295_v2, %v4215_v19  ;;  %4514 = vmatmul.f32.vlgmr.msra.gmra.mxu3 %v4416_v51  ;;  %4661 = vmatpush.msra.mxu0 %v5610_v20  ;;  %v5628_v22 = vld [vmem:[%s9628_s13 + $0xc0] sm:$0xff]  ;;  %v5632_v51 = vld [vmem:[%s9628_s13 + $0xc8] sm:$0xff]  ;;  %v5633_v4 = vld [vmem:[%s9628_s13 + $0xf0] sm:$0xff]  ;;  %v4218_v2 = vperm.slane %v9131_v47, 5  ;;  %v4219_v20 = vperm.slane %v9131_v47, 6 }
 0xc93   :  { %v4422_v29 = vmul.f32 %v4273_v61, %v9069_v24  ;;  %4704 = vmatpush.msra.mxu3 %v5611_v62  ;;  %4684 = vmatpush.msra.mxu1 %v5612_v8  ;;  %v5614_v24 = vld [vmem:[%s9628_s13 + $0x1d0] sm:$0xff]  ;;  %v5631_v26 = vld [vmem:[%s9628_s13 + $0xa0] sm:$0xff]  ;;  %v5635_v61 = vld [vmem:[%s9628_s13 + $0xa8] sm:$0xff] }
 0xc94   :  { %v4423_v63 = vmul.f32 %v4296_v37, %v9077_v57  ;;  %4662 = vmatpush.msra.mxu0 %v5613_v53  ;;  %v5634_v52 = vld [vmem:[%s9628_s13 + $0x80] sm:$0xff]  ;;  %v5636_v50 = vld [vmem:[%s9628_s13 + $0xd0] sm:$0xff]  ;;  %v5641_v53 = vld [vmem:[%s9628_s13 + $0x68] sm:$0xff] }
 0xc95   :  { %4471 = vmatmul.f32.gmra.mxu0 %v4422_v29  ;;  %4705 = vmatpush.msra.mxu3 %v5614_v24  ;;  %v5637_v37 = vld [vmem:[%s9628_s13 + $0x60] sm:$0xff]  ;;  %v5638_v29 = vld [vmem:[%s9628_s13 + $0x88] sm:$0xff]  ;;  %v5639_v62 = vld [vmem:[%s9628_s13 + $0xb0] sm:$0xff] }
 0xc96   :  { %4494 = vmatmul.f32.gmra.mxu1 %v4423_v63  ;;  %v4249_v11 = vpop.f32.mrf.mxu2  ;;  %4663 = vmatpush.msra.mxu0 %v5615_v15  ;;  %v5640_v8 = vld [vmem:[%s9628_s13 + $0x40] sm:$0xff]  ;;  %v5642_v15 = vld [vmem:[%s9628_s13 + $0x90] sm:$0xff] }
 0xc97   :  { %v4250_v19 = vadd.f32 %v4249_v11, %v4213_v36  ;;  %v4318_v57 = vpop.f32.mrf.mxu3  ;;  %4706 = vmatpush.msra.mxu3 %v5616_v27  ;;  %4685 = vmatpush.msra.mxu1 %v5617_v10  ;;  %v5619_v36 = vld [vmem:[%s9628_s13 + $0x190] sm:$0xff]  ;;  %v5644_v27 = vld [vmem:[%s9628_s13 + $0x48] sm:$0xff] }
 0xc98   :  { %v4319_v42 = vadd.f32 %v4318_v57, %v4216_v14  ;;  %4664 = vmatpush.msra.mxu0 %v5618_v13  ;;  %v5621_v14 = vld [vmem:[%s9628_s13 + $0x100] sm:$0xff]  ;;  %v5645_v13 = vld [vmem:[%s9628_s13 + $0x70] sm:$0xff] }
 0xc99   :  { %v4421_v0 = vmul.f32 %v4250_v19, %v9109_v23  ;;  %4707 = vmatpush.msra.mxu3 %v5619_v36  ;;  %4686 = vmatpush.msra.mxu1 %v5620_v32  ;;  %v5622_v23 = vld [vmem:[%s9628_s13 + $0x170] sm:$0xff]  ;;  %v5643_v19 = vld [vmem:[%s9628_s13 + $0x20] sm:$0xff]  ;;  %v4220_v32 = vperm.slane %v9131_v47, 7 }
 0xc9a   :  { %v4424_v25 = vmul.f32 %v4319_v42, %v9111_v34  ;;  %4665 = vmatpush.msra.mxu0 %v5621_v14  ;;  %v5624_v34 = vld [vmem:[%s9628_s13 + $0x150] sm:$0xff]  ;;  %v4217_v42 = vperm.slane %v9131_v47, 4  ;;  %v5650_v47 = vld [vmem:[%s9628_s13 + $0x8] sm:$0xff] }
 0xc9b   :  { %4448 = vmatmul.f32.gmra.mxu2 %v4421_v0  ;;  %4708 = vmatpush.msra.mxu3 %v5622_v23  ;;  %v5646_v0 = vld [vmem:[%s9628_s13] sm:$0xff] }
 0xc9c   :  { %4517 = vmatmul.f32.gmra.mxu3 %v4424_v25  ;;  %4687 = vmatpush.msra.mxu1 %v5623_v55  ;;  %v5648_v25 = vld [vmem:[%s9628_s13 + $0x50] sm:$0xff] }
 0xc9d   :  { %4709 = vmatpush.msra.mxu3 %v5624_v34  ;;  %4666 = vmatpush.msra.mxu0 %v5625_v3 }
 0xc9e   :  { %4688 = vmatpush.msra.mxu1 %v5626_v40 }
 0xc9f   :  { %4710 = vmatpush.msra.mxu3 %v5627_v21  ;;  %4667 = vmatpush.msra.mxu0 %v5628_v22 }
 0xca0   :  { %4689 = vmatpush.msra.mxu1 %v5629_v28  ;;  %v5651_v28 = vld [vmem:[%s9628_s13 + $0x10] sm:$0xff] }
 0xca1   :  { %4711 = vmatpush.msra.mxu3 %v5630_v5  ;;  %4668 = vmatpush.msra.mxu0 %v5631_v26 }
 0xca2   :  { %4690 = vmatpush.msra.mxu1 %v5632_v51 }
 0xca3   :  { %4712 = vmatpush.msra.mxu3 %v5633_v4  ;;  %4669 = vmatpush.msra.mxu0 %v5634_v52 }
 0xca4   :  { %4691 = vmatpush.msra.mxu1 %v5635_v61 }
 0xca5   :  { %4713 = vmatpush.msra.mxu3 %v5636_v50  ;;  %4670 = vmatpush.msra.mxu0 %v5637_v37 }
 0xca6   :  { %4692 = vmatpush.msra.mxu1 %v5638_v29  ;;  %v5082_v29 = vld [vmem:[%s9679_s14 + $0xc8] sm:$0xff] }
 0xca7   :  { %4714 = vmatpush.msra.mxu3 %v5639_v62  ;;  %4671 = vmatpush.msra.mxu0 %v5640_v8  ;;  %v5081_v62 = vld [vmem:[%s9679_s14 + $0xc0] sm:$0xff]  ;;  %v5080_v8 = vld [vmem:[%s9679_s14 + $0xb8] sm:$0xff] }
 0xca8   :  { %v4361_v63 = vpop.f32.mrf.mxu0  ;;  %4693 = vmatpush.msra.mxu1 %v5641_v53  ;;  %v5078_v53 = vld [vmem:[%s9679_s14 + $0xa8] sm:$0xff] }
 0xca9   :  { %v4362_v24 = vadd.f32 %v4361_v63, %v4218_v2  ;;  %v4384_v11 = vpop.f32.mrf.mxu1  ;;  %4715 = vmatpush.msra.mxu3 %v5642_v15  ;;  %4672 = vmatpush.msra.mxu0 %v5643_v19  ;;  %v5079_v63 = vld [vmem:[%s9679_s14 + $0xb0] sm:$0xff]  ;;  %v5074_v19 = vld [vmem:[%s9679_s14 + $0x88] sm:$0xff] }
 0xcaa   :  { %v4385_v57 = vadd.f32 %v4384_v11, %v4219_v20  ;;  %4694 = vmatpush.msra.mxu1 %v5644_v27  ;;  %v5076_v11 = vld [vmem:[%s9679_s14 + $0x98] sm:$0xff]  ;;  %v5075_v15 = vld [vmem:[%s9679_s14 + $0x90] sm:$0xff] }
 0xcab   :  { %v4418_v10 = vmul.f32 %v4362_v24, %v9119_v49  ;;  %4716 = vmatpush.msra.mxu3 %v5645_v13  ;;  %4673 = vmatpush.msra.mxu0 %v5646_v0  ;;  %v5647_v49 = vld [vmem:[%s9628_s13 + $0x28] sm:$0xff]  ;;  %v5077_v24 = vld [vmem:[%s9679_s14 + $0xa0] sm:$0xff]  ;;  %v5652_v27 = vld [vmem:[%s9628_s13 + $0x1f8] sm:$0xff] }
 0xcac   :  { %v4419_v36 = vmul.f32 %v4385_v57, %v9121_v54  ;;  %4695 = vmatpush.msra.mxu1 %v5647_v49  ;;  %v5649_v54 = vld [vmem:[%s9628_s13 + $0x30] sm:$0xff]  ;;  %v5073_v57 = vld [vmem:[%s9679_s14 + $0x80] sm:$0xff]  ;;  %v5654_v0 = vld [vmem:[%s9628_s13 + $0x1b8] sm:$0xff] }
 0xcad   :  { %4560 = vmatmul.f32.vlgmr.msrb.gmra.mxu0 %v4418_v10  ;;  %4717 = vmatpush.msra.mxu3 %v5648_v25  ;;  %v5653_v10 = vld [vmem:[%s9628_s13 + $0x1d8] sm:$0xff] }
 0xcae   :  { %4583 = vmatmul.f32.vlgmr.msrb.gmra.mxu1 %v4419_v36  ;;  %v4338_v14 = vpop.f32.mrf.mxu2  ;;  %v5656_v25 = vld [vmem:[%s9628_s13 + $0x178] sm:$0xff] }
 0xcaf   :  { %v4339_v23 = vadd.f32 %v4338_v14, %v4217_v42  ;;  %v4407_v55 = vpop.f32.mrf.mxu3  ;;  %4718 = vmatpush.msra.mxu3 %v5649_v54  ;;  %4696 = vmatpush.msra.mxu1 %v5650_v47  ;;  %v5657_v14 = vld [vmem:[%s9628_s13 + $0x158] sm:$0xff] }
 0xcb0   :  { %v4408_v34 = vadd.f32 %v4407_v55, %v4220_v32  ;;  %v4364_v3 = vpop.f32.mrf.mxu0 }
 0xcb1   :  { %v4417_v40 = vmul.f32 %v4339_v23, %v9123_v7  ;;  %v4365_v21 = vadd.f32 %v4364_v3, %v4218_v2  ;;  %v4387_v22 = vpop.f32.mrf.mxu1  ;;  %4719 = vmatpush.msra.mxu3 %v5651_v28  ;;  %v5658_v23 = vld [vmem:[%s9628_s13 + $0x138] sm:$0xff] }
 0xcb2   :  { %v4420_v5 = vmul.f32 %v4408_v34, %v9125_v6  ;;  %v4388_v26 = vadd.f32 %v4387_v22, %v4219_v20  ;;  %v5088_v6 = vld [vmem:[%s9679_s14 + $0xf8] sm:$0xff]  ;;  %v5083_v20 = vld [vmem:[%s9679_s14 + $0xd0] sm:$0xff] }
 0xcb3   :  { %v4426_v51 = vmul.f32 %v4365_v21, %v9127_v60  ;;  %4537 = vmatmul.f32.vlgmr.msrb.gmra.mxu2 %v4417_v40  ;;  %v5087_v60 = vld [vmem:[%s9679_s14 + $0xf0] sm:$0xff]  ;;  %v5659_v34 = vld [vmem:[%s9628_s13 + $0x118] sm:$0xff] }
 0xcb4   :  { %v4427_v4 = vmul.f32 %v4388_v26, %v9129_v33  ;;  %4606 = vmatmul.f32.vlgmr.msrb.gmra.mxu3 %v4420_v5  ;;  %4635 = vmatpush.msra.mxu2 %v5088_v6  ;;  %v5086_v33 = vld [vmem:[%s9679_s14 + $0xe8] sm:$0xff]  ;;  %v5660_v40 = vld [vmem:[%s9628_s13 + $0xf8] sm:$0xff] }
 0xcb5   :  { %4563 = vmatmul.f32.gmra.mxu0 %v4426_v51  ;;  %v5661_v28 = vld [vmem:[%s9628_s13 + $0xd8] sm:$0xff] }
 0xcb6   :  { %4586 = vmatmul.f32.gmra.mxu1 %v4427_v4  ;;  %v4341_v52 = vpop.f32.mrf.mxu2  ;;  %4636 = vmatpush.msra.mxu2 %v5087_v60  ;;  %v5662_v5 = vld [vmem:[%s9628_s13 + $0xb8] sm:$0xff] }
 0xcb7   :  { %v4342_v7 = vadd.f32 %v4341_v52, %v4217_v42  ;;  %v4410_v61 = vpop.f32.mrf.mxu3 }
 0xcb8   :  { %v4411_v2 = vadd.f32 %v4410_v61, %v4220_v32  ;;  %4637 = vmatpush.msra.mxu2 %v5086_v33  ;;  %v5655_v32 = vld [vmem:[%s9628_s13 + $0x198] sm:$0xff] }
 0xcb9   :  { %v4425_v50 = vmul.f32 %v4342_v7, %v9133_v38  ;;  %v5085_v38 = vld [vmem:[%s9679_s14 + $0xe0] sm:$0xff]  ;;  %v5663_v7 = vld [vmem:[%s9628_s13 + $0x98] sm:$0xff] }
 0xcba   :  { %v4428_v37 = vmul.f32 %v4411_v2, %v9135_v18  ;;  %v5084_v18 = vld [vmem:[%s9679_s14 + $0xd8] sm:$0xff]  ;;  %4638 = vmatpush.msra.mxu2 %v5085_v38 }
 0xcbb   :  { %4540 = vmatmul.f32.gmra.mxu2 %v4425_v50  ;;  %v5664_v50 = vld [vmem:[%s9628_s13 + $0x78] sm:$0xff] }
 0xcbc   :  { %4609 = vmatmul.f32.gmra.mxu3 %v4428_v37  ;;  %4639 = vmatpush.msra.mxu2 %v5084_v18  ;;  %v5665_v33 = vld [vmem:[%s9628_s13 + $0x58] sm:$0xff] }
 0xcbd   :  { %v5666_v18 = vld [vmem:[%s9628_s13 + $0x38] sm:$0xff] }
 0xcbe   :  { %4640 = vmatpush.msra.mxu2 %v5083_v20 }
 0xcc0   :  { %4641 = vmatpush.msra.mxu2 %v5082_v29 }
 0xcc2   :  { %4642 = vmatpush.msra.mxu2 %v5081_v62 }
 0xcc4   :  { %4643 = vmatpush.msra.mxu2 %v5080_v8  ;;  %v5667_v8 = vld [vmem:[%s9628_s13 + $0x18] sm:$0xff] }
 0xcc6   :  { %4644 = vmatpush.msra.mxu2 %v5079_v63 }
 0xcc8   :  { %4645 = vmatpush.msra.mxu2 %v5078_v53 }
 0xcca   :  { %4646 = vmatpush.msra.mxu2 %v5077_v24 }
 0xccc   :  { %4647 = vmatpush.msra.mxu2 %v5076_v11 }
 0xcce   :  { %4648 = vmatpush.msra.mxu2 %v5075_v15 }
 0xcd0   :  { %4649 = vmatpush.msra.mxu2 %v5074_v19 }
 0xcd2   :  { %4650 = vmatpush.msra.mxu2 %v5073_v57 }
 0xcd4   :  { %4727 = vmatpush.msrb.mxu2 %v5652_v27  ;;  %v5104_v27 = vld [vmem:[%s9680_s30 + $0x238] sm:$0xff] }
 0xcd5   :  { %4821 = vmatpush.msrb.mxu0 %v5104_v27 }
 0xcd6   :  { %4728 = vmatpush.msrb.mxu2 %v5653_v10  ;;  %v5120_v10 = vld [vmem:[%s9680_s30 + $0x2b8] sm:$0xff] }
 0xcd7   :  { %4844 = vmatpush.msrb.mxu1 %v5120_v10  ;;  %v5090_v10 = vld [vmem:[%s9680_s30 + $0x1c8] sm:$0xff] }
 0xcd8   :  { %4729 = vmatpush.msrb.mxu2 %v5654_v0  ;;  %v5102_v0 = vld [vmem:[%s9680_s30 + $0x228] sm:$0xff] }
 0xcda   :  { %4730 = vmatpush.msrb.mxu2 %v5655_v32  ;;  %v5136_v32 = vld [vmem:[%s9680_s30 + $0x338] sm:$0xff] }
 0xcdb   :  { %4867 = vmatpush.msrb.mxu3 %v5136_v32  ;;  %v5105_v32 = vld [vmem:[%s9680_s30 + $0x240] sm:$0xff] }
 0xcdc   :  { %4731 = vmatpush.msrb.mxu2 %v5656_v25  ;;  %v5101_v25 = vld [vmem:[%s9680_s30 + $0x220] sm:$0xff] }
 0xcde   :  { %4732 = vmatpush.msrb.mxu2 %v5657_v14  ;;  %v5117_v14 = vld [vmem:[%s9680_s30 + $0x2a0] sm:$0xff] }
 0xce0   :  { %4733 = vmatpush.msrb.mxu2 %v5658_v23  ;;  %v5134_v23 = vld [vmem:[%s9680_s30 + $0x328] sm:$0xff] }
 0xce2   :  { %4734 = vmatpush.msrb.mxu2 %v5659_v34  ;;  %v5099_v34 = vld [vmem:[%s9680_s30 + $0x210] sm:$0xff] }
 0xce4   :  { %4735 = vmatpush.msrb.mxu2 %v5660_v40  ;;  %v5132_v40 = vld [vmem:[%s9680_s30 + $0x318] sm:$0xff] }
 0xce6   :  { %4736 = vmatpush.msrb.mxu2 %v5661_v28  ;;  %v5131_v28 = vld [vmem:[%s9680_s30 + $0x310] sm:$0xff] }
 0xce8   :  { %4737 = vmatpush.msrb.mxu2 %v5662_v5  ;;  %v5144_v5 = vld [vmem:[%s9680_s30 + $0x378] sm:$0xff] }
 0xcea   :  { %4738 = vmatpush.msrb.mxu2 %v5663_v7  ;;  %v5142_v7 = vld [vmem:[%s9680_s30 + $0x368] sm:$0xff] }
 0xcec   :  { %4739 = vmatpush.msrb.mxu2 %v5664_v50  ;;  %v5129_v50 = vld [vmem:[%s9680_s30 + $0x300] sm:$0xff] }
 0xcee   :  { %4740 = vmatpush.msrb.mxu2 %v5665_v33  ;;  %v5128_v33 = vld [vmem:[%s9680_s30 + $0x2f8] sm:$0xff] }
 0xcf0   :  { %4741 = vmatpush.msrb.mxu2 %v5666_v18  ;;  %v5110_v18 = vld [vmem:[%s9680_s30 + $0x268] sm:$0xff] }
 0xcf2   :  { %4742 = vmatpush.msrb.mxu2 %v5667_v8  ;;  %v5093_v8 = vld [vmem:[%s9680_s30 + $0x1e0] sm:$0xff] }
 0xd08   :  { %v4469_v42 = vpop.f32.mrf.mxu0 }
 0xd09   :  { %v4492_v36 = vpop.f32.mrf.mxu1 }
 0xd12   :  { %v4472_v54 = vpop.f32.mrf.mxu0 }
 0xd13   :  { %v4495_v3 = vpop.f32.mrf.mxu1 }
 0xd14   :  { %v4446_v13 = vpop.f32.mrf.mxu2 }
 0xd15   :  { %v4515_v49 = vpop.f32.mrf.mxu3  ;;  %v4470_v55 = vadd.f32 %v4469_v42, %v4446_v13  ;;  %v5103_v42 = vld [vmem:[%s9680_s30 + $0x230] sm:$0xff] }
 0xd16   :  { %v5119_v13 = vld [vmem:[%s9680_s30 + $0x2b0] sm:$0xff]  ;;  %4822 = vmatpush.msrb.mxu0 %v5103_v42  ;;  %v5106_v42 = vld [vmem:[%s9680_s30 + $0x248] sm:$0xff] }
 0xd17   :  { %v4493_v21 = vadd.f32 %v4492_v36, %v4470_v55  ;;  %v5118_v36 = vld [vmem:[%s9680_s30 + $0x2a8] sm:$0xff]  ;;  %4845 = vmatpush.msrb.mxu1 %v5119_v13  ;;  %v5100_v55 = vld [vmem:[%s9680_s30 + $0x218] sm:$0xff]  ;;  %v5125_v13 = vld [vmem:[%s9680_s30 + $0x2e0] sm:$0xff] }
 0xd18   :  { %4823 = vmatpush.msrb.mxu0 %v5102_v0  ;;  %v5141_v0 = vld [vmem:[%s9680_s30 + $0x360] sm:$0xff] }
 0xd19   :  { %v4516_v26 = vadd.f32 %v4515_v49, %v4493_v21  ;;  %v5135_v49 = vld [vmem:[%s9680_s30 + $0x330] sm:$0xff]  ;;  %4846 = vmatpush.msrb.mxu1 %v5118_v36  ;;  %v5098_v21 = vld [vmem:[%s9680_s30 + $0x208] sm:$0xff]  ;;  %v5089_v36 = vld [vmem:[%s9680_s30 + $0x1c0] sm:$0xff] }
 0xd1a   :  { %4868 = vmatpush.msrb.mxu3 %v5135_v49  ;;  %4824 = vmatpush.msrb.mxu0 %v5101_v25  ;;  %v5124_v49 = vld [vmem:[%s9680_s30 + $0x2d8] sm:$0xff] }
 0xd1b   :  { %4847 = vmatpush.msrb.mxu1 %v5117_v14  ;;  %v5140_v25 = vld [vmem:[%s9680_s30 + $0x358] sm:$0xff]  ;;  %v5123_v14 = vld [vmem:[%s9680_s30 + $0x2d0] sm:$0xff] }
 0xd1c   :  { %4869 = vmatpush.msrb.mxu3 %v5134_v23  ;;  %4825 = vmatpush.msrb.mxu0 %v5100_v55  ;;  %v5139_v23 = vld [vmem:[%s9680_s30 + $0x350] sm:$0xff]  ;;  %v5122_v55 = vld [vmem:[%s9680_s30 + $0x2c8] sm:$0xff] }
 0xd1e   :  { %v4449_v47 = vpop.f32.mrf.mxu2  ;;  %4826 = vmatpush.msrb.mxu0 %v5099_v34  ;;  %v5137_v34 = vld [vmem:[%s9680_s30 + $0x340] sm:$0xff] }
 0xd1f   :  { %v4518_v22 = vpop.f32.mrf.mxu3  ;;  %v4473_v51 = vadd.f32 %v4472_v54, %v4449_v47  ;;  %v5116_v54 = vld [vmem:[%s9680_s30 + $0x298] sm:$0xff]  ;;  %v5133_v47 = vld [vmem:[%s9680_s30 + $0x320] sm:$0xff] }
 0xd20   :  { %4848 = vmatpush.msrb.mxu1 %v5116_v54  ;;  %4870 = vmatpush.msrb.mxu3 %v5133_v47  ;;  %v5138_v54 = vld [vmem:[%s9680_s30 + $0x348] sm:$0xff]  ;;  %v5121_v47 = vld [vmem:[%s9680_s30 + $0x2c0] sm:$0xff] }
 0xd21   :  { %v4496_v37 = vadd.f32 %v4495_v3, %v4473_v51  ;;  %v5115_v3 = vld [vmem:[%s9680_s30 + $0x290] sm:$0xff]  ;;  %v5113_v51 = vld [vmem:[%s9680_s30 + $0x280] sm:$0xff]  ;;  %4827 = vmatpush.msrb.mxu0 %v5098_v21 }
 0xd22   :  { %4849 = vmatpush.msrb.mxu1 %v5115_v3  ;;  %4871 = vmatpush.msrb.mxu3 %v5132_v40 }
 0xd23   :  { %v4519_v20 = vadd.f32 %v4518_v22, %v4496_v37  ;;  %v5114_v22 = vld [vmem:[%s9680_s30 + $0x288] sm:$0xff]  ;;  %v5095_v37 = vld [vmem:[%s9680_s30 + $0x1f0] sm:$0xff] }
 0xd24   :  { %4850 = vmatpush.msrb.mxu1 %v5114_v22  ;;  %4872 = vmatpush.msrb.mxu3 %v5131_v28 }
 0xd26   :  { %4851 = vmatpush.msrb.mxu1 %v5113_v51 }
 0xd2a   :  { %v4561_v4 = vpop.f32.mrf.mxu0 }
 0xd2b   :  { %v4584_v2 = vpop.f32.mrf.mxu1 }
 0xd32   :  { %v4564_v53 = vpop.f32.mrf.mxu0 }
 0xd33   :  { %v4587_v11 = vpop.f32.mrf.mxu1 }
 0xd36   :  { %v4538_v52 = vpop.f32.mrf.mxu2 }
 0xd37   :  { %v4539_v61 = vadd.f32 %v4538_v52, %v4516_v26  ;;  %v4607_v60 = vpop.f32.mrf.mxu3  ;;  %v5097_v26 = vld [vmem:[%s9680_s30 + $0x200] sm:$0xff]  ;;  %v5130_v52 = vld [vmem:[%s9680_s30 + $0x308] sm:$0xff] }
 0xd38   :  { %4828 = vmatpush.msrb.mxu0 %v5097_v26  ;;  %4873 = vmatpush.msrb.mxu3 %v5130_v52 }
 0xd39   :  { %v4562_v6 = vadd.f32 %v4561_v4, %v4539_v61  ;;  %v5143_v4 = vld [vmem:[%s9680_s30 + $0x370] sm:$0xff]  ;;  %v5096_v61 = vld [vmem:[%s9680_s30 + $0x1f8] sm:$0xff] }
 0xd3a   :  { %4829 = vmatpush.msrb.mxu0 %v5096_v61  ;;  %4874 = vmatpush.msrb.mxu3 %v5129_v50 }
 0xd3b   :  { %v4585_v38 = vadd.f32 %v4584_v2, %v4562_v6  ;;  %v5112_v2 = vld [vmem:[%s9680_s30 + $0x278] sm:$0xff]  ;;  %v5111_v6 = vld [vmem:[%s9680_s30 + $0x270] sm:$0xff] }
 0xd3c   :  { %4852 = vmatpush.msrb.mxu1 %v5112_v2  ;;  %4830 = vmatpush.msrb.mxu0 %v5095_v37 }
 0xd3d   :  { %v4608_v29 = vadd.f32 %v4607_v60, %v4585_v38  ;;  %v5188_v60 = vld [vmem:[#allocation14 + $0x1] ss:$0 sm:$0xff]  ;;  %v5094_v38 = vld [vmem:[%s9680_s30 + $0x1e8] sm:$0xff]  ;;  %4875 = vmatpush.msrb.mxu3 %v5128_v33 }
 0xd3e   :  { %v4541_v62 = vpop.f32.mrf.mxu2  ;;  %4853 = vmatpush.msrb.mxu1 %v5111_v6  ;;  %4831 = vmatpush.msrb.mxu0 %v5094_v38  ;;  %v2890_v38 = vadd.f32 %v8415_v39, %v8131_v17 }
 0xd3f   :  { %v4542_v63 = vadd.f32 %v4541_v62, %v4519_v20  ;;  %4651 = vmatmul.f32.vlgmr.msra.gmra.mxu2 %v4608_v29  ;;  %v4610_v19 = vpop.f32.mrf.mxu3  ;;  %v5127_v20 = vld [vmem:[%s9680_s30 + $0x2f0] sm:$0xff] }
 0xd40   :  { %4898 = vmatpush.msra.mxu2 %v5144_v5  ;;  %4854 = vmatpush.msrb.mxu1 %v5110_v18 }
 0xd41   :  { %v4565_v24 = vadd.f32 %v4564_v53, %v4542_v63  ;;  %v5109_v63 = vld [vmem:[%s9680_s30 + $0x260] sm:$0xff]  ;;  %4876 = vmatpush.msrb.mxu3 %v5127_v20  ;;  %v5126_v53 = vld [vmem:[%s9680_s30 + $0x2e8] sm:$0xff]  ;;  %4832 = vmatpush.msrb.mxu0 %v5093_v8 }
 0xd42   :  { %4899 = vmatpush.msra.mxu2 %v5143_v4  ;;  %4855 = vmatpush.msrb.mxu1 %v5109_v63 }
 0xd43   :  { %v4588_v15 = vadd.f32 %v4587_v11, %v4565_v24  ;;  %v5092_v24 = vld [vmem:[%s9680_s30 + $0x1d8] sm:$0xff]  ;;  %4877 = vmatpush.msrb.mxu3 %v5126_v53  ;;  %v2913_v53 = vadd.f32 %v8423_v9, %v2890_v38 }
 0xd44   :  { %4900 = vmatpush.msra.mxu2 %v5142_v7  ;;  %v5108_v11 = vld [vmem:[%s9680_s30 + $0x258] sm:$0xff]  ;;  %4833 = vmatpush.msrb.mxu0 %v5092_v24 }
 0xd45   :  { %v4611_v57 = vadd.f32 %v4610_v19, %v4588_v15  ;;  %v5091_v15 = vld [vmem:[%s9680_s30 + $0x1d0] sm:$0xff]  ;;  %4856 = vmatpush.msrb.mxu1 %v5108_v11  ;;  %4878 = vmatpush.msrb.mxu3 %v5125_v13 }
 0xd46   :  { %v5107_v19 = vld [vmem:[%s9680_s30 + $0x250] sm:$0xff]  ;;  %4834 = vmatpush.msrb.mxu0 %v5091_v15  ;;  %4901 = vmatpush.msra.mxu2 %v5141_v0  ;;  %v5190_v15 = vld [vmem:[#allocation22] ss:$0 sm:$0xff] }
 0xd47   :  { %4654 = vmatmul.f32.gmra.mxu2 %v4611_v57  ;;  %4857 = vmatpush.msrb.mxu1 %v5107_v19 }
 0xd48   :  { %4835 = vmatpush.msrb.mxu0 %v5090_v10  ;;  %4879 = vmatpush.msrb.mxu3 %v5124_v49 }
 0xd49   :  { %4858 = vmatpush.msrb.mxu1 %v5106_v42  ;;  %4902 = vmatpush.msra.mxu2 %v5140_v25  ;;  %v5191_v25 = vld [vmem:[#allocation23] ss:$0 sm:$0xff] }
 0xd4a   :  { %4836 = vmatpush.msrb.mxu0 %v5089_v36  ;;  %4880 = vmatpush.msrb.mxu3 %v5123_v14  ;;  %v5192_v14 = vld [vmem:[#allocation25] ss:$0 sm:$0xff] }
 0xd4b   :  { %4859 = vmatpush.msrb.mxu1 %v5105_v32  ;;  %4903 = vmatpush.msra.mxu2 %v5139_v23 }
 0xd4c   :  { %4881 = vmatpush.msrb.mxu3 %v5122_v55 }
 0xd4d   :  { %4904 = vmatpush.msra.mxu2 %v5138_v54  ;;  %v5193_v54 = vld [vmem:[#allocation26] ss:$0 sm:$0xff] }
 0xd4e   :  { %4882 = vmatpush.msrb.mxu3 %v5121_v47 }
 0xd4f   :  { %4905 = vmatpush.msra.mxu2 %v5137_v34 }
 0xdc2   :  { %v4652_v29 = vpop.f32.mrf.mxu2 }
 0xdc3   :  { %v4653_v62 = vadd.f32 %v5188_v60, %v4652_v29 }
 0xdc5   :  { %4674 = vmatmul.f32.vlgmr.msra.gmra.mxu0 %v4653_v62  ;;  %4697 = vmatmul.f32.vlgmr.msra.gmra.mxu1 %v4653_v62 }
 0xdc6   :  { %4720 = vmatmul.f32.vlgmr.msra.gmra.mxu3 %v4653_v62  ;;  %4743 = vmatmul.f32.vlgmr.msrb.gmra.mxu2 %v4653_v62 }
 0xdca   :  { %v4655_v57 = vpop.f32.mrf.mxu2 }
 0xdcb   :  { %v4656_v27 = vadd.f32 %v5188_v60, %v4655_v57  ;;  %v5185_v60 = vld [vmem:[#allocation19] ss:$0 sm:$0xff] }
 0xdcc   :  { %v564_v62 = vadd.f32 %v5185_v60, %v6789_v31  ;;  %v567_v39 = vadd.f32 %v5185_v60, %v6827_v45  ;;  %v4981_v45 = vld [vmem:[%s9641_s26] sm:$0xff] }
 0xdcd   :  { %4677 = vmatmul.f32.gmra.mxu0 %v4656_v27  ;;  %4700 = vmatmul.f32.gmra.mxu1 %v4656_v27 }
 0xdce   :  { %4723 = vmatmul.f32.gmra.mxu3 %v4656_v27  ;;  %4746 = vmatmul.f32.gmra.mxu2 %v4656_v27 }
 0xe42   :  { %v4675_v3 = vpop.f32.mrf.mxu0  ;;  %v4698_v40 = vpop.f32.mrf.mxu1 }
 0xe43   :  { %v4750_v21 = vmul.f32 %v4675_v3, %v6710_v1  ;;  %v4751_v22 = vmul.f32 %v4698_v40, %v6659_v46 }
 0xe45   :  { %4837 = vmatmul.f32.vlgmr.msrb.gmra.mxu0 %v4750_v21  ;;  %4860 = vmatmul.f32.vlgmr.msrb.gmra.mxu1 %v4751_v22 }
 0xe49   :  { %v4721_v28 = vpop.f32.mrf.mxu3  ;;  %v4744_v5 = vpop.f32.mrf.mxu2 }
 0xe4a   :  { %v4752_v26 = vmul.f32 %v4721_v28, %v6661_v48  ;;  %v4753_v51 = vmul.f32 %v4744_v5, %v6787_v30  ;;  %v4678_v4 = vpop.f32.mrf.mxu0  ;;  %v4701_v52 = vpop.f32.mrf.mxu1  ;;  %v4932_v48 = vld [vmem:[%s9637_s22 + $0x18] sm:$0xff]  ;;  %v2887_v30 = vadd.f32 %v8349_v35, %v8129_v43 }
 0xe4b   :  { %v4754_v7 = vmul.f32 %v4678_v4, %v6748_v16  ;;  %v4755_v61 = vmul.f32 %v4701_v52, %v6692_v58  ;;  %5155 = vmatpush.msrb.mxu2 %v4932_v48  ;;  %4956 = vmatpush.msra.mxu0 %v4932_v48  ;;  %v4931_v58 = vld [vmem:[%s9637_s22 + $0x10] sm:$0xff]  ;;  %v4929_v16 = vld [vmem:[%s9637_s22] sm:$0xff]  ;;  %v5189_v35 = vld [vmem:[#allocation20] ss:$0 sm:$0xff] }
 0xe4c   :  { %4883 = vmatmul.f32.vlgmr.msrb.gmra.mxu3 %v4752_v26  ;;  %5145 = vmatmul.msk.f32.vlgmr.msra.gmra.mxu2 %vm2839_vm0, %v4753_v51  ;;  %v2910_v6 = vadd.f32 %v8357_v12, %v2887_v30  ;;  %v5194_v26 = vld [vmem:[#allocation2] ss:$0 sm:$0xff] }
 0xe4d   :  { %4840 = vmatmul.f32.gmra.mxu0 %v4754_v7  ;;  %4863 = vmatmul.f32.gmra.mxu1 %v4755_v61 }
 0xe4e   :  { %4957 = vmatpush.msra.mxu0 %v4931_v58  ;;  %5156 = vmatpush.msrb.mxu2 %v4931_v58  ;;  %v2933_v33 = vadd.f32 %v8389_v41, %v2910_v6  ;;  %v2936_v41 = vadd.f32 %v8455_v56, %v2913_v53  ;;  %v4982_v56 = vld [vmem:[%s9641_s26 + $0x8] sm:$0xff] }
 0xe4f   :  { %5008 = vmatpush.msra.mxu1 %v4982_v56  ;;  %5159 = vmatpush.msra.mxu3 %v4982_v56 }
 0xe50   :  { %v2938_v63 = vadd.f32 %v2933_v33, %v564_v62  ;;  %v2939_v42 = vadd.f32 %v2936_v41, %v567_v39 }
 0xe51   :  { %v4724_v46 = vpop.f32.mrf.mxu3  ;;  %v4747_v1 = vpop.f32.mrf.mxu2  ;;  %5009 = vmatpush.msra.mxu1 %v4981_v45  ;;  %5160 = vmatpush.msra.mxu3 %v4981_v45 }
 0xe52   :  { %v4756_v2 = vmul.f32 %v4724_v46, %v6694_v59  ;;  %v4757_v50 = vmul.f32 %v4747_v1, %v6825_v44  ;;  %v4930_v59 = vld [vmem:[%s9637_s22 + $0x8] sm:$0xff] }
 0xe53   :  { %4958 = vmatpush.msra.mxu0 %v4930_v59  ;;  %5157 = vmatpush.msrb.mxu2 %v4930_v59 }
 0xe54   :  { %4886 = vmatmul.f32.gmra.mxu3 %v4756_v2  ;;  %5146 = vmatmul.msk.f32.gmra.mxu2 %vm2839_vm0, %v4757_v50 }
 0xe55   :  { %4959 = vmatpush.msra.mxu0 %v4929_v16  ;;  %5158 = vmatpush.msrb.mxu2 %v4929_v16 }
 0xec2   :  { %v4838_v44 = vpop.f32.mrf.mxu0  ;;  %v4861_v37 = vpop.f32.mrf.mxu1 }
 0xec3   :  { %v4862_v18 = vadd.f32 %v4861_v37, %v4838_v44 }
 0xeca   :  { %v4841_v24 = vpop.f32.mrf.mxu0  ;;  %v4864_v11 = vpop.f32.mrf.mxu1 }
 0xecb   :  { %v4865_v19 = vadd.f32 %v4864_v11, %v4841_v24 }
 0xecf   :  { %v4884_v20 = vpop.f32.mrf.mxu3  ;;  %v4907_v29 = vpop.f32.mrf.mxu2 }
 0xed0   :  { %v4885_v8 = vadd.f32 %v4884_v20, %v4862_v18 }
 0xed2   :  { %v4908_v43 = vadd.f32 %v4907_v29, %v4885_v8 }
 0xed4   :  { %v4913_v12 = vadd.f32 %v4908_v43, %v2938_v63 }
 0xed6   :  { %v4919_v57 = vmul.f32 %v5189_v35, %v4913_v12 }
 0xed7   :  { %v4887_v17 = vpop.f32.mrf.mxu3  ;;  %v4910_v31 = vpop.f32.mrf.mxu2 }
 0xed8   :  { %v4925_v27 = vadd.f32 %v5190_v15, %v4919_v57  ;;  %v4888_v10 = vadd.f32 %v4887_v17, %v4865_v19 }
 0xeda   :  { %v4927_v13 = vmax.f32 %v4925_v27, 0.0  ;;  %v4911_v9 = vadd.f32 %v4910_v31, %v4888_v10 }
 0xedc   :  { %v4914_v0 = vadd.f32 %v4911_v9, %v2939_v42  ;;  %5147 = vmatmul.msk.f32.vlgmr.msra.gmra.mxu0 %vm4937_vm1, %v4927_v13 }
 0xede   :  { %v4920_v36 = vmul.f32 %v5189_v35, %v4914_v0 }
 0xee0   :  { %v4926_v32 = vadd.f32 %v5190_v15, %v4920_v36 }
 0xee2   :  { %v4928_v49 = vmax.f32 %v4926_v32, 0.0 }
 0xee4   :  { %5148 = vmatmul.msk.f32.vlgmr.msrb.gmra.mxu2 %vm4937_vm1, %v4928_v49 }
 0xf59   :  { %v4961_v23 = vpop.f32.mrf.mxu0 }
 0xf5a   :  { %v4962_v55 = vadd.f32 %v5191_v25, %v4961_v23 }
 0xf5c   :  { %v4971_v47 = vmul.f32 %v5192_v14, %v4962_v55 }
 0xf5e   :  { %v4977_v34 = vadd.f32 %v5193_v54, %v4971_v47 }
 0xf60   :  { %v4979_v3 = vmax.f32 %v4977_v34, 0.0 }
 0xf62   :  { %5149 = vmatmul.msk.f32.vlgmr.msra.gmra.mxu1 %vm4987_vm2, %v4979_v3 }
 0xf67   :  { %v4964_v40 = vpop.f32.mrf.mxu2 }
 0xf68   :  { %v4965_v21 = vadd.f32 %v5191_v25, %v4964_v40 }
 0xf6a   :  { %v4972_v22 = vmul.f32 %v5192_v14, %v4965_v21 }
 0xf6c   :  { %v4978_v28 = vadd.f32 %v5193_v54, %v4972_v22 }
 0xf6e   :  { %v4980_v5 = vmax.f32 %v4978_v28, 0.0 }
 0xf70   :  { %5150 = vmatmul.msk.f32.vlgmr.msra.gmra.mxu3 %vm4987_vm2, %v4980_v5 }
 0xfdf   :  { %v5011_v51 = vpop.f32.mrf.mxu1 }
 0xfe0   :  { %v5012_v4 = vadd.f32 %v5194_v26, %v5011_v51 }
 0xfe2   :  { %v5017_v52 = vsub.f32 0.0, %v5012_v4 }
 0xfe4   :  { %v5019_v7 = vmul.f32 1.442695, %v5017_v52 }
 0xfe6   :  { %5211 = vpow2.f32 %v5019_v7 }
 0xfec   :  { %v5212_v61 = vpop.eup %5211 }
 0xfed   :  { %v5023_v46 = vadd.f32 1.0, %v5212_v61 }
 0xfef   :  { %5213 = vrcp.f32 %v5023_v46  ;;  %v5036_v30 = vand.u32 2147483648, %v5023_v46  ;;  %v5034_v37 = vand.u32 2147483647, %v5023_v46  ;;  %vm5030_vm4 = vweird.f32 %v5023_v46 }
 0xff1   :  { %v5037_v60 = vor.u32 1.1754944e-38, %v5036_v30  ;;  %vm5035_vm7 = vcmp.eq.f32.partialorder %v5034_v37, 8.507059e+37 }
 0xff3   :  { %v5014_v1 = vpop.f32.mrf.mxu3 }
 0xff4   :  { %v5015_v2 = vadd.f32 %v5194_v26, %v5014_v1 }
 0xff5   :  { %v5214_v50 = vpop.eup %5213 }
 0xff6   :  { %v5026_v48 = vmul.f32 %v5214_v50, %v5023_v46  ;;  %v5018_v58 = vsub.f32 0.0, %v5015_v2  ;;  %vm5031_vm3 = vweird.f32 %v5214_v50 }
 0xff7   :  { %vm5032_vm5 = vmor %vm5030_vm4, %vm5031_vm3 }
 0xff8   :  { %v5027_v59 = vsub.f32 1.0, %v5026_v48  ;;  %v5021_v16 = vmul.f32 1.442695, %v5018_v58 }
 0xffa   :  { %v5028_v44 = vmul.f32 %v5214_v50, %v5027_v59  ;;  %5215 = vpow2.f32 %v5021_v16 }
 0xffc   :  { %v5029_v6 = vadd.f32 %v5214_v50, %v5028_v44 }
 0xffe   :  { %v5033_v33 = vsel %vm5032_vm5, %v5214_v50, %v5029_v6 }
 0xfff   :  { %v5038_v38 = vsel %vm5035_vm7, %v5037_v60, %v5033_v33 }
0x1000   :  { %v5216_v18 = vpop.eup %5215  ;;  %5056 = vst.msk [vmem:[%s9681_s28] sm:$0xff] %vm5055_vm6, %v5038_v38 }
0x1001   :  { %v5024_v20 = vadd.f32 1.0, %v5216_v18 }
0x1003   :  { %5217 = vrcp.f32 %v5024_v20  ;;  %v5051_v63 = vand.u32 2147483648, %v5024_v20  ;;  %v5049_v43 = vand.u32 2147483647, %v5024_v20  ;;  %vm5045_vm9 = vweird.f32 %v5024_v20 }
0x1005   :  { %v5052_v24 = vor.u32 1.1754944e-38, %v5051_v63  ;;  %vm5050_vm11 = vcmp.eq.f32.partialorder %v5049_v43, 8.507059e+37 }
0x1009   :  { %v5218_v29 = vpop.eup %5217 }
0x100a   :  { %v5041_v62 = vmul.f32 %v5218_v29, %v5024_v20  ;;  %vm5046_vm8 = vweird.f32 %v5218_v29 }
0x100b   :  { %vm5047_vm10 = vmor %vm5045_vm9, %vm5046_vm8 }
0x100c   :  { %v5042_v8 = vsub.f32 1.0, %v5041_v62 }
0x100e   :  { %v5043_v53 = vmul.f32 %v5218_v29, %v5042_v8 }
0x1010   :  { %v5044_v35 = vadd.f32 %v5218_v29, %v5043_v53 }
0x1012   :  { %v5048_v11 = vsel %vm5047_vm10, %v5218_v29, %v5044_v35 }
0x1013   :  { %v5053_v12 = vsel %vm5050_vm11, %v5052_v24, %v5048_v11 }
0x1014   :  { %5057 = vst.msk [vmem:[%s9681_s28 + $0x8] sm:$0xff] %vm5055_vm6, %v5053_v12 }
0x1015   :  { %5062 = vsyncpa [#allocation4], 1 }
0x1016   :  { %5063 = vsyncpa [#allocation6], 1 }
0x1017   :  { %5064 = vsyncpa [#allocation9], 1 }
0x1018   :  { %5065 = vsyncpa [#allocation12], 1 }
0x1019   :  { %5066 = vsyncpa [#allocation15], 1 }
0x101a   :  { %5067 = vsyncpa [#allocation18], 1 }
0x101b   :  { %5068 = vsyncpa [#allocation21], 1 }
0x101c   :  { %5069 = vsyncpa [#allocation24], 1 }
0x101d   :  { %5070 = vsyncpa [#allocation27], 1 }

</bundles_post_ra>
